<compile_context>
chip_gen: v6e
topology: v6e:2x2x1
jax: 0.10.0
libtpu: 0.0.40
codegen_flags: <defaults>
</compile_context>

<pallas_src>
import functools

import jax
import jax.numpy as jnp
from jax.experimental import pallas as pl
from jax.experimental.pallas import tpu as pltpu

_VMEM_LIMIT_BYTES = 48 * 1024 * 1024   # explicit scoped-VMEM limit (fits v7x's 64 MiB)
_VMEM_TILE_BUDGET = 28 * 1024 * 1024   # per-tile working-set target


def _round_up(x, m):
    return ((x + m - 1) // m) * m


def _choose_tile_n(n, fin, fout_pad, k):
    """Lane-dense (multiple-of-128) node tile, bounded for pipelining + VMEM.

    Aims for >= 2 grid steps whenever N allows, and keeps the per-tile working
    set (double-buffered x / neighbor / output blocks + the hoisted gates_x
    temp [4*Fin, K*tile] f32) under a budget that fits every TPU generation.
    """
    n_pad = _round_up(n, 128)
    tile = min(512, n_pad)
    if n_pad >= 256:
        tile = min(tile, _round_up(pl.cdiv(n_pad, 2), 128))

    def live_bytes(t):
        io = 2 * (t * fin * 2 + k * t * fin * 2 + t * fout_pad * 4)   # double-buffered blocks
        tmp = (4 * fin) * (k * t) * 4 + 6 * (4 * fin) * t * 4         # gates_x + loop temps
        return io + tmp

    while tile > 128 and live_bytes(tile) > _VMEM_TILE_BUDGET:
        tile = max(128, (tile // 2) // 128 * 128)
    return tile


def _build_gather_index(nbr_idx, tile_n, n_pad):
    """[N, K] neighbor ids -> flat gather index in (tile, step, node) order.

    Permuting the tiny int32 index array (instead of transposing the gathered
    [N, K, F] feature tensor) deletes a full HBM read+write pass of the
    K*N*Fin tensor per layer.
    """
    N, K = nbr_idx.shape
    idx = nbr_idx
    if n_pad != N:
        idx = jnp.pad(idx, ((0, n_pad - N), (0, 0)))   # padded rows gather node 0; discarded
    idx = idx.reshape(n_pad // tile_n, tile_n, K)
    idx = jnp.transpose(idx, (0, 2, 1))                # (tile, step, node)
    return idx.reshape(n_pad * K)


# ---------------------------------------------------------------------------
# In-kernel hot path: feature-major LSTM neighbor aggregation + projections
# ---------------------------------------------------------------------------
def _lstm_sage_core(x_nm, nbr_nm, w_ih, w_hh, b_fm, w_self_t, w_neigh_t):
    """x_nm: [TN, Fin] bf16 (node-major); nbr_nm: [K*TN, Fin] bf16, rows in
    (step, node) order; returns [TN, Fout_pad] f32 pre-activation."""
    TN, Fin = x_nm.shape
    H = Fin                                   # DGL 'lstm' aggregator: hidden == Fin
    K = nbr_nm.shape[0] // TN

    # Hoisted x-path gate matmul for all K steps, feature-major result (nodes in
    # lanes) via an NT contraction (q.k^T pattern) -- off the serial chain.
    gates_x = jax.lax.dot_general(
        w_ih, nbr_nm, (((1,), (1,)), ((), ())),
        preferred_element_type=jnp.float32) + b_fm            # [4H, K*TN] f32

    # Self projection has no dependence on the recurrence -> issue before it so
    # its MXU work hides under the LSTM loop.
    out = jnp.dot(x_nm, w_self_t, preferred_element_type=jnp.float32)   # [TN, Fout_pad]

    h = jnp.zeros((H, TN), jnp.float32)
    c = jnp.zeros((H, TN), jnp.float32)
    for t in range(K):                        # K small & static -> unrolled
        g_t = gates_x[:, t * TN:(t + 1) * TN] + jnp.dot(
            w_hh, h.astype(w_hh.dtype), preferred_element_type=jnp.float32)
        sig = jax.nn.sigmoid(g_t[:3 * H, :])  # [i, f, o] contiguous sublane slab
        g = jnp.tanh(g_t[3 * H:, :])
        i_g = sig[0 * H:1 * H, :]
        f_g = sig[1 * H:2 * H, :]
        o_g = sig[2 * H:3 * H, :]
        c = f_g * c + i_g * g
        h = o_g * jnp.tanh(c)                 # all [H, TN]: lane-dense VPU/EUP work

    # Neighbor projection: small state transpose back to node-major, then NN matmul.
    out = out + jnp.dot(h.T.astype(w_neigh_t.dtype), w_neigh_t,
                        preferred_element_type=jnp.float32)
    return out


def _sage_bn_relu_kernel(x_ref, nbr_ref, w_ih_ref, w_hh_ref, b_ref,
                         w_self_ref, w_neigh_ref, scale_ref, shift_ref, o_ref):
    out = _lstm_sage_core(x_ref[...], nbr_ref[...], w_ih_ref[...], w_hh_ref[...],
                          b_ref[...], w_self_ref[...], w_neigh_ref[...])
    out = out * scale_ref[...] + shift_ref[...]   # BatchNorm1d (eval / running stats)
    o_ref[...] = jnp.maximum(out, 0.0).astype(o_ref.dtype)   # ReLU; dropout = identity (eval)


def _sage_logsoftmax_kernel(x_ref, nbr_ref, w_ih_ref, w_hh_ref, b_ref,
                            w_self_ref, w_neigh_ref, o_ref, *, n_valid):
    out = _lstm_sage_core(x_ref[...], nbr_ref[...], w_ih_ref[...], w_hh_ref[...],
                          b_ref[...], w_self_ref[...], w_neigh_ref[...])
    # log_softmax over the n_valid real classes (padded lanes are zeros; f32 mask).
    col = jax.lax.broadcasted_iota(jnp.int32, out.shape, 1)
    masked = jnp.where(col < n_valid, out, -1e30)
    m = jnp.max(masked, axis=-1, keepdims=True)
    lse = m + jnp.log(jnp.sum(jnp.exp(masked - m), axis=-1, keepdims=True))
    o_ref[...] = (out - lse).astype(o_ref.dtype)   # padded lanes sliced off outside


# ---------------------------------------------------------------------------
# Layer wrapper: builds the pallas_call
# ---------------------------------------------------------------------------
def sage_layer(x, nbr_flat, lp, *, final, tile_n, n_pad, K):
    """One SAGEConv('lstm', bias=False) layer (+ fused BN/ReLU or log_softmax)."""
    N, Fin = x.shape
    w_ih, w_hh, b = lp["w_ih"], lp["w_hh"], lp["b"]
    w_self_t, w_neigh_t = lp["w_self_t"], lp["w_neigh_t"]
    fout = lp["fout"]                 # true output width (python int, static)
    fout_pad = w_self_t.shape[1]

    if n_pad != N:                    # never drop tail nodes
        x = jnp.pad(x, ((0, n_pad - N), (0, 0)))

    grid = (n_pad // tile_n,)
    full = lambda a: pl.BlockSpec(a.shape, lambda i: (0,) * a.ndim)

    in_specs = [
        pl.BlockSpec((tile_n, Fin), lambda i: (i, 0)),        # x_self tile (node-major)
        pl.BlockSpec((K * tile_n, Fin), lambda i: (i, 0)),    # (step, node)-major neighbor tile
        full(w_ih), full(w_hh), full(b), full(w_self_t), full(w_neigh_t),
    ]
    args = [x, nbr_flat, w_ih, w_hh, b, w_self_t, w_neigh_t]

    if final:
        kernel = functools.partial(_sage_logsoftmax_kernel, n_valid=fout)
        out_dtype = jnp.float32
    else:
        kernel = _sage_bn_relu_kernel
        in_specs += [full(lp["bn_scale"]), full(lp["bn_shift"])]
        args += [lp["bn_scale"], lp["bn_shift"]]
        out_dtype = jnp.bfloat16      # feeds next layer's gather at half the HBM bytes

    flops = (2 * n_pad * K * Fin * 4 * Fin        # hoisted x-path gate matmul
             + 2 * n_pad * K * Fin * 4 * Fin      # per-step h-path gate matmul
             + 2 * 2 * n_pad * Fin * fout_pad)    # self + neigh projections
    transcendentals = 5 * n_pad * K * Fin + (n_pad * fout_pad if final else 0)
    bytes_accessed = (int(x.size) * x.dtype.itemsize
                      + int(nbr_flat.size) * nbr_flat.dtype.itemsize
                      + n_pad * fout_pad * (4 if final else 2)
                      + sum(int(a.size) * a.dtype.itemsize for a in args[2:]))

    out = pl.pallas_call(
        kernel,
        out_shape=jax.ShapeDtypeStruct((n_pad, fout_pad), out_dtype),
        grid=grid,
        in_specs=in_specs,
        out_specs=pl.BlockSpec((tile_n, fout_pad), lambda i: (i, 0)),
        compiler_params=pltpu.CompilerParams(
            dimension_semantics=("parallel",),
            vmem_limit_bytes=_VMEM_LIMIT_BYTES),
        cost_estimate=pl.CostEstimate(flops=int(flops),
                                      transcendentals=int(transcendentals),
                                      bytes_accessed=int(bytes_accessed)),
    )(*args)
    return out[:N, :fout]


def graphsage_forward(x, nbr_idx, params, *, tile_n=None):
    N = x.shape[0]
    K = nbr_idx.shape[1]
    fin_max = max([int(x.shape[1])] + [int(p["w_hh"].shape[1]) for p in params])
    fpad_max = max(int(p["w_self_t"].shape[1]) for p in params)
    if tile_n is None:                # shape-based policy; pass explicitly to override
        tile_n = _choose_tile_n(N, fin_max, fpad_max, K)
    n_pad = _round_up(N, tile_n)
    idx_flat = _build_gather_index(nbr_idx, tile_n, n_pad)   # built once, reused per layer

    h = x
    n_layers = len(params)
    for li, lp in enumerate(params):
        h = h.astype(jnp.bfloat16)            # matmul/DMA operands in bf16
        # TODO(synk): in-kernel gather (scalar-prefetched nbr_idx + VMEM-resident
        # feature table) would remove this K*N*Fin HBM round trip when it fits.
        nbr_flat = h[idx_flat]                # [n_pad*K, Fin], (tile, step, node) row order
        h = sage_layer(h, nbr_flat, lp, final=(li == n_layers - 1),
                       tile_n=tile_n, n_pad=n_pad, K=K)
    return h


# ---------------------------------------------------------------------------
# Deterministic parameter construction (matches module __init__ shapes)
# ---------------------------------------------------------------------------
def make_params(key, in_feats, hidden_feats, out_feats, num_layers):
    dims = [in_feats] + [hidden_feats] * (num_layers - 1) + [out_feats]
    params = []
    eps = 1e-5
    for li in range(num_layers):
        fin, fout = dims[li], dims[li + 1]
        fout_pad = _round_up(fout, 128)
        key, *ks = jax.random.split(key, 7)
        s = 1.0 / jnp.sqrt(jnp.float32(fin))
        # Gate row order [i, f, o, g] (relabeling of the random init, same LSTM math):
        # sigmoid covers a contiguous 3H slab, tanh the last H.
        w_ih = jax.random.uniform(ks[0], (4 * fin, fin), jnp.float32, -s, s)
        w_hh = jax.random.uniform(ks[1], (4 * fin, fin), jnp.float32, -s, s)
        b_ih = jax.random.uniform(ks[2], (4 * fin,), jnp.float32, -s, s)
        b_hh = jax.random.uniform(ks[3], (4 * fin,), jnp.float32, -s, s)
        w_self = jax.random.uniform(ks[4], (fout, fin), jnp.float32, -s, s)
        w_neigh = jax.random.uniform(ks[5], (fout, fin), jnp.float32, -s, s)
        lp = {
            "w_ih": w_ih.astype(jnp.bfloat16),                       # [4*Fin, Fin]
            "w_hh": w_hh.astype(jnp.bfloat16),                       # [4*Fin, Fin]
            "b": (b_ih + b_hh).reshape(4 * fin, 1),                  # f32, feature-major
            "w_self_t": jnp.pad(w_self.T, ((0, 0), (0, fout_pad - fout))
                                ).astype(jnp.bfloat16),              # [Fin, Fout_pad]
            "w_neigh_t": jnp.pad(w_neigh.T, ((0, 0), (0, fout_pad - fout))
                                 ).astype(jnp.bfloat16),             # [Fin, Fout_pad]
            "fout": fout,
        }
        if li < num_layers - 1:
            # BatchNorm1d at reset state: gamma=1, beta=0, mean=0, var=1 (eval mode)
            gamma = jnp.ones((fout,), jnp.float32)
            beta = jnp.zeros((fout,), jnp.float32)
            r_mean = jnp.zeros((fout,), jnp.float32)
            r_var = jnp.ones((fout,), jnp.float32)
            scale = gamma / jnp.sqrt(r_var + eps)
            shift = beta - r_mean * scale
            lp["bn_scale"] = jnp.pad(scale, (0, fout_pad - fout),
                                     constant_values=1.0).reshape(1, fout_pad)
            lp["bn_shift"] = jnp.pad(shift, (0, fout_pad - fout)).reshape(1, fout_pad)
        params.append(lp)
    return params


if __name__ == "__main__":
    # Small shapes: 128 nodes, fixed degree 8, in=32, hidden=32, classes=16, 2 layers.
    # TODO(synk): the DGL graph has variable degree; a fixed-K sampled neighbor
    # index matrix is used here (segment-length handling has no clean static tiling).
    N, K = 128, 8
    IN_FEATS, HIDDEN, OUT_FEATS, NUM_LAYERS = 32, 32, 16, 2

    key = jax.random.PRNGKey(0)
    k_x, k_g, k_p = jax.random.split(key, 3)
    x = jax.random.normal(k_x, (N, IN_FEATS), jnp.float32)
    nbr_idx = jax.random.randint(k_g, (N, K), 0, N, jnp.int32)
    params = make_params(k_p, IN_FEATS, HIDDEN, OUT_FEATS, NUM_LAYERS)

    # params captured by closure so per-layer python ints (fout) stay static under jit.
    fwd = jax.jit(lambda xx, idx: graphsage_forward(xx, idx, params))
    out = jax.block_until_ready(fwd(x, nbr_idx))

    assert out.shape == (N, OUT_FEATS)
    # rows of log_softmax output should exponentiate-and-sum to ~1
    assert jnp.allclose(jnp.sum(jnp.exp(out), axis=-1), 1.0, atol=1e-3)
    print("KERNEL_OK")
</pallas_src>

<mosaic_0001>
module attributes {stable_mosaic.version = 11 : i64} {
  func.func @_sage_bn_relu_kernel(%arg0: i32, %arg1: memref<128x32xbf16, #tpu.memory_space<vmem>>, %arg2: memref<1024x32xbf16, #tpu.memory_space<vmem>>, %arg3: memref<128x32xbf16, #tpu.memory_space<vmem>>, %arg4: memref<128x32xbf16, #tpu.memory_space<vmem>>, %arg5: memref<128x1xf32, #tpu.memory_space<vmem>>, %arg6: memref<32x128xbf16, #tpu.memory_space<vmem>>, %arg7: memref<32x128xbf16, #tpu.memory_space<vmem>>, %arg8: memref<1x128xf32, #tpu.memory_space<vmem>>, %arg9: memref<1x128xf32, #tpu.memory_space<vmem>>, %arg10: memref<128x128xbf16, #tpu.memory_space<vmem>>) attributes {dimension_semantics = [#tpu.dimension_semantics<parallel>], iteration_bounds = array<i64: 1>, scalar_prefetch = 0 : i64, scratch_operands = 0 : i64, tpu.core_type = #tpu.core_type<tc>, window_params = [{transform_indices = @transform_0, window_bounds = array<i64: 128, 32>}, {transform_indices = @transform_1, window_bounds = array<i64: 1024, 32>}, {pipeline_mode = #tpu.pipeline_mode<synchronous>, transform_indices = @transform_2, window_bounds = array<i64: 128, 32>}, {pipeline_mode = #tpu.pipeline_mode<synchronous>, transform_indices = @transform_3, window_bounds = array<i64: 128, 32>}, {pipeline_mode = #tpu.pipeline_mode<synchronous>, transform_indices = @transform_4, window_bounds = array<i64: 128, 1>}, {pipeline_mode = #tpu.pipeline_mode<synchronous>, transform_indices = @transform_5, window_bounds = array<i64: 32, 128>}, {pipeline_mode = #tpu.pipeline_mode<synchronous>, transform_indices = @transform_6, window_bounds = array<i64: 32, 128>}, {pipeline_mode = #tpu.pipeline_mode<synchronous>, transform_indices = @transform_7, window_bounds = array<i64: 1, 128>}, {pipeline_mode = #tpu.pipeline_mode<synchronous>, transform_indices = @transform_8, window_bounds = array<i64: 1, 128>}, {transform_indices = @transform_9, window_bounds = array<i64: 128, 128>}]} {
    %c0 = arith.constant 0 : index
    %c0_0 = arith.constant 0 : index
    %0 = vector.load %arg1[%c0, %c0_0] : memref<128x32xbf16, #tpu.memory_space<vmem>>, vector<128x32xbf16>
    %c0_1 = arith.constant 0 : index
    %c0_2 = arith.constant 0 : index
    %1 = vector.load %arg2[%c0_1, %c0_2] : memref<1024x32xbf16, #tpu.memory_space<vmem>>, vector<1024x32xbf16>
    %c0_3 = arith.constant 0 : index
    %c0_4 = arith.constant 0 : index
    %2 = vector.load %arg3[%c0_3, %c0_4] : memref<128x32xbf16, #tpu.memory_space<vmem>>, vector<128x32xbf16>
    %c0_5 = arith.constant 0 : index
    %c0_6 = arith.constant 0 : index
    %3 = vector.load %arg4[%c0_5, %c0_6] : memref<128x32xbf16, #tpu.memory_space<vmem>>, vector<128x32xbf16>
    %c0_7 = arith.constant 0 : index
    %c0_8 = arith.constant 0 : index
    %4 = vector.load %arg5[%c0_7, %c0_8] : memref<128x1xf32, #tpu.memory_space<vmem>>, vector<128x1xf32>
    %c0_9 = arith.constant 0 : index
    %c0_10 = arith.constant 0 : index
    %5 = vector.load %arg6[%c0_9, %c0_10] : memref<32x128xbf16, #tpu.memory_space<vmem>>, vector<32x128xbf16>
    %c0_11 = arith.constant 0 : index
    %c0_12 = arith.constant 0 : index
    %6 = vector.load %arg7[%c0_11, %c0_12] : memref<32x128xbf16, #tpu.memory_space<vmem>>, vector<32x128xbf16>
    %cst = arith.constant dense<0.000000e+00> : vector<128x1024xf32>
    %7 = tpu.matmul %2, %1, %cst {dimension_numbers = #tpu.dot_dimension_numbers<[1], [1], [0], [0], [0, 0, 1, 0], [], []>} : vector<128x32xbf16>, vector<1024x32xbf16>, vector<128x1024xf32> -> vector<128x1024xf32>
    %8 = vector.broadcast %4 : vector<128x1xf32> to vector<128x1024xf32>
    %9 = arith.addf %7, %8 : vector<128x1024xf32>
    %cst_13 = arith.constant dense<0.000000e+00> : vector<128x128xf32>
    %10 = tpu.matmul %0, %5, %cst_13 {dimension_numbers = #tpu.dot_dimension_numbers<[1], [0], [0], [1], [0, 0, 1, 1], [], []>} : vector<128x32xbf16>, vector<32x128xbf16>, vector<128x128xf32> -> vector<128x128xf32>
    %cst_14 = arith.constant 0.000000e+00 : f32
    %11 = vector.broadcast %cst_14 : f32 to vector<32x128xf32>
    %cst_15 = arith.constant 0.000000e+00 : f32
    %12 = vector.broadcast %cst_15 : f32 to vector<32x128xf32>
    %13 = vector.extract_strided_slice %9 {offsets = [0, 0], sizes = [128, 128], strides = [1, 1]} : vector<128x1024xf32> to vector<128x128xf32>
    %14 = arith.truncf %11 : vector<32x128xf32> to vector<32x128xbf16>
    %cst_16 = arith.constant dense<0.000000e+00> : vector<128x128xf32>
    %15 = tpu.matmul %3, %14, %cst_16 {dimension_numbers = #tpu.dot_dimension_numbers<[1], [0], [0], [1], [0, 0, 1, 1], [], []>} : vector<128x32xbf16>, vector<32x128xbf16>, vector<128x128xf32> -> vector<128x128xf32>
    %16 = arith.addf %13, %15 : vector<128x128xf32>
    %17 = vector.extract_strided_slice %16 {offsets = [0, 0], sizes = [96, 128], strides = [1, 1]} : vector<128x128xf32> to vector<96x128xf32>
    %18 = arith.negf %17 : vector<96x128xf32>
    %19 = math.exp %18 : vector<96x128xf32>
    %cst_17 = arith.constant 1.000000e+00 : f32
    %20 = vector.broadcast %cst_17 : f32 to vector<96x128xf32>
    %21 = arith.addf %20, %19 : vector<96x128xf32>
    %22 = arith.divf %20, %21 : vector<96x128xf32>
    %23 = vector.extract_strided_slice %16 {offsets = [96, 0], sizes = [32, 128], strides = [1, 1]} : vector<128x128xf32> to vector<32x128xf32>
    %24 = math.tanh %23 : vector<32x128xf32>
    %25 = vector.extract_strided_slice %22 {offsets = [0, 0], sizes = [32, 128], strides = [1, 1]} : vector<96x128xf32> to vector<32x128xf32>
    %26 = vector.extract_strided_slice %22 {offsets = [32, 0], sizes = [32, 128], strides = [1, 1]} : vector<96x128xf32> to vector<32x128xf32>
    %27 = vector.extract_strided_slice %22 {offsets = [64, 0], sizes = [32, 128], strides = [1, 1]} : vector<96x128xf32> to vector<32x128xf32>
    %28 = arith.mulf %26, %12 : vector<32x128xf32>
    %29 = arith.mulf %25, %24 : vector<32x128xf32>
    %30 = arith.addf %28, %29 : vector<32x128xf32>
    %31 = math.tanh %30 : vector<32x128xf32>
    %32 = arith.mulf %27, %31 : vector<32x128xf32>
    %33 = vector.extract_strided_slice %9 {offsets = [0, 128], sizes = [128, 128], strides = [1, 1]} : vector<128x1024xf32> to vector<128x128xf32>
    %34 = arith.truncf %32 : vector<32x128xf32> to vector<32x128xbf16>
    %cst_18 = arith.constant dense<0.000000e+00> : vector<128x128xf32>
    %35 = tpu.matmul %3, %34, %cst_18 {dimension_numbers = #tpu.dot_dimension_numbers<[1], [0], [0], [1], [0, 0, 1, 1], [], []>} : vector<128x32xbf16>, vector<32x128xbf16>, vector<128x128xf32> -> vector<128x128xf32>
    %36 = arith.addf %33, %35 : vector<128x128xf32>
    %37 = vector.extract_strided_slice %36 {offsets = [0, 0], sizes = [96, 128], strides = [1, 1]} : vector<128x128xf32> to vector<96x128xf32>
    %38 = arith.negf %37 : vector<96x128xf32>
    %39 = math.exp %38 : vector<96x128xf32>
    %cst_19 = arith.constant 1.000000e+00 : f32
    %40 = vector.broadcast %cst_19 : f32 to vector<96x128xf32>
    %41 = arith.addf %40, %39 : vector<96x128xf32>
    %42 = arith.divf %40, %41 : vector<96x128xf32>
    %43 = vector.extract_strided_slice %36 {offsets = [96, 0], sizes = [32, 128], strides = [1, 1]} : vector<128x128xf32> to vector<32x128xf32>
    %44 = math.tanh %43 : vector<32x128xf32>
    %45 = vector.extract_strided_slice %42 {offsets = [0, 0], sizes = [32, 128], strides = [1, 1]} : vector<96x128xf32> to vector<32x128xf32>
    %46 = vector.extract_strided_slice %42 {offsets = [32, 0], sizes = [32, 128], strides = [1, 1]} : vector<96x128xf32> to vector<32x128xf32>
    %47 = vector.extract_strided_slice %42 {offsets = [64, 0], sizes = [32, 128], strides = [1, 1]} : vector<96x128xf32> to vector<32x128xf32>
    %48 = arith.mulf %46, %30 : vector<32x128xf32>
    %49 = arith.mulf %45, %44 : vector<32x128xf32>
    %50 = arith.addf %48, %49 : vector<32x128xf32>
    %51 = math.tanh %50 : vector<32x128xf32>
    %52 = arith.mulf %47, %51 : vector<32x128xf32>
    %53 = vector.extract_strided_slice %9 {offsets = [0, 256], sizes = [128, 128], strides = [1, 1]} : vector<128x1024xf32> to vector<128x128xf32>
    %54 = arith.truncf %52 : vector<32x128xf32> to vector<32x128xbf16>
    %cst_20 = arith.constant dense<0.000000e+00> : vector<128x128xf32>
    %55 = tpu.matmul %3, %54, %cst_20 {dimension_numbers = #tpu.dot_dimension_numbers<[1], [0], [0], [1], [0, 0, 1, 1], [], []>} : vector<128x32xbf16>, vector<32x128xbf16>, vector<128x128xf32> -> vector<128x128xf32>
    %56 = arith.addf %53, %55 : vector<128x128xf32>
    %57 = vector.extract_strided_slice %56 {offsets = [0, 0], sizes = [96, 128], strides = [1, 1]} : vector<128x128xf32> to vector<96x128xf32>
    %58 = arith.negf %57 : vector<96x128xf32>
    %59 = math.exp %58 : vector<96x128xf32>
    %cst_21 = arith.constant 1.000000e+00 : f32
    %60 = vector.broadcast %cst_21 : f32 to vector<96x128xf32>
    %61 = arith.addf %60, %59 : vector<96x128xf32>
    %62 = arith.divf %60, %61 : vector<96x128xf32>
    %63 = vector.extract_strided_slice %56 {offsets = [96, 0], sizes = [32, 128], strides = [1, 1]} : vector<128x128xf32> to vector<32x128xf32>
    %64 = math.tanh %63 : vector<32x128xf32>
    %65 = vector.extract_strided_slice %62 {offsets = [0, 0], sizes = [32, 128], strides = [1, 1]} : vector<96x128xf32> to vector<32x128xf32>
    %66 = vector.extract_strided_slice %62 {offsets = [32, 0], sizes = [32, 128], strides = [1, 1]} : vector<96x128xf32> to vector<32x128xf32>
    %67 = vector.extract_strided_slice %62 {offsets = [64, 0], sizes = [32, 128], strides = [1, 1]} : vector<96x128xf32> to vector<32x128xf32>
    %68 = arith.mulf %66, %50 : vector<32x128xf32>
    %69 = arith.mulf %65, %64 : vector<32x128xf32>
    %70 = arith.addf %68, %69 : vector<32x128xf32>
    %71 = math.tanh %70 : vector<32x128xf32>
    %72 = arith.mulf %67, %71 : vector<32x128xf32>
    %73 = vector.extract_strided_slice %9 {offsets = [0, 384], sizes = [128, 128], strides = [1, 1]} : vector<128x1024xf32> to vector<128x128xf32>
    %74 = arith.truncf %72 : vector<32x128xf32> to vector<32x128xbf16>
    %cst_22 = arith.constant dense<0.000000e+00> : vector<128x128xf32>
    %75 = tpu.matmul %3, %74, %cst_22 {dimension_numbers = #tpu.dot_dimension_numbers<[1], [0], [0], [1], [0, 0, 1, 1], [], []>} : vector<128x32xbf16>, vector<32x128xbf16>, vector<128x128xf32> -> vector<128x128xf32>
    %76 = arith.addf %73, %75 : vector<128x128xf32>
    %77 = vector.extract_strided_slice %76 {offsets = [0, 0], sizes = [96, 128], strides = [1, 1]} : vector<128x128xf32> to vector<96x128xf32>
    %78 = arith.negf %77 : vector<96x128xf32>
    %79 = math.exp %78 : vector<96x128xf32>
    %cst_23 = arith.constant 1.000000e+00 : f32
    %80 = vector.broadcast %cst_23 : f32 to vector<96x128xf32>
    %81 = arith.addf %80, %79 : vector<96x128xf32>
    %82 = arith.divf %80, %81 : vector<96x128xf32>
    %83 = vector.extract_strided_slice %76 {offsets = [96, 0], sizes = [32, 128], strides = [1, 1]} : vector<128x128xf32> to vector<32x128xf32>
    %84 = math.tanh %83 : vector<32x128xf32>
    %85 = vector.extract_strided_slice %82 {offsets = [0, 0], sizes = [32, 128], strides = [1, 1]} : vector<96x128xf32> to vector<32x128xf32>
    %86 = vector.extract_strided_slice %82 {offsets = [32, 0], sizes = [32, 128], strides = [1, 1]} : vector<96x128xf32> to vector<32x128xf32>
    %87 = vector.extract_strided_slice %82 {offsets = [64, 0], sizes = [32, 128], strides = [1, 1]} : vector<96x128xf32> to vector<32x128xf32>
    %88 = arith.mulf %86, %70 : vector<32x128xf32>
    %89 = arith.mulf %85, %84 : vector<32x128xf32>
    %90 = arith.addf %88, %89 : vector<32x128xf32>
    %91 = math.tanh %90 : vector<32x128xf32>
    %92 = arith.mulf %87, %91 : vector<32x128xf32>
    %93 = vector.extract_strided_slice %9 {offsets = [0, 512], sizes = [128, 128], strides = [1, 1]} : vector<128x1024xf32> to vector<128x128xf32>
    %94 = arith.truncf %92 : vector<32x128xf32> to vector<32x128xbf16>
    %cst_24 = arith.constant dense<0.000000e+00> : vector<128x128xf32>
    %95 = tpu.matmul %3, %94, %cst_24 {dimension_numbers = #tpu.dot_dimension_numbers<[1], [0], [0], [1], [0, 0, 1, 1], [], []>} : vector<128x32xbf16>, vector<32x128xbf16>, vector<128x128xf32> -> vector<128x128xf32>
    %96 = arith.addf %93, %95 : vector<128x128xf32>
    %97 = vector.extract_strided_slice %96 {offsets = [0, 0], sizes = [96, 128], strides = [1, 1]} : vector<128x128xf32> to vector<96x128xf32>
    %98 = arith.negf %97 : vector<96x128xf32>
    %99 = math.exp %98 : vector<96x128xf32>
    %cst_25 = arith.constant 1.000000e+00 : f32
    %100 = vector.broadcast %cst_25 : f32 to vector<96x128xf32>
    %101 = arith.addf %100, %99 : vector<96x128xf32>
    %102 = arith.divf %100, %101 : vector<96x128xf32>
    %103 = vector.extract_strided_slice %96 {offsets = [96, 0], sizes = [32, 128], strides = [1, 1]} : vector<128x128xf32> to vector<32x128xf32>
    %104 = math.tanh %103 : vector<32x128xf32>
    %105 = vector.extract_strided_slice %102 {offsets = [0, 0], sizes = [32, 128], strides = [1, 1]} : vector<96x128xf32> to vector<32x128xf32>
    %106 = vector.extract_strided_slice %102 {offsets = [32, 0], sizes = [32, 128], strides = [1, 1]} : vector<96x128xf32> to vector<32x128xf32>
    %107 = vector.extract_strided_slice %102 {offsets = [64, 0], sizes = [32, 128], strides = [1, 1]} : vector<96x128xf32> to vector<32x128xf32>
    %108 = arith.mulf %106, %90 : vector<32x128xf32>
    %109 = arith.mulf %105, %104 : vector<32x128xf32>
    %110 = arith.addf %108, %109 : vector<32x128xf32>
    %111 = math.tanh %110 : vector<32x128xf32>
    %112 = arith.mulf %107, %111 : vector<32x128xf32>
    %113 = vector.extract_strided_slice %9 {offsets = [0, 640], sizes = [128, 128], strides = [1, 1]} : vector<128x1024xf32> to vector<128x128xf32>
    %114 = arith.truncf %112 : vector<32x128xf32> to vector<32x128xbf16>
    %cst_26 = arith.constant dense<0.000000e+00> : vector<128x128xf32>
    %115 = tpu.matmul %3, %114, %cst_26 {dimension_numbers = #tpu.dot_dimension_numbers<[1], [0], [0], [1], [0, 0, 1, 1], [], []>} : vector<128x32xbf16>, vector<32x128xbf16>, vector<128x128xf32> -> vector<128x128xf32>
    %116 = arith.addf %113, %115 : vector<128x128xf32>
    %117 = vector.extract_strided_slice %116 {offsets = [0, 0], sizes = [96, 128], strides = [1, 1]} : vector<128x128xf32> to vector<96x128xf32>
    %118 = arith.negf %117 : vector<96x128xf32>
    %119 = math.exp %118 : vector<96x128xf32>
    %cst_27 = arith.constant 1.000000e+00 : f32
    %120 = vector.broadcast %cst_27 : f32 to vector<96x128xf32>
    %121 = arith.addf %120, %119 : vector<96x128xf32>
    %122 = arith.divf %120, %121 : vector<96x128xf32>
    %123 = vector.extract_strided_slice %116 {offsets = [96, 0], sizes = [32, 128], strides = [1, 1]} : vector<128x128xf32> to vector<32x128xf32>
    %124 = math.tanh %123 : vector<32x128xf32>
    %125 = vector.extract_strided_slice %122 {offsets = [0, 0], sizes = [32, 128], strides = [1, 1]} : vector<96x128xf32> to vector<32x128xf32>
    %126 = vector.extract_strided_slice %122 {offsets = [32, 0], sizes = [32, 128], strides = [1, 1]} : vector<96x128xf32> to vector<32x128xf32>
    %127 = vector.extract_strided_slice %122 {offsets = [64, 0], sizes = [32, 128], strides = [1, 1]} : vector<96x128xf32> to vector<32x128xf32>
    %128 = arith.mulf %126, %110 : vector<32x128xf32>
    %129 = arith.mulf %125, %124 : vector<32x128xf32>
    %130 = arith.addf %128, %129 : vector<32x128xf32>
    %131 = math.tanh %130 : vector<32x128xf32>
    %132 = arith.mulf %127, %131 : vector<32x128xf32>
    %133 = vector.extract_strided_slice %9 {offsets = [0, 768], sizes = [128, 128], strides = [1, 1]} : vector<128x1024xf32> to vector<128x128xf32>
    %134 = arith.truncf %132 : vector<32x128xf32> to vector<32x128xbf16>
    %cst_28 = arith.constant dense<0.000000e+00> : vector<128x128xf32>
    %135 = tpu.matmul %3, %134, %cst_28 {dimension_numbers = #tpu.dot_dimension_numbers<[1], [0], [0], [1], [0, 0, 1, 1], [], []>} : vector<128x32xbf16>, vector<32x128xbf16>, vector<128x128xf32> -> vector<128x128xf32>
    %136 = arith.addf %133, %135 : vector<128x128xf32>
    %137 = vector.extract_strided_slice %136 {offsets = [0, 0], sizes = [96, 128], strides = [1, 1]} : vector<128x128xf32> to vector<96x128xf32>
    %138 = arith.negf %137 : vector<96x128xf32>
    %139 = math.exp %138 : vector<96x128xf32>
    %cst_29 = arith.constant 1.000000e+00 : f32
    %140 = vector.broadcast %cst_29 : f32 to vector<96x128xf32>
    %141 = arith.addf %140, %139 : vector<96x128xf32>
    %142 = arith.divf %140, %141 : vector<96x128xf32>
    %143 = vector.extract_strided_slice %136 {offsets = [96, 0], sizes = [32, 128], strides = [1, 1]} : vector<128x128xf32> to vector<32x128xf32>
    %144 = math.tanh %143 : vector<32x128xf32>
    %145 = vector.extract_strided_slice %142 {offsets = [0, 0], sizes = [32, 128], strides = [1, 1]} : vector<96x128xf32> to vector<32x128xf32>
    %146 = vector.extract_strided_slice %142 {offsets = [32, 0], sizes = [32, 128], strides = [1, 1]} : vector<96x128xf32> to vector<32x128xf32>
    %147 = vector.extract_strided_slice %142 {offsets = [64, 0], sizes = [32, 128], strides = [1, 1]} : vector<96x128xf32> to vector<32x128xf32>
    %148 = arith.mulf %146, %130 : vector<32x128xf32>
    %149 = arith.mulf %145, %144 : vector<32x128xf32>
    %150 = arith.addf %148, %149 : vector<32x128xf32>
    %151 = math.tanh %150 : vector<32x128xf32>
    %152 = arith.mulf %147, %151 : vector<32x128xf32>
    %153 = vector.extract_strided_slice %9 {offsets = [0, 896], sizes = [128, 128], strides = [1, 1]} : vector<128x1024xf32> to vector<128x128xf32>
    %154 = arith.truncf %152 : vector<32x128xf32> to vector<32x128xbf16>
    %cst_30 = arith.constant dense<0.000000e+00> : vector<128x128xf32>
    %155 = tpu.matmul %3, %154, %cst_30 {dimension_numbers = #tpu.dot_dimension_numbers<[1], [0], [0], [1], [0, 0, 1, 1], [], []>} : vector<128x32xbf16>, vector<32x128xbf16>, vector<128x128xf32> -> vector<128x128xf32>
    %156 = arith.addf %153, %155 : vector<128x128xf32>
    %157 = vector.extract_strided_slice %156 {offsets = [0, 0], sizes = [96, 128], strides = [1, 1]} : vector<128x128xf32> to vector<96x128xf32>
    %158 = arith.negf %157 : vector<96x128xf32>
    %159 = math.exp %158 : vector<96x128xf32>
    %cst_31 = arith.constant 1.000000e+00 : f32
    %160 = vector.broadcast %cst_31 : f32 to vector<96x128xf32>
    %161 = arith.addf %160, %159 : vector<96x128xf32>
    %162 = arith.divf %160, %161 : vector<96x128xf32>
    %163 = vector.extract_strided_slice %156 {offsets = [96, 0], sizes = [32, 128], strides = [1, 1]} : vector<128x128xf32> to vector<32x128xf32>
    %164 = math.tanh %163 : vector<32x128xf32>
    %165 = vector.extract_strided_slice %162 {offsets = [0, 0], sizes = [32, 128], strides = [1, 1]} : vector<96x128xf32> to vector<32x128xf32>
    %166 = vector.extract_strided_slice %162 {offsets = [32, 0], sizes = [32, 128], strides = [1, 1]} : vector<96x128xf32> to vector<32x128xf32>
    %167 = vector.extract_strided_slice %162 {offsets = [64, 0], sizes = [32, 128], strides = [1, 1]} : vector<96x128xf32> to vector<32x128xf32>
    %168 = arith.mulf %166, %150 : vector<32x128xf32>
    %169 = arith.mulf %165, %164 : vector<32x128xf32>
    %170 = arith.addf %168, %169 : vector<32x128xf32>
    %171 = math.tanh %170 : vector<32x128xf32>
    %172 = arith.mulf %167, %171 : vector<32x128xf32>
    %173 = tpu.transpose %172, [1, 0] : vector<32x128xf32> -> vector<128x32xf32>
    %174 = arith.truncf %173 : vector<128x32xf32> to vector<128x32xbf16>
    %cst_32 = arith.constant dense<0.000000e+00> : vector<128x128xf32>
    %175 = tpu.matmul %174, %6, %cst_32 {dimension_numbers = #tpu.dot_dimension_numbers<[1], [0], [0], [1], [0, 0, 1, 1], [], []>} : vector<128x32xbf16>, vector<32x128xbf16>, vector<128x128xf32> -> vector<128x128xf32>
    %176 = arith.addf %10, %175 : vector<128x128xf32>
    %c0_33 = arith.constant 0 : index
    %c0_34 = arith.constant 0 : index
    %177 = vector.load %arg8[%c0_33, %c0_34] : memref<1x128xf32, #tpu.memory_space<vmem>>, vector<1x128xf32>
    %178 = vector.broadcast %177 : vector<1x128xf32> to vector<128x128xf32>
    %179 = arith.mulf %176, %178 : vector<128x128xf32>
    %c0_35 = arith.constant 0 : index
    %c0_36 = arith.constant 0 : index
    %180 = vector.load %arg9[%c0_35, %c0_36] : memref<1x128xf32, #tpu.memory_space<vmem>>, vector<1x128xf32>
    %181 = vector.broadcast %180 : vector<1x128xf32> to vector<128x128xf32>
    %182 = arith.addf %179, %181 : vector<128x128xf32>
    %cst_37 = arith.constant 0.000000e+00 : f32
    %183 = vector.broadcast %cst_37 : f32 to vector<128x128xf32>
    %184 = arith.maximumf %182, %183 : vector<128x128xf32>
    %185 = arith.truncf %184 : vector<128x128xf32> to vector<128x128xbf16>
    %c0_38 = arith.constant 0 : index
    %c0_39 = arith.constant 0 : index
    %186 = vector.load %arg10[%c0_38, %c0_39] : memref<128x128xbf16, #tpu.memory_space<vmem>>, vector<128x128xbf16>
    tpu.vector_store %arg10[%c0_38, %c0_39], %185 {strides = array<i32>} : memref<128x128xbf16, #tpu.memory_space<vmem>>, vector<128x128xbf16>,
    return
  }
  func.func @transform_0(%arg0: i32) -> (i32, i32) {
    %c0_i32 = arith.constant 0 : i32
    %c0_i32_0 = arith.constant 0 : i32
    return %arg0, %c0_i32 : i32, i32
  }
  func.func @transform_1(%arg0: i32) -> (i32, i32) {
    %c0_i32 = arith.constant 0 : i32
    %c0_i32_0 = arith.constant 0 : i32
    return %arg0, %c0_i32 : i32, i32
  }
  func.func @transform_2(%arg0: i32) -> (i32, i32) {
    %c0_i32 = arith.constant 0 : i32
    %c0_i32_0 = arith.constant 0 : i32
    %c0_i32_1 = arith.constant 0 : i32
    return %c0_i32, %c0_i32_0 : i32, i32
  }
  func.func @transform_3(%arg0: i32) -> (i32, i32) {
    %c0_i32 = arith.constant 0 : i32
    %c0_i32_0 = arith.constant 0 : i32
    %c0_i32_1 = arith.constant 0 : i32
    return %c0_i32, %c0_i32_0 : i32, i32
  }
  func.func @transform_4(%arg0: i32) -> (i32, i32) {
    %c0_i32 = arith.constant 0 : i32
    %c0_i32_0 = arith.constant 0 : i32
    %c0_i32_1 = arith.constant 0 : i32
    return %c0_i32, %c0_i32_0 : i32, i32
  }
  func.func @transform_5(%arg0: i32) -> (i32, i32) {
    %c0_i32 = arith.constant 0 : i32
    %c0_i32_0 = arith.constant 0 : i32
    %c0_i32_1 = arith.constant 0 : i32
    return %c0_i32, %c0_i32_0 : i32, i32
  }
  func.func @transform_6(%arg0: i32) -> (i32, i32) {
    %c0_i32 = arith.constant 0 : i32
    %c0_i32_0 = arith.constant 0 : i32
    %c0_i32_1 = arith.constant 0 : i32
    return %c0_i32, %c0_i32_0 : i32, i32
  }
  func.func @transform_7(%arg0: i32) -> (i32, i32) {
    %c0_i32 = arith.constant 0 : i32
    %c0_i32_0 = arith.constant 0 : i32
    %c0_i32_1 = arith.constant 0 : i32
    return %c0_i32, %c0_i32_0 : i32, i32
  }
  func.func @transform_8(%arg0: i32) -> (i32, i32) {
    %c0_i32 = arith.constant 0 : i32
    %c0_i32_0 = arith.constant 0 : i32
    %c0_i32_1 = arith.constant 0 : i32
    return %c0_i32, %c0_i32_0 : i32, i32
  }
  func.func @transform_9(%arg0: i32) -> (i32, i32) {
    %c0_i32 = arith.constant 0 : i32
    %c0_i32_0 = arith.constant 0 : i32
    return %arg0, %c0_i32 : i32, i32
  }
}

module attributes {stable_mosaic.version = 11 : i64} {
  func.func @_sage_logsoftmax_kernel(%arg0: i32, %arg1: memref<128x32xbf16, #tpu.memory_space<vmem>>, %arg2: memref<1024x32xbf16, #tpu.memory_space<vmem>>, %arg3: memref<128x32xbf16, #tpu.memory_space<vmem>>, %arg4: memref<128x32xbf16, #tpu.memory_space<vmem>>, %arg5: memref<128x1xf32, #tpu.memory_space<vmem>>, %arg6: memref<32x128xbf16, #tpu.memory_space<vmem>>, %arg7: memref<32x128xbf16, #tpu.memory_space<vmem>>, %arg8: memref<128x128xf32, #tpu.memory_space<vmem>>) attributes {dimension_semantics = [#tpu.dimension_semantics<parallel>], iteration_bounds = array<i64: 1>, scalar_prefetch = 0 : i64, scratch_operands = 0 : i64, tpu.core_type = #tpu.core_type<tc>, window_params = [{transform_indices = @transform_0, window_bounds = array<i64: 128, 32>}, {transform_indices = @transform_1, window_bounds = array<i64: 1024, 32>}, {pipeline_mode = #tpu.pipeline_mode<synchronous>, transform_indices = @transform_2, window_bounds = array<i64: 128, 32>}, {pipeline_mode = #tpu.pipeline_mode<synchronous>, transform_indices = @transform_3, window_bounds = array<i64: 128, 32>}, {pipeline_mode = #tpu.pipeline_mode<synchronous>, transform_indices = @transform_4, window_bounds = array<i64: 128, 1>}, {pipeline_mode = #tpu.pipeline_mode<synchronous>, transform_indices = @transform_5, window_bounds = array<i64: 32, 128>}, {pipeline_mode = #tpu.pipeline_mode<synchronous>, transform_indices = @transform_6, window_bounds = array<i64: 32, 128>}, {transform_indices = @transform_7, window_bounds = array<i64: 128, 128>}]} {
    %c0 = arith.constant 0 : index
    %c0_0 = arith.constant 0 : index
    %0 = vector.load %arg1[%c0, %c0_0] : memref<128x32xbf16, #tpu.memory_space<vmem>>, vector<128x32xbf16>
    %c0_1 = arith.constant 0 : index
    %c0_2 = arith.constant 0 : index
    %1 = vector.load %arg2[%c0_1, %c0_2] : memref<1024x32xbf16, #tpu.memory_space<vmem>>, vector<1024x32xbf16>
    %c0_3 = arith.constant 0 : index
    %c0_4 = arith.constant 0 : index
    %2 = vector.load %arg3[%c0_3, %c0_4] : memref<128x32xbf16, #tpu.memory_space<vmem>>, vector<128x32xbf16>
    %c0_5 = arith.constant 0 : index
    %c0_6 = arith.constant 0 : index
    %3 = vector.load %arg4[%c0_5, %c0_6] : memref<128x32xbf16, #tpu.memory_space<vmem>>, vector<128x32xbf16>
    %c0_7 = arith.constant 0 : index
    %c0_8 = arith.constant 0 : index
    %4 = vector.load %arg5[%c0_7, %c0_8] : memref<128x1xf32, #tpu.memory_space<vmem>>, vector<128x1xf32>
    %c0_9 = arith.constant 0 : index
    %c0_10 = arith.constant 0 : index
    %5 = vector.load %arg6[%c0_9, %c0_10] : memref<32x128xbf16, #tpu.memory_space<vmem>>, vector<32x128xbf16>
    %c0_11 = arith.constant 0 : index
    %c0_12 = arith.constant 0 : index
    %6 = vector.load %arg7[%c0_11, %c0_12] : memref<32x128xbf16, #tpu.memory_space<vmem>>, vector<32x128xbf16>
    %cst = arith.constant dense<0.000000e+00> : vector<128x1024xf32>
    %7 = tpu.matmul %2, %1, %cst {dimension_numbers = #tpu.dot_dimension_numbers<[1], [1], [0], [0], [0, 0, 1, 0], [], []>} : vector<128x32xbf16>, vector<1024x32xbf16>, vector<128x1024xf32> -> vector<128x1024xf32>
    %8 = vector.broadcast %4 : vector<128x1xf32> to vector<128x1024xf32>
    %9 = arith.addf %7, %8 : vector<128x1024xf32>
    %cst_13 = arith.constant dense<0.000000e+00> : vector<128x128xf32>
    %10 = tpu.matmul %0, %5, %cst_13 {dimension_numbers = #tpu.dot_dimension_numbers<[1], [0], [0], [1], [0, 0, 1, 1], [], []>} : vector<128x32xbf16>, vector<32x128xbf16>, vector<128x128xf32> -> vector<128x128xf32>
    %cst_14 = arith.constant 0.000000e+00 : f32
    %11 = vector.broadcast %cst_14 : f32 to vector<32x128xf32>
    %cst_15 = arith.constant 0.000000e+00 : f32
    %12 = vector.broadcast %cst_15 : f32 to vector<32x128xf32>
    %13 = vector.extract_strided_slice %9 {offsets = [0, 0], sizes = [128, 128], strides = [1, 1]} : vector<128x1024xf32> to vector<128x128xf32>
    %14 = arith.truncf %11 : vector<32x128xf32> to vector<32x128xbf16>
    %cst_16 = arith.constant dense<0.000000e+00> : vector<128x128xf32>
    %15 = tpu.matmul %3, %14, %cst_16 {dimension_numbers = #tpu.dot_dimension_numbers<[1], [0], [0], [1], [0, 0, 1, 1], [], []>} : vector<128x32xbf16>, vector<32x128xbf16>, vector<128x128xf32> -> vector<128x128xf32>
    %16 = arith.addf %13, %15 : vector<128x128xf32>
    %17 = vector.extract_strided_slice %16 {offsets = [0, 0], sizes = [96, 128], strides = [1, 1]} : vector<128x128xf32> to vector<96x128xf32>
    %18 = arith.negf %17 : vector<96x128xf32>
    %19 = math.exp %18 : vector<96x128xf32>
    %cst_17 = arith.constant 1.000000e+00 : f32
    %20 = vector.broadcast %cst_17 : f32 to vector<96x128xf32>
    %21 = arith.addf %20, %19 : vector<96x128xf32>
    %22 = arith.divf %20, %21 : vector<96x128xf32>
    %23 = vector.extract_strided_slice %16 {offsets = [96, 0], sizes = [32, 128], strides = [1, 1]} : vector<128x128xf32> to vector<32x128xf32>
    %24 = math.tanh %23 : vector<32x128xf32>
    %25 = vector.extract_strided_slice %22 {offsets = [0, 0], sizes = [32, 128], strides = [1, 1]} : vector<96x128xf32> to vector<32x128xf32>
    %26 = vector.extract_strided_slice %22 {offsets = [32, 0], sizes = [32, 128], strides = [1, 1]} : vector<96x128xf32> to vector<32x128xf32>
    %27 = vector.extract_strided_slice %22 {offsets = [64, 0], sizes = [32, 128], strides = [1, 1]} : vector<96x128xf32> to vector<32x128xf32>
    %28 = arith.mulf %26, %12 : vector<32x128xf32>
    %29 = arith.mulf %25, %24 : vector<32x128xf32>
    %30 = arith.addf %28, %29 : vector<32x128xf32>
    %31 = math.tanh %30 : vector<32x128xf32>
    %32 = arith.mulf %27, %31 : vector<32x128xf32>
    %33 = vector.extract_strided_slice %9 {offsets = [0, 128], sizes = [128, 128], strides = [1, 1]} : vector<128x1024xf32> to vector<128x128xf32>
    %34 = arith.truncf %32 : vector<32x128xf32> to vector<32x128xbf16>
    %cst_18 = arith.constant dense<0.000000e+00> : vector<128x128xf32>
    %35 = tpu.matmul %3, %34, %cst_18 {dimension_numbers = #tpu.dot_dimension_numbers<[1], [0], [0], [1], [0, 0, 1, 1], [], []>} : vector<128x32xbf16>, vector<32x128xbf16>, vector<128x128xf32> -> vector<128x128xf32>
    %36 = arith.addf %33, %35 : vector<128x128xf32>
    %37 = vector.extract_strided_slice %36 {offsets = [0, 0], sizes = [96, 128], strides = [1, 1]} : vector<128x128xf32> to vector<96x128xf32>
    %38 = arith.negf %37 : vector<96x128xf32>
    %39 = math.exp %38 : vector<96x128xf32>
    %cst_19 = arith.constant 1.000000e+00 : f32
    %40 = vector.broadcast %cst_19 : f32 to vector<96x128xf32>
    %41 = arith.addf %40, %39 : vector<96x128xf32>
    %42 = arith.divf %40, %41 : vector<96x128xf32>
    %43 = vector.extract_strided_slice %36 {offsets = [96, 0], sizes = [32, 128], strides = [1, 1]} : vector<128x128xf32> to vector<32x128xf32>
    %44 = math.tanh %43 : vector<32x128xf32>
    %45 = vector.extract_strided_slice %42 {offsets = [0, 0], sizes = [32, 128], strides = [1, 1]} : vector<96x128xf32> to vector<32x128xf32>
    %46 = vector.extract_strided_slice %42 {offsets = [32, 0], sizes = [32, 128], strides = [1, 1]} : vector<96x128xf32> to vector<32x128xf32>
    %47 = vector.extract_strided_slice %42 {offsets = [64, 0], sizes = [32, 128], strides = [1, 1]} : vector<96x128xf32> to vector<32x128xf32>
    %48 = arith.mulf %46, %30 : vector<32x128xf32>
    %49 = arith.mulf %45, %44 : vector<32x128xf32>
    %50 = arith.addf %48, %49 : vector<32x128xf32>
    %51 = math.tanh %50 : vector<32x128xf32>
    %52 = arith.mulf %47, %51 : vector<32x128xf32>
    %53 = vector.extract_strided_slice %9 {offsets = [0, 256], sizes = [128, 128], strides = [1, 1]} : vector<128x1024xf32> to vector<128x128xf32>
    %54 = arith.truncf %52 : vector<32x128xf32> to vector<32x128xbf16>
    %cst_20 = arith.constant dense<0.000000e+00> : vector<128x128xf32>
    %55 = tpu.matmul %3, %54, %cst_20 {dimension_numbers = #tpu.dot_dimension_numbers<[1], [0], [0], [1], [0, 0, 1, 1], [], []>} : vector<128x32xbf16>, vector<32x128xbf16>, vector<128x128xf32> -> vector<128x128xf32>
    %56 = arith.addf %53, %55 : vector<128x128xf32>
    %57 = vector.extract_strided_slice %56 {offsets = [0, 0], sizes = [96, 128], strides = [1, 1]} : vector<128x128xf32> to vector<96x128xf32>
    %58 = arith.negf %57 : vector<96x128xf32>
    %59 = math.exp %58 : vector<96x128xf32>
    %cst_21 = arith.constant 1.000000e+00 : f32
    %60 = vector.broadcast %cst_21 : f32 to vector<96x128xf32>
    %61 = arith.addf %60, %59 : vector<96x128xf32>
    %62 = arith.divf %60, %61 : vector<96x128xf32>
    %63 = vector.extract_strided_slice %56 {offsets = [96, 0], sizes = [32, 128], strides = [1, 1]} : vector<128x128xf32> to vector<32x128xf32>
    %64 = math.tanh %63 : vector<32x128xf32>
    %65 = vector.extract_strided_slice %62 {offsets = [0, 0], sizes = [32, 128], strides = [1, 1]} : vector<96x128xf32> to vector<32x128xf32>
    %66 = vector.extract_strided_slice %62 {offsets = [32, 0], sizes = [32, 128], strides = [1, 1]} : vector<96x128xf32> to vector<32x128xf32>
    %67 = vector.extract_strided_slice %62 {offsets = [64, 0], sizes = [32, 128], strides = [1, 1]} : vector<96x128xf32> to vector<32x128xf32>
    %68 = arith.mulf %66, %50 : vector<32x128xf32>
    %69 = arith.mulf %65, %64 : vector<32x128xf32>
    %70 = arith.addf %68, %69 : vector<32x128xf32>
    %71 = math.tanh %70 : vector<32x128xf32>
    %72 = arith.mulf %67, %71 : vector<32x128xf32>
    %73 = vector.extract_strided_slice %9 {offsets = [0, 384], sizes = [128, 128], strides = [1, 1]} : vector<128x1024xf32> to vector<128x128xf32>
    %74 = arith.truncf %72 : vector<32x128xf32> to vector<32x128xbf16>
    %cst_22 = arith.constant dense<0.000000e+00> : vector<128x128xf32>
    %75 = tpu.matmul %3, %74, %cst_22 {dimension_numbers = #tpu.dot_dimension_numbers<[1], [0], [0], [1], [0, 0, 1, 1], [], []>} : vector<128x32xbf16>, vector<32x128xbf16>, vector<128x128xf32> -> vector<128x128xf32>
    %76 = arith.addf %73, %75 : vector<128x128xf32>
    %77 = vector.extract_strided_slice %76 {offsets = [0, 0], sizes = [96, 128], strides = [1, 1]} : vector<128x128xf32> to vector<96x128xf32>
    %78 = arith.negf %77 : vector<96x128xf32>
    %79 = math.exp %78 : vector<96x128xf32>
    %cst_23 = arith.constant 1.000000e+00 : f32
    %80 = vector.broadcast %cst_23 : f32 to vector<96x128xf32>
    %81 = arith.addf %80, %79 : vector<96x128xf32>
    %82 = arith.divf %80, %81 : vector<96x128xf32>
    %83 = vector.extract_strided_slice %76 {offsets = [96, 0], sizes = [32, 128], strides = [1, 1]} : vector<128x128xf32> to vector<32x128xf32>
    %84 = math.tanh %83 : vector<32x128xf32>
    %85 = vector.extract_strided_slice %82 {offsets = [0, 0], sizes = [32, 128], strides = [1, 1]} : vector<96x128xf32> to vector<32x128xf32>
    %86 = vector.extract_strided_slice %82 {offsets = [32, 0], sizes = [32, 128], strides = [1, 1]} : vector<96x128xf32> to vector<32x128xf32>
    %87 = vector.extract_strided_slice %82 {offsets = [64, 0], sizes = [32, 128], strides = [1, 1]} : vector<96x128xf32> to vector<32x128xf32>
    %88 = arith.mulf %86, %70 : vector<32x128xf32>
    %89 = arith.mulf %85, %84 : vector<32x128xf32>
    %90 = arith.addf %88, %89 : vector<32x128xf32>
    %91 = math.tanh %90 : vector<32x128xf32>
    %92 = arith.mulf %87, %91 : vector<32x128xf32>
    %93 = vector.extract_strided_slice %9 {offsets = [0, 512], sizes = [128, 128], strides = [1, 1]} : vector<128x1024xf32> to vector<128x128xf32>
    %94 = arith.truncf %92 : vector<32x128xf32> to vector<32x128xbf16>
    %cst_24 = arith.constant dense<0.000000e+00> : vector<128x128xf32>
    %95 = tpu.matmul %3, %94, %cst_24 {dimension_numbers = #tpu.dot_dimension_numbers<[1], [0], [0], [1], [0, 0, 1, 1], [], []>} : vector<128x32xbf16>, vector<32x128xbf16>, vector<128x128xf32> -> vector<128x128xf32>
    %96 = arith.addf %93, %95 : vector<128x128xf32>
    %97 = vector.extract_strided_slice %96 {offsets = [0, 0], sizes = [96, 128], strides = [1, 1]} : vector<128x128xf32> to vector<96x128xf32>
    %98 = arith.negf %97 : vector<96x128xf32>
    %99 = math.exp %98 : vector<96x128xf32>
    %cst_25 = arith.constant 1.000000e+00 : f32
    %100 = vector.broadcast %cst_25 : f32 to vector<96x128xf32>
    %101 = arith.addf %100, %99 : vector<96x128xf32>
    %102 = arith.divf %100, %101 : vector<96x128xf32>
    %103 = vector.extract_strided_slice %96 {offsets = [96, 0], sizes = [32, 128], strides = [1, 1]} : vector<128x128xf32> to vector<32x128xf32>
    %104 = math.tanh %103 : vector<32x128xf32>
    %105 = vector.extract_strided_slice %102 {offsets = [0, 0], sizes = [32, 128], strides = [1, 1]} : vector<96x128xf32> to vector<32x128xf32>
    %106 = vector.extract_strided_slice %102 {offsets = [32, 0], sizes = [32, 128], strides = [1, 1]} : vector<96x128xf32> to vector<32x128xf32>
    %107 = vector.extract_strided_slice %102 {offsets = [64, 0], sizes = [32, 128], strides = [1, 1]} : vector<96x128xf32> to vector<32x128xf32>
    %108 = arith.mulf %106, %90 : vector<32x128xf32>
    %109 = arith.mulf %105, %104 : vector<32x128xf32>
    %110 = arith.addf %108, %109 : vector<32x128xf32>
    %111 = math.tanh %110 : vector<32x128xf32>
    %112 = arith.mulf %107, %111 : vector<32x128xf32>
    %113 = vector.extract_strided_slice %9 {offsets = [0, 640], sizes = [128, 128], strides = [1, 1]} : vector<128x1024xf32> to vector<128x128xf32>
    %114 = arith.truncf %112 : vector<32x128xf32> to vector<32x128xbf16>
    %cst_26 = arith.constant dense<0.000000e+00> : vector<128x128xf32>
    %115 = tpu.matmul %3, %114, %cst_26 {dimension_numbers = #tpu.dot_dimension_numbers<[1], [0], [0], [1], [0, 0, 1, 1], [], []>} : vector<128x32xbf16>, vector<32x128xbf16>, vector<128x128xf32> -> vector<128x128xf32>
    %116 = arith.addf %113, %115 : vector<128x128xf32>
    %117 = vector.extract_strided_slice %116 {offsets = [0, 0], sizes = [96, 128], strides = [1, 1]} : vector<128x128xf32> to vector<96x128xf32>
    %118 = arith.negf %117 : vector<96x128xf32>
    %119 = math.exp %118 : vector<96x128xf32>
    %cst_27 = arith.constant 1.000000e+00 : f32
    %120 = vector.broadcast %cst_27 : f32 to vector<96x128xf32>
    %121 = arith.addf %120, %119 : vector<96x128xf32>
    %122 = arith.divf %120, %121 : vector<96x128xf32>
    %123 = vector.extract_strided_slice %116 {offsets = [96, 0], sizes = [32, 128], strides = [1, 1]} : vector<128x128xf32> to vector<32x128xf32>
    %124 = math.tanh %123 : vector<32x128xf32>
    %125 = vector.extract_strided_slice %122 {offsets = [0, 0], sizes = [32, 128], strides = [1, 1]} : vector<96x128xf32> to vector<32x128xf32>
    %126 = vector.extract_strided_slice %122 {offsets = [32, 0], sizes = [32, 128], strides = [1, 1]} : vector<96x128xf32> to vector<32x128xf32>
    %127 = vector.extract_strided_slice %122 {offsets = [64, 0], sizes = [32, 128], strides = [1, 1]} : vector<96x128xf32> to vector<32x128xf32>
    %128 = arith.mulf %126, %110 : vector<32x128xf32>
    %129 = arith.mulf %125, %124 : vector<32x128xf32>
    %130 = arith.addf %128, %129 : vector<32x128xf32>
    %131 = math.tanh %130 : vector<32x128xf32>
    %132 = arith.mulf %127, %131 : vector<32x128xf32>
    %133 = vector.extract_strided_slice %9 {offsets = [0, 768], sizes = [128, 128], strides = [1, 1]} : vector<128x1024xf32> to vector<128x128xf32>
    %134 = arith.truncf %132 : vector<32x128xf32> to vector<32x128xbf16>
    %cst_28 = arith.constant dense<0.000000e+00> : vector<128x128xf32>
    %135 = tpu.matmul %3, %134, %cst_28 {dimension_numbers = #tpu.dot_dimension_numbers<[1], [0], [0], [1], [0, 0, 1, 1], [], []>} : vector<128x32xbf16>, vector<32x128xbf16>, vector<128x128xf32> -> vector<128x128xf32>
    %136 = arith.addf %133, %135 : vector<128x128xf32>
    %137 = vector.extract_strided_slice %136 {offsets = [0, 0], sizes = [96, 128], strides = [1, 1]} : vector<128x128xf32> to vector<96x128xf32>
    %138 = arith.negf %137 : vector<96x128xf32>
    %139 = math.exp %138 : vector<96x128xf32>
    %cst_29 = arith.constant 1.000000e+00 : f32
    %140 = vector.broadcast %cst_29 : f32 to vector<96x128xf32>
    %141 = arith.addf %140, %139 : vector<96x128xf32>
    %142 = arith.divf %140, %141 : vector<96x128xf32>
    %143 = vector.extract_strided_slice %136 {offsets = [96, 0], sizes = [32, 128], strides = [1, 1]} : vector<128x128xf32> to vector<32x128xf32>
    %144 = math.tanh %143 : vector<32x128xf32>
    %145 = vector.extract_strided_slice %142 {offsets = [0, 0], sizes = [32, 128], strides = [1, 1]} : vector<96x128xf32> to vector<32x128xf32>
    %146 = vector.extract_strided_slice %142 {offsets = [32, 0], sizes = [32, 128], strides = [1, 1]} : vector<96x128xf32> to vector<32x128xf32>
    %147 = vector.extract_strided_slice %142 {offsets = [64, 0], sizes = [32, 128], strides = [1, 1]} : vector<96x128xf32> to vector<32x128xf32>
    %148 = arith.mulf %146, %130 : vector<32x128xf32>
    %149 = arith.mulf %145, %144 : vector<32x128xf32>
    %150 = arith.addf %148, %149 : vector<32x128xf32>
    %151 = math.tanh %150 : vector<32x128xf32>
    %152 = arith.mulf %147, %151 : vector<32x128xf32>
    %153 = vector.extract_strided_slice %9 {offsets = [0, 896], sizes = [128, 128], strides = [1, 1]} : vector<128x1024xf32> to vector<128x128xf32>
    %154 = arith.truncf %152 : vector<32x128xf32> to vector<32x128xbf16>
    %cst_30 = arith.constant dense<0.000000e+00> : vector<128x128xf32>
    %155 = tpu.matmul %3, %154, %cst_30 {dimension_numbers = #tpu.dot_dimension_numbers<[1], [0], [0], [1], [0, 0, 1, 1], [], []>} : vector<128x32xbf16>, vector<32x128xbf16>, vector<128x128xf32> -> vector<128x128xf32>
    %156 = arith.addf %153, %155 : vector<128x128xf32>
    %157 = vector.extract_strided_slice %156 {offsets = [0, 0], sizes = [96, 128], strides = [1, 1]} : vector<128x128xf32> to vector<96x128xf32>
    %158 = arith.negf %157 : vector<96x128xf32>
    %159 = math.exp %158 : vector<96x128xf32>
    %cst_31 = arith.constant 1.000000e+00 : f32
    %160 = vector.broadcast %cst_31 : f32 to vector<96x128xf32>
    %161 = arith.addf %160, %159 : vector<96x128xf32>
    %162 = arith.divf %160, %161 : vector<96x128xf32>
    %163 = vector.extract_strided_slice %156 {offsets = [96, 0], sizes = [32, 128], strides = [1, 1]} : vector<128x128xf32> to vector<32x128xf32>
    %164 = math.tanh %163 : vector<32x128xf32>
    %165 = vector.extract_strided_slice %162 {offsets = [0, 0], sizes = [32, 128], strides = [1, 1]} : vector<96x128xf32> to vector<32x128xf32>
    %166 = vector.extract_strided_slice %162 {offsets = [32, 0], sizes = [32, 128], strides = [1, 1]} : vector<96x128xf32> to vector<32x128xf32>
    %167 = vector.extract_strided_slice %162 {offsets = [64, 0], sizes = [32, 128], strides = [1, 1]} : vector<96x128xf32> to vector<32x128xf32>
    %168 = arith.mulf %166, %150 : vector<32x128xf32>
    %169 = arith.mulf %165, %164 : vector<32x128xf32>
    %170 = arith.addf %168, %169 : vector<32x128xf32>
    %171 = math.tanh %170 : vector<32x128xf32>
    %172 = arith.mulf %167, %171 : vector<32x128xf32>
    %173 = tpu.transpose %172, [1, 0] : vector<32x128xf32> -> vector<128x32xf32>
    %174 = arith.truncf %173 : vector<128x32xf32> to vector<128x32xbf16>
    %cst_32 = arith.constant dense<0.000000e+00> : vector<128x128xf32>
    %175 = tpu.matmul %174, %6, %cst_32 {dimension_numbers = #tpu.dot_dimension_numbers<[1], [0], [0], [1], [0, 0, 1, 1], [], []>} : vector<128x32xbf16>, vector<32x128xbf16>, vector<128x128xf32> -> vector<128x128xf32>
    %176 = arith.addf %10, %175 : vector<128x128xf32>
    %177 = tpu.iota {dimensions = array<i32: 1>} : vector<128x128xi32>
    %c16_i32 = arith.constant 16 : i32
    %178 = vector.broadcast %c16_i32 : i32 to vector<128x128xi32>
    %179 = arith.cmpi slt, %177, %178 : vector<128x128xi32>
    %cst_33 = arith.constant -1.000000e+30 : f32
    %180 = vector.broadcast %cst_33 : f32 to vector<128x128xf32>
    %181 = arith.select %179, %176, %180 : vector<128x128xi1>, vector<128x128xf32>
    %cst_34 = arith.constant dense<0xFF800000> : vector<128xf32>
    %182 = vector.multi_reduction <maximumf>, %181, %cst_34 [1] : vector<128x128xf32> to vector<128xf32>
    %183 = vector.shape_cast %182 : vector<128xf32> to vector<128x1xf32>
    %184 = vector.broadcast %183 : vector<128x1xf32> to vector<128x128xf32>
    %185 = arith.subf %181, %184 : vector<128x128xf32>
    %186 = math.exp %185 : vector<128x128xf32>
    %cst_35 = arith.constant dense<0.000000e+00> : vector<128xf32>
    %187 = vector.multi_reduction <add>, %186, %cst_35 [1] : vector<128x128xf32> to vector<128xf32>
    %188 = vector.shape_cast %187 : vector<128xf32> to vector<128x1xf32>
    %189 = math.log %188 : vector<128x1xf32>
    %190 = arith.addf %183, %189 : vector<128x1xf32>
    %191 = vector.broadcast %190 : vector<128x1xf32> to vector<128x128xf32>
    %192 = arith.subf %176, %191 : vector<128x128xf32>
    %c0_36 = arith.constant 0 : index
    %c0_37 = arith.constant 0 : index
    %193 = vector.load %arg8[%c0_36, %c0_37] : memref<128x128xf32, #tpu.memory_space<vmem>>, vector<128x128xf32>
    tpu.vector_store %arg8[%c0_36, %c0_37], %192 {strides = array<i32>} : memref<128x128xf32, #tpu.memory_space<vmem>>, vector<128x128xf32>,
    return
  }
  func.func @transform_0(%arg0: i32) -> (i32, i32) {
    %c0_i32 = arith.constant 0 : i32
    %c0_i32_0 = arith.constant 0 : i32
    return %arg0, %c0_i32 : i32, i32
  }
  func.func @transform_1(%arg0: i32) -> (i32, i32) {
    %c0_i32 = arith.constant 0 : i32
    %c0_i32_0 = arith.constant 0 : i32
    return %arg0, %c0_i32 : i32, i32
  }
  func.func @transform_2(%arg0: i32) -> (i32, i32) {
    %c0_i32 = arith.constant 0 : i32
    %c0_i32_0 = arith.constant 0 : i32
    %c0_i32_1 = arith.constant 0 : i32
    return %c0_i32, %c0_i32_0 : i32, i32
  }
  func.func @transform_3(%arg0: i32) -> (i32, i32) {
    %c0_i32 = arith.constant 0 : i32
    %c0_i32_0 = arith.constant 0 : i32
    %c0_i32_1 = arith.constant 0 : i32
    return %c0_i32, %c0_i32_0 : i32, i32
  }
  func.func @transform_4(%arg0: i32) -> (i32, i32) {
    %c0_i32 = arith.constant 0 : i32
    %c0_i32_0 = arith.constant 0 : i32
    %c0_i32_1 = arith.constant 0 : i32
    return %c0_i32, %c0_i32_0 : i32, i32
  }
  func.func @transform_5(%arg0: i32) -> (i32, i32) {
    %c0_i32 = arith.constant 0 : i32
    %c0_i32_0 = arith.constant 0 : i32
    %c0_i32_1 = arith.constant 0 : i32
    return %c0_i32, %c0_i32_0 : i32, i32
  }
  func.func @transform_6(%arg0: i32) -> (i32, i32) {
    %c0_i32 = arith.constant 0 : i32
    %c0_i32_0 = arith.constant 0 : i32
    %c0_i32_1 = arith.constant 0 : i32
    return %c0_i32, %c0_i32_0 : i32, i32
  }
  func.func @transform_7(%arg0: i32) -> (i32, i32) {
    %c0_i32 = arith.constant 0 : i32
    %c0_i32_0 = arith.constant 0 : i32
    return %arg0, %c0_i32 : i32, i32
  }
}

</mosaic_0001>

<bundles_post_ra>
// kernel: _lambda_.3
= control target key start
LH: loop header
LB: loop body
LE: loop exit
PB: predicated region body
PF: predicated region fallthrough
CT: control target
= control target key end

     0   :  { %vm667_vm0 = vcmask 261120   ;;  %v5091_v1 = vmov 0   ;;  %s6803_s1 = inlined_call_operand.vmem [shape: bf16[1024,32], index: 1, kind: input, shape index: {}]   ;;  %s6804_s2 = inlined_call_operand.vmem [shape: bf16[128,32], index: 2, kind: input, shape index: {}]   ;;  %s6805_s4 = inlined_call_operand.vmem [shape: f32[128,1], index: 4, kind: input, shape index: {}]   ;;  %s6806_s3 = inlined_call_operand.vmem [shape: bf16[128,32], index: 3, kind: input, shape index: {}]   ;;  %s6807_s5 = inlined_call_operand.vmem [shape: bf16[32,128], index: 5, kind: input, shape index: {}]   ;;  %s6808_s6 = inlined_call_operand.vmem [shape: bf16[32,128], index: 6, kind: input, shape index: {}]   ;;  %s6809_s0 = inlined_call_operand.vmem [shape: bf16[128,32], index: 0, kind: input, shape index: {}]   ;;  %s6810_s7 = inlined_call_operand.vmem [shape: f32[128,128], index: 7, kind: output, shape index: {}]  }
   0x1   :  { %v4408_v0 = vld [vmem:[%s6803_s1 + $0x78] sm:$0xff]   ;;  %4406 = vset.pattern.permute.xlu0 %v5091_v1  ;;  %4407 = vset.pattern.permute.xlu1 %v5091_v1  ;;  %v4410_v3 = vld [vmem:[%s6803_s1 + $0x70] sm:$0xff]   ;;  %v4414_v10 = vld [vmem:[%s6803_s1 + $0x68] sm:$0xff]  }
   0x2   :  { %v4409_v2 = vld [vmem:[%s6803_s1 + $0x38] sm:$0xff]   ;;  %4372 = vmatprep.subr.msk.bf16.mxu0 %vm667_vm0, %v4408_v0  ;;  %v4412_v6 = vld [vmem:[%s6803_s1 + $0x30] sm:$0xff]   ;;  %v4416_v13 = vld [vmem:[%s6803_s1 + $0x28] sm:$0xff]  }
   0x3   :  { %v714_v4 = vsel %vm667_vm0, %v4409_v2, 0  ;;  %v4411_v5 = vld [vmem:[%s6803_s1 + $0xf8] sm:$0xff]   ;;  %v4415_v9 = vld [vmem:[%s6803_s1 + $0xf0] sm:$0xff]   ;;  %v711_v11 = vsel %vm667_vm0, %v4412_v6, 0  ;;  %v4419_v15 = vld [vmem:[%s6803_s1 + $0xe8] sm:$0xff]   ;;  %v708_v17 = vsel %vm667_vm0, %v4416_v13, 0 }
   0x4   :  { %3948 = vmatpush3.bf16.xpose.msra.mxu0 %v714_v4  ;;  %4380 = vmatprep.subr.msk.bf16.mxu1 %vm667_vm0, %v4411_v5  ;;  %v4413_v7 = vld [vmem:[%s6803_s1 + $0xb8] sm:$0xff]   ;;  %v4417_v12 = vld [vmem:[%s6803_s1 + $0xb0] sm:$0xff]   ;;  %v4418_v16 = vld [vmem:[%s6803_s1 + $0x60] sm:$0xff]  }
   0x5   :  { %4373 = vmatprep.subr.msk.bf16.mxu0 %vm667_vm0, %v4410_v3  ;;  %v762_v8 = vsel %vm667_vm0, %v4413_v7, 0  ;;  %v759_v14 = vsel %vm667_vm0, %v4417_v12, 0  ;;  %v4421_v18 = vld [vmem:[%s6803_s1 + $0xa8] sm:$0xff]   ;;  %v4420_v19 = vld [vmem:[%s6803_s1 + $0x20] sm:$0xff]   ;;  %v4422_v22 = vld [vmem:[%s6803_s1 + $0x58] sm:$0xff]  }
   0x6   :  { %3980 = vmatpush3.bf16.xpose.msra.mxu1 %v762_v8  ;;  %v756_v20 = vsel %vm667_vm0, %v4421_v18, 0  ;;  %v4423_v21 = vld [vmem:[%s6803_s1 + $0xe0] sm:$0xff]   ;;  %v705_v23 = vsel %vm667_vm0, %v4420_v19, 0  ;;  %v4424_v25 = vld [vmem:[%s6803_s1 + $0x18] sm:$0xff]   ;;  %v4426_v29 = vld [vmem:[%s6803_s1 + $0x50] sm:$0xff]  }
   0x7   :  { %4381 = vmatprep.subr.msk.bf16.mxu1 %vm667_vm0, %v4415_v9  ;;  %v4425_v24 = vld [vmem:[%s6803_s1 + $0xa0] sm:$0xff]   ;;  %v4427_v27 = vld [vmem:[%s6803_s1 + $0xd8] sm:$0xff]   ;;  %v702_v30 = vsel %vm667_vm0, %v4424_v25, 0  ;;  %v4428_v32 = vld [vmem:[%s6803_s1 + $0x10] sm:$0xff]  }
   0x8   :  { %v753_v26 = vsel %vm667_vm0, %v4425_v24, 0  ;;  %v5211_v28 = vld [vmem:[%s6804_s2] sm:$0xff]   ;;  %v4429_v31 = vld [vmem:[%s6803_s1 + $0x98] sm:$0xff]   ;;  %v4431_v34 = vld [vmem:[%s6803_s1 + $0xd0] sm:$0xff]   ;;  %v699_v36 = vsel %vm667_vm0, %v4428_v32, 0 }
   0x9   :  { %3963 = vmatprep.mubr.msk.bf16.mxu0 %vm667_vm0, %v5211_v28  ;;  %3995 = vmatprep.mubr.msk.bf16.mxu1 %vm667_vm0, %v5211_v28  ;;  %v750_v33 = vsel %vm667_vm0, %v4429_v31, 0  ;;  %v4430_v35 = vld [vmem:[%s6803_s1 + $0x48] sm:$0xff]   ;;  %v4433_v37 = vld [vmem:[%s6803_s1 + $0x90] sm:$0xff]   ;;  %v4434_v41 = vld [vmem:[%s6803_s1 + $0x40] sm:$0xff]  }
   0xa   :  { %v4432_v38 = vld [vmem:[%s6803_s1 + $0x8] sm:$0xff]   ;;  %v747_v39 = vsel %vm667_vm0, %v4433_v37, 0  ;;  %v4436_v44 = vld [vmem:[%s6803_s1] sm:$0xff]   ;;  %v4440_v47 = vld [vmem:[%s6803_s1 + $0x178] sm:$0xff]  }
   0xb   :  { %v4435_v40 = vld [vmem:[%s6803_s1 + $0xc8] sm:$0xff]   ;;  %v696_v42 = vsel %vm667_vm0, %v4432_v38, 0  ;;  %v4439_v46 = vld [vmem:[%s6803_s1 + $0xc0] sm:$0xff]   ;;  %v693_v48 = vsel %vm667_vm0, %v4436_v44, 0  ;;  %v4442_v50 = vld [vmem:[%s6803_s1 + $0x138] sm:$0xff]  }
   0xc   :  { %3950 = vmatpush3.bf16.xpose.msra.mxu0 %v711_v11  ;;  %v4437_v43 = vld [vmem:[%s6803_s1 + $0x88] sm:$0xff]   ;;  %v4441_v49 = vld [vmem:[%s6803_s1 + $0x80] sm:$0xff]   ;;  %v4445_v52 = vld [vmem:[%s6803_s1 + $0x1f8] sm:$0xff]   ;;  %v810_v55 = vsel %vm667_vm0, %v4442_v50, 0 }
   0xd   :  { %4374 = vmatprep.subr.msk.bf16.mxu0 %vm667_vm0, %v4414_v10  ;;  %v744_v45 = vsel %vm667_vm0, %v4437_v43, 0  ;;  %v741_v51 = vsel %vm667_vm0, %v4441_v49, 0  ;;  %v5284_v53 = vld [vmem:[%s6804_s2 + $0x8] sm:$0xff]   ;;  %v4444_v54 = vld [vmem:[%s6803_s1 + $0x170] sm:$0xff]   ;;  %v4447_v56 = vld [vmem:[%s6803_s1 + $0x1b8] sm:$0xff]  }
   0xe   :  { %3982 = vmatpush3.bf16.xpose.msra.mxu1 %v759_v14  ;;  %v4446_v57 = vld [vmem:[%s6803_s1 + $0x130] sm:$0xff]   ;;  %v858_v58 = vsel %vm667_vm0, %v4447_v56, 0  ;;  %v206_v63 = vld [vmem:[%s6805_s4 + $0x18] sm:$0xff]  ;;  %v4449_v2 = vld [vmem:[%s6803_s1 + $0x168] sm:$0xff]  }
   0xf   :  { %4382 = vmatprep.subr.msk.bf16.mxu1 %vm667_vm0, %v4419_v15  ;;  %v4450_v59 = vld [vmem:[%s6803_s1 + $0x1f0] sm:$0xff]   ;;  %v807_v0 = vsel %vm667_vm0, %v4446_v57, 0  ;;  %v210_v4 = vld [vmem:[%s6805_s4 + $0x38] sm:$0xff]  ;;  %v4451_v5 = vld [vmem:[%s6803_s1 + $0x128] sm:$0xff]  }
  0x10   :  { %v205_v60 = vld [vmem:[%s6805_s4 + $0x10] sm:$0xff]  ;;  %v203_v6 = vld [vmem:[%s6805_s4] sm:$0xff]  ;;  %v4455_v8 = vld [vmem:[%s6803_s1 + $0x1e8] sm:$0xff]   ;;  %v804_v13 = vsel %vm667_vm0, %v4451_v5, 0 }
  0x11   :  { %v5314_v61 = vld [vmem:[%s6804_s2 + $0x10] sm:$0xff]   ;;  %239 = vperm.xlu0 %4406, %v205_v60   ;;  %v5353_v9 = vld [vmem:[%s6804_s2 + $0x18] sm:$0xff]   ;;  %v204_v10 = vld [vmem:[%s6805_s4 + $0x8] sm:$0xff] }
  0x12   :  { %v209_v62 = vld [vmem:[%s6805_s4 + $0x30] sm:$0xff]  ;;  %v4454_v11 = vld [vmem:[%s6803_s1 + $0x160] sm:$0xff]   ;;  %v4457_v14 = vld [vmem:[%s6803_s1 + $0x1a8] sm:$0xff]  }
  0x13   :  { %v4452_v3 = vld [vmem:[%s6803_s1 + $0x1b0] sm:$0xff]   ;;  %259 = vperm.xlu1 %4407, %v209_v62   ;;  %v207_v12 = vld [vmem:[%s6805_s4 + $0x20] sm:$0xff]  ;;  %v208_v15 = vld [vmem:[%s6805_s4 + $0x28] sm:$0xff]  ;;  %v852_v18 = vsel %vm667_vm0, %v4457_v14, 0 }
  0x14   :  { %3952 = vmatpush3.bf16.xpose.msra.mxu0 %v708_v17  ;;  %v855_v7 = vsel %vm667_vm0, %v4452_v3, 0  ;;  %v4456_v17 = vld [vmem:[%s6803_s1 + $0x120] sm:$0xff]   ;;  %v4459_v24 = vld [vmem:[%s6803_s1 + $0x158] sm:$0xff]   ;;  %v212_v32 = vld [vmem:[%s6805_s4 + $0x48] sm:$0xff] }
  0x15   :  { %4375 = vmatprep.subr.msk.bf16.mxu0 %vm667_vm0, %v4418_v16  ;;  %244 = vperm.xlu0 %4406, %v206_v63   ;;  %v213_v16 = vld [vmem:[%s6805_s4 + $0x50] sm:$0xff]  ;;  %v4460_v19 = vld [vmem:[%s6803_s1 + $0x1e0] sm:$0xff]   ;;  %v4465_v31 = vld [vmem:[%s6803_s1 + $0x1d8] sm:$0xff]  }
  0x16   :  { %3984 = vmatpush3.bf16.xpose.msra.mxu1 %v756_v20  ;;  %v214_v20 = vld [vmem:[%s6805_s4 + $0x58] sm:$0xff]  ;;  %v4462_v25 = vld [vmem:[%s6803_s1 + $0x1a0] sm:$0xff]   ;;  %v216_v38 = vld [vmem:[%s6805_s4 + $0x68] sm:$0xff] }
  0x17   :  { %4383 = vmatprep.subr.msk.bf16.mxu1 %vm667_vm0, %v4423_v21  ;;  %264 = vperm.xlu1 %4407, %v210_v4   ;;  %v5399_v21 = vld [vmem:[%s6804_s2 + $0x20] sm:$0xff]   ;;  %v4467_v37 = vld [vmem:[%s6803_s1 + $0x198] sm:$0xff]   ;;  %v4469_v44 = vld [vmem:[%s6803_s1 + $0x148] sm:$0xff]  }
  0x18   :  { %v4473_v49 = vld [vmem:[%s6804_s2 + $0x38] sm:$0xff]   ;;  %v4478_v56 = vld [vmem:[%s6803_s1 + $0x1c0] sm:$0xff]   ;;  %v5638_v62 = vld [vmem:[%s6806_s3 + $0x28] sm:$0xff]  }
  0x19   :  { %229 = vperm.xlu0 %4406, %v203_v6   ;;  %v5624_v60 = vld [vmem:[%s6806_s3 + $0x18] sm:$0xff]   ;;  %v5643_v63 = vld [vmem:[%s6806_s3 + $0x30] sm:$0xff]  }
  0x1b   :  { %234 = vperm.xlu1 %4407, %v204_v10  }
  0x1c   :  { %3954 = vmatpush3.bf16.xpose.msra.mxu0 %v705_v23  ;;  %v801_v23 = vsel %vm667_vm0, %v4456_v17, 0 }
  0x1d   :  { %4376 = vmatprep.subr.msk.bf16.mxu0 %vm667_vm0, %v4422_v22  ;;  %249 = vperm.xlu0 %4406, %v207_v12   ;;  %v217_v22 = vld [vmem:[%s6805_s4 + $0x70] sm:$0xff] }
  0x1e   :  { %3986 = vmatpush3.bf16.xpose.msra.mxu1 %v753_v26  ;;  %v218_v26 = vld [vmem:[%s6805_s4 + $0x78] sm:$0xff] }
  0x1f   :  { %4384 = vmatprep.subr.msk.bf16.mxu1 %vm667_vm0, %v4427_v27  ;;  %254 = vperm.xlu1 %4407, %v208_v15   ;;  %v211_v27 = vld [vmem:[%s6805_s4 + $0x40] sm:$0xff] }
  0x21   :  { %279 = vperm.xlu0 %4406, %v213_v16  }
  0x23   :  { %284 = vperm.xlu1 %4407, %v214_v20  }
  0x24   :  { %3956 = vmatpush3.bf16.xpose.msra.mxu0 %v702_v30  ;;  %v849_v30 = vsel %vm667_vm0, %v4462_v25, 0 }
  0x25   :  { %4377 = vmatprep.subr.msk.bf16.mxu0 %vm667_vm0, %v4426_v29  ;;  %299 = vperm.xlu0 %4406, %v217_v22   ;;  %v4461_v29 = vld [vmem:[%s6803_s1 + $0x118] sm:$0xff]  }
  0x26   :  { %3988 = vmatpush3.bf16.xpose.msra.mxu1 %v750_v33  ;;  %v5440_v33 = vld [vmem:[%s6804_s2 + $0x28] sm:$0xff]  }
  0x27   :  { %4385 = vmatprep.subr.msk.bf16.mxu1 %vm667_vm0, %v4431_v34  ;;  %304 = vperm.xlu1 %4407, %v218_v26   ;;  %v215_v34 = vld [vmem:[%s6805_s4 + $0x60] sm:$0xff] }
  0x29   :  { %269 = vperm.xlu0 %4406, %v211_v27  }
  0x2b   :  { %274 = vperm.xlu1 %4407, %v212_v32  }
  0x2c   :  { %3958 = vmatpush3.bf16.xpose.msra.mxu0 %v699_v36  ;;  %v4464_v36 = vld [vmem:[%s6803_s1 + $0x150] sm:$0xff]  }
  0x2d   :  { %4378 = vmatprep.subr.msk.bf16.mxu0 %vm667_vm0, %v4430_v35  ;;  %v798_v35 = vsel %vm667_vm0, %v4461_v29, 0  ;;  %289 = vperm.xlu0 %4406, %v215_v34  }
  0x2e   :  { %3990 = vmatpush3.bf16.xpose.msra.mxu1 %v747_v39  ;;  %v4466_v39 = vld [vmem:[%s6803_s1 + $0x110] sm:$0xff]  }
  0x2f   :  { %4386 = vmatprep.subr.msk.bf16.mxu1 %vm667_vm0, %v4435_v40  ;;  %v846_v40 = vsel %vm667_vm0, %v4467_v37, 0  ;;  %294 = vperm.xlu1 %4407, %v216_v38   ;;  %v795_v43 = vsel %vm667_vm0, %v4466_v39, 0 }
  0x34   :  { %3960 = vmatpush3.bf16.xpose.msra.mxu0 %v696_v42  ;;  %v5475_v42 = vld [vmem:[%s6804_s2 + $0x30] sm:$0xff]  }
  0x35   :  { %4379 = vmatprep.subr.msk.bf16.mxu0 %vm667_vm0, %v4434_v41  ;;  %v4470_v41 = vld [vmem:[%s6803_s1 + $0x1d0] sm:$0xff]  }
  0x36   :  { %3992 = vmatpush3.bf16.xpose.msra.mxu1 %v744_v45  ;;  %v4472_v45 = vld [vmem:[%s6803_s1 + $0x190] sm:$0xff]  }
  0x37   :  { %4387 = vmatprep.subr.msk.bf16.mxu1 %vm667_vm0, %v4439_v46  ;;  %v4471_v46 = vld [vmem:[%s6803_s1 + $0x108] sm:$0xff]  }
  0x38   :  { %v792_v50 = vsel %vm667_vm0, %v4471_v46, 0 }
  0x3c   :  { %3962 = vmatpush3.bf16.xpose.msra.mxu0 %v693_v48  ;;  %v4475_v48 = vld [vmem:[%s6803_s1 + $0x1c8] sm:$0xff]  }
  0x3d   :  { %4388 = vmatprep.subr.msk.bf16.mxu0 %vm667_vm0, %v4440_v47  ;;  %v843_v47 = vsel %vm667_vm0, %v4472_v45, 0 }
  0x3e   :  { %3994 = vmatpush3.bf16.xpose.msra.mxu1 %v741_v51  ;;  %v4474_v51 = vld [vmem:[%s6803_s1 + $0x140] sm:$0xff]  }
  0x3f   :  { %4396 = vmatprep.subr.msk.bf16.mxu1 %vm667_vm0, %v4445_v52  ;;  %v4477_v52 = vld [vmem:[%s6803_s1 + $0x188] sm:$0xff]  }
  0x43   :  { %3964 = vmatmul.mubr.msk.bf16.vlgmr.msra.gmra.mxu0 %vm667_vm0, %v5211_v28 }
  0x44   :  { %4012 = vmatpush3.bf16.xpose.msra.mxu0 %v810_v55  ;;  %3965 = vmatprep.mubr.msk.bf16.mxu0 %vm667_vm0, %v5284_v53  ;;  %v840_v55 = vsel %vm667_vm0, %v4477_v52, 0 }
  0x45   :  { %4389 = vmatprep.subr.msk.bf16.mxu0 %vm667_vm0, %v4444_v54  ;;  %3996 = vmatmul.mubr.msk.bf16.vlgmr.msra.gmra.mxu1 %vm667_vm0, %v5211_v28  ;;  %v4476_v54 = vld [vmem:[%s6803_s1 + $0x100] sm:$0xff]  }
  0x46   :  { %4044 = vmatpush3.bf16.xpose.msra.mxu1 %v858_v58  ;;  %3997 = vmatprep.mubr.msk.bf16.mxu1 %vm667_vm0, %v5284_v53  ;;  %v789_v57 = vsel %vm667_vm0, %v4476_v54, 0  ;;  %v4479_v58 = vld [vmem:[%s6803_s1 + $0x180] sm:$0xff]  }
  0x47   :  { %4397 = vmatprep.subr.msk.bf16.mxu1 %vm667_vm0, %v4450_v59  ;;  %v837_v59 = vsel %vm667_vm0, %v4479_v58, 0 }
  0x4b   :  { %3966 = vmatmul.mubr.msk.bf16.gmra.mxu0 %vm667_vm0, %v5284_v53 }
  0x4c   :  { %4014 = vmatpush3.bf16.xpose.msra.mxu0 %v807_v0  ;;  %3967 = vmatprep.mubr.msk.bf16.mxu0 %vm667_vm0, %v5314_v61  ;;  %v5652_v0 = vld [vmem:[%s6806_s3 + $0x38] sm:$0xff]  }
  0x4d   :  { %4390 = vmatprep.subr.msk.bf16.mxu0 %vm667_vm0, %v4449_v2  ;;  %3998 = vmatmul.mubr.msk.bf16.gmra.mxu1 %vm667_vm0, %v5284_v53 }
  0x4e   :  { %4046 = vmatpush3.bf16.xpose.msra.mxu1 %v855_v7  ;;  %3999 = vmatprep.mubr.msk.bf16.mxu1 %vm667_vm0, %v5314_v61 }
  0x4f   :  { %4398 = vmatprep.subr.msk.bf16.mxu1 %vm667_vm0, %v4455_v8 }
  0x53   :  { %3968 = vmatmul.mubr.msk.bf16.gmra.mxu0 %vm667_vm0, %v5314_v61 }
  0x54   :  { %4016 = vmatpush3.bf16.xpose.msra.mxu0 %v804_v13  ;;  %3969 = vmatprep.mubr.msk.bf16.mxu0 %vm667_vm0, %v5353_v9 }
  0x55   :  { %4391 = vmatprep.subr.msk.bf16.mxu0 %vm667_vm0, %v4454_v11  ;;  %4000 = vmatmul.mubr.msk.bf16.gmra.mxu1 %vm667_vm0, %v5314_v61 }
  0x56   :  { %4048 = vmatpush3.bf16.xpose.msra.mxu1 %v852_v18  ;;  %4001 = vmatprep.mubr.msk.bf16.mxu1 %vm667_vm0, %v5353_v9 }
  0x57   :  { %4399 = vmatprep.subr.msk.bf16.mxu1 %vm667_vm0, %v4460_v19 }
  0x5b   :  { %3970 = vmatmul.mubr.msk.bf16.gmra.mxu0 %vm667_vm0, %v5353_v9 }
  0x5c   :  { %4018 = vmatpush3.bf16.xpose.msra.mxu0 %v801_v23  ;;  %3971 = vmatprep.mubr.msk.bf16.mxu0 %vm667_vm0, %v5399_v21 }
  0x5d   :  { %4392 = vmatprep.subr.msk.bf16.mxu0 %vm667_vm0, %v4459_v24  ;;  %4002 = vmatmul.mubr.msk.bf16.gmra.mxu1 %vm667_vm0, %v5353_v9 }
  0x5e   :  { %4050 = vmatpush3.bf16.xpose.msra.mxu1 %v849_v30  ;;  %4003 = vmatprep.mubr.msk.bf16.mxu1 %vm667_vm0, %v5399_v21 }
  0x5f   :  { %4400 = vmatprep.subr.msk.bf16.mxu1 %vm667_vm0, %v4465_v31 }
  0x63   :  { %3972 = vmatmul.mubr.msk.bf16.gmra.mxu0 %vm667_vm0, %v5399_v21 }
  0x64   :  { %4020 = vmatpush3.bf16.xpose.msra.mxu0 %v798_v35  ;;  %3973 = vmatprep.mubr.msk.bf16.mxu0 %vm667_vm0, %v5440_v33 }
  0x65   :  { %4393 = vmatprep.subr.msk.bf16.mxu0 %vm667_vm0, %v4464_v36  ;;  %4004 = vmatmul.mubr.msk.bf16.gmra.mxu1 %vm667_vm0, %v5399_v21 }
  0x66   :  { %4052 = vmatpush3.bf16.xpose.msra.mxu1 %v846_v40  ;;  %4005 = vmatprep.mubr.msk.bf16.mxu1 %vm667_vm0, %v5440_v33 }
  0x67   :  { %4401 = vmatprep.subr.msk.bf16.mxu1 %vm667_vm0, %v4470_v41 }
  0x6b   :  { %3974 = vmatmul.mubr.msk.bf16.gmra.mxu0 %vm667_vm0, %v5440_v33 }
  0x6c   :  { %4022 = vmatpush3.bf16.xpose.msra.mxu0 %v795_v43  ;;  %3975 = vmatprep.mubr.msk.bf16.mxu0 %vm667_vm0, %v5475_v42 }
  0x6d   :  { %4394 = vmatprep.subr.msk.bf16.mxu0 %vm667_vm0, %v4469_v44  ;;  %4006 = vmatmul.mubr.msk.bf16.gmra.mxu1 %vm667_vm0, %v5440_v33 }
  0x6e   :  { %4054 = vmatpush3.bf16.xpose.msra.mxu1 %v843_v47  ;;  %4007 = vmatprep.mubr.msk.bf16.mxu1 %vm667_vm0, %v5475_v42 }
  0x6f   :  { %4402 = vmatprep.subr.msk.bf16.mxu1 %vm667_vm0, %v4475_v48 }
  0x73   :  { %3976 = vmatmul.mubr.msk.bf16.gmra.mxu0 %vm667_vm0, %v5475_v42 }
  0x74   :  { %4024 = vmatpush3.bf16.xpose.msra.mxu0 %v792_v50  ;;  %3977 = vmatprep.mubr.msk.bf16.mxu0 %vm667_vm0, %v4473_v49 }
  0x75   :  { %4395 = vmatprep.subr.msk.bf16.mxu0 %vm667_vm0, %v4474_v51  ;;  %4008 = vmatmul.mubr.msk.bf16.gmra.mxu1 %vm667_vm0, %v5475_v42 }
  0x76   :  { %4056 = vmatpush3.bf16.xpose.msra.mxu1 %v840_v55  ;;  %4009 = vmatprep.mubr.msk.bf16.mxu1 %vm667_vm0, %v4473_v49 }
  0x77   :  { %4403 = vmatprep.subr.msk.bf16.mxu1 %vm667_vm0, %v4478_v56 }
  0x7b   :  { %3978 = vmatmul.mubr.msk.bf16.gmra.mxu0 %vm667_vm0, %v4473_v49 }
  0x7c   :  { %4026 = vmatpush3.bf16.xpose.msra.mxu0 %v789_v57  ;;  %4027 = vmatprep.mubr.msk.bf16.mxu0 %vm667_vm0, %v5211_v28 }
  0x7d   :  { %4174 = vmatprep.subr.bf16.mxu0 %v5091_v1  ;;  %4010 = vmatmul.mubr.msk.bf16.gmra.mxu1 %vm667_vm0, %v4473_v49 }
  0x7e   :  { %4058 = vmatpush3.bf16.xpose.msra.mxu1 %v837_v59  ;;  %4059 = vmatprep.mubr.msk.bf16.mxu1 %vm667_vm0, %v5211_v28 }
  0x83   :  { %4028 = vmatmul.mubr.msk.bf16.vlgmr.msra.gmra.mxu0 %vm667_vm0, %v5211_v28 }
  0x84   :  { %4029 = vmatprep.mubr.msk.bf16.mxu0 %vm667_vm0, %v5284_v53  ;;  %4175 = vmatpush3.bf16.msra.mxu0 %v5091_v1  ;;  %v5599_v1 = vld [vmem:[%s6806_s3] sm:$0xff]  }
  0x85   :  { %4060 = vmatmul.mubr.msk.bf16.vlgmr.msra.gmra.mxu1 %vm667_vm0, %v5211_v28  ;;  %v5608_v28 = vld [vmem:[%s6806_s3 + $0x8] sm:$0xff]  }
  0x86   :  { %4061 = vmatprep.mubr.msk.bf16.mxu1 %vm667_vm0, %v5284_v53 }
  0x8b   :  { %4030 = vmatmul.mubr.msk.bf16.gmra.mxu0 %vm667_vm0, %v5284_v53 }
  0x8c   :  { %4031 = vmatprep.mubr.msk.bf16.mxu0 %vm667_vm0, %v5314_v61  ;;  %v5768_v59 = vpop.permute.xlu0 %239 }
  0x8d   :  { %4062 = vmatmul.mubr.msk.bf16.gmra.mxu1 %vm667_vm0, %v5284_v53  ;;  %v5613_v53 = vld [vmem:[%s6806_s3 + $0x10] sm:$0xff]  }
  0x8e   :  { %4063 = vmatprep.mubr.msk.bf16.mxu1 %vm667_vm0, %v5314_v61 }
  0x93   :  { %4032 = vmatmul.mubr.msk.bf16.gmra.mxu0 %vm667_vm0, %v5314_v61 }
  0x94   :  { %4033 = vmatprep.mubr.msk.bf16.mxu0 %vm667_vm0, %v5353_v9 }
  0x95   :  { %4064 = vmatmul.mubr.msk.bf16.gmra.mxu1 %vm667_vm0, %v5314_v61  ;;  %v5629_v61 = vld [vmem:[%s6806_s3 + $0x20] sm:$0xff]  }
  0x96   :  { %4065 = vmatprep.mubr.msk.bf16.mxu1 %vm667_vm0, %v5353_v9 }
  0x9b   :  { %4034 = vmatmul.mubr.msk.bf16.gmra.mxu0 %vm667_vm0, %v5353_v9 }
  0x9c   :  { %4035 = vmatprep.mubr.msk.bf16.mxu0 %vm667_vm0, %v5399_v21 }
  0x9d   :  { %4066 = vmatmul.mubr.msk.bf16.gmra.mxu1 %vm667_vm0, %v5353_v9 }
  0x9e   :  { %4067 = vmatprep.mubr.msk.bf16.mxu1 %vm667_vm0, %v5399_v21 }
  0xa3   :  { %4036 = vmatmul.mubr.msk.bf16.gmra.mxu0 %vm667_vm0, %v5399_v21 }
  0xa4   :  { %4037 = vmatprep.mubr.msk.bf16.mxu0 %vm667_vm0, %v5440_v33 }
  0xa5   :  { %4068 = vmatmul.mubr.msk.bf16.gmra.mxu1 %vm667_vm0, %v5399_v21 }
  0xa6   :  { %4069 = vmatprep.mubr.msk.bf16.mxu1 %vm667_vm0, %v5440_v33 }
  0xab   :  { %4038 = vmatmul.mubr.msk.bf16.gmra.mxu0 %vm667_vm0, %v5440_v33 }
  0xac   :  { %4039 = vmatprep.mubr.msk.bf16.mxu0 %vm667_vm0, %v5475_v42 }
  0xad   :  { %4070 = vmatmul.mubr.msk.bf16.gmra.mxu1 %vm667_vm0, %v5440_v33 }
  0xae   :  { %4071 = vmatprep.mubr.msk.bf16.mxu1 %vm667_vm0, %v5475_v42 }
  0xb3   :  { %4040 = vmatmul.mubr.msk.bf16.gmra.mxu0 %vm667_vm0, %v5475_v42 }
  0xb4   :  { %4041 = vmatprep.mubr.msk.bf16.mxu0 %vm667_vm0, %v4473_v49 }
  0xb5   :  { %4072 = vmatmul.mubr.msk.bf16.gmra.mxu1 %vm667_vm0, %v5475_v42 }
  0xb6   :  { %4073 = vmatprep.mubr.msk.bf16.mxu1 %vm667_vm0, %v4473_v49 }
  0xbb   :  { %4042 = vmatmul.mubr.msk.bf16.gmra.mxu0 %vm667_vm0, %v4473_v49 }
  0xbc   :  { %4176 = vmatprep.mubr.msk.bf16.mxu0 %vm667_vm0, %v5599_v1 }
  0xbd   :  { %4074 = vmatmul.mubr.msk.bf16.gmra.mxu1 %vm667_vm0, %v4473_v49 }
  0xbe   :  { %4196 = vmatprep.mubr.msk.bf16.mxu1 %vm667_vm0, %v5599_v1 }
  0xc3   :  { %4177 = vmatmul.mubr.msk.bf16.vlgmr.msra.gmra.mxu0 %vm667_vm0, %v5608_v28 }
  0xc4   :  { %4180 = vmatprep.mubr.msk.bf16.mxu0 %vm667_vm0, %v5613_v53 }
  0xcb   :  { %4181 = vmatmul.mubr.msk.bf16.gmra.mxu0 %vm667_vm0, %v5624_v60 }
  0xcc   :  { %4184 = vmatprep.mubr.msk.bf16.mxu0 %vm667_vm0, %v5629_v61 }
  0xd3   :  { %4185 = vmatmul.mubr.msk.bf16.gmra.mxu0 %vm667_vm0, %v5638_v62 }
  0xd4   :  { %4188 = vmatprep.mubr.msk.bf16.mxu0 %vm667_vm0, %v5643_v63 }
  0xdb   :  { %4189 = vmatmul.mubr.msk.bf16.gmra.mxu0 %vm667_vm0, %v5652_v0 }
  0xdc   :  { %4216 = vmatprep.mubr.msk.bf16.mxu0 %vm667_vm0, %v5599_v1 }
 0x103   :  { %v5658_v2 = vpop.f32.mrf.mxu0 }
 0x105   :  { %v5660_v3 = vpop.f32.mrf.mxu0 }
 0x107   :  { %v5662_v4 = vpop.f32.mrf.mxu0 }
 0x109   :  { %v5664_v5 = vpop.f32.mrf.mxu0 }
 0x10b   :  { %v5666_v6 = vpop.f32.mrf.mxu0 }
 0x10d   :  { %v5668_v7 = vpop.f32.mrf.mxu0 }
 0x10f   :  { %v5670_v8 = vpop.f32.mrf.mxu0 }
 0x111   :  { %v5672_v9 = vpop.f32.mrf.mxu0 }
 0x113   :  { %v5674_v10 = vpop.f32.mrf.mxu0 }
 0x115   :  { %v5676_v11 = vpop.f32.mrf.mxu0 }
 0x117   :  { %v5678_v12 = vpop.f32.mrf.mxu0 }
 0x119   :  { %v5680_v13 = vpop.f32.mrf.mxu0 }
 0x11b   :  { %v5682_v14 = vpop.f32.mrf.mxu0 }
 0x11d   :  { %v5684_v15 = vpop.f32.mrf.mxu0 }
 0x11f   :  { %v5686_v16 = vpop.f32.mrf.mxu0 }
 0x121   :  { %v5688_v17 = vpop.f32.mrf.mxu0 }
 0x123   :  { %v5690_v18 = vpop.f32.mrf.mxu0 }
 0x125   :  { %v5692_v19 = vpop.f32.mrf.mxu0 }
 0x127   :  { %v5694_v20 = vpop.f32.mrf.mxu0 }
 0x129   :  { %v5696_v21 = vpop.f32.mrf.mxu0 }
 0x12b   :  { %v5698_v22 = vpop.f32.mrf.mxu0 }
 0x12d   :  { %v5700_v23 = vpop.f32.mrf.mxu0 }
 0x12f   :  { %v5702_v24 = vpop.f32.mrf.mxu0 }
 0x131   :  { %v5704_v25 = vpop.f32.mrf.mxu0 }
 0x133   :  { %v5706_v26 = vpop.f32.mrf.mxu0 }
 0x135   :  { %v5708_v27 = vpop.f32.mrf.mxu0 }
 0x137   :  { %v5710_v29 = vpop.f32.mrf.mxu0 }
 0x139   :  { %v5712_v30 = vpop.f32.mrf.mxu0 }
 0x13a   :  { %6813 = vst [vmem:[#allocation2_spill] sm:$0xff] %v5712_v30 }
 0x13b   :  { %v5714_v31 = vpop.f32.mrf.mxu0 }
 0x13d   :  { %v5716_v32 = vpop.f32.mrf.mxu0 }
 0x13f   :  { %v5718_v33 = vpop.f32.mrf.mxu0 }
 0x141   :  { %v5720_v34 = vpop.f32.mrf.mxu0 }
 0x143   :  { %v5722_v35 = vpop.f32.mrf.mxu0 }
 0x144   :  { %6814 = vst [vmem:[#allocation3_spill] sm:$0xff] %v5722_v35 }
 0x145   :  { %v5724_v36 = vpop.f32.mrf.mxu0 }
 0x146   :  { %6815 = vst [vmem:[#allocation4_spill] sm:$0xff] %v5724_v36 }
 0x147   :  { %v5726_v37 = vpop.f32.mrf.mxu0 }
 0x148   :  { %6816 = vst [vmem:[#allocation5_spill] sm:$0xff] %v5726_v37 }
 0x149   :  { %v5728_v38 = vpop.f32.mrf.mxu0 }
 0x14a   :  { %6817 = vst [vmem:[#allocation6_spill] sm:$0xff] %v5728_v38 }
 0x14b   :  { %v5730_v39 = vpop.f32.mrf.mxu0 }
 0x14c   :  { %6818 = vst [vmem:[#allocation7_spill] sm:$0xff] %v5730_v39 }
 0x14d   :  { %v5732_v40 = vpop.f32.mrf.mxu0 }
 0x14e   :  { %6819 = vst [vmem:[#allocation8_spill] sm:$0xff] %v5732_v40 }
 0x14f   :  { %v5734_v41 = vpop.f32.mrf.mxu0 }
 0x150   :  { %6820 = vst [vmem:[#allocation9_spill] sm:$0xff] %v5734_v41 }
 0x151   :  { %v5736_v42 = vpop.f32.mrf.mxu0 }
 0x152   :  { %6821 = vst [vmem:[#allocation10_spill] sm:$0xff] %v5736_v42 }
 0x153   :  { %v5738_v43 = vpop.f32.mrf.mxu0 }
 0x154   :  { %6822 = vst [vmem:[#allocation11_spill] sm:$0xff] %v5738_v43 }
 0x155   :  { %v5740_v44 = vpop.f32.mrf.mxu0 }
 0x156   :  { %6823 = vst [vmem:[#allocation12_spill] sm:$0xff] %v5740_v44 }
 0x157   :  { %v5742_v45 = vpop.f32.mrf.mxu0 }
 0x158   :  { %6824 = vst [vmem:[#allocation13_spill] sm:$0xff] %v5742_v45 }
 0x159   :  { %v5744_v46 = vpop.f32.mrf.mxu0 }
 0x15a   :  { %6825 = vst [vmem:[#allocation14_spill] sm:$0xff] %v5744_v46 }
 0x15b   :  { %v5746_v47 = vpop.f32.mrf.mxu0 }
 0x15c   :  { %6826 = vst [vmem:[#allocation15_spill] sm:$0xff] %v5746_v47 }
 0x15d   :  { %v5748_v48 = vpop.f32.mrf.mxu0 }
 0x15e   :  { %6827 = vst [vmem:[#allocation16_spill] sm:$0xff] %v5748_v48 }
 0x15f   :  { %v5750_v49 = vpop.f32.mrf.mxu0 }
 0x160   :  { %6828 = vst [vmem:[#allocation17_spill] sm:$0xff] %v5750_v49 }
 0x161   :  { %v5752_v50 = vpop.f32.mrf.mxu0 }
 0x162   :  { %6829 = vst [vmem:[#allocation18_spill] sm:$0xff] %v5752_v50  ;;  %v5774_v50 = vpop.permute.xlu1 %259 }
 0x163   :  { %v5754_v51 = vpop.f32.mrf.mxu0 }
 0x164   :  { %6830 = vst [vmem:[#allocation19_spill] sm:$0xff] %v5754_v51 }
 0x165   :  { %v5756_v52 = vpop.f32.mrf.mxu0 }
 0x166   :  { %6831 = vst [vmem:[#allocation20_spill] sm:$0xff] %v5756_v52  ;;  %v5778_v52 = vpop.permute.xlu0 %244  ;;  %v5784_v42 = vpop.permute.xlu1 %264 }
 0x167   :  { %v5758_v54 = vpop.f32.mrf.mxu0 }
 0x168   :  { %6832 = vst [vmem:[#allocation21_spill] sm:$0xff] %v5758_v54 }
 0x169   :  { %v5760_v55 = vpop.f32.mrf.mxu0 }
 0x16a   :  { %6833 = vst [vmem:[#allocation22_spill] sm:$0xff] %v5760_v55  ;;  %v5788_v36 = vpop.permute.xlu0 %229 }
 0x16b   :  { %v5762_v56 = vpop.f32.mrf.mxu0 }
 0x16c   :  { %6834 = vst [vmem:[#allocation23_spill] sm:$0xff] %v5762_v56 }
 0x16d   :  { %v5764_v57 = vpop.f32.mrf.mxu0 }
 0x16e   :  { %6835 = vst [vmem:[#allocation24_spill] sm:$0xff] %v5764_v57  ;;  %v5796_v54 = vpop.permute.xlu0 %249 }
 0x16f   :  { %v5766_v58 = vpop.f32.mrf.mxu0 }
 0x170   :  { %6836 = vst [vmem:[#allocation25_spill] sm:$0xff] %v5766_v58  ;;  %v919_v58 = vadd.f32 %v5658_v2, %v5788_v36 }
 0x171   :  { %v5770_v46 = vpop.f32.mrf.mxu0 }
 0x172   :  { %6837 = vst [vmem:[#allocation26_spill] sm:$0xff] %v5770_v46  ;;  %v5806_v56 = vpop.permute.xlu0 %279 }
 0x173   :  { %v5772_v44 = vpop.f32.mrf.mxu0 }
 0x174   :  { %6838 = vst [vmem:[#allocation27_spill] sm:$0xff] %v5772_v44  ;;  %v5794_v44 = vpop.permute.xlu1 %234 }
 0x175   :  { %v5776_v48 = vpop.f32.mrf.mxu0 }
 0x176   :  { %6839 = vst [vmem:[#allocation28_spill] sm:$0xff] %v5776_v48  ;;  %v5816_v35 = vpop.permute.xlu0 %299 }
 0x177   :  { %v5780_v38 = vpop.f32.mrf.mxu0 }
 0x178   :  { %6840 = vst [vmem:[#allocation29_spill] sm:$0xff] %v5780_v38  ;;  %v929_v38 = vadd.f32 %v5666_v6, %v5768_v59 }
 0x179   :  { %v5782_v55 = vpop.f32.mrf.mxu0 }
 0x17a   :  { %6841 = vst [vmem:[#allocation30_spill] sm:$0xff] %v5782_v55 }
 0x17b   :  { %v5786_v57 = vpop.f32.mrf.mxu0 }
 0x17c   :  { %6842 = vst [vmem:[#allocation31_spill] sm:$0xff] %v5786_v57  ;;  %v5804_v57 = vpop.permute.xlu1 %254 }
 0x17d   :  { %v5790_v40 = vpop.f32.mrf.mxu0 }
 0x17e   :  { %6843 = vst [vmem:[#allocation32_spill] sm:$0xff] %v5790_v40 }
 0x17f   :  { %v5792_v46 = vpop.f32.mrf.mxu0 }
 0x180   :  { %6844 = vst [vmem:[#allocation33_spill] sm:$0xff] %v5792_v46  ;;  %v933_v46 = vadd.f32 %v5670_v8, %v5778_v52  ;;  %v5812_v6 = vpop.permute.xlu1 %284 }
 0x181   :  { %v5798_v48 = vpop.f32.mrf.mxu0 }
 0x182   :  { %6845 = vst [vmem:[#allocation34_spill] sm:$0xff] %v5798_v48  ;;  %v923_v48 = vadd.f32 %v5662_v4, %v5794_v44 }
 0x183   :  { %v4178_v55 = vpop.f32.mrf.mxu0 }
 0x184   :  { %v1499_v51 = vadd.f32 %v4178_v55, %v929_v38  ;;  %v949_v38 = vadd.f32 %v5682_v14, %v5774_v50 }
 0x185   :  { %v1434_v40 = vpop.f32.mrf.mxu0 }
 0x186   :  { %v3769_v45 = vmul.f32 -1.442695, %v1499_v51  ;;  %v1497_v49 = vadd.f32 %v1434_v40, %v919_v58  ;;  %v939_v40 = vadd.f32 %v5674_v10, %v5796_v54  ;;  %v5826_v10 = vpop.permute.xlu0 %269 }
 0x187   :  { %v4179_v43 = vpop.f32.mrf.mxu0 }
 0x188   :  { %4500 = vpow2.f32 %v3769_v45  ;;  %v3767_v47 = vmul.f32 -1.442695, %v1497_v49  ;;  %v1500_v2 = vadd.f32 %v4179_v43, %v933_v46  ;;  %v953_v43 = vadd.f32 %v5686_v16, %v5784_v42  ;;  %v5822_v45 = vpop.permute.xlu1 %304 }
 0x189   :  { %v1437_v37 = vpop.f32.mrf.mxu0 }
 0x18a   :  { %4502 = vpow2.f32 %v3767_v47  ;;  %v3770_v55 = vmul.f32 -1.442695, %v1500_v2  ;;  %v1498_v41 = vadd.f32 %v1437_v37, %v923_v48  ;;  %v943_v37 = vadd.f32 %v5678_v12, %v5804_v57 }
 0x18b   :  { %v4182_v8 = vpop.f32.mrf.mxu0  ;;  %v969_v2 = vadd.f32 %v5698_v22, %v5806_v56 }
 0x18c   :  { %4504 = vpow2.f32 %v3770_v55  ;;  %v3768_v4 = vmul.f32 -1.442695, %v1498_v41  ;;  %v1503_v51 = vadd.f32 %v4182_v8, %v949_v38  ;;  %v5830_v55 = vpop.f32.mrf.mxu1 }
 0x18d   :  { %v1450_v58 = vpop.f32.mrf.mxu0  ;;  %6846 = vst [vmem:[#allocation35_spill] sm:$0xff] %v5830_v55 }
 0x18e   :  { %4506 = vpow2.f32 %v3768_v4  ;;  %v3773_v14 = vmul.f32 -1.442695, %v1503_v51  ;;  %v1501_v46 = vadd.f32 %v1450_v58, %v939_v40  ;;  %v959_v40 = vadd.f32 %v5690_v18, %v5826_v10  ;;  %v5834_v4 = vpop.permute.xlu1 %274 }
 0x18f   :  { %v4183_v47 = vpop.f32.mrf.mxu0  ;;  %v963_v18 = vadd.f32 %v5694_v20, %v5834_v4  ;;  %v989_v20 = vadd.f32 %v5714_v31, %v5816_v35  ;;  %v993_v31 = vadd.f32 %v5718_v33, %v5822_v45 }
 0x190   :  { %4508 = vpow2.f32 %v3773_v14  ;;  %v3771_v48 = vmul.f32 -1.442695, %v1501_v46  ;;  %v1504_v49 = vadd.f32 %v4183_v47, %v953_v43  ;;  %v973_v43 = vadd.f32 %v5702_v24, %v5812_v6  ;;  %v5842_v24 = vpop.permute.xlu0 %289 }
 0x191   :  { %v1453_v41 = vpop.f32.mrf.mxu0 }
 0x192   :  { %4510 = vpow2.f32 %v3771_v48  ;;  %v3774_v16 = vmul.f32 -1.442695, %v1504_v49  ;;  %v1502_v38 = vadd.f32 %v1453_v41, %v943_v37  ;;  %v5838_v48 = vpop.f32.mrf.mxu1 }
 0x193   :  { %v4186_v8 = vpop.f32.mrf.mxu0  ;;  %6847 = vst [vmem:[#allocation36_spill] sm:$0xff] %v5838_v48 }
 0x194   :  { %4512 = vpow2.f32 %v3774_v16  ;;  %v3772_v12 = vmul.f32 -1.442695, %v1502_v38  ;;  %v1507_v51 = vadd.f32 %v4186_v8, %v969_v2 }
 0x195   :  { %v4501_v58 = vpop.eup %4500  ;;  %v1466_v14 = vpop.f32.mrf.mxu0 }
 0x196   :  { %v1551_v22 = vadd.f32 1.0, %v4501_v58  ;;  %4514 = vpow2.f32 %v3772_v12  ;;  %v3777_v46 = vmul.f32 -1.442695, %v1507_v51  ;;  %v1505_v47 = vadd.f32 %v1466_v14, %v959_v40  ;;  %v5844_v14 = vpop.f32.mrf.mxu1 }
 0x197   :  { %v4503_v37 = vpop.eup %4502  ;;  %v4187_v49 = vpop.f32.mrf.mxu0  ;;  %6848 = vst [vmem:[#allocation37_spill] sm:$0xff] %v5844_v14 }
 0x198   :  { %4516 = vrcp.f32 %v1551_v22  ;;  %v1549_v41 = vadd.f32 1.0, %v4503_v37  ;;  %v3775_v16 = vmul.f32 -1.442695, %v1505_v47  ;;  %v1508_v2 = vadd.f32 %v4187_v49, %v973_v43 }
 0x199   :  { %v4505_v38 = vpop.eup %4504  ;;  %4518 = vpow2.f32 %v3777_v46  ;;  %v1469_v8 = vpop.f32.mrf.mxu0  ;;  %v979_v46 = vadd.f32 %v5706_v26, %v5842_v24 }
 0x19a   :  { %4520 = vrcp.f32 %v1549_v41  ;;  %v1552_v12 = vadd.f32 1.0, %v4505_v38  ;;  %v3778_v51 = vmul.f32 -1.442695, %v1508_v2  ;;  %v1506_v40 = vadd.f32 %v1469_v8, %v963_v18  ;;  %v5850_v2 = vpop.permute.xlu1 %294  ;;  %v5852_v8 = vpop.f32.mrf.mxu1 }
 0x19b   :  { %v4507_v58 = vpop.eup %4506  ;;  %4522 = vpow2.f32 %v3775_v16  ;;  %v4190_v22 = vpop.f32.mrf.mxu0  ;;  %6849 = vst [vmem:[#allocation38_spill] sm:$0xff] %v5850_v2  ;;  %6850 = vst [vmem:[#allocation39_spill] sm:$0xff] %v5852_v8  ;;  %v983_v26 = vadd.f32 %v5710_v29, %v5850_v2 }
 0x19c   :  { %4524 = vrcp.f32 %v1552_v12  ;;  %v1550_v47 = vadd.f32 1.0, %v4507_v58  ;;  %v3776_v43 = vmul.f32 -1.442695, %v1506_v40  ;;  %v1511_v49 = vadd.f32 %v4190_v22, %v989_v20 }
 0x19d   :  { %v4509_v37 = vpop.eup %4508  ;;  %4526 = vpow2.f32 %v3778_v51  ;;  %v1482_v41 = vpop.f32.mrf.mxu0 }
 0x19e   :  { %4528 = vrcp.f32 %v1550_v47  ;;  %v1555_v18 = vadd.f32 1.0, %v4509_v37  ;;  %v1509_v16 = vadd.f32 %v1482_v41, %v979_v46  ;;  %v5858_v37 = vpop.f32.mrf.mxu1 }
 0x19f   :  { %v4511_v38 = vpop.eup %4510  ;;  %4530 = vpow2.f32 %v3776_v43  ;;  %v4191_v12 = vpop.f32.mrf.mxu0  ;;  %6851 = vst [vmem:[#allocation40_spill] sm:$0xff] %v5858_v37 }
 0x1a0   :  { %4532 = vrcp.f32 %v1555_v18  ;;  %v1553_v40 = vadd.f32 1.0, %v4511_v38  ;;  %v1512_v51 = vadd.f32 %v4191_v12, %v993_v31  ;;  %v5860_v18 = vpop.f32.mrf.mxu1 }
 0x1a1   :  { %v4513_v58 = vpop.eup %4512  ;;  %4534 = vtanh.f32 %v1511_v49  ;;  %v1485_v20 = vpop.f32.mrf.mxu0  ;;  %6852 = vst [vmem:[#allocation41_spill] sm:$0xff] %v5860_v18 }
 0x1a2   :  { %4536 = vrcp.f32 %v1553_v40  ;;  %v1556_v22 = vadd.f32 1.0, %v4513_v58  ;;  %v1510_v39 = vadd.f32 %v1485_v20, %v983_v26  ;;  %v5862_v12 = vpop.f32.mrf.mxu1 }
 0x1a3   :  { %v4515_v47 = vpop.eup %4514  ;;  %4538 = vtanh.f32 %v1509_v16  ;;  %6853 = vst [vmem:[#allocation42_spill] sm:$0xff] %v5862_v12 }
 0x1a4   :  { %4540 = vrcp.f32 %v1556_v22  ;;  %v1554_v33 = vadd.f32 1.0, %v4515_v47  ;;  %v5864_v47 = vpop.f32.mrf.mxu1 }
 0x1a5   :  { %v4517_v43 = vpop.eup %4516  ;;  %4542 = vtanh.f32 %v1512_v51  ;;  %6854 = vst [vmem:[#allocation43_spill] sm:$0xff] %v5864_v47 }
 0x1a6   :  { %v4519_v46 = vpop.eup %4518  ;;  %4544 = vrcp.f32 %v1554_v33  ;;  %v5868_v2 = vpop.f32.mrf.mxu1 }
 0x1a7   :  { %v4521_v41 = vpop.eup %4520  ;;  %4546 = vtanh.f32 %v1510_v39  ;;  %v1559_v20 = vadd.f32 1.0, %v4519_v46 }
 0x1a8   :  { %v4523_v29 = vpop.eup %4522 }
 0x1a9   :  { %v4525_v49 = vpop.eup %4524  ;;  %v1557_v51 = vadd.f32 1.0, %v4523_v29  ;;  %4548 = vrcp.f32 %v1559_v20 }
 0x1aa   :  { %v4527_v38 = vpop.eup %4526 }
 0x1ab   :  { %v4529_v31 = vpop.eup %4528  ;;  %v1560_v18 = vadd.f32 1.0, %v4527_v38  ;;  %4550 = vrcp.f32 %v1557_v51 }
 0x1ac   :  { %v4531_v40 = vpop.eup %4530 }
 0x1ad   :  { %v4533_v58 = vpop.eup %4532  ;;  %4552 = vrcp.f32 %v1560_v18 }
 0x1ae   :  { %v4535_v16 = vpop.eup %4534  ;;  %v1591_v26 = vmul.f32 0.0, %v4533_v58 }
 0x1af   :  { %v4537_v22 = vpop.eup %4536  ;;  %v1595_v33 = vmul.f32 %v4535_v16, %v4517_v43  ;;  %v1558_v43 = vadd.f32 1.0, %v4531_v40 }
 0x1b0   :  { %v4539_v8 = vpop.eup %4538  ;;  %v1589_v48 = vmul.f32 0.0, %v4537_v22 }
 0x1b1   :  { %v4541_v39 = vpop.eup %4540  ;;  %v5866_v14 = vadd.f32 %v1595_v33, %v1591_v26  ;;  %v1593_v55 = vmul.f32 %v4539_v8, %v4521_v41  ;;  %v5876_v8 = vpop.f32.mrf.mxu1 }
 0x1b2   :  { %v4543_v37 = vpop.eup %4542  ;;  %v1592_v30 = vmul.f32 0.0, %v4541_v39  ;;  %6855 = vst [vmem:[#allocation44_spill] sm:$0xff] %v5876_v8 }
 0x1b3   :  { %v4545_v12 = vpop.eup %4544  ;;  %v5870_v46 = vadd.f32 %v1593_v55, %v1589_v48  ;;  %v1596_v58 = vmul.f32 %v4543_v37, %v4525_v49  ;;  %4554 = vtanh.f32 %v5866_v14  ;;  %v5882_v55 = vpop.f32.mrf.mxu1 }
 0x1b4   :  { %v4547_v47 = vpop.eup %4546  ;;  %v1590_v29 = vmul.f32 0.0, %v4545_v12 }
 0x1b5   :  { %v5873_v38 = vadd.f32 %v1596_v58, %v1592_v30  ;;  %v1594_v16 = vmul.f32 %v4547_v47, %v4529_v31  ;;  %4556 = vtanh.f32 %v5870_v46  ;;  %v5884_v37 = vpop.f32.mrf.mxu1 }
 0x1b6   :  { %v4549_v48 = vpop.eup %4548  ;;  %6856 = vst [vmem:[#allocation45_spill] sm:$0xff] %v5884_v37 }
 0x1b7   :  { %4558 = vtanh.f32 %v5873_v38  ;;  %v5879_v41 = vadd.f32 %v1594_v16, %v1590_v29  ;;  %v5886_v12 = vpop.f32.mrf.mxu1 }
 0x1b8   :  { %4560 = vrcp.f32 %v1558_v43  ;;  %v4551_v18 = vpop.eup %4550 }
 0x1b9   :  { %4562 = vtanh.f32 %v5879_v41  ;;  %v5888_v51 = vpop.f32.mrf.mxu1 }
 0x1ba   :  { %v4553_v30 = vpop.eup %4552  ;;  %6857 = vst [vmem:[#allocation46_spill] sm:$0xff] %v5888_v51 }
 0x1bb   :  { %v5890_v43 = vpop.f32.mrf.mxu1 }
 0x1bd   :  { %v5892_v16 = vpop.f32.mrf.mxu1 }
 0x1be   :  { %6858 = vst [vmem:[#allocation47_spill] sm:$0xff] %v5892_v16 }
 0x1c0   :  { %v4555_v49 = vpop.eup %4554 }
 0x1c1   :  { %v1607_v20 = vmul.f32 %v4555_v49, %v4549_v48  ;;  %v5898_v48 = vpop.f32.mrf.mxu1 }
 0x1c2   :  { %v4557_v31 = vpop.eup %4556 }
 0x1c3   :  { %v1605_v39 = vmul.f32 %v4557_v31, %v4551_v18 }
 0x1c4   :  { %v4559_v40 = vpop.eup %4558 }
 0x1c5   :  { %v4561_v26 = vpop.eup %4560  ;;  %v1608_v22 = vmul.f32 %v4559_v40, %v4553_v30  ;;  %v5900_v30 = vpop.f32.mrf.mxu1 }
 0x1c6   :  { %v4563_v47 = vpop.eup %4562  ;;  %6859 = vst [vmem:[#allocation48_spill] sm:$0xff] %v5900_v30 }
 0x1c7   :  { %v1610_v33 = vpack.c.bf16 %v1608_v22, %v1607_v20  ;;  %v1606_v58 = vmul.f32 %v4563_v47, %v4561_v26  ;;  %v5906_v18 = vpop.f32.mrf.mxu1 }
 0x1c9   :  { %4192 = vmatprep.subr.bf16.mxu1 %v1610_v33  ;;  %v1609_v29 = vpack.c.bf16 %v1606_v58, %v1605_v39  ;;  %v5908_v49 = vpop.f32.mrf.mxu1 }
 0x1ca   :  { %4193 = vmatpush3.bf16.msra.mxu1 %v1610_v33  ;;  %6860 = vst [vmem:[#allocation49_spill] sm:$0xff] %v5908_v49 }
 0x1cb   :  { %4194 = vmatprep.subr.bf16.mxu1 %v1609_v29  ;;  %v5914_v31 = vpop.f32.mrf.mxu1 }
 0x1cd   :  { %v5916_v40 = vpop.f32.mrf.mxu1 }
 0x1ce   :  { %4195 = vmatpush3.bf16.msra.mxu1 %v1609_v29  ;;  %6861 = vst [vmem:[#allocation50_spill] sm:$0xff] %v5916_v40 }
 0x1cf   :  { %v5922_v26 = vpop.f32.mrf.mxu1 }
 0x1d1   :  { %4197 = vmatmul.mubr.msk.bf16.vlgmr.msra.gmra.mxu1 %vm667_vm0, %v5608_v28  ;;  %v5924_v20 = vpop.f32.mrf.mxu1 }
 0x1d2   :  { %4200 = vmatprep.mubr.msk.bf16.mxu1 %vm667_vm0, %v5613_v53  ;;  %6862 = vst [vmem:[#allocation51_spill] sm:$0xff] %v5924_v20 }
 0x1d3   :  { %v5926_v22 = vpop.f32.mrf.mxu1 }
 0x1d4   :  { %6863 = vst [vmem:[#allocation52_spill] sm:$0xff] %v5926_v22 }
 0x1d5   :  { %v5928_v47 = vpop.f32.mrf.mxu1 }
 0x1d6   :  { %6864 = vst [vmem:[#allocation53_spill] sm:$0xff] %v5928_v47 }
 0x1d7   :  { %v5930_v33 = vpop.f32.mrf.mxu1 }
 0x1d8   :  { %6865 = vst [vmem:[#allocation54_spill] sm:$0xff] %v5930_v33 }
 0x1d9   :  { %4201 = vmatmul.mubr.msk.bf16.gmra.mxu1 %vm667_vm0, %v5624_v60  ;;  %v5932_v39 = vpop.f32.mrf.mxu1 }
 0x1da   :  { %4204 = vmatprep.mubr.msk.bf16.mxu1 %vm667_vm0, %v5629_v61  ;;  %6866 = vst [vmem:[#allocation55_spill] sm:$0xff] %v5932_v39 }
 0x1db   :  { %v5934_v58 = vpop.f32.mrf.mxu1 }
 0x1dd   :  { %v5936_v29 = vpop.f32.mrf.mxu1 }
 0x1de   :  { %6867 = vst [vmem:[#allocation56_spill] sm:$0xff] %v5936_v29 }
 0x1df   :  { %v5938_v49 = vpop.f32.mrf.mxu1 }
 0x1e0   :  { %6868 = vst [vmem:[#allocation57_spill] sm:$0xff] %v5938_v49 }
 0x1e1   :  { %4205 = vmatmul.mubr.msk.bf16.gmra.mxu1 %vm667_vm0, %v5638_v62  ;;  %v5940_v30 = vpop.f32.mrf.mxu1 }
 0x1e2   :  { %4208 = vmatprep.mubr.msk.bf16.mxu1 %vm667_vm0, %v5643_v63  ;;  %6869 = vst [vmem:[#allocation58_spill] sm:$0xff] %v5940_v30 }
 0x1e3   :  { %v5942_v40 = vpop.f32.mrf.mxu1 }
 0x1e4   :  { %6870 = vst [vmem:[#allocation59_spill] sm:$0xff] %v5942_v40 }
 0x1e5   :  { %v5944_v37 = vpop.f32.mrf.mxu1 }
 0x1e6   :  { %6871 = vst [vmem:[#allocation60_spill] sm:$0xff] %v5944_v37 }
 0x1e7   :  { %v5946_v20 = vpop.f32.mrf.mxu1 }
 0x1e8   :  { %6872 = vst [vmem:[#allocation61_spill] sm:$0xff] %v5946_v20 }
 0x1e9   :  { %4209 = vmatmul.mubr.msk.bf16.gmra.mxu1 %vm667_vm0, %v5652_v0  ;;  %v5948_v16 = vpop.f32.mrf.mxu1 }
 0x1ea   :  { %4236 = vmatprep.mubr.msk.bf16.mxu1 %vm667_vm0, %v5599_v1  ;;  %6873 = vst [vmem:[#allocation62_spill] sm:$0xff] %v5948_v16 }
 0x1eb   :  { %v5950_v47 = vpop.f32.mrf.mxu1 }
 0x1ec   :  { %6874 = vst [vmem:[#allocation63_spill] sm:$0xff] %v5950_v47 }
 0x1ed   :  { %v5952_v8 = vpop.f32.mrf.mxu1 }
 0x1ee   :  { %6875 = vst [vmem:[#allocation64_spill] sm:$0xff] %v5952_v8 }
 0x1ef   :  { %v5954_v39 = vpop.f32.mrf.mxu1 }
 0x1f0   :  { %6876 = vst [vmem:[#allocation65_spill] sm:$0xff] %v5954_v39 }
 0x1f1   :  { %v5956_v51 = vpop.f32.mrf.mxu1 }
 0x1f2   :  { %6877 = vst [vmem:[#allocation66_spill] sm:$0xff] %v5956_v51 }
 0x1f3   :  { %v5958_v29 = vpop.f32.mrf.mxu1 }
 0x1f4   :  { %6878 = vst [vmem:[#allocation67_spill] sm:$0xff] %v5958_v29 }
 0x1f5   :  { %v5960_v33 = vpop.f32.mrf.mxu1 }
 0x1f6   :  { %6879 = vst [vmem:[#allocation68_spill] sm:$0xff] %v5960_v33 }
 0x1f7   :  { %v5962_v30 = vpop.f32.mrf.mxu1 }
 0x1f8   :  { %6880 = vst [vmem:[#allocation69_spill] sm:$0xff] %v5962_v30 }
 0x1f9   :  { %v5964_v40 = vpop.f32.mrf.mxu1 }
 0x1fa   :  { %6881 = vst [vmem:[#allocation70_spill] sm:$0xff] %v5964_v40 }
 0x1fb   :  { %v5966_v37 = vpop.f32.mrf.mxu1 }
 0x1fc   :  { %6882 = vst [vmem:[#allocation71_spill] sm:$0xff] %v5966_v37 }
 0x1fd   :  { %v5968_v20 = vpop.f32.mrf.mxu1 }
 0x1fe   :  { %6883 = vst [vmem:[#allocation72_spill] sm:$0xff] %v5968_v20 }
 0x1ff   :  { %v5970_v16 = vpop.f32.mrf.mxu1 }
 0x200   :  { %6884 = vst [vmem:[#allocation73_spill] sm:$0xff] %v5970_v16 }
 0x201   :  { %v5972_v47 = vpop.f32.mrf.mxu1 }
 0x202   :  { %6885 = vst [vmem:[#allocation74_spill] sm:$0xff] %v5972_v47 }
 0x203   :  { %v5974_v8 = vpop.f32.mrf.mxu1 }
 0x204   :  { %6886 = vst [vmem:[#allocation75_spill] sm:$0xff] %v5974_v8 }
 0x205   :  { %v5976_v39 = vpop.f32.mrf.mxu1 }
 0x206   :  { %6887 = vst [vmem:[#allocation76_spill] sm:$0xff] %v5976_v39 }
 0x207   :  { %v5978_v51 = vpop.f32.mrf.mxu1 }
 0x208   :  { %6888 = vst [vmem:[#allocation77_spill] sm:$0xff] %v5978_v51 }
 0x209   :  { %v5980_v29 = vpop.f32.mrf.mxu1 }
 0x20a   :  { %6889 = vst [vmem:[#allocation78_spill] sm:$0xff] %v5980_v29 }
 0x20b   :  { %v5982_v33 = vpop.f32.mrf.mxu1 }
 0x20c   :  { %6890 = vst [vmem:[#allocation79_spill] sm:$0xff] %v5982_v33 }
 0x20d   :  { %v5984_v30 = vpop.f32.mrf.mxu1 }
 0x20e   :  { %6891 = vst [vmem:[#allocation80_spill] sm:$0xff] %v5984_v30  ;;  %v931_v30 = vadd.f32 %v5668_v7, %v5768_v59  ;;  %v951_v7 = vadd.f32 %v5684_v15, %v5774_v50  ;;  %v945_v15 = vadd.f32 %v5680_v13, %v5804_v57  ;;  %v975_v13 = vadd.f32 %v5704_v25, %v5812_v6 }
 0x20f   :  { %v5986_v40 = vpop.f32.mrf.mxu1 }
 0x210   :  { %6892 = vst [vmem:[#allocation81_spill] sm:$0xff] %v5986_v40 }
 0x211   :  { %v5988_v37 = vpop.f32.mrf.mxu1 }
 0x212   :  { %6893 = vst [vmem:[#allocation82_spill] sm:$0xff] %v5988_v37 }
 0x213   :  { %v5990_v20 = vpop.f32.mrf.mxu1 }
 0x214   :  { %6894 = vst [vmem:[#allocation83_spill] sm:$0xff] %v5990_v20  ;;  %v921_v20 = vadd.f32 %v5660_v3, %v5788_v36 }
 0x215   :  { %v5992_v16 = vpop.f32.mrf.mxu1 }
 0x216   :  { %6895 = vst [vmem:[#allocation84_spill] sm:$0xff] %v5992_v16 }
 0x217   :  { %v5994_v47 = vpop.f32.mrf.mxu1 }
 0x218   :  { %6896 = vst [vmem:[#allocation85_spill] sm:$0xff] %v5994_v47 }
 0x219   :  { %v5996_v8 = vpop.f32.mrf.mxu1 }
 0x21a   :  { %6897 = vst [vmem:[#allocation86_spill] sm:$0xff] %v5996_v8  ;;  %v935_v8 = vadd.f32 %v5672_v9, %v5778_v52  ;;  %v941_v9 = vadd.f32 %v5676_v11, %v5796_v54  ;;  %v971_v11 = vadd.f32 %v5700_v23, %v5806_v56 }
 0x21b   :  { %v5998_v39 = vpop.f32.mrf.mxu1 }
 0x21c   :  { %6898 = vst [vmem:[#allocation87_spill] sm:$0xff] %v5998_v39 }
 0x21d   :  { %v6000_v51 = vpop.f32.mrf.mxu1 }
 0x21e   :  { %6899 = vst [vmem:[#allocation88_spill] sm:$0xff] %v6000_v51  ;;  %v925_v51 = vadd.f32 %v5664_v5, %v5794_v44  ;;  %v955_v5 = vadd.f32 %v5688_v17, %v5784_v42  ;;  %v961_v17 = vadd.f32 %v5692_v19, %v5826_v10 }
 0x21f   :  { %v6002_v29 = vpop.f32.mrf.mxu1 }
 0x220   :  { %6900 = vst [vmem:[#allocation89_spill] sm:$0xff] %v6002_v29 }
 0x221   :  { %v6004_v33 = vpop.f32.mrf.mxu1 }
 0x222   :  { %6901 = vst [vmem:[#allocation90_spill] sm:$0xff] %v6004_v33 }
 0x291   :  { %v4198_v37 = vpop.f32.mrf.mxu1 }
 0x292   :  { %v1710_v16 = vadd.f32 %v4198_v37, %v931_v30 }
 0x293   :  { %v1645_v40 = vpop.f32.mrf.mxu1 }
 0x294   :  { %v3789_v47 = vmul.f32 -1.442695, %v1710_v16  ;;  %v1708_v39 = vadd.f32 %v1645_v40, %v921_v20 }
 0x295   :  { %v4199_v49 = vpop.f32.mrf.mxu1 }
 0x296   :  { %4564 = vpow2.f32 %v3789_v47  ;;  %v3787_v33 = vmul.f32 -1.442695, %v1708_v39  ;;  %v1711_v29 = vadd.f32 %v4199_v49, %v935_v8 }
 0x297   :  { %v1648_v22 = vpop.f32.mrf.mxu1 }
 0x298   :  { %4566 = vpow2.f32 %v3787_v33  ;;  %v3790_v3 = vmul.f32 -1.442695, %v1711_v29  ;;  %v1709_v37 = vadd.f32 %v1648_v22, %v925_v51 }
 0x299   :  { %v4202_v30 = vpop.f32.mrf.mxu1 }
 0x29a   :  { %4568 = vpow2.f32 %v3790_v3  ;;  %v3788_v16 = vmul.f32 -1.442695, %v1709_v37  ;;  %v1714_v40 = vadd.f32 %v4202_v30, %v951_v7 }
 0x29b   :  { %v1661_v20 = vpop.f32.mrf.mxu1 }
 0x29c   :  { %4570 = vpow2.f32 %v3788_v16  ;;  %v3793_v8 = vmul.f32 -1.442695, %v1714_v40  ;;  %v1712_v49 = vadd.f32 %v1661_v20, %v941_v9 }
 0x29d   :  { %v4203_v47 = vpop.f32.mrf.mxu1 }
 0x29e   :  { %4572 = vpow2.f32 %v3793_v8  ;;  %v3791_v51 = vmul.f32 -1.442695, %v1712_v49  ;;  %v1715_v22 = vadd.f32 %v4203_v47, %v955_v5  ;;  %v965_v5 = vadd.f32 %v5696_v21, %v5834_v4 }
 0x29f   :  { %v1664_v33 = vpop.f32.mrf.mxu1 }
 0x2a0   :  { %4574 = vpow2.f32 %v3791_v51  ;;  %v3794_v39 = vmul.f32 -1.442695, %v1715_v22  ;;  %v1713_v29 = vadd.f32 %v1664_v33, %v945_v15 }
 0x2a1   :  { %v4206_v7 = vpop.f32.mrf.mxu1 }
 0x2a2   :  { %4576 = vpow2.f32 %v3794_v39  ;;  %v3792_v3 = vmul.f32 -1.442695, %v1713_v29  ;;  %v1718_v37 = vadd.f32 %v4206_v7, %v971_v11  ;;  %v991_v39 = vadd.f32 %v5716_v32, %v5816_v35 }
 0x2a3   :  { %v4565_v30 = vpop.eup %4564  ;;  %v1677_v9 = vpop.f32.mrf.mxu1 }
 0x2a4   :  { %v1762_v16 = vadd.f32 1.0, %v4565_v30  ;;  %4578 = vpow2.f32 %v3792_v3  ;;  %v3797_v40 = vmul.f32 -1.442695, %v1718_v37  ;;  %v1716_v20 = vadd.f32 %v1677_v9, %v961_v17 }
 0x2a5   :  { %v4567_v23 = vpop.eup %4566  ;;  %v4207_v8 = vpop.f32.mrf.mxu1  ;;  %v981_v3 = vadd.f32 %v5708_v27, %v5842_v24 }
 0x2a6   :  { %4580 = vrcp.f32 %v1762_v16  ;;  %v1760_v49 = vadd.f32 1.0, %v4567_v23  ;;  %v3795_v19 = vmul.f32 -1.442695, %v1716_v20  ;;  %v1719_v47 = vadd.f32 %v4207_v8, %v975_v13  ;;  %v6903_v8 = vld [vmem:[#allocation2_spill] sm:$0xff] }
 0x2a7   :  { %v4569_v15 = vpop.eup %4568  ;;  %4582 = vpow2.f32 %v3797_v40  ;;  %v1680_v51 = vpop.f32.mrf.mxu1  ;;  %v995_v16 = vadd.f32 %v5720_v34, %v5822_v45 }
 0x2a8   :  { %4584 = vrcp.f32 %v1760_v49  ;;  %v1763_v22 = vadd.f32 1.0, %v4569_v15  ;;  %v3798_v25 = vmul.f32 -1.442695, %v1719_v47  ;;  %v1717_v33 = vadd.f32 %v1680_v51, %v965_v5  ;;  %v6902_v5 = vld [vmem:[#allocation38_spill] sm:$0xff] }
 0x2a9   :  { %v4571_v11 = vpop.eup %4570  ;;  %4586 = vpow2.f32 %v3795_v19  ;;  %v4210_v29 = vpop.f32.mrf.mxu1  ;;  %v985_v49 = vadd.f32 %v6903_v8, %v6902_v5 }
 0x2aa   :  { %4588 = vrcp.f32 %v1763_v22  ;;  %v1761_v21 = vadd.f32 1.0, %v4571_v11  ;;  %v3796_v7 = vmul.f32 -1.442695, %v1717_v33  ;;  %v1722_v37 = vadd.f32 %v4210_v29, %v991_v39 }
 0x2ab   :  { %v4573_v17 = vpop.eup %4572  ;;  %4590 = vpow2.f32 %v3798_v25  ;;  %v1693_v30 = vpop.f32.mrf.mxu1 }
 0x2ac   :  { %4592 = vrcp.f32 %v1761_v21  ;;  %v1766_v13 = vadd.f32 1.0, %v4573_v17  ;;  %v1720_v32 = vadd.f32 %v1693_v30, %v981_v3 }
 0x2ad   :  { %v4575_v9 = vpop.eup %4574  ;;  %4594 = vpow2.f32 %v3796_v7  ;;  %v4211_v40 = vpop.f32.mrf.mxu1 }
 0x2ae   :  { %4596 = vrcp.f32 %v1766_v13  ;;  %v1764_v20 = vadd.f32 1.0, %v4575_v9  ;;  %v1723_v27 = vadd.f32 %v4211_v40, %v995_v16 }
 0x2af   :  { %v4577_v23 = vpop.eup %4576  ;;  %4598 = vtanh.f32 %v1722_v37  ;;  %v1696_v19 = vpop.f32.mrf.mxu1 }
 0x2b0   :  { %4600 = vrcp.f32 %v1764_v20  ;;  %v1767_v47 = vadd.f32 1.0, %v4577_v23  ;;  %v1721_v51 = vadd.f32 %v1696_v19, %v985_v49 }
 0x2b1   :  { %v4579_v15 = vpop.eup %4578  ;;  %4602 = vtanh.f32 %v1720_v32 }
 0x2b2   :  { %4604 = vrcp.f32 %v1767_v47  ;;  %v1765_v22 = vadd.f32 1.0, %v4579_v15 }
 0x2b3   :  { %v4581_v34 = vpop.eup %4580  ;;  %4606 = vtanh.f32 %v1723_v27 }
 0x2b4   :  { %v4583_v25 = vpop.eup %4582  ;;  %4608 = vrcp.f32 %v1765_v22 }
 0x2b5   :  { %v4585_v33 = vpop.eup %4584  ;;  %4610 = vtanh.f32 %v1721_v51  ;;  %v1770_v37 = vadd.f32 1.0, %v4583_v25 }
 0x2b6   :  { %v4587_v11 = vpop.eup %4586 }
 0x2b7   :  { %v4589_v39 = vpop.eup %4588  ;;  %v1768_v9 = vadd.f32 1.0, %v4587_v11  ;;  %4612 = vrcp.f32 %v1770_v37 }
 0x2b8   :  { %v4591_v29 = vpop.eup %4590 }
 0x2b9   :  { %v4593_v21 = vpop.eup %4592  ;;  %v1771_v40 = vadd.f32 1.0, %v4591_v29  ;;  %4614 = vrcp.f32 %v1768_v9 }
 0x2ba   :  { %v4595_v7 = vpop.eup %4594 }
 0x2bb   :  { %v4597_v17 = vpop.eup %4596  ;;  %4616 = vrcp.f32 %v1771_v40  ;;  %v1769_v22 = vadd.f32 1.0, %v4595_v7 }
 0x2bc   :  { %v4599_v3 = vpop.eup %4598  ;;  %v1802_v30 = vmul.f32 %v4597_v17, %v5866_v14 }
 0x2bd   :  { %v4601_v13 = vpop.eup %4600  ;;  %v1806_v16 = vmul.f32 %v4599_v3, %v4581_v34 }
 0x2be   :  { %v4603_v32 = vpop.eup %4602  ;;  %v1800_v20 = vmul.f32 %v4601_v13, %v5870_v46 }
 0x2bf   :  { %v4605_v23 = vpop.eup %4604  ;;  %v6040_v8 = vadd.f32 %v1806_v16, %v1802_v30  ;;  %v1804_v49 = vmul.f32 %v4603_v32, %v4585_v33 }
 0x2c0   :  { %v4607_v27 = vpop.eup %4606  ;;  %v1803_v19 = vmul.f32 %v4605_v23, %v5873_v38 }
 0x2c1   :  { %v4609_v47 = vpop.eup %4608  ;;  %v6043_v15 = vadd.f32 %v1804_v49, %v1800_v20  ;;  %v1807_v14 = vmul.f32 %v4607_v27, %v4589_v39  ;;  %4618 = vtanh.f32 %v6040_v8 }
 0x2c2   :  { %v4611_v51 = vpop.eup %4610  ;;  %v1801_v34 = vmul.f32 %v4609_v47, %v5879_v41 }
 0x2c3   :  { %v6047_v46 = vadd.f32 %v1807_v14, %v1803_v19  ;;  %v1805_v25 = vmul.f32 %v4611_v51, %v4593_v21  ;;  %4620 = vtanh.f32 %v6043_v15  ;;  %v1062_v51 = vadd.f32 %v5886_v12, %v5774_v50 }
 0x2c4   :  { %v4613_v33 = vpop.eup %4612  ;;  %v1056_v12 = vadd.f32 %v5882_v55, %v5804_v57  ;;  %v1086_v55 = vadd.f32 %v5922_v26, %v5812_v6 }
 0x2c5   :  { %4622 = vtanh.f32 %v6047_v46  ;;  %v6051_v38 = vadd.f32 %v1805_v25, %v1801_v34 }
 0x2c6   :  { %4624 = vrcp.f32 %v1769_v22  ;;  %v4615_v11 = vpop.eup %4614 }
 0x2c7   :  { %4626 = vtanh.f32 %v6051_v38 }
 0x2c8   :  { %v4617_v39 = vpop.eup %4616 }
 0x2ce   :  { %v4619_v29 = vpop.eup %4618 }
 0x2cf   :  { %v1818_v3 = vmul.f32 %v4619_v29, %v4613_v33  ;;  %v1052_v33 = vadd.f32 %v5868_v2, %v5796_v54  ;;  %v1082_v2 = vadd.f32 %v5914_v31, %v5806_v56 }
 0x2d0   :  { %v4621_v7 = vpop.eup %4620 }
 0x2d1   :  { %v1816_v13 = vmul.f32 %v4621_v7, %v4615_v11  ;;  %v1066_v7 = vadd.f32 %v5890_v43, %v5784_v42  ;;  %v1072_v43 = vadd.f32 %v5898_v48, %v5826_v10 }
 0x2d2   :  { %v4623_v41 = vpop.eup %4622 }
 0x2d3   :  { %v4625_v17 = vpop.eup %4624  ;;  %v1819_v37 = vmul.f32 %v4623_v41, %v4617_v39 }
 0x2d4   :  { %v4627_v30 = vpop.eup %4626 }
 0x2d5   :  { %v1821_v21 = vpack.c.bf16 %v1819_v37, %v1818_v3  ;;  %v1817_v9 = vmul.f32 %v4627_v30, %v4625_v17 }
 0x2d7   :  { %4212 = vmatprep.subr.bf16.mxu0 %v1821_v21  ;;  %v1820_v16 = vpack.c.bf16 %v1817_v9, %v1816_v13 }
 0x2d8   :  { %4213 = vmatpush3.bf16.msra.mxu0 %v1821_v21 }
 0x2d9   :  { %4214 = vmatprep.subr.bf16.mxu0 %v1820_v16 }
 0x2dc   :  { %4215 = vmatpush3.bf16.msra.mxu0 %v1820_v16 }
 0x2df   :  { %4217 = vmatmul.mubr.msk.bf16.vlgmr.msra.gmra.mxu0 %vm667_vm0, %v5608_v28  ;;  %v6904_v28 = vld [vmem:[#allocation40_spill] sm:$0xff] }
 0x2e0   :  { %4220 = vmatprep.mubr.msk.bf16.mxu0 %vm667_vm0, %v5613_v53  ;;  %v1042_v53 = vadd.f32 %v6904_v28, %v5768_v59 }
 0x2e7   :  { %4221 = vmatmul.mubr.msk.bf16.gmra.mxu0 %vm667_vm0, %v5624_v60  ;;  %v6905_v60 = vld [vmem:[#allocation35_spill] sm:$0xff] }
 0x2e8   :  { %4224 = vmatprep.mubr.msk.bf16.mxu0 %vm667_vm0, %v5629_v61  ;;  %v1032_v40 = vadd.f32 %v6905_v60, %v5788_v36 }
 0x2ef   :  { %4225 = vmatmul.mubr.msk.bf16.gmra.mxu0 %vm667_vm0, %v5638_v62  ;;  %v6906_v62 = vld [vmem:[#allocation42_spill] sm:$0xff] }
 0x2f0   :  { %4228 = vmatprep.mubr.msk.bf16.mxu0 %vm667_vm0, %v5643_v63  ;;  %v1046_v23 = vadd.f32 %v6906_v62, %v5778_v52  ;;  %v1076_v62 = vadd.f32 %v5906_v18, %v5834_v4 }
 0x2f7   :  { %4229 = vmatmul.mubr.msk.bf16.gmra.mxu0 %vm667_vm0, %v5652_v0  ;;  %v6907_v0 = vld [vmem:[#allocation37_spill] sm:$0xff] }
 0x2f8   :  { %4256 = vmatprep.mubr.msk.bf16.mxu0 %vm667_vm0, %v5599_v1  ;;  %v1036_v19 = vadd.f32 %v6907_v0, %v5794_v44 }
 0x39f   :  { %v4218_v32 = vpop.f32.mrf.mxu0 }
 0x3a0   :  { %v1921_v61 = vadd.f32 %v4218_v32, %v1042_v53 }
 0x3a1   :  { %v1856_v20 = vpop.f32.mrf.mxu0 }
 0x3a2   :  { %v3809_v49 = vmul.f32 -1.442695, %v1921_v61  ;;  %v1919_v63 = vadd.f32 %v1856_v20, %v1032_v40 }
 0x3a3   :  { %v4219_v27 = vpop.f32.mrf.mxu0 }
 0x3a4   :  { %4628 = vpow2.f32 %v3809_v49  ;;  %v3807_v1 = vmul.f32 -1.442695, %v1919_v63  ;;  %v1922_v47 = vadd.f32 %v4219_v27, %v1046_v23 }
 0x3a5   :  { %v1859_v14 = vpop.f32.mrf.mxu0 }
 0x3a6   :  { %4630 = vpow2.f32 %v3807_v1  ;;  %v3810_v22 = vmul.f32 -1.442695, %v1922_v47  ;;  %v1920_v34 = vadd.f32 %v1859_v14, %v1036_v19  ;;  %v1102_v14 = vadd.f32 %v5934_v58, %v5816_v35 }
 0x3a7   :  { %v4222_v25 = vpop.f32.mrf.mxu0 }
 0x3a8   :  { %4632 = vpow2.f32 %v3810_v22  ;;  %v3808_v11 = vmul.f32 -1.442695, %v1920_v34  ;;  %v1925_v39 = vadd.f32 %v4222_v25, %v1062_v51  ;;  %v6908_v25 = vld [vmem:[#allocation52_spill] sm:$0xff] }
 0x3a9   :  { %v1872_v29 = vpop.f32.mrf.mxu0 }
 0x3aa   :  { %4634 = vpow2.f32 %v3808_v11  ;;  %v3813_v41 = vmul.f32 -1.442695, %v1925_v39  ;;  %v1923_v17 = vadd.f32 %v1872_v29, %v1052_v33  ;;  %v1092_v33 = vadd.f32 %v6908_v25, %v5842_v24 }
 0x3ab   :  { %v4223_v3 = vpop.f32.mrf.mxu0 }
 0x3ac   :  { %4636 = vpow2.f32 %v3813_v41  ;;  %v3811_v37 = vmul.f32 -1.442695, %v1923_v17  ;;  %v1926_v30 = vadd.f32 %v4223_v3, %v1066_v7  ;;  %v6909_v41 = vld [vmem:[#allocation57_spill] sm:$0xff] }
 0x3ad   :  { %v1875_v21 = vpop.f32.mrf.mxu0  ;;  %v1106_v17 = vadd.f32 %v6909_v41, %v5822_v45 }
 0x3ae   :  { %4638 = vpow2.f32 %v3811_v37  ;;  %v3814_v13 = vmul.f32 -1.442695, %v1926_v30  ;;  %v1924_v9 = vadd.f32 %v1875_v21, %v1056_v12  ;;  %v6910_v30 = vld [vmem:[#allocation54_spill] sm:$0xff] }
 0x3af   :  { %v4226_v16 = vpop.f32.mrf.mxu0  ;;  %v1096_v21 = vadd.f32 %v6910_v30, %v6902_v5 }
 0x3b0   :  { %4640 = vpow2.f32 %v3814_v13  ;;  %v3812_v28 = vmul.f32 -1.442695, %v1924_v9  ;;  %v1929_v53 = vadd.f32 %v4226_v16, %v1082_v2 }
 0x3b1   :  { %v4629_v32 = vpop.eup %4628  ;;  %v1888_v60 = vpop.f32.mrf.mxu0 }
 0x3b2   :  { %v1973_v40 = vadd.f32 1.0, %v4629_v32  ;;  %4642 = vpow2.f32 %v3812_v28  ;;  %v3817_v61 = vmul.f32 -1.442695, %v1929_v53  ;;  %v1927_v20 = vadd.f32 %v1888_v60, %v1072_v43 }
 0x3b3   :  { %v4631_v31 = vpop.eup %4630  ;;  %v4227_v23 = vpop.f32.mrf.mxu0 }
 0x3b4   :  { %4644 = vrcp.f32 %v1973_v40  ;;  %v1971_v49 = vadd.f32 1.0, %v4631_v31  ;;  %v3815_v48 = vmul.f32 -1.442695, %v1927_v20  ;;  %v1930_v63 = vadd.f32 %v4227_v23, %v1086_v55 }
 0x3b5   :  { %v4633_v27 = vpop.eup %4632  ;;  %4646 = vpow2.f32 %v3817_v61  ;;  %v1891_v0 = vpop.f32.mrf.mxu0 }
 0x3b6   :  { %4648 = vrcp.f32 %v1971_v49  ;;  %v1974_v19 = vadd.f32 1.0, %v4633_v27  ;;  %v3818_v26 = vmul.f32 -1.442695, %v1930_v63  ;;  %v1928_v1 = vadd.f32 %v1891_v0, %v1076_v62 }
 0x3b7   :  { %v4635_v47 = vpop.eup %4634  ;;  %4650 = vpow2.f32 %v3815_v48  ;;  %v4230_v51 = vpop.f32.mrf.mxu0 }
 0x3b8   :  { %4652 = vrcp.f32 %v1974_v19  ;;  %v1972_v18 = vadd.f32 1.0, %v4635_v47  ;;  %v3816_v22 = vmul.f32 -1.442695, %v1928_v1  ;;  %v1933_v11 = vadd.f32 %v4230_v51, %v1102_v14 }
 0x3b9   :  { %v4637_v34 = vpop.eup %4636  ;;  %4654 = vpow2.f32 %v3818_v26  ;;  %v1904_v39 = vpop.f32.mrf.mxu0 }
 0x3ba   :  { %4656 = vrcp.f32 %v1972_v18  ;;  %v1977_v29 = vadd.f32 1.0, %v4637_v34  ;;  %v1931_v58 = vadd.f32 %v1904_v39, %v1092_v33 }
 0x3bb   :  { %v4639_v7 = vpop.eup %4638  ;;  %4658 = vpow2.f32 %v3816_v22  ;;  %v4231_v3 = vpop.f32.mrf.mxu0 }
 0x3bc   :  { %4660 = vrcp.f32 %v1977_v29  ;;  %v1975_v12 = vadd.f32 1.0, %v4639_v7  ;;  %v1934_v2 = vadd.f32 %v4231_v3, %v1106_v17 }
 0x3bd   :  { %v4641_v37 = vpop.eup %4640  ;;  %4662 = vtanh.f32 %v1933_v11  ;;  %v1907_v13 = vpop.f32.mrf.mxu0 }
 0x3be   :  { %4664 = vrcp.f32 %v1975_v12  ;;  %v1978_v9 = vadd.f32 1.0, %v4641_v37  ;;  %v1932_v43 = vadd.f32 %v1907_v13, %v1096_v21 }
 0x3bf   :  { %v4643_v16 = vpop.eup %4642  ;;  %4666 = vtanh.f32 %v1931_v58 }
 0x3c0   :  { %4668 = vrcp.f32 %v1978_v9  ;;  %v1976_v28 = vadd.f32 1.0, %v4643_v16 }
 0x3c1   :  { %v4645_v53 = vpop.eup %4644  ;;  %4670 = vtanh.f32 %v1934_v2 }
 0x3c2   :  { %v4647_v32 = vpop.eup %4646  ;;  %4672 = vrcp.f32 %v1976_v28  ;;  %v6128_v28 = vld [vmem:[%s6806_s3 + $0x10] sm:$0xff]  }
 0x3c3   :  { %v4649_v55 = vpop.eup %4648  ;;  %4674 = vtanh.f32 %v1932_v43  ;;  %v1981_v49 = vadd.f32 1.0, %v4647_v32  ;;  %v6121_v43 = vld [vmem:[%s6806_s3 + $0x8] sm:$0xff]   ;;  %v6142_v32 = vld [vmem:[%s6806_s3 + $0x20] sm:$0xff]  }
 0x3c4   :  { %v4651_v60 = vpop.eup %4650 }
 0x3c5   :  { %v4653_v40 = vpop.eup %4652  ;;  %v1979_v27 = vadd.f32 1.0, %v4651_v60  ;;  %4676 = vrcp.f32 %v1981_v49  ;;  %v6156_v60 = vld [vmem:[%s6806_s3 + $0x30] sm:$0xff]  }
 0x3c6   :  { %v4655_v61 = vpop.eup %4654 }
 0x3c7   :  { %v4657_v20 = vpop.eup %4656  ;;  %v1982_v26 = vadd.f32 1.0, %v4655_v61  ;;  %4678 = vrcp.f32 %v1979_v27  ;;  %v6170_v61 = vld [vmem:[%s6806_s3] sm:$0xff]   ;;  %v6913_v27 = vld [vmem:[#allocation43_spill] sm:$0xff] }
 0x3c8   :  { %v4659_v31 = vpop.eup %4658 }
 0x3c9   :  { %v4661_v62 = vpop.eup %4660  ;;  %4680 = vrcp.f32 %v1982_v26  ;;  %v1980_v11 = vadd.f32 1.0, %v4659_v31 }
 0x3ca   :  { %v4663_v23 = vpop.eup %4662  ;;  %v2013_v48 = vmul.f32 %v4661_v62, %v6040_v8 }
 0x3cb   :  { %v4665_v63 = vpop.eup %4664  ;;  %v2017_v0 = vmul.f32 %v4663_v23, %v4645_v53  ;;  %v6135_v53 = vld [vmem:[%s6806_s3 + $0x18] sm:$0xff]   ;;  %v6912_v23 = vld [vmem:[#allocation36_spill] sm:$0xff] }
 0x3cc   :  { %v4667_v19 = vpop.eup %4666  ;;  %v2011_v1 = vmul.f32 %v4665_v63, %v6043_v15  ;;  %v1034_v49 = vadd.f32 %v6912_v23, %v5788_v36 }
 0x3cd   :  { %v4669_v47 = vpop.eup %4668  ;;  %v6104_v14 = vadd.f32 %v2017_v0, %v2013_v48  ;;  %v2015_v51 = vmul.f32 %v4667_v19, %v4649_v55  ;;  %v6149_v55 = vld [vmem:[%s6806_s3 + $0x28] sm:$0xff]   ;;  %v1048_v0 = vadd.f32 %v6913_v27, %v5778_v52 }
 0x3ce   :  { %v4671_v18 = vpop.eup %4670  ;;  %v2014_v22 = vmul.f32 %v4669_v47, %v6047_v46  ;;  %v6914_v47 = vld [vmem:[#allocation39_spill] sm:$0xff] }
 0x3cf   :  { %v4673_v34 = vpop.eup %4672  ;;  %v6107_v25 = vadd.f32 %v2015_v51, %v2011_v1  ;;  %v2018_v8 = vmul.f32 %v4671_v18, %v4653_v40  ;;  %4682 = vtanh.f32 %v6104_v14  ;;  %v6163_v40 = vld [vmem:[%s6806_s3 + $0x38] sm:$0xff]   ;;  %v1038_v51 = vadd.f32 %v6914_v47, %v5794_v44 }
 0x3d0   :  { %v4675_v33 = vpop.eup %4674  ;;  %v2012_v39 = vmul.f32 %v4673_v34, %v6051_v38 }
 0x3d1   :  { %v6111_v15 = vadd.f32 %v2018_v8, %v2014_v22  ;;  %v2016_v29 = vmul.f32 %v4675_v33, %v4657_v20  ;;  %4684 = vtanh.f32 %v6107_v25  ;;  %v6911_v20 = vld [vmem:[#allocation41_spill] sm:$0xff]  ;;  %v6915_v8 = vld [vmem:[#allocation46_spill] sm:$0xff] }
 0x3d2   :  { %v4677_v7 = vpop.eup %4676  ;;  %v1044_v31 = vadd.f32 %v6911_v20, %v5768_v59  ;;  %v1064_v33 = vadd.f32 %v6915_v8, %v5774_v50 }
 0x3d3   :  { %4686 = vtanh.f32 %v6111_v15  ;;  %v6115_v46 = vadd.f32 %v2016_v29, %v2012_v39 }
 0x3d4   :  { %4688 = vrcp.f32 %v1980_v11  ;;  %v4679_v41 = vpop.eup %4678 }
 0x3d5   :  { %4690 = vtanh.f32 %v6115_v46 }
 0x3d6   :  { %v4681_v17 = vpop.eup %4680 }
 0x3dc   :  { %v4683_v58 = vpop.eup %4682 }
 0x3dd   :  { %v2029_v37 = vmul.f32 %v4683_v58, %v4677_v7  ;;  %v6916_v7 = vld [vmem:[#allocation44_spill] sm:$0xff] }
 0x3de   :  { %v4685_v3 = vpop.eup %4684 }
 0x3df   :  { %v2027_v13 = vmul.f32 %v4685_v3, %v4679_v41  ;;  %v1054_v41 = vadd.f32 %v6916_v7, %v5796_v54 }
 0x3e0   :  { %v4687_v38 = vpop.eup %4686 }
 0x3e1   :  { %v4689_v12 = vpop.eup %4688  ;;  %v2030_v30 = vmul.f32 %v4687_v38, %v4681_v17  ;;  %v6917_v38 = vld [vmem:[#allocation47_spill] sm:$0xff] }
 0x3e2   :  { %v4691_v21 = vpop.eup %4690 }
 0x3e3   :  { %v2032_v2 = vpack.c.bf16 %v2030_v30, %v2029_v37  ;;  %v2028_v9 = vmul.f32 %v4691_v21, %v4689_v12  ;;  %v1068_v12 = vadd.f32 %v6917_v38, %v5784_v42 }
 0x3e5   :  { %4232 = vmatprep.subr.bf16.mxu1 %v2032_v2  ;;  %v2031_v16 = vpack.c.bf16 %v2028_v9, %v2027_v13 }
 0x3e6   :  { %4233 = vmatpush3.bf16.msra.mxu1 %v2032_v2  ;;  %v6918_v2 = vld [vmem:[#allocation45_spill] sm:$0xff] }
 0x3e7   :  { %4234 = vmatprep.subr.bf16.mxu1 %v2031_v16  ;;  %v1058_v13 = vadd.f32 %v6918_v2, %v5804_v57 }
 0x3ea   :  { %4235 = vmatpush3.bf16.msra.mxu1 %v2031_v16 }
 0x3ed   :  { %4237 = vmatmul.mubr.msk.bf16.vlgmr.msra.gmra.mxu1 %vm667_vm0, %v6121_v43 }
 0x3ee   :  { %4240 = vmatprep.mubr.msk.bf16.mxu1 %vm667_vm0, %v6128_v28 }
 0x3f5   :  { %4241 = vmatmul.mubr.msk.bf16.gmra.mxu1 %vm667_vm0, %v6135_v53 }
 0x3f6   :  { %4244 = vmatprep.mubr.msk.bf16.mxu1 %vm667_vm0, %v6142_v32 }
 0x3fd   :  { %4245 = vmatmul.mubr.msk.bf16.gmra.mxu1 %vm667_vm0, %v6149_v55 }
 0x3fe   :  { %4248 = vmatprep.mubr.msk.bf16.mxu1 %vm667_vm0, %v6156_v60 }
 0x405   :  { %4249 = vmatmul.mubr.msk.bf16.gmra.mxu1 %vm667_vm0, %v6163_v40 }
 0x406   :  { %4276 = vmatprep.mubr.msk.bf16.mxu1 %vm667_vm0, %v6170_v61 }
 0x4ad   :  { %v4238_v62 = vpop.f32.mrf.mxu1 }
 0x4ae   :  { %v2132_v48 = vadd.f32 %v4238_v62, %v1044_v31  ;;  %v6919_v31 = vld [vmem:[#allocation50_spill] sm:$0xff] }
 0x4af   :  { %v2067_v63 = vpop.f32.mrf.mxu1  ;;  %v1084_v62 = vadd.f32 %v6919_v31, %v5806_v56 }
 0x4b0   :  { %v3829_v19 = vmul.f32 -1.442695, %v2132_v48  ;;  %v2130_v26 = vadd.f32 %v2067_v63, %v1034_v49  ;;  %v6920_v63 = vld [vmem:[#allocation48_spill] sm:$0xff] }
 0x4b1   :  { %v4239_v1 = vpop.f32.mrf.mxu1  ;;  %v1074_v27 = vadd.f32 %v6920_v63, %v5826_v10  ;;  %v6925_v63 = vld [vmem:[#allocation58_spill] sm:$0xff] }
 0x4b2   :  { %4692 = vpow2.f32 %v3829_v19  ;;  %v3827_v18 = vmul.f32 -1.442695, %v2130_v26  ;;  %v2133_v22 = vadd.f32 %v4239_v1, %v1048_v0  ;;  %v6921_v1 = vld [vmem:[#allocation51_spill] sm:$0xff] }
 0x4b3   :  { %v2070_v34 = vpop.f32.mrf.mxu1  ;;  %v1088_v47 = vadd.f32 %v6921_v1, %v5812_v6 }
 0x4b4   :  { %4694 = vpow2.f32 %v3827_v18  ;;  %v3830_v11 = vmul.f32 -1.442695, %v2133_v22  ;;  %v2131_v39 = vadd.f32 %v2070_v34, %v1038_v51 }
 0x4b5   :  { %v4242_v29 = vpop.f32.mrf.mxu1 }
 0x4b6   :  { %4696 = vpow2.f32 %v3830_v11  ;;  %v3828_v17 = vmul.f32 -1.442695, %v2131_v39  ;;  %v2136_v58 = vadd.f32 %v4242_v29, %v1064_v33  ;;  %v6922_v33 = vld [vmem:[#allocation49_spill] sm:$0xff] }
 0x4b7   :  { %v2083_v3 = vpop.f32.mrf.mxu1  ;;  %v1078_v11 = vadd.f32 %v6922_v33, %v5834_v4 }
 0x4b8   :  { %4698 = vpow2.f32 %v3828_v17  ;;  %v3833_v37 = vmul.f32 -1.442695, %v2136_v58  ;;  %v2134_v30 = vadd.f32 %v2083_v3, %v1054_v41 }
 0x4b9   :  { %v4243_v21 = vpop.f32.mrf.mxu1 }
 0x4ba   :  { %4700 = vpow2.f32 %v3833_v37  ;;  %v3831_v9 = vmul.f32 -1.442695, %v2134_v30  ;;  %v2137_v16 = vadd.f32 %v4243_v21, %v1068_v12  ;;  %v6923_v30 = vld [vmem:[#allocation56_spill] sm:$0xff] }
 0x4bb   :  { %v2086_v20 = vpop.f32.mrf.mxu1  ;;  %v1104_v21 = vadd.f32 %v6923_v30, %v5816_v35 }
 0x4bc   :  { %4702 = vpow2.f32 %v3831_v9  ;;  %v3834_v23 = vmul.f32 -1.442695, %v2137_v16  ;;  %v2135_v49 = vadd.f32 %v2086_v20, %v1058_v13  ;;  %v6924_v20 = vld [vmem:[#allocation53_spill] sm:$0xff] }
 0x4bd   :  { %v4246_v48 = vpop.f32.mrf.mxu1  ;;  %v1094_v31 = vadd.f32 %v6924_v20, %v5842_v24 }
 0x4be   :  { %4704 = vpow2.f32 %v3834_v23  ;;  %v3832_v0 = vmul.f32 -1.442695, %v2135_v49  ;;  %v2140_v19 = vadd.f32 %v4246_v48, %v1084_v62 }
 0x4bf   :  { %v4693_v26 = vpop.eup %4692  ;;  %v2099_v51 = vpop.f32.mrf.mxu1 }
 0x4c0   :  { %v2184_v18 = vadd.f32 1.0, %v4693_v26  ;;  %4706 = vpow2.f32 %v3832_v0  ;;  %v3837_v22 = vmul.f32 -1.442695, %v2140_v19  ;;  %v2138_v34 = vadd.f32 %v2099_v51, %v1074_v27 }
 0x4c1   :  { %v4695_v8 = vpop.eup %4694  ;;  %v4247_v39 = vpop.f32.mrf.mxu1  ;;  %v1108_v27 = vadd.f32 %v6925_v63, %v5822_v45 }
 0x4c2   :  { %4708 = vrcp.f32 %v2184_v18  ;;  %v2182_v29 = vadd.f32 1.0, %v4695_v8  ;;  %v3835_v7 = vmul.f32 -1.442695, %v2138_v34  ;;  %v2141_v41 = vadd.f32 %v4247_v39, %v1088_v47  ;;  %v6926_v47 = vld [vmem:[#allocation55_spill] sm:$0xff] }
 0x4c3   :  { %v4697_v17 = vpop.eup %4696  ;;  %4710 = vpow2.f32 %v3837_v22  ;;  %v2102_v58 = vpop.f32.mrf.mxu1  ;;  %v1098_v51 = vadd.f32 %v6926_v47, %v6902_v5 }
 0x4c4   :  { %4712 = vrcp.f32 %v2182_v29  ;;  %v2185_v3 = vadd.f32 1.0, %v4697_v17  ;;  %v3838_v38 = vmul.f32 -1.442695, %v2141_v41  ;;  %v2139_v12 = vadd.f32 %v2102_v58, %v1078_v11 }
 0x4c5   :  { %v4699_v37 = vpop.eup %4698  ;;  %4714 = vpow2.f32 %v3835_v7  ;;  %v4250_v2 = vpop.f32.mrf.mxu1 }
 0x4c6   :  { %4716 = vrcp.f32 %v2185_v3  ;;  %v2183_v13 = vadd.f32 1.0, %v4699_v37  ;;  %v3836_v9 = vmul.f32 -1.442695, %v2139_v12  ;;  %v2144_v62 = vadd.f32 %v4250_v2, %v1104_v21 }
 0x4c7   :  { %v4701_v16 = vpop.eup %4700  ;;  %4718 = vpow2.f32 %v3838_v38  ;;  %v2115_v23 = vpop.f32.mrf.mxu1 }
 0x4c8   :  { %4720 = vrcp.f32 %v2183_v13  ;;  %v2188_v49 = vadd.f32 1.0, %v4701_v16  ;;  %v2142_v0 = vadd.f32 %v2115_v23, %v1094_v31 }
 0x4c9   :  { %v4703_v48 = vpop.eup %4702  ;;  %4722 = vpow2.f32 %v3836_v9  ;;  %v4251_v19 = vpop.f32.mrf.mxu1 }
 0x4ca   :  { %4724 = vrcp.f32 %v2188_v49  ;;  %v2186_v26 = vadd.f32 1.0, %v4703_v48  ;;  %v2145_v18 = vadd.f32 %v4251_v19, %v1108_v27 }
 0x4cb   :  { %v4705_v1 = vpop.eup %4704  ;;  %4726 = vtanh.f32 %v2144_v62  ;;  %v2118_v22 = vpop.f32.mrf.mxu1 }
 0x4cc   :  { %4728 = vrcp.f32 %v2186_v26  ;;  %v2189_v34 = vadd.f32 1.0, %v4705_v1  ;;  %v2143_v33 = vadd.f32 %v2118_v22, %v1098_v51 }
 0x4cd   :  { %v4707_v8 = vpop.eup %4706  ;;  %4730 = vtanh.f32 %v2142_v0 }
 0x4ce   :  { %4732 = vrcp.f32 %v2189_v34  ;;  %v2187_v11 = vadd.f32 1.0, %v4707_v8 }
 0x4cf   :  { %v4709_v39 = vpop.eup %4708  ;;  %4734 = vtanh.f32 %v2145_v18 }
 0x4d0   :  { %v4711_v29 = vpop.eup %4710  ;;  %4736 = vrcp.f32 %v2187_v11 }
 0x4d1   :  { %v4713_v7 = vpop.eup %4712  ;;  %4738 = vtanh.f32 %v2143_v33  ;;  %v2192_v30 = vadd.f32 1.0, %v4711_v29 }
 0x4d2   :  { %v4715_v41 = vpop.eup %4714 }
 0x4d3   :  { %v4717_v17 = vpop.eup %4716  ;;  %v2190_v13 = vadd.f32 1.0, %v4715_v41  ;;  %4740 = vrcp.f32 %v2192_v30 }
 0x4d4   :  { %v4719_v58 = vpop.eup %4718 }
 0x4d5   :  { %v4721_v3 = vpop.eup %4720  ;;  %v2193_v20 = vadd.f32 1.0, %v4719_v58  ;;  %4742 = vrcp.f32 %v2190_v13  ;;  %v6929_v13 = vld [vmem:[#allocation9_spill] sm:$0xff] }
 0x4d6   :  { %v4723_v38 = vpop.eup %4722 }
 0x4d7   :  { %v4725_v12 = vpop.eup %4724  ;;  %4744 = vrcp.f32 %v2193_v20  ;;  %v2191_v26 = vadd.f32 1.0, %v4723_v38 }
 0x4d8   :  { %v4727_v37 = vpop.eup %4726  ;;  %v2224_v21 = vmul.f32 %v4725_v12, %v6104_v14 }
 0x4d9   :  { %v4729_v2 = vpop.eup %4728  ;;  %v2228_v9 = vmul.f32 %v4727_v37, %v4709_v39  ;;  %v6928_v37 = vld [vmem:[#allocation3_spill] sm:$0xff] }
 0x4da   :  { %v4731_v16 = vpop.eup %4730  ;;  %v2222_v31 = vmul.f32 %v4729_v2, %v6107_v25  ;;  %v1145_v30 = vadd.f32 %v6928_v37, %v5788_v36 }
 0x4db   :  { %v4733_v62 = vpop.eup %4732  ;;  %v6208_v23 = vadd.f32 %v2228_v9, %v2224_v21  ;;  %v2226_v49 = vmul.f32 %v4731_v16, %v4713_v7  ;;  %v1159_v9 = vadd.f32 %v6929_v13, %v5778_v52 }
 0x4dc   :  { %v4735_v48 = vpop.eup %4734  ;;  %v2225_v63 = vmul.f32 %v4733_v62, %v6111_v15  ;;  %v6930_v62 = vld [vmem:[#allocation5_spill] sm:$0xff] }
 0x4dd   :  { %v4737_v27 = vpop.eup %4736  ;;  %v6211_v0 = vadd.f32 %v2226_v49, %v2222_v31  ;;  %v2229_v14 = vmul.f32 %v4735_v48, %v4717_v17  ;;  %4746 = vtanh.f32 %v6208_v23  ;;  %v1149_v49 = vadd.f32 %v6930_v62, %v5794_v44 }
 0x4de   :  { %v4739_v19 = vpop.eup %4738  ;;  %v2223_v1 = vmul.f32 %v4737_v27, %v6115_v46 }
 0x4df   :  { %v6215_v25 = vadd.f32 %v2229_v14, %v2225_v63  ;;  %v2227_v47 = vmul.f32 %v4739_v19, %v4721_v3  ;;  %4748 = vtanh.f32 %v6211_v0  ;;  %v6927_v3 = vld [vmem:[#allocation7_spill] sm:$0xff] }
 0x4e0   :  { %v4741_v51 = vpop.eup %4740  ;;  %v1155_v38 = vadd.f32 %v6927_v3, %v5768_v59  ;;  %v6931_v14 = vld [vmem:[#allocation15_spill] sm:$0xff] }
 0x4e1   :  { %4750 = vtanh.f32 %v6215_v25  ;;  %v6219_v15 = vadd.f32 %v2227_v47, %v2223_v1  ;;  %v1175_v19 = vadd.f32 %v6931_v14, %v5774_v50 }
 0x4e2   :  { %4752 = vrcp.f32 %v2191_v26  ;;  %v4743_v18 = vpop.eup %4742 }
 0x4e3   :  { %4754 = vtanh.f32 %v6219_v15 }
 0x4e4   :  { %v4745_v22 = vpop.eup %4744 }
 0x4ea   :  { %v4747_v34 = vpop.eup %4746 }
 0x4eb   :  { %v2240_v11 = vmul.f32 %v4747_v34, %v4741_v51  ;;  %v6932_v51 = vld [vmem:[#allocation11_spill] sm:$0xff] }
 0x4ec   :  { %v4749_v8 = vpop.eup %4748 }
 0x4ed   :  { %v2238_v41 = vmul.f32 %v4749_v8, %v4743_v18  ;;  %v1165_v18 = vadd.f32 %v6932_v51, %v5796_v54 }
 0x4ee   :  { %v4751_v46 = vpop.eup %4750 }
 0x4ef   :  { %v4753_v33 = vpop.eup %4752  ;;  %v2241_v39 = vmul.f32 %v4751_v46, %v4745_v22  ;;  %v6933_v46 = vld [vmem:[#allocation17_spill] sm:$0xff] }
 0x4f0   :  { %v4755_v29 = vpop.eup %4754 }
 0x4f1   :  { %v2243_v7 = vpack.c.bf16 %v2241_v39, %v2240_v11  ;;  %v2239_v17 = vmul.f32 %v4755_v29, %v4753_v33  ;;  %v1179_v33 = vadd.f32 %v6933_v46, %v5784_v42 }
 0x4f3   :  { %4252 = vmatprep.subr.bf16.mxu0 %v2243_v7  ;;  %v2242_v58 = vpack.c.bf16 %v2239_v17, %v2238_v41 }
 0x4f4   :  { %4253 = vmatpush3.bf16.msra.mxu0 %v2243_v7  ;;  %v6934_v7 = vld [vmem:[#allocation13_spill] sm:$0xff] }
 0x4f5   :  { %4254 = vmatprep.subr.bf16.mxu0 %v2242_v58  ;;  %v1169_v41 = vadd.f32 %v6934_v7, %v5804_v57 }
 0x4f8   :  { %4255 = vmatpush3.bf16.msra.mxu0 %v2242_v58 }
 0x4fb   :  { %4257 = vmatmul.mubr.msk.bf16.vlgmr.msra.gmra.mxu0 %vm667_vm0, %v6121_v43 }
 0x4fc   :  { %4260 = vmatprep.mubr.msk.bf16.mxu0 %vm667_vm0, %v6128_v28 }
 0x503   :  { %4261 = vmatmul.mubr.msk.bf16.gmra.mxu0 %vm667_vm0, %v6135_v53 }
 0x504   :  { %4264 = vmatprep.mubr.msk.bf16.mxu0 %vm667_vm0, %v6142_v32 }
 0x50b   :  { %4265 = vmatmul.mubr.msk.bf16.gmra.mxu0 %vm667_vm0, %v6149_v55 }
 0x50c   :  { %4268 = vmatprep.mubr.msk.bf16.mxu0 %vm667_vm0, %v6156_v60 }
 0x513   :  { %4269 = vmatmul.mubr.msk.bf16.gmra.mxu0 %vm667_vm0, %v6163_v40 }
 0x514   :  { %4296 = vmatprep.mubr.msk.bf16.mxu0 %vm667_vm0, %v6170_v61 }
 0x5bb   :  { %v4258_v12 = vpop.f32.mrf.mxu0 }
 0x5bc   :  { %v2343_v21 = vadd.f32 %v4258_v12, %v1155_v38  ;;  %v6935_v38 = vld [vmem:[#allocation23_spill] sm:$0xff] }
 0x5bd   :  { %v2278_v2 = vpop.f32.mrf.mxu0  ;;  %v1195_v12 = vadd.f32 %v6935_v38, %v5806_v56 }
 0x5be   :  { %v3849_v16 = vmul.f32 -1.442695, %v2343_v21  ;;  %v2341_v20 = vadd.f32 %v2278_v2, %v1145_v30  ;;  %v6936_v2 = vld [vmem:[#allocation19_spill] sm:$0xff] }
 0x5bf   :  { %v4259_v31 = vpop.f32.mrf.mxu0  ;;  %v1185_v13 = vadd.f32 %v6936_v2, %v5826_v10  ;;  %v6941_v2 = vld [vmem:[#allocation33_spill] sm:$0xff] }
 0x5c0   :  { %4756 = vpow2.f32 %v3849_v16  ;;  %v3847_v48 = vmul.f32 -1.442695, %v2341_v20  ;;  %v2344_v63 = vadd.f32 %v4259_v31, %v1159_v9  ;;  %v6937_v31 = vld [vmem:[#allocation25_spill] sm:$0xff] }
 0x5c1   :  { %v2281_v27 = vpop.f32.mrf.mxu0  ;;  %v1199_v62 = vadd.f32 %v6937_v31, %v5812_v6 }
 0x5c2   :  { %4758 = vpow2.f32 %v3847_v48  ;;  %v3850_v26 = vmul.f32 -1.442695, %v2344_v63  ;;  %v2342_v1 = vadd.f32 %v2281_v27, %v1149_v49 }
 0x5c3   :  { %v4262_v47 = vpop.f32.mrf.mxu0 }
 0x5c4   :  { %4760 = vpow2.f32 %v3850_v26  ;;  %v3848_v22 = vmul.f32 -1.442695, %v2342_v1  ;;  %v2347_v34 = vadd.f32 %v4262_v47, %v1175_v19  ;;  %v6938_v19 = vld [vmem:[#allocation21_spill] sm:$0xff] }
 0x5c5   :  { %v2294_v8 = vpop.f32.mrf.mxu0  ;;  %v1189_v26 = vadd.f32 %v6938_v19, %v5834_v4 }
 0x5c6   :  { %4762 = vpow2.f32 %v3848_v22  ;;  %v3853_v11 = vmul.f32 -1.442695, %v2347_v34  ;;  %v2345_v39 = vadd.f32 %v2294_v8, %v1165_v18 }
 0x5c7   :  { %v4263_v29 = vpop.f32.mrf.mxu0 }
 0x5c8   :  { %4764 = vpow2.f32 %v3853_v11  ;;  %v3851_v17 = vmul.f32 -1.442695, %v2345_v39  ;;  %v2348_v58 = vadd.f32 %v4263_v29, %v1179_v33  ;;  %v6939_v39 = vld [vmem:[#allocation31_spill] sm:$0xff] }
 0x5c9   :  { %v2297_v3 = vpop.f32.mrf.mxu0  ;;  %v1215_v29 = vadd.f32 %v6939_v39, %v5816_v35 }
 0x5ca   :  { %4766 = vpow2.f32 %v3851_v17  ;;  %v3854_v37 = vmul.f32 -1.442695, %v2348_v58  ;;  %v2346_v30 = vadd.f32 %v2297_v3, %v1169_v41  ;;  %v6940_v3 = vld [vmem:[#allocation27_spill] sm:$0xff] }
 0x5cb   :  { %v4266_v21 = vpop.f32.mrf.mxu0  ;;  %v1205_v38 = vadd.f32 %v6940_v3, %v5842_v24 }
 0x5cc   :  { %4768 = vpow2.f32 %v3854_v37  ;;  %v3852_v9 = vmul.f32 -1.442695, %v2346_v30  ;;  %v2351_v16 = vadd.f32 %v4266_v21, %v1195_v12 }
 0x5cd   :  { %v4757_v20 = vpop.eup %4756  ;;  %v2310_v49 = vpop.f32.mrf.mxu0 }
 0x5ce   :  { %v2395_v48 = vadd.f32 1.0, %v4757_v20  ;;  %4770 = vpow2.f32 %v3852_v9  ;;  %v3857_v63 = vmul.f32 -1.442695, %v2351_v16  ;;  %v2349_v27 = vadd.f32 %v2310_v49, %v1185_v13 }
 0x5cf   :  { %v4759_v14 = vpop.eup %4758  ;;  %v4267_v1 = vpop.f32.mrf.mxu0  ;;  %v1219_v13 = vadd.f32 %v6941_v2, %v5822_v45 }
 0x5d0   :  { %4772 = vrcp.f32 %v2395_v48  ;;  %v2393_v47 = vadd.f32 1.0, %v4759_v14  ;;  %v3855_v51 = vmul.f32 -1.442695, %v2349_v27  ;;  %v2352_v18 = vadd.f32 %v4267_v1, %v1199_v62  ;;  %v6942_v62 = vld [vmem:[#allocation29_spill] sm:$0xff] }
 0x5d1   :  { %v4761_v22 = vpop.eup %4760  ;;  %4774 = vpow2.f32 %v3857_v63  ;;  %v2313_v34 = vpop.f32.mrf.mxu0  ;;  %v1209_v49 = vadd.f32 %v6942_v62, %v6902_v5 }
 0x5d2   :  { %4776 = vrcp.f32 %v2393_v47  ;;  %v2396_v8 = vadd.f32 1.0, %v4761_v22  ;;  %v3858_v46 = vmul.f32 -1.442695, %v2352_v18  ;;  %v2350_v33 = vadd.f32 %v2313_v34, %v1189_v26 }
 0x5d3   :  { %v4763_v11 = vpop.eup %4762  ;;  %4778 = vpow2.f32 %v3855_v51  ;;  %v4270_v7 = vpop.f32.mrf.mxu0 }
 0x5d4   :  { %4780 = vrcp.f32 %v2396_v8  ;;  %v2394_v41 = vadd.f32 1.0, %v4763_v11  ;;  %v3856_v17 = vmul.f32 -1.442695, %v2350_v33  ;;  %v2355_v12 = vadd.f32 %v4270_v7, %v1215_v29 }
 0x5d5   :  { %v4765_v58 = vpop.eup %4764  ;;  %4782 = vpow2.f32 %v3858_v46  ;;  %v2326_v37 = vpop.f32.mrf.mxu0 }
 0x5d6   :  { %4784 = vrcp.f32 %v2394_v41  ;;  %v2399_v30 = vadd.f32 1.0, %v4765_v58  ;;  %v2353_v9 = vadd.f32 %v2326_v37, %v1205_v38 }
 0x5d7   :  { %v4767_v21 = vpop.eup %4766  ;;  %4786 = vpow2.f32 %v3856_v17  ;;  %v4271_v16 = vpop.f32.mrf.mxu0 }
 0x5d8   :  { %4788 = vrcp.f32 %v2399_v30  ;;  %v2397_v20 = vadd.f32 1.0, %v4767_v21  ;;  %v2356_v48 = vadd.f32 %v4271_v16, %v1219_v13 }
 0x5d9   :  { %v4769_v31 = vpop.eup %4768  ;;  %4790 = vtanh.f32 %v2355_v12  ;;  %v2329_v63 = vpop.f32.mrf.mxu0 }
 0x5da   :  { %4792 = vrcp.f32 %v2397_v20  ;;  %v2400_v27 = vadd.f32 1.0, %v4769_v31  ;;  %v2354_v19 = vadd.f32 %v2329_v63, %v1209_v49 }
 0x5db   :  { %v4771_v14 = vpop.eup %4770  ;;  %4794 = vtanh.f32 %v2353_v9 }
 0x5dc   :  { %4796 = vrcp.f32 %v2400_v27  ;;  %v2398_v26 = vadd.f32 1.0, %v4771_v14 }
 0x5dd   :  { %v4773_v1 = vpop.eup %4772  ;;  %4798 = vtanh.f32 %v2356_v48 }
 0x5de   :  { %v4775_v47 = vpop.eup %4774  ;;  %4800 = vrcp.f32 %v2398_v26 }
 0x5df   :  { %v4777_v51 = vpop.eup %4776  ;;  %4802 = vtanh.f32 %v2354_v19  ;;  %v2403_v39 = vadd.f32 1.0, %v4775_v47 }
 0x5e0   :  { %v4779_v18 = vpop.eup %4778 }
 0x5e1   :  { %v4781_v22 = vpop.eup %4780  ;;  %v2401_v41 = vadd.f32 1.0, %v4779_v18  ;;  %4804 = vrcp.f32 %v2403_v39 }
 0x5e2   :  { %v4783_v34 = vpop.eup %4782 }
 0x5e3   :  { %v4785_v8 = vpop.eup %4784  ;;  %v2404_v3 = vadd.f32 1.0, %v4783_v34  ;;  %4806 = vrcp.f32 %v2401_v41  ;;  %v6945_v41 = vld [vmem:[#allocation10_spill] sm:$0xff] }
 0x5e4   :  { %v4787_v46 = vpop.eup %4786 }
 0x5e5   :  { %v4789_v33 = vpop.eup %4788  ;;  %4808 = vrcp.f32 %v2404_v3  ;;  %v2402_v20 = vadd.f32 1.0, %v4787_v46 }
 0x5e6   :  { %v4791_v11 = vpop.eup %4790  ;;  %v2435_v29 = vmul.f32 %v4789_v33, %v6208_v23 }
 0x5e7   :  { %v4793_v7 = vpop.eup %4792  ;;  %v2439_v17 = vmul.f32 %v4791_v11, %v4773_v1  ;;  %v6944_v11 = vld [vmem:[#allocation4_spill] sm:$0xff] }
 0x5e8   :  { %v4795_v58 = vpop.eup %4794  ;;  %v2433_v38 = vmul.f32 %v4793_v7, %v6211_v0  ;;  %v1147_v39 = vadd.f32 %v6944_v11, %v5788_v36 }
 0x5e9   :  { %v4797_v12 = vpop.eup %4796  ;;  %v6272_v37 = vadd.f32 %v2439_v17, %v2435_v29  ;;  %v2437_v30 = vmul.f32 %v4795_v58, %v4777_v51  ;;  %v1161_v17 = vadd.f32 %v6945_v41, %v5778_v52 }
 0x5ea   :  { %v4799_v21 = vpop.eup %4798  ;;  %v2436_v2 = vmul.f32 %v4797_v12, %v6215_v25  ;;  %v6946_v12 = vld [vmem:[#allocation6_spill] sm:$0xff] }
 0x5eb   :  { %v4801_v13 = vpop.eup %4800  ;;  %v6275_v9 = vadd.f32 %v2437_v30, %v2433_v38  ;;  %v2440_v23 = vmul.f32 %v4799_v21, %v4781_v22  ;;  %4810 = vtanh.f32 %v6272_v37  ;;  %v1151_v30 = vadd.f32 %v6946_v12, %v5794_v44 }
 0x5ec   :  { %v4803_v16 = vpop.eup %4802  ;;  %v2434_v31 = vmul.f32 %v4801_v13, %v6219_v15  ;;  %v6947_v13 = vld [vmem:[#allocation16_spill] sm:$0xff] }
 0x5ed   :  { %v6279_v0 = vadd.f32 %v2440_v23, %v2436_v2  ;;  %v2438_v62 = vmul.f32 %v4803_v16, %v4785_v8  ;;  %4812 = vtanh.f32 %v6275_v9  ;;  %v6943_v8 = vld [vmem:[#allocation8_spill] sm:$0xff]  ;;  %v1177_v23 = vadd.f32 %v6947_v13, %v5774_v50  ;;  %v6954_v13 = vld [vmem:[#allocation22_spill] sm:$0xff] }
 0x5ee   :  { %v4805_v49 = vpop.eup %4804  ;;  %v1157_v46 = vadd.f32 %v6943_v8, %v5768_v59  ;;  %v6951_v8 = vld [vmem:[#allocation24_spill] sm:$0xff] }
 0x5ef   :  { %4814 = vtanh.f32 %v6279_v0  ;;  %v6283_v25 = vadd.f32 %v2438_v62, %v2434_v31  ;;  %v6948_v62 = vld [vmem:[#allocation12_spill] sm:$0xff] }
 0x5f0   :  { %4816 = vrcp.f32 %v2402_v20  ;;  %v4807_v48 = vpop.eup %4806 }
 0x5f1   :  { %4818 = vtanh.f32 %v6283_v25 }
 0x5f2   :  { %v4809_v63 = vpop.eup %4808 }
 0x5f8   :  { %v4811_v27 = vpop.eup %4810 }
 0x5f9   :  { %v2451_v26 = vmul.f32 %v4811_v27, %v4805_v49  ;;  %v1167_v49 = vadd.f32 %v6948_v62, %v5796_v54 }
 0x5fa   :  { %v4813_v14 = vpop.eup %4812 }
 0x5fb   :  { %v2449_v18 = vmul.f32 %v4813_v14, %v4807_v48  ;;  %v6949_v14 = vld [vmem:[#allocation18_spill] sm:$0xff] }
 0x5fc   :  { %v4815_v15 = vpop.eup %4814 }
 0x5fd   :  { %v4817_v19 = vpop.eup %4816  ;;  %v2452_v1 = vmul.f32 %v4815_v15, %v4809_v63  ;;  %v1181_v15 = vadd.f32 %v6949_v14, %v5784_v42 }
 0x5fe   :  { %v4819_v47 = vpop.eup %4818 }
 0x5ff   :  { %v2454_v51 = vpack.c.bf16 %v2452_v1, %v2451_v26  ;;  %v2450_v22 = vmul.f32 %v4819_v47, %v4817_v19  ;;  %v6950_v47 = vld [vmem:[#allocation14_spill] sm:$0xff] }
 0x601   :  { %4272 = vmatprep.subr.bf16.mxu1 %v2454_v51  ;;  %v2453_v34 = vpack.c.bf16 %v2450_v22, %v2449_v18 }
 0x602   :  { %4273 = vmatpush3.bf16.msra.mxu1 %v2454_v51  ;;  %v1171_v51 = vadd.f32 %v6950_v47, %v5804_v57 }
 0x603   :  { %4274 = vmatprep.subr.bf16.mxu1 %v2453_v34 }
 0x606   :  { %4275 = vmatpush3.bf16.msra.mxu1 %v2453_v34 }
 0x609   :  { %4277 = vmatmul.mubr.msk.bf16.vlgmr.msra.gmra.mxu1 %vm667_vm0, %v6121_v43 }
 0x60a   :  { %4280 = vmatprep.mubr.msk.bf16.mxu1 %vm667_vm0, %v6128_v28 }
 0x611   :  { %4281 = vmatmul.mubr.msk.bf16.gmra.mxu1 %vm667_vm0, %v6135_v53 }
 0x612   :  { %4284 = vmatprep.mubr.msk.bf16.mxu1 %vm667_vm0, %v6142_v32 }
 0x619   :  { %4285 = vmatmul.mubr.msk.bf16.gmra.mxu1 %vm667_vm0, %v6149_v55 }
 0x61a   :  { %4288 = vmatprep.mubr.msk.bf16.mxu1 %vm667_vm0, %v6156_v60 }
 0x621   :  { %4289 = vmatmul.mubr.msk.bf16.gmra.mxu1 %vm667_vm0, %v6163_v40 }
 0x622   :  { %4316 = vmatprep.mubr.msk.bf16.mxu1 %vm667_vm0, %v6170_v61 }
 0x6c9   :  { %v4278_v33 = vpop.f32.mrf.mxu1 }
 0x6ca   :  { %v2554_v29 = vadd.f32 %v4278_v33, %v1157_v46  ;;  %v1197_v46 = vadd.f32 %v6951_v8, %v5806_v56 }
 0x6cb   :  { %v2489_v7 = vpop.f32.mrf.mxu1 }
 0x6cc   :  { %v3869_v58 = vmul.f32 -1.442695, %v2554_v29  ;;  %v2552_v3 = vadd.f32 %v2489_v7, %v1147_v39  ;;  %v6952_v29 = vld [vmem:[#allocation20_spill] sm:$0xff] }
 0x6cd   :  { %v4279_v38 = vpop.f32.mrf.mxu1  ;;  %v1187_v7 = vadd.f32 %v6952_v29, %v5826_v10 }
 0x6ce   :  { %4820 = vpow2.f32 %v3869_v58  ;;  %v3867_v61 = vmul.f32 -1.442695, %v2552_v3  ;;  %v2555_v21 = vadd.f32 %v4279_v38, %v1161_v17  ;;  %v6953_v3 = vld [vmem:[#allocation26_spill] sm:$0xff] }
 0x6cf   :  { %v2492_v2 = vpop.f32.mrf.mxu1  ;;  %v1201_v38 = vadd.f32 %v6953_v3, %v5812_v6  ;;  %v6958_v3 = vld [vmem:[#allocation30_spill] sm:$0xff] }
 0x6d0   :  { %4822 = vpow2.f32 %v3867_v61  ;;  %v3870_v16 = vmul.f32 -1.442695, %v2555_v21  ;;  %v2553_v20 = vadd.f32 %v2492_v2, %v1151_v30 }
 0x6d1   :  { %v4282_v31 = vpop.f32.mrf.mxu1 }
 0x6d2   :  { %4824 = vpow2.f32 %v3870_v16  ;;  %v3868_v48 = vmul.f32 -1.442695, %v2553_v20  ;;  %v2558_v63 = vadd.f32 %v4282_v31, %v1177_v23  ;;  %v1191_v23 = vadd.f32 %v6954_v13, %v5834_v4 }
 0x6d3   :  { %v2505_v27 = vpop.f32.mrf.mxu1 }
 0x6d4   :  { %4826 = vpow2.f32 %v3868_v48  ;;  %v3873_v19 = vmul.f32 -1.442695, %v2558_v63  ;;  %v2556_v26 = vadd.f32 %v2505_v27, %v1167_v49 }
 0x6d5   :  { %v4283_v1 = vpop.f32.mrf.mxu1 }
 0x6d6   :  { %4828 = vpow2.f32 %v3873_v19  ;;  %v3871_v18 = vmul.f32 -1.442695, %v2556_v26  ;;  %v2559_v22 = vadd.f32 %v4283_v1, %v1181_v15  ;;  %v6955_v19 = vld [vmem:[#allocation32_spill] sm:$0xff] }
 0x6d7   :  { %v2508_v34 = vpop.f32.mrf.mxu1  ;;  %v1217_v26 = vadd.f32 %v6955_v19, %v5816_v35 }
 0x6d8   :  { %4830 = vpow2.f32 %v3871_v18  ;;  %v3874_v33 = vmul.f32 -1.442695, %v2559_v22  ;;  %v2557_v11 = vadd.f32 %v2508_v34, %v1171_v51  ;;  %v6956_v22 = vld [vmem:[#allocation28_spill] sm:$0xff] }
 0x6d9   :  { %v4286_v39 = vpop.f32.mrf.mxu1  ;;  %v1207_v34 = vadd.f32 %v6956_v22, %v5842_v24 }
 0x6da   :  { %4832 = vpow2.f32 %v3874_v33  ;;  %v3872_v41 = vmul.f32 -1.442695, %v2557_v11  ;;  %v2562_v17 = vadd.f32 %v4286_v39, %v1197_v46  ;;  %v6957_v39 = vld [vmem:[#allocation34_spill] sm:$0xff] }
 0x6db   :  { %v4821_v58 = vpop.eup %4820  ;;  %v2521_v12 = vpop.f32.mrf.mxu1  ;;  %v1221_v29 = vadd.f32 %v6957_v39, %v5822_v45 }
 0x6dc   :  { %v2606_v30 = vadd.f32 1.0, %v4821_v58  ;;  %4834 = vpow2.f32 %v3872_v41  ;;  %v3877_v61 = vmul.f32 -1.442695, %v2562_v17  ;;  %v2560_v21 = vadd.f32 %v2521_v12, %v1187_v7 }
 0x6dd   :  { %v4823_v2 = vpop.eup %4822  ;;  %v4287_v16 = vpop.f32.mrf.mxu1 }
 0x6de   :  { %4836 = vrcp.f32 %v2606_v30  ;;  %v2604_v20 = vadd.f32 1.0, %v4823_v2  ;;  %v3875_v31 = vmul.f32 -1.442695, %v2560_v21  ;;  %v2563_v62 = vadd.f32 %v4287_v16, %v1201_v38 }
 0x6df   :  { %v4825_v49 = vpop.eup %4824  ;;  %4838 = vpow2.f32 %v3877_v61  ;;  %v2524_v48 = vpop.f32.mrf.mxu1  ;;  %v1211_v38 = vadd.f32 %v6958_v3, %v6902_v5 }
 0x6e0   :  { %4840 = vrcp.f32 %v2604_v20  ;;  %v2607_v63 = vadd.f32 1.0, %v4825_v49  ;;  %v3878_v27 = vmul.f32 -1.442695, %v2563_v62  ;;  %v2561_v14 = vadd.f32 %v2524_v48, %v1191_v23 }
 0x6e1   :  { %v4827_v15 = vpop.eup %4826  ;;  %4842 = vpow2.f32 %v3875_v31  ;;  %v4290_v1 = vpop.f32.mrf.mxu1 }
 0x6e2   :  { %4844 = vrcp.f32 %v2607_v63  ;;  %v2605_v47 = vadd.f32 1.0, %v4827_v15  ;;  %v3876_v51 = vmul.f32 -1.442695, %v2561_v14  ;;  %v2566_v8 = vadd.f32 %v4290_v1, %v1217_v26 }
 0x6e3   :  { %v4829_v18 = vpop.eup %4828  ;;  %4846 = vpow2.f32 %v3878_v27  ;;  %v2537_v46 = vpop.f32.mrf.mxu1 }
 0x6e4   :  { %4848 = vrcp.f32 %v2605_v47  ;;  %v2610_v33 = vadd.f32 1.0, %v4829_v18  ;;  %v2564_v7 = vadd.f32 %v2537_v46, %v1207_v34 }
 0x6e5   :  { %v4831_v11 = vpop.eup %4830  ;;  %4850 = vpow2.f32 %v3876_v51  ;;  %v4291_v41 = vpop.f32.mrf.mxu1 }
 0x6e6   :  { %4852 = vrcp.f32 %v2610_v33  ;;  %v2608_v17 = vadd.f32 1.0, %v4831_v11  ;;  %v2567_v12 = vadd.f32 %v4291_v41, %v1221_v29 }
 0x6e7   :  { %v4833_v58 = vpop.eup %4832  ;;  %4854 = vtanh.f32 %v2566_v8  ;;  %v2540_v30 = vpop.f32.mrf.mxu1 }
 0x6e8   :  { %4856 = vrcp.f32 %v2608_v17  ;;  %v2611_v61 = vadd.f32 1.0, %v4833_v58  ;;  %v2565_v2 = vadd.f32 %v2540_v30, %v1211_v38 }
 0x6e9   :  { %v4835_v21 = vpop.eup %4834  ;;  %4858 = vtanh.f32 %v2564_v7 }
 0x6ea   :  { %4860 = vrcp.f32 %v2611_v61  ;;  %v2609_v13 = vadd.f32 1.0, %v4835_v21 }
 0x6eb   :  { %v4837_v23 = vpop.eup %4836  ;;  %4862 = vtanh.f32 %v2567_v12 }
 0x6ec   :  { %v4839_v16 = vpop.eup %4838  ;;  %4864 = vrcp.f32 %v2609_v13 }
 0x6ed   :  { %v4841_v20 = vpop.eup %4840  ;;  %4866 = vtanh.f32 %v2565_v2  ;;  %v2614_v15 = vadd.f32 1.0, %v4839_v16 }
 0x6ee   :  { %v4843_v31 = vpop.eup %4842 }
 0x6ef   :  { %v4845_v62 = vpop.eup %4844  ;;  %v2612_v1 = vadd.f32 1.0, %v4843_v31  ;;  %4868 = vrcp.f32 %v2614_v15 }
 0x6f0   :  { %v4847_v49 = vpop.eup %4846 }
 0x6f1   :  { %v4849_v48 = vpop.eup %4848  ;;  %v2615_v18 = vadd.f32 1.0, %v4847_v49  ;;  %4870 = vrcp.f32 %v2612_v1 }
 0x6f2   :  { %v4851_v63 = vpop.eup %4850 }
 0x6f3   :  { %v4853_v27 = vpop.eup %4852  ;;  %4872 = vrcp.f32 %v2615_v18  ;;  %v2613_v41 = vadd.f32 1.0, %v4851_v63 }
 0x6f4   :  { %v4855_v14 = vpop.eup %4854  ;;  %v2646_v19 = vmul.f32 %v4853_v27, %v6272_v37 }
 0x6f5   :  { %v4857_v26 = vpop.eup %4856  ;;  %v2650_v47 = vmul.f32 %v4855_v14, %v4837_v23 }
 0x6f6   :  { %v4859_v51 = vpop.eup %4858  ;;  %v2644_v22 = vmul.f32 %v4857_v26, %v6275_v9 }
 0x6f7   :  { %v4861_v34 = vpop.eup %4860  ;;  %v6336_v8 = vadd.f32 %v2650_v47, %v2646_v19  ;;  %v2648_v46 = vmul.f32 %v4859_v51, %v4841_v20  ;;  %v6963_v51 = vld [vmem:[#allocation71_spill] sm:$0xff] }
 0x6f8   :  { %v4863_v33 = vpop.eup %4862  ;;  %v2647_v11 = vmul.f32 %v4861_v34, %v6279_v0  ;;  %v1288_v18 = vadd.f32 %v6963_v51, %v5774_v50 }
 0x6f9   :  { %v4865_v39 = vpop.eup %4864  ;;  %v6339_v29 = vadd.f32 %v2648_v46, %v2644_v22  ;;  %v2651_v37 = vmul.f32 %v4863_v33, %v4845_v62  ;;  %4874 = vtanh.f32 %v6336_v8  ;;  %v6964_v33 = vld [vmem:[#allocation67_spill] sm:$0xff] }
 0x6fa   :  { %v4867_v7 = vpop.eup %4866  ;;  %v2645_v17 = vmul.f32 %v4865_v39, %v6283_v25 }
 0x6fb   :  { %v6343_v9 = vadd.f32 %v2651_v37, %v2647_v11  ;;  %v2649_v58 = vmul.f32 %v4867_v7, %v4849_v48  ;;  %4876 = vtanh.f32 %v6339_v29  ;;  %v1278_v11 = vadd.f32 %v6964_v33, %v5796_v54  ;;  %v6971_v33 = vld [vmem:[#allocation87_spill] sm:$0xff] }
 0x6fc   :  { %v4869_v3 = vpop.eup %4868 }
 0x6fd   :  { %4878 = vtanh.f32 %v6343_v9  ;;  %v6347_v0 = vadd.f32 %v2649_v58, %v2645_v17 }
 0x6fe   :  { %4880 = vrcp.f32 %v2613_v41  ;;  %v4871_v38 = vpop.eup %4870  ;;  %v6965_v41 = vld [vmem:[#allocation73_spill] sm:$0xff] }
 0x6ff   :  { %4882 = vtanh.f32 %v6347_v0  ;;  %v1292_v17 = vadd.f32 %v6965_v41, %v5784_v42 }
 0x700   :  { %v4873_v12 = vpop.eup %4872 }
 0x706   :  { %v4875_v30 = vpop.eup %4874 }
 0x707   :  { %v2662_v2 = vmul.f32 %v4875_v30, %v4869_v3 }
 0x708   :  { %v4877_v61 = vpop.eup %4876 }
 0x709   :  { %v2660_v20 = vmul.f32 %v4877_v61, %v4871_v38 }
 0x70a   :  { %v4879_v25 = vpop.eup %4878 }
 0x70b   :  { %v4881_v21 = vpop.eup %4880  ;;  %v2663_v13 = vmul.f32 %v4879_v25, %v4873_v12  ;;  %v6966_v12 = vld [vmem:[#allocation69_spill] sm:$0xff] }
 0x70c   :  { %v4883_v23 = vpop.eup %4882  ;;  %v1282_v30 = vadd.f32 %v6966_v12, %v5804_v57 }
 0x70d   :  { %v2665_v16 = vpack.c.bf16 %v2663_v13, %v2662_v2  ;;  %v2661_v31 = vmul.f32 %v4883_v23, %v4881_v21  ;;  %v6967_v2 = vld [vmem:[#allocation79_spill] sm:$0xff] }
 0x70e   :  { %v1308_v13 = vadd.f32 %v6967_v2, %v5806_v56 }
 0x70f   :  { %4292 = vmatprep.subr.bf16.mxu0 %v2665_v16  ;;  %v2664_v62 = vpack.c.bf16 %v2661_v31, %v2660_v20  ;;  %v6968_v31 = vld [vmem:[#allocation75_spill] sm:$0xff] }
 0x710   :  { %4293 = vmatpush3.bf16.msra.mxu0 %v2665_v16 }
 0x711   :  { %4294 = vmatprep.subr.bf16.mxu0 %v2664_v62 }
 0x714   :  { %4295 = vmatpush3.bf16.msra.mxu0 %v2664_v62  ;;  %v1298_v62 = vadd.f32 %v6968_v31, %v5826_v10 }
 0x717   :  { %4297 = vmatmul.mubr.msk.bf16.vlgmr.msra.gmra.mxu0 %vm667_vm0, %v6121_v43  ;;  %v6959_v43 = vld [vmem:[#allocation63_spill] sm:$0xff] }
 0x718   :  { %4300 = vmatprep.mubr.msk.bf16.mxu0 %vm667_vm0, %v6128_v28  ;;  %v1268_v49 = vadd.f32 %v6959_v43, %v5768_v59  ;;  %v6960_v28 = vld [vmem:[#allocation59_spill] sm:$0xff] }
 0x719   :  { %v1258_v63 = vadd.f32 %v6960_v28, %v5788_v36  ;;  %v6969_v28 = vld [vmem:[#allocation81_spill] sm:$0xff] }
 0x71f   :  { %4301 = vmatmul.mubr.msk.bf16.gmra.mxu0 %vm667_vm0, %v6135_v53 }
 0x720   :  { %4304 = vmatprep.mubr.msk.bf16.mxu0 %vm667_vm0, %v6142_v32  ;;  %v6961_v32 = vld [vmem:[#allocation65_spill] sm:$0xff] }
 0x721   :  { %v1272_v14 = vadd.f32 %v6961_v32, %v5778_v52 }
 0x727   :  { %4305 = vmatmul.mubr.msk.bf16.gmra.mxu0 %vm667_vm0, %v6149_v55 }
 0x728   :  { %4308 = vmatprep.mubr.msk.bf16.mxu0 %vm667_vm0, %v6156_v60  ;;  %v6962_v60 = vld [vmem:[#allocation61_spill] sm:$0xff] }
 0x729   :  { %v1262_v26 = vadd.f32 %v6962_v60, %v5794_v44 }
 0x72f   :  { %4309 = vmatmul.mubr.msk.bf16.gmra.mxu0 %vm667_vm0, %v6163_v40 }
 0x7d7   :  { %v4298_v48 = vpop.f32.mrf.mxu0 }
 0x7d8   :  { %v2765_v53 = vadd.f32 %v4298_v48, %v1268_v49 }
 0x7d9   :  { %v2700_v27 = vpop.f32.mrf.mxu0 }
 0x7da   :  { %v3889_v15 = vmul.f32 -1.442695, %v2765_v53  ;;  %v2763_v55 = vadd.f32 %v2700_v27, %v1258_v63  ;;  %v1312_v63 = vadd.f32 %v6969_v28, %v5812_v6 }
 0x7db   :  { %v4299_v19 = vpop.f32.mrf.mxu0 }
 0x7dc   :  { %4884 = vpow2.f32 %v3889_v15  ;;  %v3887_v40 = vmul.f32 -1.442695, %v2763_v55  ;;  %v2766_v1 = vadd.f32 %v4299_v19, %v1272_v14  ;;  %v6970_v55 = vld [vmem:[#allocation77_spill] sm:$0xff] }
 0x7dd   :  { %v2703_v47 = vpop.f32.mrf.mxu0  ;;  %v1302_v19 = vadd.f32 %v6970_v55, %v5834_v4 }
 0x7de   :  { %4886 = vpow2.f32 %v3887_v40  ;;  %v3890_v22 = vmul.f32 -1.442695, %v2766_v1  ;;  %v2764_v34 = vadd.f32 %v2703_v47, %v1262_v26 }
 0x7df   :  { %v4302_v46 = vpop.f32.mrf.mxu0 }
 0x7e0   :  { %4888 = vpow2.f32 %v3890_v22  ;;  %v3888_v39 = vmul.f32 -1.442695, %v2764_v34  ;;  %v2769_v37 = vadd.f32 %v4302_v46, %v1288_v18 }
 0x7e1   :  { %v2716_v7 = vpop.f32.mrf.mxu0 }
 0x7e2   :  { %4890 = vpow2.f32 %v3888_v39  ;;  %v3893_v58 = vmul.f32 -1.442695, %v2769_v37  ;;  %v2767_v3 = vadd.f32 %v2716_v7, %v1278_v11  ;;  %v1328_v11 = vadd.f32 %v6971_v33, %v5816_v35 }
 0x7e3   :  { %v4303_v38 = vpop.f32.mrf.mxu0 }
 0x7e4   :  { %4892 = vpow2.f32 %v3893_v58  ;;  %v3891_v61 = vmul.f32 -1.442695, %v2767_v3  ;;  %v2770_v25 = vadd.f32 %v4303_v38, %v1292_v17  ;;  %v6972_v17 = vld [vmem:[#allocation83_spill] sm:$0xff] }
 0x7e5   :  { %v2719_v21 = vpop.f32.mrf.mxu0  ;;  %v1318_v58 = vadd.f32 %v6972_v17, %v5842_v24 }
 0x7e6   :  { %4894 = vpow2.f32 %v3891_v61  ;;  %v3894_v23 = vmul.f32 -1.442695, %v2770_v25  ;;  %v2768_v16 = vadd.f32 %v2719_v21, %v1282_v30  ;;  %v6973_v61 = vld [vmem:[#allocation89_spill] sm:$0xff] }
 0x7e7   :  { %v4306_v20 = vpop.f32.mrf.mxu0  ;;  %v1332_v25 = vadd.f32 %v6973_v61, %v5822_v45 }
 0x7e8   :  { %4896 = vpow2.f32 %v3894_v23  ;;  %v3892_v43 = vmul.f32 -1.442695, %v2768_v16  ;;  %v2773_v49 = vadd.f32 %v4306_v20, %v1308_v13  ;;  %v6974_v16 = vld [vmem:[#allocation85_spill] sm:$0xff] }
 0x7e9   :  { %v4885_v48 = vpop.eup %4884  ;;  %v2732_v53 = vpop.f32.mrf.mxu0  ;;  %v1322_v20 = vadd.f32 %v6974_v16, %v6902_v5 }
 0x7ea   :  { %v2817_v27 = vadd.f32 1.0, %v4885_v48  ;;  %4898 = vpow2.f32 %v3892_v43  ;;  %v3897_v32 = vmul.f32 -1.442695, %v2773_v49  ;;  %v2771_v14 = vadd.f32 %v2732_v53, %v1298_v62 }
 0x7eb   :  { %v4887_v15 = vpop.eup %4886  ;;  %v4307_v60 = vpop.f32.mrf.mxu0 }
 0x7ec   :  { %4900 = vrcp.f32 %v2817_v27  ;;  %v2815_v26 = vadd.f32 1.0, %v4887_v15  ;;  %v3895_v40 = vmul.f32 -1.442695, %v2771_v14  ;;  %v2774_v1 = vadd.f32 %v4307_v60, %v1312_v63 }
 0x7ed   :  { %v4889_v47 = vpop.eup %4888  ;;  %4902 = vpow2.f32 %v3897_v32  ;;  %v2735_v51 = vpop.f32.mrf.mxu0 }
 0x7ee   :  { %4904 = vrcp.f32 %v2815_v26  ;;  %v2818_v18 = vadd.f32 1.0, %v4889_v47  ;;  %v3898_v22 = vmul.f32 -1.442695, %v2774_v1  ;;  %v2772_v34 = vadd.f32 %v2735_v51, %v1302_v19 }
 0x7ef   :  { %v4891_v46 = vpop.eup %4890  ;;  %4906 = vpow2.f32 %v3895_v40  ;;  %v4310_v39 = vpop.f32.mrf.mxu0 }
 0x7f0   :  { %4908 = vrcp.f32 %v2818_v18  ;;  %v2816_v37 = vadd.f32 1.0, %v4891_v46  ;;  %v3896_v7 = vmul.f32 -1.442695, %v2772_v34  ;;  %v2777_v3 = vadd.f32 %v4310_v39, %v1328_v11 }
 0x7f1   :  { %v4893_v41 = vpop.eup %4892  ;;  %4910 = vpow2.f32 %v3898_v22  ;;  %v2748_v38 = vpop.f32.mrf.mxu0 }
 0x7f2   :  { %4912 = vrcp.f32 %v2816_v37  ;;  %v2821_v12 = vadd.f32 1.0, %v4893_v41  ;;  %v2775_v21 = vadd.f32 %v2748_v38, %v1318_v58 }
 0x7f3   :  { %v4895_v30 = vpop.eup %4894  ;;  %4914 = vpow2.f32 %v3896_v7  ;;  %v4311_v2 = vpop.f32.mrf.mxu0 }
 0x7f4   :  { %4916 = vrcp.f32 %v2821_v12  ;;  %v2819_v13 = vadd.f32 1.0, %v4895_v30  ;;  %v2778_v31 = vadd.f32 %v4311_v2, %v1332_v25 }
 0x7f5   :  { %v4897_v23 = vpop.eup %4896  ;;  %4918 = vtanh.f32 %v2777_v3  ;;  %v2751_v62 = vpop.f32.mrf.mxu0 }
 0x7f6   :  { %4920 = vrcp.f32 %v2819_v13  ;;  %v2822_v43 = vadd.f32 1.0, %v4897_v23  ;;  %v2776_v48 = vadd.f32 %v2751_v62, %v1322_v20 }
 0x7f7   :  { %v4899_v49 = vpop.eup %4898  ;;  %4922 = vtanh.f32 %v2775_v21 }
 0x7f8   :  { %4924 = vrcp.f32 %v2822_v43  ;;  %v2820_v28 = vadd.f32 1.0, %v4899_v49 }
 0x7f9   :  { %v4901_v63 = vpop.eup %4900  ;;  %4926 = vtanh.f32 %v2778_v31 }
 0x7fa   :  { %v4903_v53 = vpop.eup %4902  ;;  %4928 = vrcp.f32 %v2820_v28  ;;  %v5085_v28 = vld [vmem:[%s6806_s3 + $0x10] sm:$0xff]  }
 0x7fb   :  { %v4905_v27 = vpop.eup %4904  ;;  %4930 = vtanh.f32 %v2776_v48  ;;  %v2825_v40 = vadd.f32 1.0, %v4903_v53  ;;  %v5084_v48 = vld [vmem:[%s6806_s3 + $0x8] sm:$0xff]   ;;  %v5087_v53 = vld [vmem:[%s6806_s3 + $0x20] sm:$0xff]  }
 0x7fc   :  { %v4907_v32 = vpop.eup %4906 }
 0x7fd   :  { %v4909_v14 = vpop.eup %4908  ;;  %v2823_v51 = vadd.f32 1.0, %v4907_v32  ;;  %4932 = vrcp.f32 %v2825_v40  ;;  %v5089_v32 = vld [vmem:[%s6806_s3 + $0x30] sm:$0xff]  }
 0x7fe   :  { %v4911_v15 = vpop.eup %4910 }
 0x7ff   :  { %v4913_v55 = vpop.eup %4912  ;;  %v2826_v34 = vadd.f32 1.0, %v4911_v15  ;;  %4934 = vrcp.f32 %v2823_v51  ;;  %v6975_v15 = vld [vmem:[#allocation64_spill] sm:$0xff] }
 0x800   :  { %v4915_v19 = vpop.eup %4914 }
 0x801   :  { %v4917_v60 = vpop.eup %4916  ;;  %4936 = vrcp.f32 %v2826_v34  ;;  %v2824_v3 = vadd.f32 1.0, %v4915_v19 }
 0x802   :  { %v4919_v26 = vpop.eup %4918  ;;  %v2857_v1 = vmul.f32 %v4917_v60, %v6336_v8  ;;  %v6976_v60 = vld [vmem:[#allocation60_spill] sm:$0xff] }
 0x803   :  { %v4921_v47 = vpop.eup %4920  ;;  %v2861_v18 = vmul.f32 %v4919_v26, %v4901_v63  ;;  %v5086_v63 = vld [vmem:[%s6806_s3 + $0x18] sm:$0xff]   ;;  %v1260_v26 = vadd.f32 %v6976_v60, %v5788_v36 }
 0x804   :  { %v4923_v22 = vpop.eup %4922  ;;  %v2855_v46 = vmul.f32 %v4921_v47, %v6339_v29  ;;  %v6977_v47 = vld [vmem:[#allocation66_spill] sm:$0xff] }
 0x805   :  { %v4925_v33 = vpop.eup %4924  ;;  %v6398_v11 = vadd.f32 %v2861_v18, %v2857_v1  ;;  %v2859_v39 = vmul.f32 %v4923_v22, %v4905_v27  ;;  %v5088_v27 = vld [vmem:[%s6806_s3 + $0x28] sm:$0xff]   ;;  %v1274_v51 = vadd.f32 %v6977_v47, %v5778_v52 }
 0x806   :  { %v4927_v37 = vpop.eup %4926  ;;  %v2858_v7 = vmul.f32 %v4925_v33, %v6343_v9 }
 0x807   :  { %v4929_v41 = vpop.eup %4928  ;;  %v6401_v17 = vadd.f32 %v2859_v39, %v2855_v46  ;;  %v2862_v8 = vmul.f32 %v4927_v37, %v4909_v14  ;;  %4938 = vtanh.f32 %v6398_v11  ;;  %v5090_v14 = vld [vmem:[%s6806_s3 + $0x38] sm:$0xff]   ;;  %v6978_v46 = vld [vmem:[#allocation62_spill] sm:$0xff] }
 0x808   :  { %v4931_v58 = vpop.eup %4930  ;;  %v2856_v38 = vmul.f32 %v4929_v41, %v6347_v0  ;;  %v1264_v33 = vadd.f32 %v6978_v46, %v5794_v44  ;;  %v6981_v44 = vld [vmem:[#allocation74_spill] sm:$0xff] }
 0x809   :  { %v6405_v29 = vadd.f32 %v2862_v8, %v2858_v7  ;;  %v2860_v12 = vmul.f32 %v4931_v58, %v4913_v55  ;;  %4940 = vtanh.f32 %v6401_v17  ;;  %v1270_v55 = vadd.f32 %v6975_v15, %v5768_v59  ;;  %v6979_v59 = vld [vmem:[#allocation72_spill] sm:$0xff] }
 0x80a   :  { %v4933_v30 = vpop.eup %4932  ;;  %v1290_v41 = vadd.f32 %v6979_v59, %v5774_v50  ;;  %v6982_v50 = vld [vmem:[#allocation70_spill] sm:$0xff] }
 0x80b   :  { %4942 = vtanh.f32 %v6405_v29  ;;  %v6409_v9 = vadd.f32 %v2860_v12, %v2856_v38 }
 0x80c   :  { %4944 = vrcp.f32 %v2824_v3  ;;  %v4935_v61 = vpop.eup %4934  ;;  %v6980_v3 = vld [vmem:[#allocation68_spill] sm:$0xff] }
 0x80d   :  { %4946 = vtanh.f32 %v6409_v9  ;;  %v1280_v52 = vadd.f32 %v6980_v3, %v5796_v54  ;;  %v6983_v54 = vld [vmem:[#allocation80_spill] sm:$0xff]  ;;  %v6989_v3 = vld [vmem:[#allocation90_spill] sm:$0xff] }
 0x80e   :  { %v4937_v25 = vpop.eup %4936 }
 0x814   :  { %v4939_v21 = vpop.eup %4938 }
 0x815   :  { %v2873_v23 = vmul.f32 %v4939_v21, %v4933_v30 }
 0x816   :  { %v4941_v2 = vpop.eup %4940 }
 0x817   :  { %v2871_v62 = vmul.f32 %v4941_v2, %v4935_v61  ;;  %v1294_v61 = vadd.f32 %v6981_v44, %v5784_v42  ;;  %v6984_v42 = vld [vmem:[#allocation76_spill] sm:$0xff]  ;;  %v6990_v44 = vld [vmem:[#allocation86_spill] sm:$0xff] }
 0x818   :  { %v4943_v0 = vpop.eup %4942 }
 0x819   :  { %v4945_v13 = vpop.eup %4944  ;;  %v2874_v16 = vmul.f32 %v4943_v0, %v4937_v25  ;;  %v1284_v0 = vadd.f32 %v6982_v50, %v5804_v57  ;;  %v6985_v57 = vld [vmem:[#allocation82_spill] sm:$0xff] }
 0x81a   :  { %v4947_v20 = vpop.eup %4946 }
 0x81b   :  { %v2876_v31 = vpack.c.bf16 %v2874_v16, %v2873_v23  ;;  %v2872_v43 = vmul.f32 %v4947_v20, %v4945_v13  ;;  %v1310_v20 = vadd.f32 %v6983_v54, %v5806_v56 }
 0x81d   :  { %4312 = vmatprep.subr.bf16.mxu1 %v2876_v31  ;;  %v2875_v49 = vpack.c.bf16 %v2872_v43, %v2871_v62 }
 0x81e   :  { %4313 = vmatpush3.bf16.msra.mxu1 %v2876_v31 }
 0x81f   :  { %4314 = vmatprep.subr.bf16.mxu1 %v2875_v49 }
 0x822   :  { %4315 = vmatpush3.bf16.msra.mxu1 %v2875_v49  ;;  %v1300_v49 = vadd.f32 %v6984_v42, %v5826_v10 }
 0x825   :  { %4317 = vmatmul.mubr.msk.bf16.vlgmr.msra.gmra.mxu1 %vm667_vm0, %v5084_v48 }
 0x826   :  { %4320 = vmatprep.mubr.msk.bf16.mxu1 %vm667_vm0, %v5085_v28 }
 0x82d   :  { %4321 = vmatmul.mubr.msk.bf16.gmra.mxu1 %vm667_vm0, %v5086_v63 }
 0x82e   :  { %4324 = vmatprep.mubr.msk.bf16.mxu1 %vm667_vm0, %v5087_v53  ;;  %v1314_v53 = vadd.f32 %v6985_v57, %v5812_v6 }
 0x835   :  { %4325 = vmatmul.mubr.msk.bf16.gmra.mxu1 %vm667_vm0, %v5088_v27 }
 0x836   :  { %4328 = vmatprep.mubr.msk.bf16.mxu1 %vm667_vm0, %v5089_v32 }
 0x83d   :  { %4329 = vmatmul.mubr.msk.bf16.gmra.mxu1 %vm667_vm0, %v5090_v14 }
 0x8e5   :  { %v4318_v19 = vpop.f32.mrf.mxu1 }
 0x8e6   :  { %v2976_v40 = vadd.f32 %v4318_v19, %v1270_v55  ;;  %v6986_v55 = vld [vmem:[#allocation78_spill] sm:$0xff] }
 0x8e7   :  { %v2911_v1 = vpop.f32.mrf.mxu1  ;;  %v1304_v19 = vadd.f32 %v6986_v55, %v5834_v4 }
 0x8e8   :  { %v3909_v18 = vmul.f32 -1.442695, %v2976_v40  ;;  %v2974_v22 = vadd.f32 %v2911_v1, %v1260_v26 }
 0x8e9   :  { %v4319_v34 = vpop.f32.mrf.mxu1 }
 0x8ea   :  { %4948 = vpow2.f32 %v3909_v18  ;;  %v3907_v39 = vmul.f32 -1.442695, %v2974_v22  ;;  %v2977_v37 = vadd.f32 %v4319_v34, %v1274_v51  ;;  %v6987_v34 = vld [vmem:[#allocation88_spill] sm:$0xff] }
 0x8eb   :  { %v2914_v7 = vpop.f32.mrf.mxu1  ;;  %v1330_v46 = vadd.f32 %v6987_v34, %v5816_v35 }
 0x8ec   :  { %4950 = vpow2.f32 %v3907_v39  ;;  %v3910_v36 = vmul.f32 -1.442695, %v2977_v37  ;;  %v2975_v8 = vadd.f32 %v2914_v7, %v1264_v33  ;;  %v6988_v7 = vld [vmem:[#allocation84_spill] sm:$0xff] }
 0x8ed   :  { %v4322_v58 = vpop.f32.mrf.mxu1  ;;  %v1320_v59 = vadd.f32 %v6988_v7, %v5842_v24 }
 0x8ee   :  { %4952 = vpow2.f32 %v3910_v36  ;;  %v3908_v38 = vmul.f32 -1.442695, %v2975_v8  ;;  %v2980_v12 = vadd.f32 %v4322_v58, %v1290_v41 }
 0x8ef   :  { %v2927_v30 = vpop.f32.mrf.mxu1 }
 0x8f0   :  { %4954 = vpow2.f32 %v3908_v38  ;;  %v3913_v25 = vmul.f32 -1.442695, %v2980_v12  ;;  %v2978_v21 = vadd.f32 %v2927_v30, %v1280_v52  ;;  %v1334_v52 = vadd.f32 %v6989_v3, %v5822_v45  ;;  %v4494_v3 = vld [vmem:[%s6809_s0 + $0x10] sm:$0xff]  }
 0x8f1   :  { %v4323_v2 = vpop.f32.mrf.mxu1 }
 0x8f2   :  { %4956 = vpow2.f32 %v3913_v25  ;;  %v3911_v13 = vmul.f32 -1.442695, %v2978_v21  ;;  %v2981_v23 = vadd.f32 %v4323_v2, %v1294_v61  ;;  %v1324_v61 = vadd.f32 %v6990_v44, %v6902_v5 }
 0x8f3   :  { %v2930_v16 = vpop.f32.mrf.mxu1 }
 0x8f4   :  { %4958 = vpow2.f32 %v3911_v13  ;;  %v3914_v31 = vmul.f32 -1.442695, %v2981_v23  ;;  %v2979_v62 = vadd.f32 %v2930_v16, %v1284_v0 }
 0x8f5   :  { %v4326_v43 = vpop.f32.mrf.mxu1 }
 0x8f6   :  { %4960 = vpow2.f32 %v3914_v31  ;;  %v3912_v48 = vmul.f32 -1.442695, %v2979_v62  ;;  %v2984_v28 = vadd.f32 %v4326_v43, %v1310_v20 }
 0x8f7   :  { %v4949_v63 = vpop.eup %4948  ;;  %v2943_v27 = vpop.f32.mrf.mxu1 }
 0x8f8   :  { %v3028_v32 = vadd.f32 1.0, %v4949_v63  ;;  %4962 = vpow2.f32 %v3912_v48  ;;  %v3917_v14 = vmul.f32 -1.442695, %v2984_v28  ;;  %v2982_v15 = vadd.f32 %v2943_v27, %v1300_v49 }
 0x8f9   :  { %v4951_v56 = vpop.eup %4950  ;;  %v4327_v60 = vpop.f32.mrf.mxu1 }
 0x8fa   :  { %4964 = vrcp.f32 %v3028_v32  ;;  %v3026_v26 = vadd.f32 1.0, %v4951_v56  ;;  %v3915_v10 = vmul.f32 -1.442695, %v2982_v15  ;;  %v2985_v40 = vadd.f32 %v4327_v60, %v1314_v53 }
 0x8fb   :  { %v4953_v1 = vpop.eup %4952  ;;  %4966 = vpow2.f32 %v3917_v14  ;;  %v2946_v47 = vpop.f32.mrf.mxu1 }
 0x8fc   :  { %4968 = vrcp.f32 %v3026_v26  ;;  %v3029_v51 = vadd.f32 1.0, %v4953_v1  ;;  %v3918_v6 = vmul.f32 -1.442695, %v2985_v40  ;;  %v2983_v18 = vadd.f32 %v2946_v47, %v1304_v19 }
 0x8fd   :  { %v4955_v22 = vpop.eup %4954  ;;  %4970 = vpow2.f32 %v3915_v10  ;;  %v4330_v33 = vpop.f32.mrf.mxu1 }
 0x8fe   :  { %4972 = vrcp.f32 %v3029_v51  ;;  %v3027_v4 = vadd.f32 1.0, %v4955_v22  ;;  %v3916_v39 = vmul.f32 -1.442695, %v2983_v18  ;;  %v2988_v41 = vadd.f32 %v4330_v33, %v1330_v46 }
 0x8ff   :  { %v4957_v37 = vpop.eup %4956  ;;  %4974 = vpow2.f32 %v3918_v6  ;;  %v2959_v36 = vpop.f32.mrf.mxu1 }
 0x900   :  { %4976 = vrcp.f32 %v3027_v4  ;;  %v3032_v8 = vadd.f32 1.0, %v4957_v37  ;;  %v2986_v35 = vadd.f32 %v2959_v36, %v1320_v59  ;;  %v4489_v37 = vld [vmem:[%s6807_s5 + $0x8] sm:$0xff]   ;;  %v4491_v36 = vld [vmem:[%s6807_s5] sm:$0xff]  }
 0x901   :  { %v4959_v58 = vpop.eup %4958  ;;  %4978 = vpow2.f32 %v3916_v39  ;;  %v4331_v38 = vpop.f32.mrf.mxu1  ;;  %v4488_v59 = vld [vmem:[%s6808_s6 + $0x8] sm:$0xff]   ;;  %4352 = vmatprep.subr.bf16.mxu1 %v4489_v37 }
 0x902   :  { %4980 = vrcp.f32 %v3032_v8  ;;  %v3030_v12 = vadd.f32 1.0, %v4959_v58  ;;  %v2989_v24 = vadd.f32 %v4331_v38, %v1334_v52  ;;  %4332 = vmatprep.subr.bf16.mxu0 %v4488_v59  ;;  %4353 = vmatpush3.bf16.msra.mxu1 %v4489_v37  ;;  %v4492_v8 = vld [vmem:[%s6809_s0] sm:$0xff]   ;;  %v4493_v58 = vld [vmem:[%s6809_s0 + $0x8] sm:$0xff]   ;;  %v4495_v52 = vld [vmem:[%s6809_s0 + $0x18] sm:$0xff]  }
 0x903   :  { %v4961_v30 = vpop.eup %4960  ;;  %4982 = vtanh.f32 %v2988_v41  ;;  %v2962_v25 = vpop.f32.mrf.mxu1  ;;  %v4490_v41 = vld [vmem:[%s6808_s6] sm:$0xff]   ;;  %4333 = vmatpush3.bf16.msra.mxu0 %v4488_v59  ;;  %4354 = vmatprep.subr.bf16.mxu1 %v4491_v36  ;;  %v4497_v38 = vld [vmem:[%s6809_s0 + $0x28] sm:$0xff]  }
 0x904   :  { %4984 = vrcp.f32 %v3030_v12  ;;  %v3033_v21 = vadd.f32 1.0, %v4961_v30  ;;  %v2987_v50 = vadd.f32 %v2962_v25, %v1324_v61  ;;  %4334 = vmatprep.subr.bf16.mxu0 %v4490_v41  ;;  %4356 = vmatprep.mubr.msk.bf16.mxu1 %vm667_vm0, %v4492_v8  ;;  %v4498_v12 = vld [vmem:[%s6809_s0 + $0x30] sm:$0xff]   ;;  %v4499_v30 = vld [vmem:[%s6809_s0 + $0x38] sm:$0xff]  }
 0x905   :  { %v4963_v2 = vpop.eup %4962  ;;  %4986 = vtanh.f32 %v2986_v35  ;;  %v4496_v35 = vld [vmem:[%s6809_s0 + $0x20] sm:$0xff]  }
 0x906   :  { %4988 = vrcp.f32 %v3033_v21  ;;  %v3031_v0 = vadd.f32 1.0, %v4963_v2  ;;  %4355 = vmatpush3.bf16.msra.mxu1 %v4491_v36 }
 0x907   :  { %v4965_v45 = vpop.eup %4964  ;;  %4990 = vtanh.f32 %v2989_v24  ;;  %4335 = vmatpush3.bf16.msra.mxu0 %v4490_v41 }
 0x908   :  { %v4967_v13 = vpop.eup %4966  ;;  %4992 = vrcp.f32 %v3031_v0 }
 0x909   :  { %v4969_v23 = vpop.eup %4968  ;;  %4994 = vtanh.f32 %v2987_v50  ;;  %v3036_v42 = vadd.f32 1.0, %v4967_v13  ;;  %4357 = vmatmul.mubr.msk.bf16.vlgmr.msra.gmra.mxu1 %vm667_vm0, %v4493_v58 }
 0x90a   :  { %v4971_v16 = vpop.eup %4970  ;;  %4360 = vmatprep.mubr.msk.bf16.mxu1 %vm667_vm0, %v4494_v3 }
 0x90b   :  { %v4973_v54 = vpop.eup %4972  ;;  %v3034_v57 = vadd.f32 1.0, %v4971_v16  ;;  %4996 = vrcp.f32 %v3036_v42 }
 0x90c   :  { %v4975_v20 = vpop.eup %4974 }
 0x90d   :  { %v4977_v5 = vpop.eup %4976  ;;  %v3037_v56 = vadd.f32 1.0, %v4975_v20 }
 0x90e   :  { %v4979_v31 = vpop.eup %4978 }
 0x90f   :  { %v4981_v62 = vpop.eup %4980 }
 0x910   :  { %v4983_v43 = vpop.eup %4982  ;;  %v3068_v49 = vmul.f32 %v4981_v62, %v6398_v11  ;;  %v3035_v11 = vadd.f32 1.0, %v4979_v31 }
 0x911   :  { %v4985_v48 = vpop.eup %4984  ;;  %v3072_v28 = vmul.f32 %v4983_v43, %v4965_v45  ;;  %4361 = vmatmul.mubr.msk.bf16.gmra.mxu1 %vm667_vm0, %v4495_v52 }
 0x912   :  { %v4987_v63 = vpop.eup %4986  ;;  %v3066_v53 = vmul.f32 %v4985_v48, %v6401_v17  ;;  %4364 = vmatprep.mubr.msk.bf16.mxu1 %vm667_vm0, %v4496_v35 }
 0x913   :  { %v4989_v27 = vpop.eup %4988  ;;  %v3076_v32 = vadd.f32 %v3072_v28, %v3068_v49  ;;  %v3070_v14 = vmul.f32 %v4987_v63, %v4969_v23 }
 0x914   :  { %v4991_v15 = vpop.eup %4990  ;;  %v3069_v55 = vmul.f32 %v4989_v27, %v6405_v29 }
 0x915   :  { %v4993_v19 = vpop.eup %4992  ;;  %4998 = vtanh.f32 %v3076_v32  ;;  %v3074_v60 = vadd.f32 %v3070_v14, %v3066_v53  ;;  %v3073_v26 = vmul.f32 %v4991_v15, %v4973_v54  ;;  %v3432_v53 = vlaneseq }
 0x916   :  { %v4995_v10 = vpop.eup %4994  ;;  %5000 = vrcp.f32 %v3034_v57  ;;  %v3067_v40 = vmul.f32 %v4993_v19, %v6409_v9 }
 0x917   :  { %5002 = vtanh.f32 %v3074_v60  ;;  %v3077_v1 = vadd.f32 %v3073_v26, %v3069_v55  ;;  %v3071_v17 = vmul.f32 %v4995_v10, %v4977_v5  ;;  %v6528_v32 = vand.u32 127, %v3432_v53 }
 0x918   :  { %5004 = vrcp.f32 %v3037_v56  ;;  %v4997_v51 = vpop.eup %4996 }
 0x919   :  { %5006 = vtanh.f32 %v3077_v1  ;;  %v3075_v47 = vadd.f32 %v3071_v17, %v3067_v40  ;;  %4365 = vmatmul.mubr.msk.bf16.gmra.mxu1 %vm667_vm0, %v4497_v38  ;;  %vm3434_vm1 = vcmp.lt.s32.totalorder %v6528_v32, 16 }
 0x91a   :  { %5008 = vrcp.f32 %v3035_v11  ;;  %4368 = vmatprep.mubr.msk.bf16.mxu1 %vm667_vm0, %v4498_v12 }
 0x91b   :  { %5010 = vtanh.f32 %v3075_v47 }
 0x921   :  { %4369 = vmatmul.mubr.msk.bf16.gmra.mxu1 %vm667_vm0, %v4499_v30 }
 0x922   :  { %v4999_v6 = vpop.eup %4998 }
 0x923   :  { %v5001_v29 = vpop.eup %5000  ;;  %v3084_v18 = vmul.f32 %v4999_v6, %v4997_v51 }
 0x924   :  { %v5003_v22 = vpop.eup %5002 }
 0x925   :  { %v5005_v34 = vpop.eup %5004  ;;  %v3082_v46 = vmul.f32 %v5003_v22, %v5001_v29 }
 0x926   :  { %v5007_v33 = vpop.eup %5006 }
 0x927   :  { %v5009_v4 = vpop.eup %5008  ;;  %3086 = vxpose.xlu0.b32.start [1/4] (short) %v3082_v46, 128  ;;  %v3085_v39 = vmul.f32 %v5007_v33, %v5005_v34 }
 0x928   :  { %v5011_v9 = vpop.eup %5010 }
 0x929   :  { %v3083_v7 = vmul.f32 %v5011_v9, %v5009_v4 }
 0x92b   :  { %3087 = vxpose.xlu0.b32.cont [2/4] (short) %v3083_v7, 128 }
 0x92f   :  { %3088 = vxpose.xlu0.b32.cont [3/4] (short) %v3084_v18, 128 }
 0x933   :  { %3089 = vxpose.xlu0.b32.end [4/4] (short) %v3085_v39, 128 }
 0x9a3   :  { %v3102_v44 = vpop.trf.xlu0 }
 0x9a7   :  { %v3103_v61 = vpop.trf.xlu0 }
 0x9a8   :  { %v3118_v24 = vpack.c.bf16 %v3103_v61, %v3102_v44 }
 0x9aa   :  { %4336 = vmatprep.mubr.msk.bf16.mxu0 %vm667_vm0, %v3118_v24 }
 0x9ab   :  { %v3104_v25 = vpop.trf.xlu0 }
 0x9af   :  { %v3105_v21 = vpop.trf.xlu0 }
 0x9b0   :  { %v3119_v2 = vpack.c.bf16 %v3105_v21, %v3104_v25 }
 0x9b2   :  { %4337 = vmatmul.mubr.msk.bf16.vlgmr.msra.gmra.mxu0 %vm667_vm0, %v3119_v2 }
 0x9b3   :  { %v3106_v50 = vpop.trf.xlu0 }
 0x9b7   :  { %v3107_v0 = vpop.trf.xlu0 }
 0x9b8   :  { %v3120_v45 = vpack.c.bf16 %v3107_v0, %v3106_v50 }
 0x9ba   :  { %4340 = vmatprep.mubr.msk.bf16.mxu0 %vm667_vm0, %v3120_v45 }
 0x9bb   :  { %v3108_v13 = vpop.trf.xlu0 }
 0x9bf   :  { %v3109_v23 = vpop.trf.xlu0 }
 0x9c0   :  { %v3121_v16 = vpack.c.bf16 %v3109_v23, %v3108_v13 }
 0x9c2   :  { %4341 = vmatmul.mubr.msk.bf16.gmra.mxu0 %vm667_vm0, %v3121_v16 }
 0x9c3   :  { %v3110_v54 = vpop.trf.xlu0 }
 0x9c7   :  { %v3111_v20 = vpop.trf.xlu0 }
 0x9c8   :  { %v3122_v5 = vpack.c.bf16 %v3111_v20, %v3110_v54 }
 0x9c9   :  { %v4358_v27 = vpop.f32.mrf.mxu1 }
 0x9ca   :  { %4344 = vmatprep.mubr.msk.bf16.mxu0 %vm667_vm0, %v3122_v5 }
 0x9cb   :  { %v3112_v31 = vpop.trf.xlu0  ;;  %v3369_v14 = vpop.f32.mrf.mxu1 }
 0x9cd   :  { %v4359_v19 = vpop.f32.mrf.mxu1 }
 0x9cf   :  { %v3113_v62 = vpop.trf.xlu0  ;;  %v3372_v1 = vpop.f32.mrf.mxu1 }
 0x9d0   :  { %v3123_v43 = vpack.c.bf16 %v3113_v62, %v3112_v31 }
 0x9d1   :  { %v4362_v29 = vpop.f32.mrf.mxu1 }
 0x9d2   :  { %4345 = vmatmul.mubr.msk.bf16.gmra.mxu0 %vm667_vm0, %v3123_v43 }
 0x9d3   :  { %v3114_v42 = vpop.trf.xlu0  ;;  %v3385_v46 = vpop.f32.mrf.mxu1 }
 0x9d5   :  { %v4363_v9 = vpop.f32.mrf.mxu1 }
 0x9d7   :  { %v3115_v49 = vpop.trf.xlu0  ;;  %v3388_v41 = vpop.f32.mrf.mxu1 }
 0x9d8   :  { %v3124_v48 = vpack.c.bf16 %v3115_v49, %v3114_v42 }
 0x9d9   :  { %v4366_v58 = vpop.f32.mrf.mxu1 }
 0x9da   :  { %4348 = vmatprep.mubr.msk.bf16.mxu0 %vm667_vm0, %v3124_v48 }
 0x9db   :  { %v3116_v28 = vpop.trf.xlu0  ;;  %v3401_v35 = vpop.f32.mrf.mxu1 }
 0x9dd   :  { %v4367_v24 = vpop.f32.mrf.mxu1 }
 0x9df   :  { %v3117_v63 = vpop.trf.xlu0  ;;  %v3404_v50 = vpop.f32.mrf.mxu1 }
 0x9e0   :  { %v3125_v57 = vpack.c.bf16 %v3117_v63, %v3116_v28 }
 0x9e1   :  { %v4370_v0 = vpop.f32.mrf.mxu1 }
 0x9e2   :  { %4349 = vmatmul.mubr.msk.bf16.gmra.mxu0 %vm667_vm0, %v3125_v57 }
 0x9e3   :  { %v3417_v23 = vpop.f32.mrf.mxu1 }
 0x9e5   :  { %v4371_v31 = vpop.f32.mrf.mxu1 }
 0x9e7   :  { %v3420_v48 = vpop.f32.mrf.mxu1 }
 0xa72   :  { %v4338_v15 = vpop.f32.mrf.mxu0 }
 0xa73   :  { %v6531_v56 = vadd.f32 %v4358_v27, %v4338_v15 }
 0xa74   :  { %v3196_v55 = vpop.f32.mrf.mxu0 }
 0xa75   :  { %v6533_v60 = vadd.f32 %v3369_v14, %v3196_v55  ;;  %v6538_v26 = vsel %vm3434_vm1, %v6531_v56, -1e+30 }
 0xa76   :  { %v4339_v10 = vpop.f32.mrf.mxu0  ;;  %3455 = vmax.xlane.f32.xlu1 %v6538_v26 }
 0xa77   :  { %v6541_v11 = vadd.f32 %v4359_v19, %v4339_v10  ;;  %v6553_v51 = vsel %vm3434_vm1, %v6533_v60, -1e+30 }
 0xa78   :  { %v3199_v40 = vpop.f32.mrf.mxu0 }
 0xa79   :  { %v6546_v17 = vsel %vm3434_vm1, %v6541_v11, -1e+30  ;;  %v6548_v47 = vadd.f32 %v3372_v1, %v3199_v40 }
 0xa7a   :  { %3457 = vmax.xlane.f32.xlu0 %v6546_v17  ;;  %3451 = vmax.xlane.f32.xlu1 %v6553_v51 }
 0xa7b   :  { %v6560_v6 = vsel %vm3434_vm1, %v6548_v47, -1e+30 }
 0xa7e   :  { %3453 = vmax.xlane.f32.xlu1 %v6560_v6 }
 0xa82   :  { %v4342_v18 = vpop.f32.mrf.mxu0 }
 0xa83   :  { %v6563_v22 = vadd.f32 %v4362_v29, %v4342_v18 }
 0xa84   :  { %v3212_v34 = vpop.f32.mrf.mxu0 }
 0xa85   :  { %v6565_v33 = vadd.f32 %v3385_v46, %v3212_v34  ;;  %v6570_v4 = vsel %vm3434_vm1, %v6563_v22, -1e+30 }
 0xa86   :  { %3463 = vmax.xlane.f32.xlu1 %v6570_v4  ;;  %v4343_v39 = vpop.f32.mrf.mxu0 }
 0xa87   :  { %v6573_v37 = vadd.f32 %v4363_v9, %v4343_v39  ;;  %v6578_v7 = vsel %vm3434_vm1, %v6565_v33, -1e+30 }
 0xa88   :  { %v3215_v59 = vpop.f32.mrf.mxu0 }
 0xa89   :  { %v6581_v36 = vadd.f32 %v3388_v41, %v3215_v59  ;;  %v6586_v8 = vsel %vm3434_vm1, %v6573_v37, -1e+30 }
 0xa8a   :  { %3459 = vmax.xlane.f32.xlu1 %v6578_v7 }
 0xa8b   :  { %v6592_v3 = vsel %vm3434_vm1, %v6581_v36, -1e+30 }
 0xa8e   :  { %3465 = vmax.xlane.f32.xlu1 %v6586_v8 }
 0xa92   :  { %v4346_v52 = vpop.f32.mrf.mxu0  ;;  %3461 = vmax.xlane.f32.xlu1 %v6592_v3 }
 0xa93   :  { %v6595_v38 = vadd.f32 %v4366_v58, %v4346_v52 }
 0xa94   :  { %v3228_v12 = vpop.f32.mrf.mxu0 }
 0xa95   :  { %v6597_v30 = vadd.f32 %v3401_v35, %v3228_v12  ;;  %v6602_v44 = vsel %vm3434_vm1, %v6595_v38, -1e+30 }
 0xa96   :  { %3471 = vmax.xlane.f32.xlu1 %v6602_v44  ;;  %v4347_v61 = vpop.f32.mrf.mxu0 }
 0xa97   :  { %v6605_v25 = vadd.f32 %v4367_v24, %v4347_v61  ;;  %v6610_v21 = vsel %vm3434_vm1, %v6597_v30, -1e+30 }
 0xa98   :  { %v3231_v2 = vpop.f32.mrf.mxu0 }
 0xa99   :  { %v6613_v45 = vadd.f32 %v3404_v50, %v3231_v2  ;;  %v6618_v13 = vsel %vm3434_vm1, %v6605_v25, -1e+30 }
 0xa9a   :  { %3467 = vmax.xlane.f32.xlu1 %v6610_v21 }
 0xa9b   :  { %v6624_v16 = vsel %vm3434_vm1, %v6613_v45, -1e+30 }
 0xa9e   :  { %3473 = vmax.xlane.f32.xlu1 %v6618_v13 }
 0xaa2   :  { %v4350_v54 = vpop.f32.mrf.mxu0  ;;  %3469 = vmax.xlane.f32.xlu1 %v6624_v16 }
 0xaa3   :  { %v6627_v20 = vadd.f32 %v4370_v0, %v4350_v54 }
 0xaa4   :  { %v3244_v5 = vpop.f32.mrf.mxu0 }
 0xaa5   :  { %v6629_v62 = vadd.f32 %v3417_v23, %v3244_v5  ;;  %v6634_v43 = vsel %vm3434_vm1, %v6627_v20, -1e+30 }
 0xaa6   :  { %3479 = vmax.xlane.f32.xlu1 %v6634_v43  ;;  %v4351_v42 = vpop.f32.mrf.mxu0 }
 0xaa7   :  { %v6642_v63 = vsel %vm3434_vm1, %v6629_v62, -1e+30  ;;  %v6645_v57 = vadd.f32 %v4371_v31, %v4351_v42 }
 0xaa8   :  { %v3247_v49 = vpop.f32.mrf.mxu0 }
 0xaa9   :  { %v6637_v28 = vadd.f32 %v3420_v48, %v3247_v49  ;;  %v6656_v27 = vsel %vm3434_vm1, %v6645_v57, -1e+30 }
 0xaaa   :  { %3475 = vmax.xlane.f32.xlu1 %v6642_v63 }
 0xaab   :  { %v6650_v53 = vsel %vm3434_vm1, %v6637_v28, -1e+30 }
 0xaae   :  { %3477 = vmax.xlane.f32.xlu1 %v6650_v53 }
 0xab2   :  { %3481 = vmax.xlane.f32.xlu1 %v6656_v27 }
 0xaff   :  { %v6659_v14 = vpop.xlane.xlu1 %3455 }
 0xb00   :  { %v3485_v15 = vsub.f32 %v6538_v26, %v6659_v14 }
 0xb02   :  { %v3503_v55 = vmul.f32 1.442695, %v3485_v15 }
 0xb03   :  { %v6663_v19 = vpop.xlane.xlu0 %3457  ;;  %v6665_v10 = vpop.xlane.xlu1 %3451 }
 0xb04   :  { %5012 = vpow2.f32 %v3503_v55  ;;  %v3483_v40 = vsub.f32 %v6553_v51, %v6665_v10  ;;  %v3486_v32 = vsub.f32 %v6546_v17, %v6663_v19 }
 0xb06   :  { %v3499_v1 = vmul.f32 1.442695, %v3483_v40  ;;  %v3505_v18 = vmul.f32 1.442695, %v3486_v32 }
 0xb07   :  { %v6671_v29 = vpop.xlane.xlu1 %3453 }
 0xb08   :  { %5014 = vpow2.f32 %v3499_v1  ;;  %v3484_v26 = vsub.f32 %v6560_v6, %v6671_v29 }
 0xb09   :  { %5016 = vpow2.f32 %v3505_v18 }
 0xb0a   :  { %v3501_v34 = vmul.f32 1.442695, %v3484_v26 }
 0xb0c   :  { %5018 = vpow2.f32 %v3501_v34 }
 0xb0f   :  { %v6675_v46 = vpop.xlane.xlu1 %3463 }
 0xb10   :  { %v3489_v39 = vsub.f32 %v6570_v4, %v6675_v46 }
 0xb11   :  { %v5013_v9 = vpop.eup %5012 }
 0xb12   :  { %v3511_v51 = vmul.f32 1.442695, %v3489_v39  ;;  %3535 = vadd.xlane.f32.xlu1 %v5013_v9 }
 0xb13   :  { %v6679_v17 = vpop.xlane.xlu1 %3459 }
 0xb14   :  { %5020 = vpow2.f32 %v3511_v51  ;;  %v3487_v59 = vsub.f32 %v6578_v7, %v6679_v17 }
 0xb15   :  { %v5015_v41 = vpop.eup %5014 }
 0xb16   :  { %v3507_v58 = vmul.f32 1.442695, %v3487_v59  ;;  %3531 = vadd.xlane.f32.xlu1 %v5015_v41  ;;  %v5017_v4 = vpop.eup %5016 }
 0xb17   :  { %v6683_v6 = vpop.xlane.xlu1 %3465 }
 0xb18   :  { %5022 = vpow2.f32 %v3507_v58  ;;  %v3490_v52 = vsub.f32 %v6586_v8, %v6683_v6 }
 0xb19   :  { %v5019_v24 = vpop.eup %5018 }
 0xb1a   :  { %v3513_v35 = vmul.f32 1.442695, %v3490_v52  ;;  %3537 = vadd.xlane.f32.xlu1 %v5017_v4 }
 0xb1b   :  { %v6687_v12 = vpop.xlane.xlu1 %3461 }
 0xb1c   :  { %5024 = vpow2.f32 %v3513_v35  ;;  %v3488_v61 = vsub.f32 %v6592_v3, %v6687_v12 }
 0xb1e   :  { %v3509_v7 = vmul.f32 1.442695, %v3488_v61  ;;  %3533 = vadd.xlane.f32.xlu1 %v5019_v24 }
 0xb1f   :  { %v6691_v2 = vpop.xlane.xlu1 %3471 }
 0xb20   :  { %5026 = vpow2.f32 %v3509_v7  ;;  %v3493_v50 = vsub.f32 %v6602_v44, %v6691_v2 }
 0xb21   :  { %v5021_v0 = vpop.eup %5020 }
 0xb22   :  { %v3519_v8 = vmul.f32 1.442695, %v3493_v50  ;;  %3543 = vadd.xlane.f32.xlu1 %v5021_v0 }
 0xb23   :  { %v6695_v23 = vpop.xlane.xlu1 %3467 }
 0xb24   :  { %5028 = vpow2.f32 %v3519_v8  ;;  %v3491_v54 = vsub.f32 %v6610_v21, %v6695_v23 }
 0xb25   :  { %v5023_v5 = vpop.eup %5022 }
 0xb26   :  { %v3515_v3 = vmul.f32 1.442695, %v3491_v54  ;;  %3539 = vadd.xlane.f32.xlu1 %v5023_v5 }
 0xb27   :  { %v6699_v31 = vpop.xlane.xlu1 %3473 }
 0xb28   :  { %5030 = vpow2.f32 %v3515_v3  ;;  %v3494_v42 = vsub.f32 %v6618_v13, %v6699_v31 }
 0xb29   :  { %v5025_v49 = vpop.eup %5024 }
 0xb2a   :  { %v3521_v44 = vmul.f32 1.442695, %v3494_v42  ;;  %3545 = vadd.xlane.f32.xlu1 %v5025_v49 }
 0xb2b   :  { %v6703_v48 = vpop.xlane.xlu1 %3469 }
 0xb2c   :  { %5032 = vpow2.f32 %v3521_v44  ;;  %v3492_v15 = vsub.f32 %v6624_v16, %v6703_v48 }
 0xb2d   :  { %v5027_v55 = vpop.eup %5026 }
 0xb2e   :  { %v3517_v21 = vmul.f32 1.442695, %v3492_v15  ;;  %3541 = vadd.xlane.f32.xlu1 %v5027_v55 }
 0xb2f   :  { %v6707_v40 = vpop.xlane.xlu1 %3479 }
 0xb30   :  { %5034 = vpow2.f32 %v3517_v21  ;;  %v3497_v1 = vsub.f32 %v6634_v43, %v6707_v40 }
 0xb31   :  { %v5029_v32 = vpop.eup %5028 }
 0xb32   :  { %3551 = vadd.xlane.f32.xlu1 %v5029_v32  ;;  %v3527_v39 = vmul.f32 1.442695, %v3497_v1 }
 0xb33   :  { %v6711_v13 = vpop.xlane.xlu1 %3475 }
 0xb34   :  { %v3495_v18 = vsub.f32 %v6642_v63, %v6711_v13 }
 0xb35   :  { %v5031_v26 = vpop.eup %5030 }
 0xb36   :  { %v3523_v34 = vmul.f32 1.442695, %v3495_v18  ;;  %3547 = vadd.xlane.f32.xlu1 %v5031_v26 }
 0xb37   :  { %v6715_v16 = vpop.xlane.xlu1 %3477 }
 0xb38   :  { %5036 = vpow2.f32 %v3523_v34  ;;  %v3496_v9 = vsub.f32 %v6650_v53, %v6715_v16 }
 0xb39   :  { %v5033_v51 = vpop.eup %5032  ;;  %5038 = vpow2.f32 %v3527_v39 }
 0xb3a   :  { %v3525_v59 = vmul.f32 1.442695, %v3496_v9  ;;  %3553 = vadd.xlane.f32.xlu0 %v5033_v51 }
 0xb3b   :  { %v6719_v43 = vpop.xlane.xlu1 %3481 }
 0xb3c   :  { %5040 = vpow2.f32 %v3525_v59  ;;  %v3498_v63 = vsub.f32 %v6656_v27, %v6719_v43 }
 0xb3d   :  { %v5035_v41 = vpop.eup %5034 }
 0xb3e   :  { %v3529_v58 = vmul.f32 1.442695, %v3498_v63  ;;  %3549 = vadd.xlane.f32.xlu1 %v5035_v41 }
 0xb40   :  { %5042 = vpow2.f32 %v3529_v58 }
 0xb45   :  { %v5037_v52 = vpop.eup %5036 }
 0xb46   :  { %3555 = vadd.xlane.f32.xlu1 %v5037_v52  ;;  %v5039_v4 = vpop.eup %5038 }
 0xb49   :  { %v5041_v35 = vpop.eup %5040 }
 0xb4a   :  { %3559 = vadd.xlane.f32.xlu1 %v5039_v4  ;;  %3557 = vadd.xlane.f32.xlu0 %v5041_v35 }
 0xb4d   :  { %v5043_v53 = vpop.eup %5042 }
 0xb4e   :  { %3561 = vadd.xlane.f32.xlu0 %v5043_v53 }
 0xb9b   :  { %v3536_v61 = vpop.xlane.xlu1 %3535 }
 0xb9c   :  { %5044 = vlog2.f32 %v3536_v61 }
 0xb9f   :  { %v3532_v24 = vpop.xlane.xlu1 %3531 }
 0xba0   :  { %5046 = vlog2.f32 %v3532_v24 }
 0xba3   :  { %v3538_v7 = vpop.xlane.xlu1 %3537 }
 0xba4   :  { %5048 = vlog2.f32 %v3538_v7 }
 0xba7   :  { %v3534_v50 = vpop.xlane.xlu1 %3533 }
 0xba8   :  { %5050 = vlog2.f32 %v3534_v50 }
 0xba9   :  { %v5045_v27 = vpop.eup %5044 }
 0xbaa   :  { %v3568_v0 = vmul.f32 0.6931472, %v5045_v27 }
 0xbab   :  { %v3544_v54 = vpop.xlane.xlu1 %3543 }
 0xbac   :  { %v3597_v8 = vadd.f32 %v3568_v0, %v6659_v14  ;;  %5052 = vlog2.f32 %v3544_v54 }
 0xbad   :  { %v5047_v5 = vpop.eup %5046 }
 0xbae   :  { %v3613_v3 = vsub.f32 %v6531_v56, %v3597_v8  ;;  %v3564_v42 = vmul.f32 0.6931472, %v5047_v5 }
 0xbaf   :  { %v3540_v49 = vpop.xlane.xlu1 %3539 }
 0xbb0   :  { %3629 = vst [vmem:[%s6810_s7 + $0x10] sm:$0xff] %v3613_v3  ;;  %v3595_v44 = vadd.f32 %v3564_v42, %v6665_v10  ;;  %5054 = vlog2.f32 %v3540_v49 }
 0xbb1   :  { %v5049_v15 = vpop.eup %5048 }
 0xbb2   :  { %v3611_v55 = vsub.f32 %v6533_v60, %v3595_v44  ;;  %v3570_v21 = vmul.f32 0.6931472, %v5049_v15 }
 0xbb3   :  { %v3546_v32 = vpop.xlane.xlu1 %3545 }
 0xbb4   :  { %3627 = vst [vmem:[%s6810_s7] sm:$0xff] %v3611_v55  ;;  %v3598_v56 = vadd.f32 %v3570_v21, %v6663_v19  ;;  %5056 = vlog2.f32 %v3546_v32 }
 0xbb5   :  { %v5051_v14 = vpop.eup %5050 }
 0xbb6   :  { %v3614_v1 = vsub.f32 %v6541_v11, %v3598_v56  ;;  %v3566_v18 = vmul.f32 0.6931472, %v5051_v14 }
 0xbb7   :  { %v3542_v26 = vpop.xlane.xlu1 %3541 }
 0xbb8   :  { %3630 = vst [vmem:[%s6810_s7 + $0x18] sm:$0xff] %v3614_v1  ;;  %v3596_v60 = vadd.f32 %v3566_v18, %v6671_v29  ;;  %5058 = vlog2.f32 %v3542_v26 }
 0xbb9   :  { %v5053_v10 = vpop.eup %5052 }
 0xbba   :  { %v3612_v34 = vsub.f32 %v6548_v47, %v3596_v60  ;;  %v3576_v39 = vmul.f32 0.6931472, %v5053_v10 }
 0xbbb   :  { %v3552_v9 = vpop.xlane.xlu1 %3551 }
 0xbbc   :  { %3628 = vst [vmem:[%s6810_s7 + $0x8] sm:$0xff] %v3612_v34  ;;  %v3601_v11 = vadd.f32 %v3576_v39, %v6675_v46  ;;  %5060 = vlog2.f32 %v3552_v9 }
 0xbbd   :  { %v5055_v19 = vpop.eup %5054 }
 0xbbe   :  { %v3617_v51 = vsub.f32 %v6563_v22, %v3601_v11  ;;  %v3572_v59 = vmul.f32 0.6931472, %v5055_v19 }
 0xbbf   :  { %v3548_v63 = vpop.xlane.xlu1 %3547 }
 0xbc0   :  { %3633 = vst [vmem:[%s6810_s7 + $0x30] sm:$0xff] %v3617_v51  ;;  %v3599_v47 = vadd.f32 %v3572_v59, %v6679_v17  ;;  %5062 = vlog2.f32 %v3548_v63 }
 0xbc1   :  { %v5057_v29 = vpop.eup %5056 }
 0xbc2   :  { %v3615_v41 = vsub.f32 %v6565_v33, %v3599_v47  ;;  %v3578_v58 = vmul.f32 0.6931472, %v5057_v29 }
 0xbc3   :  { %v3554_v52 = vpop.xlane.xlu0 %3553 }
 0xbc4   :  { %5064 = vlog2.f32 %v3554_v52  ;;  %3631 = vst [vmem:[%s6810_s7 + $0x20] sm:$0xff] %v3615_v41  ;;  %v3602_v22 = vadd.f32 %v3578_v58, %v6683_v6 }
 0xbc5   :  { %v5059_v46 = vpop.eup %5058 }
 0xbc6   :  { %v3618_v4 = vsub.f32 %v6573_v37, %v3602_v22  ;;  %v3574_v35 = vmul.f32 0.6931472, %v5059_v46 }
 0xbc7   :  { %v3550_v53 = vpop.xlane.xlu1 %3549 }
 0xbc8   :  { %5066 = vlog2.f32 %v3550_v53  ;;  %3634 = vst [vmem:[%s6810_s7 + $0x38] sm:$0xff] %v3618_v4  ;;  %v3600_v33 = vadd.f32 %v3574_v35, %v6687_v12 }
 0xbc9   :  { %v5061_v17 = vpop.eup %5060 }
 0xbca   :  { %v3616_v61 = vsub.f32 %v6581_v36, %v3600_v33  ;;  %v3584_v24 = vmul.f32 0.6931472, %v5061_v17 }
 0xbcc   :  { %3632 = vst [vmem:[%s6810_s7 + $0x28] sm:$0xff] %v3616_v61  ;;  %v3605_v6 = vadd.f32 %v3584_v24, %v6691_v2 }
 0xbcd   :  { %v5063_v37 = vpop.eup %5062 }
 0xbce   :  { %v3621_v7 = vsub.f32 %v6595_v38, %v3605_v6  ;;  %v3580_v50 = vmul.f32 0.6931472, %v5063_v37 }
 0xbcf   :  { %v3556_v27 = vpop.xlane.xlu1 %3555 }
 0xbd0   :  { %5068 = vlog2.f32 %v3556_v27  ;;  %3637 = vst [vmem:[%s6810_s7 + $0x50] sm:$0xff] %v3621_v7  ;;  %v3603_v36 = vadd.f32 %v3580_v50, %v6695_v23 }
 0xbd1   :  { %v5065_v0 = vpop.eup %5064 }
 0xbd2   :  { %v3586_v12 = vmul.f32 0.6931472, %v5065_v0  ;;  %v3619_v8 = vsub.f32 %v6597_v30, %v3603_v36 }
 0xbd3   :  { %v3558_v54 = vpop.xlane.xlu0 %3557  ;;  %v3560_v5 = vpop.xlane.xlu1 %3559 }
 0xbd4   :  { %v3606_v2 = vadd.f32 %v3586_v12, %v6699_v31  ;;  %5070 = vlog2.f32 %v3558_v54  ;;  %3635 = vst [vmem:[%s6810_s7 + $0x40] sm:$0xff] %v3619_v8 }
 0xbd5   :  { %v5067_v3 = vpop.eup %5066  ;;  %5072 = vlog2.f32 %v3560_v5 }
 0xbd6   :  { %v3622_v38 = vsub.f32 %v6605_v25, %v3606_v2  ;;  %v3582_v42 = vmul.f32 0.6931472, %v5067_v3 }
 0xbd7   :  { %v3562_v49 = vpop.xlane.xlu0 %3561 }
 0xbd8   :  { %3638 = vst [vmem:[%s6810_s7 + $0x58] sm:$0xff] %v3622_v38  ;;  %v3604_v30 = vadd.f32 %v3582_v42, %v6703_v48  ;;  %5074 = vlog2.f32 %v3562_v49 }
 0xbda   :  { %v3620_v23 = vsub.f32 %v6613_v45, %v3604_v30 }
 0xbdc   :  { %3636 = vst [vmem:[%s6810_s7 + $0x48] sm:$0xff] %v3620_v23 }
 0xbdd   :  { %v5069_v31 = vpop.eup %5068 }
 0xbde   :  { %v3588_v44 = vmul.f32 0.6931472, %v5069_v31 }
 0xbe0   :  { %v3607_v15 = vadd.f32 %v3588_v44, %v6711_v13 }
 0xbe1   :  { %v5071_v25 = vpop.eup %5070 }
 0xbe2   :  { %v5073_v55 = vpop.eup %5072  ;;  %v3623_v21 = vsub.f32 %v6629_v62, %v3607_v15  ;;  %v3590_v32 = vmul.f32 0.6931472, %v5071_v25 }
 0xbe3   :  { %v3592_v56 = vmul.f32 0.6931472, %v5073_v55 }
 0xbe4   :  { %3639 = vst [vmem:[%s6810_s7 + $0x60] sm:$0xff] %v3623_v21  ;;  %v3608_v45 = vadd.f32 %v3590_v32, %v6715_v16 }
 0xbe5   :  { %v5075_v48 = vpop.eup %5074  ;;  %v3609_v14 = vadd.f32 %v3592_v56, %v6707_v40 }
 0xbe6   :  { %v3624_v1 = vsub.f32 %v6637_v28, %v3608_v45  ;;  %v3594_v18 = vmul.f32 0.6931472, %v5075_v48 }
 0xbe7   :  { %v3625_v13 = vsub.f32 %v6627_v20, %v3609_v14 }
 0xbe8   :  { %3640 = vst [vmem:[%s6810_s7 + $0x68] sm:$0xff] %v3624_v1  ;;  %v3610_v62 = vadd.f32 %v3594_v18, %v6719_v43 }
 0xbe9   :  { %3641 = vst [vmem:[%s6810_s7 + $0x70] sm:$0xff] %v3625_v13 }
 0xbea   :  { %v3626_v16 = vsub.f32 %v6645_v57, %v3610_v62 }
 0xbec   :  { %3642 = vst [vmem:[%s6810_s7 + $0x78] sm:$0xff] %v3626_v16 }

// kernel: _lambda_.2
= control target key start
LH: loop header
LB: loop body
LE: loop exit
PB: predicated region body
PF: predicated region fallthrough
CT: control target
= control target key end

     0   :  { %vm673_vm0 = vcmask 261120   ;;  %v5045_v1 = vmov 0   ;;  %s6558_s1 = inlined_call_operand.vmem [shape: bf16[1024,32], index: 1, kind: input, shape index: {}]   ;;  %s6559_s2 = inlined_call_operand.vmem [shape: bf16[128,32], index: 2, kind: input, shape index: {}]   ;;  %s6560_s4 = inlined_call_operand.vmem [shape: f32[128,1], index: 4, kind: input, shape index: {}]   ;;  %s6561_s3 = inlined_call_operand.vmem [shape: bf16[128,32], index: 3, kind: input, shape index: {}]   ;;  %s6562_s6 = inlined_call_operand.vmem [shape: bf16[32,128], index: 6, kind: input, shape index: {}]   ;;  %s6563_s5 = inlined_call_operand.vmem [shape: bf16[32,128], index: 5, kind: input, shape index: {}]   ;;  %s6564_s0 = inlined_call_operand.vmem [shape: bf16[128,32], index: 0, kind: input, shape index: {}]   ;;  %s6565_s7 = inlined_call_operand.vmem [shape: f32[1,128], index: 7, kind: input, shape index: {}]   ;;  %s6566_s8 = inlined_call_operand.vmem [shape: f32[1,128], index: 8, kind: input, shape index: {}]   ;;  %s6567_s9 = inlined_call_operand.vmem [shape: bf16[128,128], index: 9, kind: output, shape index: {}]  }
   0x1   :  { %v4426_v0 = vld [vmem:[%s6558_s1 + $0x78] sm:$0xff]   ;;  %4424 = vset.pattern.permute.xlu0 %v5045_v1  ;;  %4425 = vset.pattern.permute.xlu1 %v5045_v1  ;;  %v4428_v3 = vld [vmem:[%s6558_s1 + $0x70] sm:$0xff]   ;;  %v4432_v10 = vld [vmem:[%s6558_s1 + $0x68] sm:$0xff]  }
   0x2   :  { %v4427_v2 = vld [vmem:[%s6558_s1 + $0x38] sm:$0xff]   ;;  %4390 = vmatprep.subr.msk.bf16.mxu0 %vm673_vm0, %v4426_v0  ;;  %v4430_v6 = vld [vmem:[%s6558_s1 + $0x30] sm:$0xff]   ;;  %v4434_v13 = vld [vmem:[%s6558_s1 + $0x28] sm:$0xff]  }
   0x3   :  { %v720_v4 = vsel %vm673_vm0, %v4427_v2, 0  ;;  %v4429_v5 = vld [vmem:[%s6558_s1 + $0xf8] sm:$0xff]   ;;  %v4433_v9 = vld [vmem:[%s6558_s1 + $0xf0] sm:$0xff]   ;;  %v717_v11 = vsel %vm673_vm0, %v4430_v6, 0  ;;  %v4437_v15 = vld [vmem:[%s6558_s1 + $0xe8] sm:$0xff]   ;;  %v714_v17 = vsel %vm673_vm0, %v4434_v13, 0 }
   0x4   :  { %3966 = vmatpush3.bf16.xpose.msra.mxu0 %v720_v4  ;;  %4398 = vmatprep.subr.msk.bf16.mxu1 %vm673_vm0, %v4429_v5  ;;  %v4431_v7 = vld [vmem:[%s6558_s1 + $0xb8] sm:$0xff]   ;;  %v4435_v12 = vld [vmem:[%s6558_s1 + $0xb0] sm:$0xff]   ;;  %v4436_v16 = vld [vmem:[%s6558_s1 + $0x60] sm:$0xff]  }
   0x5   :  { %4391 = vmatprep.subr.msk.bf16.mxu0 %vm673_vm0, %v4428_v3  ;;  %v768_v8 = vsel %vm673_vm0, %v4431_v7, 0  ;;  %v765_v14 = vsel %vm673_vm0, %v4435_v12, 0  ;;  %v4439_v18 = vld [vmem:[%s6558_s1 + $0xa8] sm:$0xff]   ;;  %v4438_v19 = vld [vmem:[%s6558_s1 + $0x20] sm:$0xff]   ;;  %v4440_v22 = vld [vmem:[%s6558_s1 + $0x58] sm:$0xff]  }
   0x6   :  { %3998 = vmatpush3.bf16.xpose.msra.mxu1 %v768_v8  ;;  %v762_v20 = vsel %vm673_vm0, %v4439_v18, 0  ;;  %v4441_v21 = vld [vmem:[%s6558_s1 + $0xe0] sm:$0xff]   ;;  %v711_v23 = vsel %vm673_vm0, %v4438_v19, 0  ;;  %v4442_v25 = vld [vmem:[%s6558_s1 + $0x18] sm:$0xff]   ;;  %v4444_v29 = vld [vmem:[%s6558_s1 + $0x50] sm:$0xff]  }
   0x7   :  { %4399 = vmatprep.subr.msk.bf16.mxu1 %vm673_vm0, %v4433_v9  ;;  %v4443_v24 = vld [vmem:[%s6558_s1 + $0xa0] sm:$0xff]   ;;  %v4445_v27 = vld [vmem:[%s6558_s1 + $0xd8] sm:$0xff]   ;;  %v708_v30 = vsel %vm673_vm0, %v4442_v25, 0  ;;  %v4446_v32 = vld [vmem:[%s6558_s1 + $0x10] sm:$0xff]  }
   0x8   :  { %v759_v26 = vsel %vm673_vm0, %v4443_v24, 0  ;;  %v5175_v28 = vld [vmem:[%s6559_s2] sm:$0xff]   ;;  %v4447_v31 = vld [vmem:[%s6558_s1 + $0x98] sm:$0xff]   ;;  %v4449_v34 = vld [vmem:[%s6558_s1 + $0xd0] sm:$0xff]   ;;  %v705_v36 = vsel %vm673_vm0, %v4446_v32, 0 }
   0x9   :  { %3981 = vmatprep.mubr.msk.bf16.mxu0 %vm673_vm0, %v5175_v28  ;;  %4013 = vmatprep.mubr.msk.bf16.mxu1 %vm673_vm0, %v5175_v28  ;;  %v756_v33 = vsel %vm673_vm0, %v4447_v31, 0  ;;  %v4448_v35 = vld [vmem:[%s6558_s1 + $0x48] sm:$0xff]   ;;  %v4451_v37 = vld [vmem:[%s6558_s1 + $0x90] sm:$0xff]   ;;  %v4452_v41 = vld [vmem:[%s6558_s1 + $0x40] sm:$0xff]  }
   0xa   :  { %v4450_v38 = vld [vmem:[%s6558_s1 + $0x8] sm:$0xff]   ;;  %v753_v39 = vsel %vm673_vm0, %v4451_v37, 0  ;;  %v4454_v44 = vld [vmem:[%s6558_s1] sm:$0xff]   ;;  %v4458_v47 = vld [vmem:[%s6558_s1 + $0x178] sm:$0xff]  }
   0xb   :  { %v4453_v40 = vld [vmem:[%s6558_s1 + $0xc8] sm:$0xff]   ;;  %v702_v42 = vsel %vm673_vm0, %v4450_v38, 0  ;;  %v4457_v46 = vld [vmem:[%s6558_s1 + $0xc0] sm:$0xff]   ;;  %v699_v48 = vsel %vm673_vm0, %v4454_v44, 0  ;;  %v4460_v50 = vld [vmem:[%s6558_s1 + $0x138] sm:$0xff]  }
   0xc   :  { %3968 = vmatpush3.bf16.xpose.msra.mxu0 %v717_v11  ;;  %v4455_v43 = vld [vmem:[%s6558_s1 + $0x88] sm:$0xff]   ;;  %v4459_v49 = vld [vmem:[%s6558_s1 + $0x80] sm:$0xff]   ;;  %v4463_v52 = vld [vmem:[%s6558_s1 + $0x1f8] sm:$0xff]   ;;  %v816_v55 = vsel %vm673_vm0, %v4460_v50, 0 }
   0xd   :  { %4392 = vmatprep.subr.msk.bf16.mxu0 %vm673_vm0, %v4432_v10  ;;  %v750_v45 = vsel %vm673_vm0, %v4455_v43, 0  ;;  %v747_v51 = vsel %vm673_vm0, %v4459_v49, 0  ;;  %v5248_v53 = vld [vmem:[%s6559_s2 + $0x8] sm:$0xff]   ;;  %v4462_v54 = vld [vmem:[%s6558_s1 + $0x170] sm:$0xff]   ;;  %v4465_v56 = vld [vmem:[%s6558_s1 + $0x1b8] sm:$0xff]  }
   0xe   :  { %4000 = vmatpush3.bf16.xpose.msra.mxu1 %v765_v14  ;;  %v4464_v57 = vld [vmem:[%s6558_s1 + $0x130] sm:$0xff]   ;;  %v864_v58 = vsel %vm673_vm0, %v4465_v56, 0  ;;  %v212_v63 = vld [vmem:[%s6560_s4 + $0x18] sm:$0xff]  ;;  %v4467_v2 = vld [vmem:[%s6558_s1 + $0x168] sm:$0xff]  }
   0xf   :  { %4400 = vmatprep.subr.msk.bf16.mxu1 %vm673_vm0, %v4437_v15  ;;  %v4468_v59 = vld [vmem:[%s6558_s1 + $0x1f0] sm:$0xff]   ;;  %v813_v0 = vsel %vm673_vm0, %v4464_v57, 0  ;;  %v216_v4 = vld [vmem:[%s6560_s4 + $0x38] sm:$0xff]  ;;  %v4469_v5 = vld [vmem:[%s6558_s1 + $0x128] sm:$0xff]  }
  0x10   :  { %v211_v60 = vld [vmem:[%s6560_s4 + $0x10] sm:$0xff]  ;;  %v209_v6 = vld [vmem:[%s6560_s4] sm:$0xff]  ;;  %v4473_v8 = vld [vmem:[%s6558_s1 + $0x1e8] sm:$0xff]   ;;  %v810_v13 = vsel %vm673_vm0, %v4469_v5, 0 }
  0x11   :  { %v5278_v61 = vld [vmem:[%s6559_s2 + $0x10] sm:$0xff]   ;;  %245 = vperm.xlu0 %4424, %v211_v60   ;;  %v5317_v9 = vld [vmem:[%s6559_s2 + $0x18] sm:$0xff]   ;;  %v210_v10 = vld [vmem:[%s6560_s4 + $0x8] sm:$0xff] }
  0x12   :  { %v215_v62 = vld [vmem:[%s6560_s4 + $0x30] sm:$0xff]  ;;  %v4472_v11 = vld [vmem:[%s6558_s1 + $0x160] sm:$0xff]   ;;  %v4475_v14 = vld [vmem:[%s6558_s1 + $0x1a8] sm:$0xff]  }
  0x13   :  { %v4470_v3 = vld [vmem:[%s6558_s1 + $0x1b0] sm:$0xff]   ;;  %265 = vperm.xlu1 %4425, %v215_v62   ;;  %v213_v12 = vld [vmem:[%s6560_s4 + $0x20] sm:$0xff]  ;;  %v214_v15 = vld [vmem:[%s6560_s4 + $0x28] sm:$0xff]  ;;  %v858_v18 = vsel %vm673_vm0, %v4475_v14, 0 }
  0x14   :  { %3970 = vmatpush3.bf16.xpose.msra.mxu0 %v714_v17  ;;  %v861_v7 = vsel %vm673_vm0, %v4470_v3, 0  ;;  %v4474_v17 = vld [vmem:[%s6558_s1 + $0x120] sm:$0xff]   ;;  %v4477_v24 = vld [vmem:[%s6558_s1 + $0x158] sm:$0xff]   ;;  %v218_v32 = vld [vmem:[%s6560_s4 + $0x48] sm:$0xff] }
  0x15   :  { %4393 = vmatprep.subr.msk.bf16.mxu0 %vm673_vm0, %v4436_v16  ;;  %250 = vperm.xlu0 %4424, %v212_v63   ;;  %v219_v16 = vld [vmem:[%s6560_s4 + $0x50] sm:$0xff]  ;;  %v4478_v19 = vld [vmem:[%s6558_s1 + $0x1e0] sm:$0xff]   ;;  %v4483_v31 = vld [vmem:[%s6558_s1 + $0x1d8] sm:$0xff]  }
  0x16   :  { %4002 = vmatpush3.bf16.xpose.msra.mxu1 %v762_v20  ;;  %v220_v20 = vld [vmem:[%s6560_s4 + $0x58] sm:$0xff]  ;;  %v4480_v25 = vld [vmem:[%s6558_s1 + $0x1a0] sm:$0xff]   ;;  %v222_v38 = vld [vmem:[%s6560_s4 + $0x68] sm:$0xff] }
  0x17   :  { %4401 = vmatprep.subr.msk.bf16.mxu1 %vm673_vm0, %v4441_v21  ;;  %270 = vperm.xlu1 %4425, %v216_v4   ;;  %v5363_v21 = vld [vmem:[%s6559_s2 + $0x20] sm:$0xff]   ;;  %v4485_v37 = vld [vmem:[%s6558_s1 + $0x198] sm:$0xff]   ;;  %v4487_v44 = vld [vmem:[%s6558_s1 + $0x148] sm:$0xff]  }
  0x18   :  { %v4491_v49 = vld [vmem:[%s6559_s2 + $0x38] sm:$0xff]   ;;  %v4496_v56 = vld [vmem:[%s6558_s1 + $0x1c0] sm:$0xff]   ;;  %v5602_v62 = vld [vmem:[%s6561_s3 + $0x28] sm:$0xff]  }
  0x19   :  { %235 = vperm.xlu0 %4424, %v209_v6   ;;  %v5588_v60 = vld [vmem:[%s6561_s3 + $0x18] sm:$0xff]   ;;  %v5607_v63 = vld [vmem:[%s6561_s3 + $0x30] sm:$0xff]  }
  0x1b   :  { %240 = vperm.xlu1 %4425, %v210_v10  }
  0x1c   :  { %3972 = vmatpush3.bf16.xpose.msra.mxu0 %v711_v23  ;;  %v807_v23 = vsel %vm673_vm0, %v4474_v17, 0 }
  0x1d   :  { %4394 = vmatprep.subr.msk.bf16.mxu0 %vm673_vm0, %v4440_v22  ;;  %255 = vperm.xlu0 %4424, %v213_v12   ;;  %v223_v22 = vld [vmem:[%s6560_s4 + $0x70] sm:$0xff] }
  0x1e   :  { %4004 = vmatpush3.bf16.xpose.msra.mxu1 %v759_v26  ;;  %v224_v26 = vld [vmem:[%s6560_s4 + $0x78] sm:$0xff] }
  0x1f   :  { %4402 = vmatprep.subr.msk.bf16.mxu1 %vm673_vm0, %v4445_v27  ;;  %260 = vperm.xlu1 %4425, %v214_v15   ;;  %v217_v27 = vld [vmem:[%s6560_s4 + $0x40] sm:$0xff] }
  0x21   :  { %285 = vperm.xlu0 %4424, %v219_v16  }
  0x23   :  { %290 = vperm.xlu1 %4425, %v220_v20  }
  0x24   :  { %3974 = vmatpush3.bf16.xpose.msra.mxu0 %v708_v30  ;;  %v855_v30 = vsel %vm673_vm0, %v4480_v25, 0 }
  0x25   :  { %4395 = vmatprep.subr.msk.bf16.mxu0 %vm673_vm0, %v4444_v29  ;;  %305 = vperm.xlu0 %4424, %v223_v22   ;;  %v4479_v29 = vld [vmem:[%s6558_s1 + $0x118] sm:$0xff]  }
  0x26   :  { %4006 = vmatpush3.bf16.xpose.msra.mxu1 %v756_v33  ;;  %v5404_v33 = vld [vmem:[%s6559_s2 + $0x28] sm:$0xff]  }
  0x27   :  { %4403 = vmatprep.subr.msk.bf16.mxu1 %vm673_vm0, %v4449_v34  ;;  %310 = vperm.xlu1 %4425, %v224_v26   ;;  %v221_v34 = vld [vmem:[%s6560_s4 + $0x60] sm:$0xff] }
  0x29   :  { %275 = vperm.xlu0 %4424, %v217_v27  }
  0x2b   :  { %280 = vperm.xlu1 %4425, %v218_v32  }
  0x2c   :  { %3976 = vmatpush3.bf16.xpose.msra.mxu0 %v705_v36  ;;  %v4482_v36 = vld [vmem:[%s6558_s1 + $0x150] sm:$0xff]  }
  0x2d   :  { %4396 = vmatprep.subr.msk.bf16.mxu0 %vm673_vm0, %v4448_v35  ;;  %v804_v35 = vsel %vm673_vm0, %v4479_v29, 0  ;;  %295 = vperm.xlu0 %4424, %v221_v34  }
  0x2e   :  { %4008 = vmatpush3.bf16.xpose.msra.mxu1 %v753_v39  ;;  %v4484_v39 = vld [vmem:[%s6558_s1 + $0x110] sm:$0xff]  }
  0x2f   :  { %4404 = vmatprep.subr.msk.bf16.mxu1 %vm673_vm0, %v4453_v40  ;;  %v852_v40 = vsel %vm673_vm0, %v4485_v37, 0  ;;  %300 = vperm.xlu1 %4425, %v222_v38   ;;  %v801_v43 = vsel %vm673_vm0, %v4484_v39, 0 }
  0x34   :  { %3978 = vmatpush3.bf16.xpose.msra.mxu0 %v702_v42  ;;  %v5439_v42 = vld [vmem:[%s6559_s2 + $0x30] sm:$0xff]  }
  0x35   :  { %4397 = vmatprep.subr.msk.bf16.mxu0 %vm673_vm0, %v4452_v41  ;;  %v4488_v41 = vld [vmem:[%s6558_s1 + $0x1d0] sm:$0xff]  }
  0x36   :  { %4010 = vmatpush3.bf16.xpose.msra.mxu1 %v750_v45  ;;  %v4490_v45 = vld [vmem:[%s6558_s1 + $0x190] sm:$0xff]  }
  0x37   :  { %4405 = vmatprep.subr.msk.bf16.mxu1 %vm673_vm0, %v4457_v46  ;;  %v4489_v46 = vld [vmem:[%s6558_s1 + $0x108] sm:$0xff]  }
  0x38   :  { %v798_v50 = vsel %vm673_vm0, %v4489_v46, 0 }
  0x3c   :  { %3980 = vmatpush3.bf16.xpose.msra.mxu0 %v699_v48  ;;  %v4493_v48 = vld [vmem:[%s6558_s1 + $0x1c8] sm:$0xff]  }
  0x3d   :  { %4406 = vmatprep.subr.msk.bf16.mxu0 %vm673_vm0, %v4458_v47  ;;  %v849_v47 = vsel %vm673_vm0, %v4490_v45, 0 }
  0x3e   :  { %4012 = vmatpush3.bf16.xpose.msra.mxu1 %v747_v51  ;;  %v4492_v51 = vld [vmem:[%s6558_s1 + $0x140] sm:$0xff]  }
  0x3f   :  { %4414 = vmatprep.subr.msk.bf16.mxu1 %vm673_vm0, %v4463_v52  ;;  %v4495_v52 = vld [vmem:[%s6558_s1 + $0x188] sm:$0xff]  }
  0x43   :  { %3982 = vmatmul.mubr.msk.bf16.vlgmr.msra.gmra.mxu0 %vm673_vm0, %v5175_v28 }
  0x44   :  { %4030 = vmatpush3.bf16.xpose.msra.mxu0 %v816_v55  ;;  %3983 = vmatprep.mubr.msk.bf16.mxu0 %vm673_vm0, %v5248_v53  ;;  %v846_v55 = vsel %vm673_vm0, %v4495_v52, 0 }
  0x45   :  { %4407 = vmatprep.subr.msk.bf16.mxu0 %vm673_vm0, %v4462_v54  ;;  %4014 = vmatmul.mubr.msk.bf16.vlgmr.msra.gmra.mxu1 %vm673_vm0, %v5175_v28  ;;  %v4494_v54 = vld [vmem:[%s6558_s1 + $0x100] sm:$0xff]  }
  0x46   :  { %4062 = vmatpush3.bf16.xpose.msra.mxu1 %v864_v58  ;;  %4015 = vmatprep.mubr.msk.bf16.mxu1 %vm673_vm0, %v5248_v53  ;;  %v795_v57 = vsel %vm673_vm0, %v4494_v54, 0  ;;  %v4497_v58 = vld [vmem:[%s6558_s1 + $0x180] sm:$0xff]  }
  0x47   :  { %4415 = vmatprep.subr.msk.bf16.mxu1 %vm673_vm0, %v4468_v59  ;;  %v843_v59 = vsel %vm673_vm0, %v4497_v58, 0 }
  0x4b   :  { %3984 = vmatmul.mubr.msk.bf16.gmra.mxu0 %vm673_vm0, %v5248_v53 }
  0x4c   :  { %4032 = vmatpush3.bf16.xpose.msra.mxu0 %v813_v0  ;;  %3985 = vmatprep.mubr.msk.bf16.mxu0 %vm673_vm0, %v5278_v61  ;;  %v5616_v0 = vld [vmem:[%s6561_s3 + $0x38] sm:$0xff]  }
  0x4d   :  { %4408 = vmatprep.subr.msk.bf16.mxu0 %vm673_vm0, %v4467_v2  ;;  %4016 = vmatmul.mubr.msk.bf16.gmra.mxu1 %vm673_vm0, %v5248_v53 }
  0x4e   :  { %4064 = vmatpush3.bf16.xpose.msra.mxu1 %v861_v7  ;;  %4017 = vmatprep.mubr.msk.bf16.mxu1 %vm673_vm0, %v5278_v61 }
  0x4f   :  { %4416 = vmatprep.subr.msk.bf16.mxu1 %vm673_vm0, %v4473_v8 }
  0x53   :  { %3986 = vmatmul.mubr.msk.bf16.gmra.mxu0 %vm673_vm0, %v5278_v61 }
  0x54   :  { %4034 = vmatpush3.bf16.xpose.msra.mxu0 %v810_v13  ;;  %3987 = vmatprep.mubr.msk.bf16.mxu0 %vm673_vm0, %v5317_v9 }
  0x55   :  { %4409 = vmatprep.subr.msk.bf16.mxu0 %vm673_vm0, %v4472_v11  ;;  %4018 = vmatmul.mubr.msk.bf16.gmra.mxu1 %vm673_vm0, %v5278_v61 }
  0x56   :  { %4066 = vmatpush3.bf16.xpose.msra.mxu1 %v858_v18  ;;  %4019 = vmatprep.mubr.msk.bf16.mxu1 %vm673_vm0, %v5317_v9 }
  0x57   :  { %4417 = vmatprep.subr.msk.bf16.mxu1 %vm673_vm0, %v4478_v19 }
  0x5b   :  { %3988 = vmatmul.mubr.msk.bf16.gmra.mxu0 %vm673_vm0, %v5317_v9 }
  0x5c   :  { %4036 = vmatpush3.bf16.xpose.msra.mxu0 %v807_v23  ;;  %3989 = vmatprep.mubr.msk.bf16.mxu0 %vm673_vm0, %v5363_v21 }
  0x5d   :  { %4410 = vmatprep.subr.msk.bf16.mxu0 %vm673_vm0, %v4477_v24  ;;  %4020 = vmatmul.mubr.msk.bf16.gmra.mxu1 %vm673_vm0, %v5317_v9 }
  0x5e   :  { %4068 = vmatpush3.bf16.xpose.msra.mxu1 %v855_v30  ;;  %4021 = vmatprep.mubr.msk.bf16.mxu1 %vm673_vm0, %v5363_v21 }
  0x5f   :  { %4418 = vmatprep.subr.msk.bf16.mxu1 %vm673_vm0, %v4483_v31 }
  0x63   :  { %3990 = vmatmul.mubr.msk.bf16.gmra.mxu0 %vm673_vm0, %v5363_v21 }
  0x64   :  { %4038 = vmatpush3.bf16.xpose.msra.mxu0 %v804_v35  ;;  %3991 = vmatprep.mubr.msk.bf16.mxu0 %vm673_vm0, %v5404_v33 }
  0x65   :  { %4411 = vmatprep.subr.msk.bf16.mxu0 %vm673_vm0, %v4482_v36  ;;  %4022 = vmatmul.mubr.msk.bf16.gmra.mxu1 %vm673_vm0, %v5363_v21 }
  0x66   :  { %4070 = vmatpush3.bf16.xpose.msra.mxu1 %v852_v40  ;;  %4023 = vmatprep.mubr.msk.bf16.mxu1 %vm673_vm0, %v5404_v33 }
  0x67   :  { %4419 = vmatprep.subr.msk.bf16.mxu1 %vm673_vm0, %v4488_v41 }
  0x6b   :  { %3992 = vmatmul.mubr.msk.bf16.gmra.mxu0 %vm673_vm0, %v5404_v33 }
  0x6c   :  { %4040 = vmatpush3.bf16.xpose.msra.mxu0 %v801_v43  ;;  %3993 = vmatprep.mubr.msk.bf16.mxu0 %vm673_vm0, %v5439_v42 }
  0x6d   :  { %4412 = vmatprep.subr.msk.bf16.mxu0 %vm673_vm0, %v4487_v44  ;;  %4024 = vmatmul.mubr.msk.bf16.gmra.mxu1 %vm673_vm0, %v5404_v33 }
  0x6e   :  { %4072 = vmatpush3.bf16.xpose.msra.mxu1 %v849_v47  ;;  %4025 = vmatprep.mubr.msk.bf16.mxu1 %vm673_vm0, %v5439_v42 }
  0x6f   :  { %4420 = vmatprep.subr.msk.bf16.mxu1 %vm673_vm0, %v4493_v48 }
  0x73   :  { %3994 = vmatmul.mubr.msk.bf16.gmra.mxu0 %vm673_vm0, %v5439_v42 }
  0x74   :  { %4042 = vmatpush3.bf16.xpose.msra.mxu0 %v798_v50  ;;  %3995 = vmatprep.mubr.msk.bf16.mxu0 %vm673_vm0, %v4491_v49 }
  0x75   :  { %4413 = vmatprep.subr.msk.bf16.mxu0 %vm673_vm0, %v4492_v51  ;;  %4026 = vmatmul.mubr.msk.bf16.gmra.mxu1 %vm673_vm0, %v5439_v42 }
  0x76   :  { %4074 = vmatpush3.bf16.xpose.msra.mxu1 %v846_v55  ;;  %4027 = vmatprep.mubr.msk.bf16.mxu1 %vm673_vm0, %v4491_v49 }
  0x77   :  { %4421 = vmatprep.subr.msk.bf16.mxu1 %vm673_vm0, %v4496_v56 }
  0x7b   :  { %3996 = vmatmul.mubr.msk.bf16.gmra.mxu0 %vm673_vm0, %v4491_v49 }
  0x7c   :  { %4044 = vmatpush3.bf16.xpose.msra.mxu0 %v795_v57  ;;  %4045 = vmatprep.mubr.msk.bf16.mxu0 %vm673_vm0, %v5175_v28 }
  0x7d   :  { %4192 = vmatprep.subr.bf16.mxu0 %v5045_v1  ;;  %4028 = vmatmul.mubr.msk.bf16.gmra.mxu1 %vm673_vm0, %v4491_v49 }
  0x7e   :  { %4076 = vmatpush3.bf16.xpose.msra.mxu1 %v843_v59  ;;  %4077 = vmatprep.mubr.msk.bf16.mxu1 %vm673_vm0, %v5175_v28 }
  0x83   :  { %4046 = vmatmul.mubr.msk.bf16.vlgmr.msra.gmra.mxu0 %vm673_vm0, %v5175_v28 }
  0x84   :  { %4047 = vmatprep.mubr.msk.bf16.mxu0 %vm673_vm0, %v5248_v53  ;;  %4193 = vmatpush3.bf16.msra.mxu0 %v5045_v1  ;;  %v5563_v1 = vld [vmem:[%s6561_s3] sm:$0xff]  }
  0x85   :  { %4078 = vmatmul.mubr.msk.bf16.vlgmr.msra.gmra.mxu1 %vm673_vm0, %v5175_v28  ;;  %v5572_v28 = vld [vmem:[%s6561_s3 + $0x8] sm:$0xff]  }
  0x86   :  { %4079 = vmatprep.mubr.msk.bf16.mxu1 %vm673_vm0, %v5248_v53 }
  0x8b   :  { %4048 = vmatmul.mubr.msk.bf16.gmra.mxu0 %vm673_vm0, %v5248_v53 }
  0x8c   :  { %4049 = vmatprep.mubr.msk.bf16.mxu0 %vm673_vm0, %v5278_v61  ;;  %v5732_v59 = vpop.permute.xlu0 %245 }
  0x8d   :  { %4080 = vmatmul.mubr.msk.bf16.gmra.mxu1 %vm673_vm0, %v5248_v53  ;;  %v5577_v53 = vld [vmem:[%s6561_s3 + $0x10] sm:$0xff]  }
  0x8e   :  { %4081 = vmatprep.mubr.msk.bf16.mxu1 %vm673_vm0, %v5278_v61 }
  0x93   :  { %4050 = vmatmul.mubr.msk.bf16.gmra.mxu0 %vm673_vm0, %v5278_v61 }
  0x94   :  { %4051 = vmatprep.mubr.msk.bf16.mxu0 %vm673_vm0, %v5317_v9 }
  0x95   :  { %4082 = vmatmul.mubr.msk.bf16.gmra.mxu1 %vm673_vm0, %v5278_v61  ;;  %v5593_v61 = vld [vmem:[%s6561_s3 + $0x20] sm:$0xff]  }
  0x96   :  { %4083 = vmatprep.mubr.msk.bf16.mxu1 %vm673_vm0, %v5317_v9 }
  0x9b   :  { %4052 = vmatmul.mubr.msk.bf16.gmra.mxu0 %vm673_vm0, %v5317_v9 }
  0x9c   :  { %4053 = vmatprep.mubr.msk.bf16.mxu0 %vm673_vm0, %v5363_v21 }
  0x9d   :  { %4084 = vmatmul.mubr.msk.bf16.gmra.mxu1 %vm673_vm0, %v5317_v9 }
  0x9e   :  { %4085 = vmatprep.mubr.msk.bf16.mxu1 %vm673_vm0, %v5363_v21 }
  0xa3   :  { %4054 = vmatmul.mubr.msk.bf16.gmra.mxu0 %vm673_vm0, %v5363_v21 }
  0xa4   :  { %4055 = vmatprep.mubr.msk.bf16.mxu0 %vm673_vm0, %v5404_v33 }
  0xa5   :  { %4086 = vmatmul.mubr.msk.bf16.gmra.mxu1 %vm673_vm0, %v5363_v21 }
  0xa6   :  { %4087 = vmatprep.mubr.msk.bf16.mxu1 %vm673_vm0, %v5404_v33 }
  0xab   :  { %4056 = vmatmul.mubr.msk.bf16.gmra.mxu0 %vm673_vm0, %v5404_v33 }
  0xac   :  { %4057 = vmatprep.mubr.msk.bf16.mxu0 %vm673_vm0, %v5439_v42 }
  0xad   :  { %4088 = vmatmul.mubr.msk.bf16.gmra.mxu1 %vm673_vm0, %v5404_v33 }
  0xae   :  { %4089 = vmatprep.mubr.msk.bf16.mxu1 %vm673_vm0, %v5439_v42 }
  0xb3   :  { %4058 = vmatmul.mubr.msk.bf16.gmra.mxu0 %vm673_vm0, %v5439_v42 }
  0xb4   :  { %4059 = vmatprep.mubr.msk.bf16.mxu0 %vm673_vm0, %v4491_v49 }
  0xb5   :  { %4090 = vmatmul.mubr.msk.bf16.gmra.mxu1 %vm673_vm0, %v5439_v42 }
  0xb6   :  { %4091 = vmatprep.mubr.msk.bf16.mxu1 %vm673_vm0, %v4491_v49 }
  0xbb   :  { %4060 = vmatmul.mubr.msk.bf16.gmra.mxu0 %vm673_vm0, %v4491_v49 }
  0xbc   :  { %4194 = vmatprep.mubr.msk.bf16.mxu0 %vm673_vm0, %v5563_v1 }
  0xbd   :  { %4092 = vmatmul.mubr.msk.bf16.gmra.mxu1 %vm673_vm0, %v4491_v49 }
  0xbe   :  { %4214 = vmatprep.mubr.msk.bf16.mxu1 %vm673_vm0, %v5563_v1 }
  0xc3   :  { %4195 = vmatmul.mubr.msk.bf16.vlgmr.msra.gmra.mxu0 %vm673_vm0, %v5572_v28 }
  0xc4   :  { %4198 = vmatprep.mubr.msk.bf16.mxu0 %vm673_vm0, %v5577_v53 }
  0xcb   :  { %4199 = vmatmul.mubr.msk.bf16.gmra.mxu0 %vm673_vm0, %v5588_v60 }
  0xcc   :  { %4202 = vmatprep.mubr.msk.bf16.mxu0 %vm673_vm0, %v5593_v61 }
  0xd3   :  { %4203 = vmatmul.mubr.msk.bf16.gmra.mxu0 %vm673_vm0, %v5602_v62 }
  0xd4   :  { %4206 = vmatprep.mubr.msk.bf16.mxu0 %vm673_vm0, %v5607_v63 }
  0xdb   :  { %4207 = vmatmul.mubr.msk.bf16.gmra.mxu0 %vm673_vm0, %v5616_v0 }
  0xdc   :  { %4234 = vmatprep.mubr.msk.bf16.mxu0 %vm673_vm0, %v5563_v1 }
 0x103   :  { %v5622_v2 = vpop.f32.mrf.mxu0 }
 0x105   :  { %v5624_v3 = vpop.f32.mrf.mxu0 }
 0x107   :  { %v5626_v4 = vpop.f32.mrf.mxu0 }
 0x109   :  { %v5628_v5 = vpop.f32.mrf.mxu0 }
 0x10b   :  { %v5630_v6 = vpop.f32.mrf.mxu0 }
 0x10d   :  { %v5632_v7 = vpop.f32.mrf.mxu0 }
 0x10f   :  { %v5634_v8 = vpop.f32.mrf.mxu0 }
 0x111   :  { %v5636_v9 = vpop.f32.mrf.mxu0 }
 0x113   :  { %v5638_v10 = vpop.f32.mrf.mxu0 }
 0x115   :  { %v5640_v11 = vpop.f32.mrf.mxu0 }
 0x117   :  { %v5642_v12 = vpop.f32.mrf.mxu0 }
 0x119   :  { %v5644_v13 = vpop.f32.mrf.mxu0 }
 0x11b   :  { %v5646_v14 = vpop.f32.mrf.mxu0 }
 0x11d   :  { %v5648_v15 = vpop.f32.mrf.mxu0 }
 0x11f   :  { %v5650_v16 = vpop.f32.mrf.mxu0 }
 0x121   :  { %v5652_v17 = vpop.f32.mrf.mxu0 }
 0x123   :  { %v5654_v18 = vpop.f32.mrf.mxu0 }
 0x125   :  { %v5656_v19 = vpop.f32.mrf.mxu0 }
 0x127   :  { %v5658_v20 = vpop.f32.mrf.mxu0 }
 0x129   :  { %v5660_v21 = vpop.f32.mrf.mxu0 }
 0x12b   :  { %v5662_v22 = vpop.f32.mrf.mxu0 }
 0x12d   :  { %v5664_v23 = vpop.f32.mrf.mxu0 }
 0x12f   :  { %v5666_v24 = vpop.f32.mrf.mxu0 }
 0x131   :  { %v5668_v25 = vpop.f32.mrf.mxu0 }
 0x133   :  { %v5670_v26 = vpop.f32.mrf.mxu0 }
 0x135   :  { %v5672_v27 = vpop.f32.mrf.mxu0 }
 0x137   :  { %v5674_v29 = vpop.f32.mrf.mxu0 }
 0x139   :  { %v5676_v30 = vpop.f32.mrf.mxu0 }
 0x13a   :  { %6570 = vst [vmem:[#allocation2_spill] sm:$0xff] %v5676_v30 }
 0x13b   :  { %v5678_v31 = vpop.f32.mrf.mxu0 }
 0x13d   :  { %v5680_v32 = vpop.f32.mrf.mxu0 }
 0x13f   :  { %v5682_v33 = vpop.f32.mrf.mxu0 }
 0x141   :  { %v5684_v34 = vpop.f32.mrf.mxu0 }
 0x143   :  { %v5686_v35 = vpop.f32.mrf.mxu0 }
 0x144   :  { %6571 = vst [vmem:[#allocation3_spill] sm:$0xff] %v5686_v35 }
 0x145   :  { %v5688_v36 = vpop.f32.mrf.mxu0 }
 0x146   :  { %6572 = vst [vmem:[#allocation4_spill] sm:$0xff] %v5688_v36 }
 0x147   :  { %v5690_v37 = vpop.f32.mrf.mxu0 }
 0x148   :  { %6573 = vst [vmem:[#allocation5_spill] sm:$0xff] %v5690_v37 }
 0x149   :  { %v5692_v38 = vpop.f32.mrf.mxu0 }
 0x14a   :  { %6574 = vst [vmem:[#allocation6_spill] sm:$0xff] %v5692_v38 }
 0x14b   :  { %v5694_v39 = vpop.f32.mrf.mxu0 }
 0x14c   :  { %6575 = vst [vmem:[#allocation7_spill] sm:$0xff] %v5694_v39 }
 0x14d   :  { %v5696_v40 = vpop.f32.mrf.mxu0 }
 0x14e   :  { %6576 = vst [vmem:[#allocation8_spill] sm:$0xff] %v5696_v40 }
 0x14f   :  { %v5698_v41 = vpop.f32.mrf.mxu0 }
 0x150   :  { %6577 = vst [vmem:[#allocation9_spill] sm:$0xff] %v5698_v41 }
 0x151   :  { %v5700_v42 = vpop.f32.mrf.mxu0 }
 0x152   :  { %6578 = vst [vmem:[#allocation10_spill] sm:$0xff] %v5700_v42 }
 0x153   :  { %v5702_v43 = vpop.f32.mrf.mxu0 }
 0x154   :  { %6579 = vst [vmem:[#allocation11_spill] sm:$0xff] %v5702_v43 }
 0x155   :  { %v5704_v44 = vpop.f32.mrf.mxu0 }
 0x156   :  { %6580 = vst [vmem:[#allocation12_spill] sm:$0xff] %v5704_v44 }
 0x157   :  { %v5706_v45 = vpop.f32.mrf.mxu0 }
 0x158   :  { %6581 = vst [vmem:[#allocation13_spill] sm:$0xff] %v5706_v45 }
 0x159   :  { %v5708_v46 = vpop.f32.mrf.mxu0 }
 0x15a   :  { %6582 = vst [vmem:[#allocation14_spill] sm:$0xff] %v5708_v46 }
 0x15b   :  { %v5710_v47 = vpop.f32.mrf.mxu0 }
 0x15c   :  { %6583 = vst [vmem:[#allocation15_spill] sm:$0xff] %v5710_v47 }
 0x15d   :  { %v5712_v48 = vpop.f32.mrf.mxu0 }
 0x15e   :  { %6584 = vst [vmem:[#allocation16_spill] sm:$0xff] %v5712_v48 }
 0x15f   :  { %v5714_v49 = vpop.f32.mrf.mxu0 }
 0x160   :  { %6585 = vst [vmem:[#allocation17_spill] sm:$0xff] %v5714_v49 }
 0x161   :  { %v5716_v50 = vpop.f32.mrf.mxu0 }
 0x162   :  { %6586 = vst [vmem:[#allocation18_spill] sm:$0xff] %v5716_v50  ;;  %v5738_v50 = vpop.permute.xlu1 %265 }
 0x163   :  { %v5718_v51 = vpop.f32.mrf.mxu0 }
 0x164   :  { %6587 = vst [vmem:[#allocation19_spill] sm:$0xff] %v5718_v51 }
 0x165   :  { %v5720_v52 = vpop.f32.mrf.mxu0 }
 0x166   :  { %6588 = vst [vmem:[#allocation20_spill] sm:$0xff] %v5720_v52  ;;  %v5742_v52 = vpop.permute.xlu0 %250  ;;  %v5748_v42 = vpop.permute.xlu1 %270 }
 0x167   :  { %v5722_v54 = vpop.f32.mrf.mxu0 }
 0x168   :  { %6589 = vst [vmem:[#allocation21_spill] sm:$0xff] %v5722_v54 }
 0x169   :  { %v5724_v55 = vpop.f32.mrf.mxu0 }
 0x16a   :  { %6590 = vst [vmem:[#allocation22_spill] sm:$0xff] %v5724_v55  ;;  %v5752_v36 = vpop.permute.xlu0 %235 }
 0x16b   :  { %v5726_v56 = vpop.f32.mrf.mxu0 }
 0x16c   :  { %6591 = vst [vmem:[#allocation23_spill] sm:$0xff] %v5726_v56 }
 0x16d   :  { %v5728_v57 = vpop.f32.mrf.mxu0 }
 0x16e   :  { %6592 = vst [vmem:[#allocation24_spill] sm:$0xff] %v5728_v57  ;;  %v5760_v54 = vpop.permute.xlu0 %255 }
 0x16f   :  { %v5730_v58 = vpop.f32.mrf.mxu0 }
 0x170   :  { %6593 = vst [vmem:[#allocation25_spill] sm:$0xff] %v5730_v58  ;;  %v925_v58 = vadd.f32 %v5622_v2, %v5752_v36 }
 0x171   :  { %v5734_v46 = vpop.f32.mrf.mxu0 }
 0x172   :  { %6594 = vst [vmem:[#allocation26_spill] sm:$0xff] %v5734_v46  ;;  %v5770_v56 = vpop.permute.xlu0 %285 }
 0x173   :  { %v5736_v44 = vpop.f32.mrf.mxu0 }
 0x174   :  { %6595 = vst [vmem:[#allocation27_spill] sm:$0xff] %v5736_v44  ;;  %v5758_v44 = vpop.permute.xlu1 %240 }
 0x175   :  { %v5740_v48 = vpop.f32.mrf.mxu0 }
 0x176   :  { %6596 = vst [vmem:[#allocation28_spill] sm:$0xff] %v5740_v48  ;;  %v5780_v35 = vpop.permute.xlu0 %305 }
 0x177   :  { %v5744_v38 = vpop.f32.mrf.mxu0 }
 0x178   :  { %6597 = vst [vmem:[#allocation29_spill] sm:$0xff] %v5744_v38  ;;  %v935_v38 = vadd.f32 %v5630_v6, %v5732_v59 }
 0x179   :  { %v5746_v55 = vpop.f32.mrf.mxu0 }
 0x17a   :  { %6598 = vst [vmem:[#allocation30_spill] sm:$0xff] %v5746_v55 }
 0x17b   :  { %v5750_v57 = vpop.f32.mrf.mxu0 }
 0x17c   :  { %6599 = vst [vmem:[#allocation31_spill] sm:$0xff] %v5750_v57  ;;  %v5768_v57 = vpop.permute.xlu1 %260 }
 0x17d   :  { %v5754_v40 = vpop.f32.mrf.mxu0 }
 0x17e   :  { %6600 = vst [vmem:[#allocation32_spill] sm:$0xff] %v5754_v40 }
 0x17f   :  { %v5756_v46 = vpop.f32.mrf.mxu0 }
 0x180   :  { %6601 = vst [vmem:[#allocation33_spill] sm:$0xff] %v5756_v46  ;;  %v939_v46 = vadd.f32 %v5634_v8, %v5742_v52  ;;  %v5776_v6 = vpop.permute.xlu1 %290 }
 0x181   :  { %v5762_v48 = vpop.f32.mrf.mxu0 }
 0x182   :  { %6602 = vst [vmem:[#allocation34_spill] sm:$0xff] %v5762_v48  ;;  %v929_v48 = vadd.f32 %v5626_v4, %v5758_v44 }
 0x183   :  { %v4196_v55 = vpop.f32.mrf.mxu0 }
 0x184   :  { %v1505_v51 = vadd.f32 %v4196_v55, %v935_v38  ;;  %v955_v38 = vadd.f32 %v5646_v14, %v5738_v50 }
 0x185   :  { %v1440_v40 = vpop.f32.mrf.mxu0 }
 0x186   :  { %v3706_v45 = vmul.f32 -1.442695, %v1505_v51  ;;  %v1503_v49 = vadd.f32 %v1440_v40, %v925_v58  ;;  %v945_v40 = vadd.f32 %v5638_v10, %v5760_v54  ;;  %v5790_v10 = vpop.permute.xlu0 %275 }
 0x187   :  { %v4197_v43 = vpop.f32.mrf.mxu0 }
 0x188   :  { %4518 = vpow2.f32 %v3706_v45  ;;  %v3704_v47 = vmul.f32 -1.442695, %v1503_v49  ;;  %v1506_v2 = vadd.f32 %v4197_v43, %v939_v46  ;;  %v959_v43 = vadd.f32 %v5650_v16, %v5748_v42  ;;  %v5786_v45 = vpop.permute.xlu1 %310 }
 0x189   :  { %v1443_v37 = vpop.f32.mrf.mxu0 }
 0x18a   :  { %4520 = vpow2.f32 %v3704_v47  ;;  %v3707_v55 = vmul.f32 -1.442695, %v1506_v2  ;;  %v1504_v41 = vadd.f32 %v1443_v37, %v929_v48  ;;  %v949_v37 = vadd.f32 %v5642_v12, %v5768_v57 }
 0x18b   :  { %v4200_v8 = vpop.f32.mrf.mxu0  ;;  %v975_v2 = vadd.f32 %v5662_v22, %v5770_v56 }
 0x18c   :  { %4522 = vpow2.f32 %v3707_v55  ;;  %v3705_v4 = vmul.f32 -1.442695, %v1504_v41  ;;  %v1509_v51 = vadd.f32 %v4200_v8, %v955_v38  ;;  %v5794_v55 = vpop.f32.mrf.mxu1 }
 0x18d   :  { %v1456_v58 = vpop.f32.mrf.mxu0  ;;  %6603 = vst [vmem:[#allocation35_spill] sm:$0xff] %v5794_v55 }
 0x18e   :  { %4524 = vpow2.f32 %v3705_v4  ;;  %v3710_v14 = vmul.f32 -1.442695, %v1509_v51  ;;  %v1507_v46 = vadd.f32 %v1456_v58, %v945_v40  ;;  %v965_v40 = vadd.f32 %v5654_v18, %v5790_v10  ;;  %v5798_v4 = vpop.permute.xlu1 %280 }
 0x18f   :  { %v4201_v47 = vpop.f32.mrf.mxu0  ;;  %v969_v18 = vadd.f32 %v5658_v20, %v5798_v4  ;;  %v995_v20 = vadd.f32 %v5678_v31, %v5780_v35  ;;  %v999_v31 = vadd.f32 %v5682_v33, %v5786_v45 }
 0x190   :  { %4526 = vpow2.f32 %v3710_v14  ;;  %v3708_v48 = vmul.f32 -1.442695, %v1507_v46  ;;  %v1510_v49 = vadd.f32 %v4201_v47, %v959_v43  ;;  %v979_v43 = vadd.f32 %v5666_v24, %v5776_v6  ;;  %v5806_v24 = vpop.permute.xlu0 %295 }
 0x191   :  { %v1459_v41 = vpop.f32.mrf.mxu0 }
 0x192   :  { %4528 = vpow2.f32 %v3708_v48  ;;  %v3711_v16 = vmul.f32 -1.442695, %v1510_v49  ;;  %v1508_v38 = vadd.f32 %v1459_v41, %v949_v37  ;;  %v5802_v48 = vpop.f32.mrf.mxu1 }
 0x193   :  { %v4204_v8 = vpop.f32.mrf.mxu0  ;;  %6604 = vst [vmem:[#allocation36_spill] sm:$0xff] %v5802_v48 }
 0x194   :  { %4530 = vpow2.f32 %v3711_v16  ;;  %v3709_v12 = vmul.f32 -1.442695, %v1508_v38  ;;  %v1513_v51 = vadd.f32 %v4204_v8, %v975_v2 }
 0x195   :  { %v4519_v58 = vpop.eup %4518  ;;  %v1472_v14 = vpop.f32.mrf.mxu0 }
 0x196   :  { %v1557_v22 = vadd.f32 1.0, %v4519_v58  ;;  %4532 = vpow2.f32 %v3709_v12  ;;  %v3714_v46 = vmul.f32 -1.442695, %v1513_v51  ;;  %v1511_v47 = vadd.f32 %v1472_v14, %v965_v40  ;;  %v5808_v14 = vpop.f32.mrf.mxu1 }
 0x197   :  { %v4521_v37 = vpop.eup %4520  ;;  %v4205_v49 = vpop.f32.mrf.mxu0  ;;  %6605 = vst [vmem:[#allocation37_spill] sm:$0xff] %v5808_v14 }
 0x198   :  { %4534 = vrcp.f32 %v1557_v22  ;;  %v1555_v41 = vadd.f32 1.0, %v4521_v37  ;;  %v3712_v16 = vmul.f32 -1.442695, %v1511_v47  ;;  %v1514_v2 = vadd.f32 %v4205_v49, %v979_v43 }
 0x199   :  { %v4523_v38 = vpop.eup %4522  ;;  %4536 = vpow2.f32 %v3714_v46  ;;  %v1475_v8 = vpop.f32.mrf.mxu0  ;;  %v985_v46 = vadd.f32 %v5670_v26, %v5806_v24 }
 0x19a   :  { %4538 = vrcp.f32 %v1555_v41  ;;  %v1558_v12 = vadd.f32 1.0, %v4523_v38  ;;  %v3715_v51 = vmul.f32 -1.442695, %v1514_v2  ;;  %v1512_v40 = vadd.f32 %v1475_v8, %v969_v18  ;;  %v5814_v2 = vpop.permute.xlu1 %300  ;;  %v5816_v8 = vpop.f32.mrf.mxu1 }
 0x19b   :  { %v4525_v58 = vpop.eup %4524  ;;  %4540 = vpow2.f32 %v3712_v16  ;;  %v4208_v22 = vpop.f32.mrf.mxu0  ;;  %6606 = vst [vmem:[#allocation38_spill] sm:$0xff] %v5814_v2  ;;  %6607 = vst [vmem:[#allocation39_spill] sm:$0xff] %v5816_v8  ;;  %v989_v26 = vadd.f32 %v5674_v29, %v5814_v2 }
 0x19c   :  { %4542 = vrcp.f32 %v1558_v12  ;;  %v1556_v47 = vadd.f32 1.0, %v4525_v58  ;;  %v3713_v43 = vmul.f32 -1.442695, %v1512_v40  ;;  %v1517_v49 = vadd.f32 %v4208_v22, %v995_v20 }
 0x19d   :  { %v4527_v37 = vpop.eup %4526  ;;  %4544 = vpow2.f32 %v3715_v51  ;;  %v1488_v41 = vpop.f32.mrf.mxu0 }
 0x19e   :  { %4546 = vrcp.f32 %v1556_v47  ;;  %v1561_v18 = vadd.f32 1.0, %v4527_v37  ;;  %v1515_v16 = vadd.f32 %v1488_v41, %v985_v46  ;;  %v5822_v37 = vpop.f32.mrf.mxu1 }
 0x19f   :  { %v4529_v38 = vpop.eup %4528  ;;  %4548 = vpow2.f32 %v3713_v43  ;;  %v4209_v12 = vpop.f32.mrf.mxu0  ;;  %6608 = vst [vmem:[#allocation40_spill] sm:$0xff] %v5822_v37 }
 0x1a0   :  { %4550 = vrcp.f32 %v1561_v18  ;;  %v1559_v40 = vadd.f32 1.0, %v4529_v38  ;;  %v1518_v51 = vadd.f32 %v4209_v12, %v999_v31  ;;  %v5824_v18 = vpop.f32.mrf.mxu1 }
 0x1a1   :  { %v4531_v58 = vpop.eup %4530  ;;  %4552 = vtanh.f32 %v1517_v49  ;;  %v1491_v20 = vpop.f32.mrf.mxu0  ;;  %6609 = vst [vmem:[#allocation41_spill] sm:$0xff] %v5824_v18 }
 0x1a2   :  { %4554 = vrcp.f32 %v1559_v40  ;;  %v1562_v22 = vadd.f32 1.0, %v4531_v58  ;;  %v1516_v39 = vadd.f32 %v1491_v20, %v989_v26  ;;  %v5826_v12 = vpop.f32.mrf.mxu1 }
 0x1a3   :  { %v4533_v47 = vpop.eup %4532  ;;  %4556 = vtanh.f32 %v1515_v16  ;;  %6610 = vst [vmem:[#allocation42_spill] sm:$0xff] %v5826_v12 }
 0x1a4   :  { %4558 = vrcp.f32 %v1562_v22  ;;  %v1560_v33 = vadd.f32 1.0, %v4533_v47  ;;  %v5828_v47 = vpop.f32.mrf.mxu1 }
 0x1a5   :  { %v4535_v43 = vpop.eup %4534  ;;  %4560 = vtanh.f32 %v1518_v51  ;;  %6611 = vst [vmem:[#allocation43_spill] sm:$0xff] %v5828_v47 }
 0x1a6   :  { %v4537_v46 = vpop.eup %4536  ;;  %4562 = vrcp.f32 %v1560_v33  ;;  %v5832_v2 = vpop.f32.mrf.mxu1 }
 0x1a7   :  { %v4539_v41 = vpop.eup %4538  ;;  %4564 = vtanh.f32 %v1516_v39  ;;  %v1565_v20 = vadd.f32 1.0, %v4537_v46 }
 0x1a8   :  { %v4541_v29 = vpop.eup %4540 }
 0x1a9   :  { %v4543_v49 = vpop.eup %4542  ;;  %v1563_v51 = vadd.f32 1.0, %v4541_v29  ;;  %4566 = vrcp.f32 %v1565_v20 }
 0x1aa   :  { %v4545_v38 = vpop.eup %4544 }
 0x1ab   :  { %v4547_v31 = vpop.eup %4546  ;;  %v1566_v18 = vadd.f32 1.0, %v4545_v38  ;;  %4568 = vrcp.f32 %v1563_v51 }
 0x1ac   :  { %v4549_v40 = vpop.eup %4548 }
 0x1ad   :  { %v4551_v58 = vpop.eup %4550  ;;  %4570 = vrcp.f32 %v1566_v18 }
 0x1ae   :  { %v4553_v16 = vpop.eup %4552  ;;  %v1597_v26 = vmul.f32 0.0, %v4551_v58 }
 0x1af   :  { %v4555_v22 = vpop.eup %4554  ;;  %v1601_v33 = vmul.f32 %v4553_v16, %v4535_v43  ;;  %v1564_v43 = vadd.f32 1.0, %v4549_v40 }
 0x1b0   :  { %v4557_v8 = vpop.eup %4556  ;;  %v1595_v48 = vmul.f32 0.0, %v4555_v22 }
 0x1b1   :  { %v4559_v39 = vpop.eup %4558  ;;  %v5830_v14 = vadd.f32 %v1601_v33, %v1597_v26  ;;  %v1599_v55 = vmul.f32 %v4557_v8, %v4539_v41  ;;  %v5840_v8 = vpop.f32.mrf.mxu1 }
 0x1b2   :  { %v4561_v37 = vpop.eup %4560  ;;  %v1598_v30 = vmul.f32 0.0, %v4559_v39  ;;  %6612 = vst [vmem:[#allocation44_spill] sm:$0xff] %v5840_v8 }
 0x1b3   :  { %v4563_v12 = vpop.eup %4562  ;;  %v5834_v46 = vadd.f32 %v1599_v55, %v1595_v48  ;;  %v1602_v58 = vmul.f32 %v4561_v37, %v4543_v49  ;;  %4572 = vtanh.f32 %v5830_v14  ;;  %v5846_v55 = vpop.f32.mrf.mxu1 }
 0x1b4   :  { %v4565_v47 = vpop.eup %4564  ;;  %v1596_v29 = vmul.f32 0.0, %v4563_v12 }
 0x1b5   :  { %v5837_v38 = vadd.f32 %v1602_v58, %v1598_v30  ;;  %v1600_v16 = vmul.f32 %v4565_v47, %v4547_v31  ;;  %4574 = vtanh.f32 %v5834_v46  ;;  %v5848_v37 = vpop.f32.mrf.mxu1 }
 0x1b6   :  { %v4567_v48 = vpop.eup %4566  ;;  %6613 = vst [vmem:[#allocation45_spill] sm:$0xff] %v5848_v37 }
 0x1b7   :  { %4576 = vtanh.f32 %v5837_v38  ;;  %v5843_v41 = vadd.f32 %v1600_v16, %v1596_v29  ;;  %v5850_v12 = vpop.f32.mrf.mxu1 }
 0x1b8   :  { %4578 = vrcp.f32 %v1564_v43  ;;  %v4569_v18 = vpop.eup %4568 }
 0x1b9   :  { %4580 = vtanh.f32 %v5843_v41  ;;  %v5852_v51 = vpop.f32.mrf.mxu1 }
 0x1ba   :  { %v4571_v30 = vpop.eup %4570  ;;  %6614 = vst [vmem:[#allocation46_spill] sm:$0xff] %v5852_v51 }
 0x1bb   :  { %v5854_v43 = vpop.f32.mrf.mxu1 }
 0x1bd   :  { %v5856_v16 = vpop.f32.mrf.mxu1 }
 0x1be   :  { %6615 = vst [vmem:[#allocation47_spill] sm:$0xff] %v5856_v16 }
 0x1c0   :  { %v4573_v49 = vpop.eup %4572 }
 0x1c1   :  { %v1613_v20 = vmul.f32 %v4573_v49, %v4567_v48  ;;  %v5862_v48 = vpop.f32.mrf.mxu1 }
 0x1c2   :  { %v4575_v31 = vpop.eup %4574 }
 0x1c3   :  { %v1611_v39 = vmul.f32 %v4575_v31, %v4569_v18 }
 0x1c4   :  { %v4577_v40 = vpop.eup %4576 }
 0x1c5   :  { %v4579_v26 = vpop.eup %4578  ;;  %v1614_v22 = vmul.f32 %v4577_v40, %v4571_v30  ;;  %v5864_v30 = vpop.f32.mrf.mxu1 }
 0x1c6   :  { %v4581_v47 = vpop.eup %4580  ;;  %6616 = vst [vmem:[#allocation48_spill] sm:$0xff] %v5864_v30 }
 0x1c7   :  { %v1616_v33 = vpack.c.bf16 %v1614_v22, %v1613_v20  ;;  %v1612_v58 = vmul.f32 %v4581_v47, %v4579_v26  ;;  %v5870_v18 = vpop.f32.mrf.mxu1 }
 0x1c9   :  { %4210 = vmatprep.subr.bf16.mxu1 %v1616_v33  ;;  %v1615_v29 = vpack.c.bf16 %v1612_v58, %v1611_v39  ;;  %v5872_v49 = vpop.f32.mrf.mxu1 }
 0x1ca   :  { %4211 = vmatpush3.bf16.msra.mxu1 %v1616_v33  ;;  %6617 = vst [vmem:[#allocation49_spill] sm:$0xff] %v5872_v49 }
 0x1cb   :  { %4212 = vmatprep.subr.bf16.mxu1 %v1615_v29  ;;  %v5878_v31 = vpop.f32.mrf.mxu1 }
 0x1cd   :  { %v5880_v40 = vpop.f32.mrf.mxu1 }
 0x1ce   :  { %4213 = vmatpush3.bf16.msra.mxu1 %v1615_v29  ;;  %6618 = vst [vmem:[#allocation50_spill] sm:$0xff] %v5880_v40 }
 0x1cf   :  { %v5886_v26 = vpop.f32.mrf.mxu1 }
 0x1d1   :  { %4215 = vmatmul.mubr.msk.bf16.vlgmr.msra.gmra.mxu1 %vm673_vm0, %v5572_v28  ;;  %v5888_v20 = vpop.f32.mrf.mxu1 }
 0x1d2   :  { %4218 = vmatprep.mubr.msk.bf16.mxu1 %vm673_vm0, %v5577_v53  ;;  %6619 = vst [vmem:[#allocation51_spill] sm:$0xff] %v5888_v20 }
 0x1d3   :  { %v5890_v22 = vpop.f32.mrf.mxu1 }
 0x1d4   :  { %6620 = vst [vmem:[#allocation52_spill] sm:$0xff] %v5890_v22 }
 0x1d5   :  { %v5892_v47 = vpop.f32.mrf.mxu1 }
 0x1d6   :  { %6621 = vst [vmem:[#allocation53_spill] sm:$0xff] %v5892_v47 }
 0x1d7   :  { %v5894_v33 = vpop.f32.mrf.mxu1 }
 0x1d8   :  { %6622 = vst [vmem:[#allocation54_spill] sm:$0xff] %v5894_v33 }
 0x1d9   :  { %4219 = vmatmul.mubr.msk.bf16.gmra.mxu1 %vm673_vm0, %v5588_v60  ;;  %v5896_v39 = vpop.f32.mrf.mxu1 }
 0x1da   :  { %4222 = vmatprep.mubr.msk.bf16.mxu1 %vm673_vm0, %v5593_v61  ;;  %6623 = vst [vmem:[#allocation55_spill] sm:$0xff] %v5896_v39 }
 0x1db   :  { %v5898_v58 = vpop.f32.mrf.mxu1 }
 0x1dd   :  { %v5900_v29 = vpop.f32.mrf.mxu1 }
 0x1de   :  { %6624 = vst [vmem:[#allocation56_spill] sm:$0xff] %v5900_v29 }
 0x1df   :  { %v5902_v49 = vpop.f32.mrf.mxu1 }
 0x1e0   :  { %6625 = vst [vmem:[#allocation57_spill] sm:$0xff] %v5902_v49 }
 0x1e1   :  { %4223 = vmatmul.mubr.msk.bf16.gmra.mxu1 %vm673_vm0, %v5602_v62  ;;  %v5904_v30 = vpop.f32.mrf.mxu1 }
 0x1e2   :  { %4226 = vmatprep.mubr.msk.bf16.mxu1 %vm673_vm0, %v5607_v63  ;;  %6626 = vst [vmem:[#allocation58_spill] sm:$0xff] %v5904_v30 }
 0x1e3   :  { %v5906_v40 = vpop.f32.mrf.mxu1 }
 0x1e4   :  { %6627 = vst [vmem:[#allocation59_spill] sm:$0xff] %v5906_v40 }
 0x1e5   :  { %v5908_v37 = vpop.f32.mrf.mxu1 }
 0x1e6   :  { %6628 = vst [vmem:[#allocation60_spill] sm:$0xff] %v5908_v37 }
 0x1e7   :  { %v5910_v20 = vpop.f32.mrf.mxu1 }
 0x1e8   :  { %6629 = vst [vmem:[#allocation61_spill] sm:$0xff] %v5910_v20 }
 0x1e9   :  { %4227 = vmatmul.mubr.msk.bf16.gmra.mxu1 %vm673_vm0, %v5616_v0  ;;  %v5912_v16 = vpop.f32.mrf.mxu1 }
 0x1ea   :  { %4254 = vmatprep.mubr.msk.bf16.mxu1 %vm673_vm0, %v5563_v1  ;;  %6630 = vst [vmem:[#allocation62_spill] sm:$0xff] %v5912_v16 }
 0x1eb   :  { %v5914_v47 = vpop.f32.mrf.mxu1 }
 0x1ec   :  { %6631 = vst [vmem:[#allocation63_spill] sm:$0xff] %v5914_v47 }
 0x1ed   :  { %v5916_v8 = vpop.f32.mrf.mxu1 }
 0x1ee   :  { %6632 = vst [vmem:[#allocation64_spill] sm:$0xff] %v5916_v8 }
 0x1ef   :  { %v5918_v39 = vpop.f32.mrf.mxu1 }
 0x1f0   :  { %6633 = vst [vmem:[#allocation65_spill] sm:$0xff] %v5918_v39 }
 0x1f1   :  { %v5920_v51 = vpop.f32.mrf.mxu1 }
 0x1f2   :  { %6634 = vst [vmem:[#allocation66_spill] sm:$0xff] %v5920_v51 }
 0x1f3   :  { %v5922_v29 = vpop.f32.mrf.mxu1 }
 0x1f4   :  { %6635 = vst [vmem:[#allocation67_spill] sm:$0xff] %v5922_v29 }
 0x1f5   :  { %v5924_v33 = vpop.f32.mrf.mxu1 }
 0x1f6   :  { %6636 = vst [vmem:[#allocation68_spill] sm:$0xff] %v5924_v33 }
 0x1f7   :  { %v5926_v30 = vpop.f32.mrf.mxu1 }
 0x1f8   :  { %6637 = vst [vmem:[#allocation69_spill] sm:$0xff] %v5926_v30 }
 0x1f9   :  { %v5928_v40 = vpop.f32.mrf.mxu1 }
 0x1fa   :  { %6638 = vst [vmem:[#allocation70_spill] sm:$0xff] %v5928_v40 }
 0x1fb   :  { %v5930_v37 = vpop.f32.mrf.mxu1 }
 0x1fc   :  { %6639 = vst [vmem:[#allocation71_spill] sm:$0xff] %v5930_v37 }
 0x1fd   :  { %v5932_v20 = vpop.f32.mrf.mxu1 }
 0x1fe   :  { %6640 = vst [vmem:[#allocation72_spill] sm:$0xff] %v5932_v20 }
 0x1ff   :  { %v5934_v16 = vpop.f32.mrf.mxu1 }
 0x200   :  { %6641 = vst [vmem:[#allocation73_spill] sm:$0xff] %v5934_v16 }
 0x201   :  { %v5936_v47 = vpop.f32.mrf.mxu1 }
 0x202   :  { %6642 = vst [vmem:[#allocation74_spill] sm:$0xff] %v5936_v47 }
 0x203   :  { %v5938_v8 = vpop.f32.mrf.mxu1 }
 0x204   :  { %6643 = vst [vmem:[#allocation75_spill] sm:$0xff] %v5938_v8 }
 0x205   :  { %v5940_v39 = vpop.f32.mrf.mxu1 }
 0x206   :  { %6644 = vst [vmem:[#allocation76_spill] sm:$0xff] %v5940_v39 }
 0x207   :  { %v5942_v51 = vpop.f32.mrf.mxu1 }
 0x208   :  { %6645 = vst [vmem:[#allocation77_spill] sm:$0xff] %v5942_v51 }
 0x209   :  { %v5944_v29 = vpop.f32.mrf.mxu1 }
 0x20a   :  { %6646 = vst [vmem:[#allocation78_spill] sm:$0xff] %v5944_v29 }
 0x20b   :  { %v5946_v33 = vpop.f32.mrf.mxu1 }
 0x20c   :  { %6647 = vst [vmem:[#allocation79_spill] sm:$0xff] %v5946_v33 }
 0x20d   :  { %v5948_v30 = vpop.f32.mrf.mxu1 }
 0x20e   :  { %6648 = vst [vmem:[#allocation80_spill] sm:$0xff] %v5948_v30  ;;  %v937_v30 = vadd.f32 %v5632_v7, %v5732_v59  ;;  %v957_v7 = vadd.f32 %v5648_v15, %v5738_v50  ;;  %v951_v15 = vadd.f32 %v5644_v13, %v5768_v57  ;;  %v981_v13 = vadd.f32 %v5668_v25, %v5776_v6 }
 0x20f   :  { %v5950_v40 = vpop.f32.mrf.mxu1 }
 0x210   :  { %6649 = vst [vmem:[#allocation81_spill] sm:$0xff] %v5950_v40 }
 0x211   :  { %v5952_v37 = vpop.f32.mrf.mxu1 }
 0x212   :  { %6650 = vst [vmem:[#allocation82_spill] sm:$0xff] %v5952_v37 }
 0x213   :  { %v5954_v20 = vpop.f32.mrf.mxu1 }
 0x214   :  { %6651 = vst [vmem:[#allocation83_spill] sm:$0xff] %v5954_v20  ;;  %v927_v20 = vadd.f32 %v5624_v3, %v5752_v36 }
 0x215   :  { %v5956_v16 = vpop.f32.mrf.mxu1 }
 0x216   :  { %6652 = vst [vmem:[#allocation84_spill] sm:$0xff] %v5956_v16 }
 0x217   :  { %v5958_v47 = vpop.f32.mrf.mxu1 }
 0x218   :  { %6653 = vst [vmem:[#allocation85_spill] sm:$0xff] %v5958_v47 }
 0x219   :  { %v5960_v8 = vpop.f32.mrf.mxu1 }
 0x21a   :  { %6654 = vst [vmem:[#allocation86_spill] sm:$0xff] %v5960_v8  ;;  %v941_v8 = vadd.f32 %v5636_v9, %v5742_v52  ;;  %v947_v9 = vadd.f32 %v5640_v11, %v5760_v54  ;;  %v977_v11 = vadd.f32 %v5664_v23, %v5770_v56 }
 0x21b   :  { %v5962_v39 = vpop.f32.mrf.mxu1 }
 0x21c   :  { %6655 = vst [vmem:[#allocation87_spill] sm:$0xff] %v5962_v39 }
 0x21d   :  { %v5964_v51 = vpop.f32.mrf.mxu1 }
 0x21e   :  { %6656 = vst [vmem:[#allocation88_spill] sm:$0xff] %v5964_v51  ;;  %v931_v51 = vadd.f32 %v5628_v5, %v5758_v44  ;;  %v961_v5 = vadd.f32 %v5652_v17, %v5748_v42  ;;  %v967_v17 = vadd.f32 %v5656_v19, %v5790_v10 }
 0x21f   :  { %v5966_v29 = vpop.f32.mrf.mxu1 }
 0x220   :  { %6657 = vst [vmem:[#allocation89_spill] sm:$0xff] %v5966_v29 }
 0x221   :  { %v5968_v33 = vpop.f32.mrf.mxu1 }
 0x222   :  { %6658 = vst [vmem:[#allocation90_spill] sm:$0xff] %v5968_v33 }
 0x291   :  { %v4216_v37 = vpop.f32.mrf.mxu1 }
 0x292   :  { %v1716_v16 = vadd.f32 %v4216_v37, %v937_v30 }
 0x293   :  { %v1651_v40 = vpop.f32.mrf.mxu1 }
 0x294   :  { %v3726_v47 = vmul.f32 -1.442695, %v1716_v16  ;;  %v1714_v39 = vadd.f32 %v1651_v40, %v927_v20 }
 0x295   :  { %v4217_v49 = vpop.f32.mrf.mxu1 }
 0x296   :  { %4582 = vpow2.f32 %v3726_v47  ;;  %v3724_v33 = vmul.f32 -1.442695, %v1714_v39  ;;  %v1717_v29 = vadd.f32 %v4217_v49, %v941_v8 }
 0x297   :  { %v1654_v22 = vpop.f32.mrf.mxu1 }
 0x298   :  { %4584 = vpow2.f32 %v3724_v33  ;;  %v3727_v3 = vmul.f32 -1.442695, %v1717_v29  ;;  %v1715_v37 = vadd.f32 %v1654_v22, %v931_v51 }
 0x299   :  { %v4220_v30 = vpop.f32.mrf.mxu1 }
 0x29a   :  { %4586 = vpow2.f32 %v3727_v3  ;;  %v3725_v16 = vmul.f32 -1.442695, %v1715_v37  ;;  %v1720_v40 = vadd.f32 %v4220_v30, %v957_v7 }
 0x29b   :  { %v1667_v20 = vpop.f32.mrf.mxu1 }
 0x29c   :  { %4588 = vpow2.f32 %v3725_v16  ;;  %v3730_v8 = vmul.f32 -1.442695, %v1720_v40  ;;  %v1718_v49 = vadd.f32 %v1667_v20, %v947_v9 }
 0x29d   :  { %v4221_v47 = vpop.f32.mrf.mxu1 }
 0x29e   :  { %4590 = vpow2.f32 %v3730_v8  ;;  %v3728_v51 = vmul.f32 -1.442695, %v1718_v49  ;;  %v1721_v22 = vadd.f32 %v4221_v47, %v961_v5  ;;  %v971_v5 = vadd.f32 %v5660_v21, %v5798_v4 }
 0x29f   :  { %v1670_v33 = vpop.f32.mrf.mxu1 }
 0x2a0   :  { %4592 = vpow2.f32 %v3728_v51  ;;  %v3731_v39 = vmul.f32 -1.442695, %v1721_v22  ;;  %v1719_v29 = vadd.f32 %v1670_v33, %v951_v15 }
 0x2a1   :  { %v4224_v7 = vpop.f32.mrf.mxu1 }
 0x2a2   :  { %4594 = vpow2.f32 %v3731_v39  ;;  %v3729_v3 = vmul.f32 -1.442695, %v1719_v29  ;;  %v1724_v37 = vadd.f32 %v4224_v7, %v977_v11  ;;  %v997_v39 = vadd.f32 %v5680_v32, %v5780_v35 }
 0x2a3   :  { %v4583_v30 = vpop.eup %4582  ;;  %v1683_v9 = vpop.f32.mrf.mxu1 }
 0x2a4   :  { %v1768_v16 = vadd.f32 1.0, %v4583_v30  ;;  %4596 = vpow2.f32 %v3729_v3  ;;  %v3734_v40 = vmul.f32 -1.442695, %v1724_v37  ;;  %v1722_v20 = vadd.f32 %v1683_v9, %v967_v17 }
 0x2a5   :  { %v4585_v23 = vpop.eup %4584  ;;  %v4225_v8 = vpop.f32.mrf.mxu1  ;;  %v987_v3 = vadd.f32 %v5672_v27, %v5806_v24 }
 0x2a6   :  { %4598 = vrcp.f32 %v1768_v16  ;;  %v1766_v49 = vadd.f32 1.0, %v4585_v23  ;;  %v3732_v19 = vmul.f32 -1.442695, %v1722_v20  ;;  %v1725_v47 = vadd.f32 %v4225_v8, %v981_v13  ;;  %v6660_v8 = vld [vmem:[#allocation2_spill] sm:$0xff] }
 0x2a7   :  { %v4587_v15 = vpop.eup %4586  ;;  %4600 = vpow2.f32 %v3734_v40  ;;  %v1686_v51 = vpop.f32.mrf.mxu1  ;;  %v1001_v16 = vadd.f32 %v5684_v34, %v5786_v45 }
 0x2a8   :  { %4602 = vrcp.f32 %v1766_v49  ;;  %v1769_v22 = vadd.f32 1.0, %v4587_v15  ;;  %v3735_v25 = vmul.f32 -1.442695, %v1725_v47  ;;  %v1723_v33 = vadd.f32 %v1686_v51, %v971_v5  ;;  %v6659_v5 = vld [vmem:[#allocation38_spill] sm:$0xff] }
 0x2a9   :  { %v4589_v11 = vpop.eup %4588  ;;  %4604 = vpow2.f32 %v3732_v19  ;;  %v4228_v29 = vpop.f32.mrf.mxu1  ;;  %v991_v49 = vadd.f32 %v6660_v8, %v6659_v5 }
 0x2aa   :  { %4606 = vrcp.f32 %v1769_v22  ;;  %v1767_v21 = vadd.f32 1.0, %v4589_v11  ;;  %v3733_v7 = vmul.f32 -1.442695, %v1723_v33  ;;  %v1728_v37 = vadd.f32 %v4228_v29, %v997_v39 }
 0x2ab   :  { %v4591_v17 = vpop.eup %4590  ;;  %4608 = vpow2.f32 %v3735_v25  ;;  %v1699_v30 = vpop.f32.mrf.mxu1 }
 0x2ac   :  { %4610 = vrcp.f32 %v1767_v21  ;;  %v1772_v13 = vadd.f32 1.0, %v4591_v17  ;;  %v1726_v32 = vadd.f32 %v1699_v30, %v987_v3 }
 0x2ad   :  { %v4593_v9 = vpop.eup %4592  ;;  %4612 = vpow2.f32 %v3733_v7  ;;  %v4229_v40 = vpop.f32.mrf.mxu1 }
 0x2ae   :  { %4614 = vrcp.f32 %v1772_v13  ;;  %v1770_v20 = vadd.f32 1.0, %v4593_v9  ;;  %v1729_v27 = vadd.f32 %v4229_v40, %v1001_v16 }
 0x2af   :  { %v4595_v23 = vpop.eup %4594  ;;  %4616 = vtanh.f32 %v1728_v37  ;;  %v1702_v19 = vpop.f32.mrf.mxu1 }
 0x2b0   :  { %4618 = vrcp.f32 %v1770_v20  ;;  %v1773_v47 = vadd.f32 1.0, %v4595_v23  ;;  %v1727_v51 = vadd.f32 %v1702_v19, %v991_v49 }
 0x2b1   :  { %v4597_v15 = vpop.eup %4596  ;;  %4620 = vtanh.f32 %v1726_v32 }
 0x2b2   :  { %4622 = vrcp.f32 %v1773_v47  ;;  %v1771_v22 = vadd.f32 1.0, %v4597_v15 }
 0x2b3   :  { %v4599_v34 = vpop.eup %4598  ;;  %4624 = vtanh.f32 %v1729_v27 }
 0x2b4   :  { %v4601_v25 = vpop.eup %4600  ;;  %4626 = vrcp.f32 %v1771_v22 }
 0x2b5   :  { %v4603_v33 = vpop.eup %4602  ;;  %4628 = vtanh.f32 %v1727_v51  ;;  %v1776_v37 = vadd.f32 1.0, %v4601_v25 }
 0x2b6   :  { %v4605_v11 = vpop.eup %4604 }
 0x2b7   :  { %v4607_v39 = vpop.eup %4606  ;;  %v1774_v9 = vadd.f32 1.0, %v4605_v11  ;;  %4630 = vrcp.f32 %v1776_v37 }
 0x2b8   :  { %v4609_v29 = vpop.eup %4608 }
 0x2b9   :  { %v4611_v21 = vpop.eup %4610  ;;  %v1777_v40 = vadd.f32 1.0, %v4609_v29  ;;  %4632 = vrcp.f32 %v1774_v9 }
 0x2ba   :  { %v4613_v7 = vpop.eup %4612 }
 0x2bb   :  { %v4615_v17 = vpop.eup %4614  ;;  %4634 = vrcp.f32 %v1777_v40  ;;  %v1775_v22 = vadd.f32 1.0, %v4613_v7 }
 0x2bc   :  { %v4617_v3 = vpop.eup %4616  ;;  %v1808_v30 = vmul.f32 %v4615_v17, %v5830_v14 }
 0x2bd   :  { %v4619_v13 = vpop.eup %4618  ;;  %v1812_v16 = vmul.f32 %v4617_v3, %v4599_v34 }
 0x2be   :  { %v4621_v32 = vpop.eup %4620  ;;  %v1806_v20 = vmul.f32 %v4619_v13, %v5834_v46 }
 0x2bf   :  { %v4623_v23 = vpop.eup %4622  ;;  %v6004_v8 = vadd.f32 %v1812_v16, %v1808_v30  ;;  %v1810_v49 = vmul.f32 %v4621_v32, %v4603_v33 }
 0x2c0   :  { %v4625_v27 = vpop.eup %4624  ;;  %v1809_v19 = vmul.f32 %v4623_v23, %v5837_v38 }
 0x2c1   :  { %v4627_v47 = vpop.eup %4626  ;;  %v6007_v15 = vadd.f32 %v1810_v49, %v1806_v20  ;;  %v1813_v14 = vmul.f32 %v4625_v27, %v4607_v39  ;;  %4636 = vtanh.f32 %v6004_v8 }
 0x2c2   :  { %v4629_v51 = vpop.eup %4628  ;;  %v1807_v34 = vmul.f32 %v4627_v47, %v5843_v41 }
 0x2c3   :  { %v6011_v46 = vadd.f32 %v1813_v14, %v1809_v19  ;;  %v1811_v25 = vmul.f32 %v4629_v51, %v4611_v21  ;;  %4638 = vtanh.f32 %v6007_v15  ;;  %v1068_v51 = vadd.f32 %v5850_v12, %v5738_v50 }
 0x2c4   :  { %v4631_v33 = vpop.eup %4630  ;;  %v1062_v12 = vadd.f32 %v5846_v55, %v5768_v57  ;;  %v1092_v55 = vadd.f32 %v5886_v26, %v5776_v6 }
 0x2c5   :  { %4640 = vtanh.f32 %v6011_v46  ;;  %v6015_v38 = vadd.f32 %v1811_v25, %v1807_v34 }
 0x2c6   :  { %4642 = vrcp.f32 %v1775_v22  ;;  %v4633_v11 = vpop.eup %4632 }
 0x2c7   :  { %4644 = vtanh.f32 %v6015_v38 }
 0x2c8   :  { %v4635_v39 = vpop.eup %4634 }
 0x2ce   :  { %v4637_v29 = vpop.eup %4636 }
 0x2cf   :  { %v1824_v3 = vmul.f32 %v4637_v29, %v4631_v33  ;;  %v1058_v33 = vadd.f32 %v5832_v2, %v5760_v54  ;;  %v1088_v2 = vadd.f32 %v5878_v31, %v5770_v56 }
 0x2d0   :  { %v4639_v7 = vpop.eup %4638 }
 0x2d1   :  { %v1822_v13 = vmul.f32 %v4639_v7, %v4633_v11  ;;  %v1072_v7 = vadd.f32 %v5854_v43, %v5748_v42  ;;  %v1078_v43 = vadd.f32 %v5862_v48, %v5790_v10 }
 0x2d2   :  { %v4641_v41 = vpop.eup %4640 }
 0x2d3   :  { %v4643_v17 = vpop.eup %4642  ;;  %v1825_v37 = vmul.f32 %v4641_v41, %v4635_v39 }
 0x2d4   :  { %v4645_v30 = vpop.eup %4644 }
 0x2d5   :  { %v1827_v21 = vpack.c.bf16 %v1825_v37, %v1824_v3  ;;  %v1823_v9 = vmul.f32 %v4645_v30, %v4643_v17 }
 0x2d7   :  { %4230 = vmatprep.subr.bf16.mxu0 %v1827_v21  ;;  %v1826_v16 = vpack.c.bf16 %v1823_v9, %v1822_v13 }
 0x2d8   :  { %4231 = vmatpush3.bf16.msra.mxu0 %v1827_v21 }
 0x2d9   :  { %4232 = vmatprep.subr.bf16.mxu0 %v1826_v16 }
 0x2dc   :  { %4233 = vmatpush3.bf16.msra.mxu0 %v1826_v16 }
 0x2df   :  { %4235 = vmatmul.mubr.msk.bf16.vlgmr.msra.gmra.mxu0 %vm673_vm0, %v5572_v28  ;;  %v6661_v28 = vld [vmem:[#allocation40_spill] sm:$0xff] }
 0x2e0   :  { %4238 = vmatprep.mubr.msk.bf16.mxu0 %vm673_vm0, %v5577_v53  ;;  %v1048_v53 = vadd.f32 %v6661_v28, %v5732_v59 }
 0x2e7   :  { %4239 = vmatmul.mubr.msk.bf16.gmra.mxu0 %vm673_vm0, %v5588_v60  ;;  %v6662_v60 = vld [vmem:[#allocation35_spill] sm:$0xff] }
 0x2e8   :  { %4242 = vmatprep.mubr.msk.bf16.mxu0 %vm673_vm0, %v5593_v61  ;;  %v1038_v40 = vadd.f32 %v6662_v60, %v5752_v36 }
 0x2ef   :  { %4243 = vmatmul.mubr.msk.bf16.gmra.mxu0 %vm673_vm0, %v5602_v62  ;;  %v6663_v62 = vld [vmem:[#allocation42_spill] sm:$0xff] }
 0x2f0   :  { %4246 = vmatprep.mubr.msk.bf16.mxu0 %vm673_vm0, %v5607_v63  ;;  %v1052_v23 = vadd.f32 %v6663_v62, %v5742_v52  ;;  %v1082_v62 = vadd.f32 %v5870_v18, %v5798_v4 }
 0x2f7   :  { %4247 = vmatmul.mubr.msk.bf16.gmra.mxu0 %vm673_vm0, %v5616_v0  ;;  %v6664_v0 = vld [vmem:[#allocation37_spill] sm:$0xff] }
 0x2f8   :  { %4274 = vmatprep.mubr.msk.bf16.mxu0 %vm673_vm0, %v5563_v1  ;;  %v1042_v19 = vadd.f32 %v6664_v0, %v5758_v44 }
 0x39f   :  { %v4236_v32 = vpop.f32.mrf.mxu0 }
 0x3a0   :  { %v1927_v61 = vadd.f32 %v4236_v32, %v1048_v53 }
 0x3a1   :  { %v1862_v20 = vpop.f32.mrf.mxu0 }
 0x3a2   :  { %v3746_v49 = vmul.f32 -1.442695, %v1927_v61  ;;  %v1925_v63 = vadd.f32 %v1862_v20, %v1038_v40 }
 0x3a3   :  { %v4237_v27 = vpop.f32.mrf.mxu0 }
 0x3a4   :  { %4646 = vpow2.f32 %v3746_v49  ;;  %v3744_v1 = vmul.f32 -1.442695, %v1925_v63  ;;  %v1928_v47 = vadd.f32 %v4237_v27, %v1052_v23 }
 0x3a5   :  { %v1865_v14 = vpop.f32.mrf.mxu0 }
 0x3a6   :  { %4648 = vpow2.f32 %v3744_v1  ;;  %v3747_v22 = vmul.f32 -1.442695, %v1928_v47  ;;  %v1926_v34 = vadd.f32 %v1865_v14, %v1042_v19  ;;  %v1108_v14 = vadd.f32 %v5898_v58, %v5780_v35 }
 0x3a7   :  { %v4240_v25 = vpop.f32.mrf.mxu0 }
 0x3a8   :  { %4650 = vpow2.f32 %v3747_v22  ;;  %v3745_v11 = vmul.f32 -1.442695, %v1926_v34  ;;  %v1931_v39 = vadd.f32 %v4240_v25, %v1068_v51  ;;  %v6665_v25 = vld [vmem:[#allocation52_spill] sm:$0xff] }
 0x3a9   :  { %v1878_v29 = vpop.f32.mrf.mxu0 }
 0x3aa   :  { %4652 = vpow2.f32 %v3745_v11  ;;  %v3750_v41 = vmul.f32 -1.442695, %v1931_v39  ;;  %v1929_v17 = vadd.f32 %v1878_v29, %v1058_v33  ;;  %v1098_v33 = vadd.f32 %v6665_v25, %v5806_v24 }
 0x3ab   :  { %v4241_v3 = vpop.f32.mrf.mxu0 }
 0x3ac   :  { %4654 = vpow2.f32 %v3750_v41  ;;  %v3748_v37 = vmul.f32 -1.442695, %v1929_v17  ;;  %v1932_v30 = vadd.f32 %v4241_v3, %v1072_v7  ;;  %v6666_v41 = vld [vmem:[#allocation57_spill] sm:$0xff] }
 0x3ad   :  { %v1881_v21 = vpop.f32.mrf.mxu0  ;;  %v1112_v17 = vadd.f32 %v6666_v41, %v5786_v45 }
 0x3ae   :  { %4656 = vpow2.f32 %v3748_v37  ;;  %v3751_v13 = vmul.f32 -1.442695, %v1932_v30  ;;  %v1930_v9 = vadd.f32 %v1881_v21, %v1062_v12  ;;  %v6667_v30 = vld [vmem:[#allocation54_spill] sm:$0xff] }
 0x3af   :  { %v4244_v16 = vpop.f32.mrf.mxu0  ;;  %v1102_v21 = vadd.f32 %v6667_v30, %v6659_v5 }
 0x3b0   :  { %4658 = vpow2.f32 %v3751_v13  ;;  %v3749_v28 = vmul.f32 -1.442695, %v1930_v9  ;;  %v1935_v53 = vadd.f32 %v4244_v16, %v1088_v2 }
 0x3b1   :  { %v4647_v32 = vpop.eup %4646  ;;  %v1894_v60 = vpop.f32.mrf.mxu0 }
 0x3b2   :  { %v1979_v40 = vadd.f32 1.0, %v4647_v32  ;;  %4660 = vpow2.f32 %v3749_v28  ;;  %v3754_v61 = vmul.f32 -1.442695, %v1935_v53  ;;  %v1933_v20 = vadd.f32 %v1894_v60, %v1078_v43 }
 0x3b3   :  { %v4649_v31 = vpop.eup %4648  ;;  %v4245_v23 = vpop.f32.mrf.mxu0 }
 0x3b4   :  { %4662 = vrcp.f32 %v1979_v40  ;;  %v1977_v49 = vadd.f32 1.0, %v4649_v31  ;;  %v3752_v48 = vmul.f32 -1.442695, %v1933_v20  ;;  %v1936_v63 = vadd.f32 %v4245_v23, %v1092_v55 }
 0x3b5   :  { %v4651_v27 = vpop.eup %4650  ;;  %4664 = vpow2.f32 %v3754_v61  ;;  %v1897_v0 = vpop.f32.mrf.mxu0 }
 0x3b6   :  { %4666 = vrcp.f32 %v1977_v49  ;;  %v1980_v19 = vadd.f32 1.0, %v4651_v27  ;;  %v3755_v26 = vmul.f32 -1.442695, %v1936_v63  ;;  %v1934_v1 = vadd.f32 %v1897_v0, %v1082_v62 }
 0x3b7   :  { %v4653_v47 = vpop.eup %4652  ;;  %4668 = vpow2.f32 %v3752_v48  ;;  %v4248_v51 = vpop.f32.mrf.mxu0 }
 0x3b8   :  { %4670 = vrcp.f32 %v1980_v19  ;;  %v1978_v18 = vadd.f32 1.0, %v4653_v47  ;;  %v3753_v22 = vmul.f32 -1.442695, %v1934_v1  ;;  %v1939_v11 = vadd.f32 %v4248_v51, %v1108_v14 }
 0x3b9   :  { %v4655_v34 = vpop.eup %4654  ;;  %4672 = vpow2.f32 %v3755_v26  ;;  %v1910_v39 = vpop.f32.mrf.mxu0 }
 0x3ba   :  { %4674 = vrcp.f32 %v1978_v18  ;;  %v1983_v29 = vadd.f32 1.0, %v4655_v34  ;;  %v1937_v58 = vadd.f32 %v1910_v39, %v1098_v33 }
 0x3bb   :  { %v4657_v7 = vpop.eup %4656  ;;  %4676 = vpow2.f32 %v3753_v22  ;;  %v4249_v3 = vpop.f32.mrf.mxu0 }
 0x3bc   :  { %4678 = vrcp.f32 %v1983_v29  ;;  %v1981_v12 = vadd.f32 1.0, %v4657_v7  ;;  %v1940_v2 = vadd.f32 %v4249_v3, %v1112_v17 }
 0x3bd   :  { %v4659_v37 = vpop.eup %4658  ;;  %4680 = vtanh.f32 %v1939_v11  ;;  %v1913_v13 = vpop.f32.mrf.mxu0 }
 0x3be   :  { %4682 = vrcp.f32 %v1981_v12  ;;  %v1984_v9 = vadd.f32 1.0, %v4659_v37  ;;  %v1938_v43 = vadd.f32 %v1913_v13, %v1102_v21 }
 0x3bf   :  { %v4661_v16 = vpop.eup %4660  ;;  %4684 = vtanh.f32 %v1937_v58 }
 0x3c0   :  { %4686 = vrcp.f32 %v1984_v9  ;;  %v1982_v28 = vadd.f32 1.0, %v4661_v16 }
 0x3c1   :  { %v4663_v53 = vpop.eup %4662  ;;  %4688 = vtanh.f32 %v1940_v2 }
 0x3c2   :  { %v4665_v32 = vpop.eup %4664  ;;  %4690 = vrcp.f32 %v1982_v28  ;;  %v6092_v28 = vld [vmem:[%s6561_s3 + $0x10] sm:$0xff]  }
 0x3c3   :  { %v4667_v55 = vpop.eup %4666  ;;  %4692 = vtanh.f32 %v1938_v43  ;;  %v1987_v49 = vadd.f32 1.0, %v4665_v32  ;;  %v6085_v43 = vld [vmem:[%s6561_s3 + $0x8] sm:$0xff]   ;;  %v6106_v32 = vld [vmem:[%s6561_s3 + $0x20] sm:$0xff]  }
 0x3c4   :  { %v4669_v60 = vpop.eup %4668 }
 0x3c5   :  { %v4671_v40 = vpop.eup %4670  ;;  %v1985_v27 = vadd.f32 1.0, %v4669_v60  ;;  %4694 = vrcp.f32 %v1987_v49  ;;  %v6120_v60 = vld [vmem:[%s6561_s3 + $0x30] sm:$0xff]  }
 0x3c6   :  { %v4673_v61 = vpop.eup %4672 }
 0x3c7   :  { %v4675_v20 = vpop.eup %4674  ;;  %v1988_v26 = vadd.f32 1.0, %v4673_v61  ;;  %4696 = vrcp.f32 %v1985_v27  ;;  %v6134_v61 = vld [vmem:[%s6561_s3] sm:$0xff]   ;;  %v6670_v27 = vld [vmem:[#allocation43_spill] sm:$0xff] }
 0x3c8   :  { %v4677_v31 = vpop.eup %4676 }
 0x3c9   :  { %v4679_v62 = vpop.eup %4678  ;;  %4698 = vrcp.f32 %v1988_v26  ;;  %v1986_v11 = vadd.f32 1.0, %v4677_v31 }
 0x3ca   :  { %v4681_v23 = vpop.eup %4680  ;;  %v2019_v48 = vmul.f32 %v4679_v62, %v6004_v8 }
 0x3cb   :  { %v4683_v63 = vpop.eup %4682  ;;  %v2023_v0 = vmul.f32 %v4681_v23, %v4663_v53  ;;  %v6099_v53 = vld [vmem:[%s6561_s3 + $0x18] sm:$0xff]   ;;  %v6669_v23 = vld [vmem:[#allocation36_spill] sm:$0xff] }
 0x3cc   :  { %v4685_v19 = vpop.eup %4684  ;;  %v2017_v1 = vmul.f32 %v4683_v63, %v6007_v15  ;;  %v1040_v49 = vadd.f32 %v6669_v23, %v5752_v36 }
 0x3cd   :  { %v4687_v47 = vpop.eup %4686  ;;  %v6068_v14 = vadd.f32 %v2023_v0, %v2019_v48  ;;  %v2021_v51 = vmul.f32 %v4685_v19, %v4667_v55  ;;  %v6113_v55 = vld [vmem:[%s6561_s3 + $0x28] sm:$0xff]   ;;  %v1054_v0 = vadd.f32 %v6670_v27, %v5742_v52 }
 0x3ce   :  { %v4689_v18 = vpop.eup %4688  ;;  %v2020_v22 = vmul.f32 %v4687_v47, %v6011_v46  ;;  %v6671_v47 = vld [vmem:[#allocation39_spill] sm:$0xff] }
 0x3cf   :  { %v4691_v34 = vpop.eup %4690  ;;  %v6071_v25 = vadd.f32 %v2021_v51, %v2017_v1  ;;  %v2024_v8 = vmul.f32 %v4689_v18, %v4671_v40  ;;  %4700 = vtanh.f32 %v6068_v14  ;;  %v6127_v40 = vld [vmem:[%s6561_s3 + $0x38] sm:$0xff]   ;;  %v1044_v51 = vadd.f32 %v6671_v47, %v5758_v44 }
 0x3d0   :  { %v4693_v33 = vpop.eup %4692  ;;  %v2018_v39 = vmul.f32 %v4691_v34, %v6015_v38 }
 0x3d1   :  { %v6075_v15 = vadd.f32 %v2024_v8, %v2020_v22  ;;  %v2022_v29 = vmul.f32 %v4693_v33, %v4675_v20  ;;  %4702 = vtanh.f32 %v6071_v25  ;;  %v6668_v20 = vld [vmem:[#allocation41_spill] sm:$0xff]  ;;  %v6672_v8 = vld [vmem:[#allocation46_spill] sm:$0xff] }
 0x3d2   :  { %v4695_v7 = vpop.eup %4694  ;;  %v1050_v31 = vadd.f32 %v6668_v20, %v5732_v59  ;;  %v1070_v33 = vadd.f32 %v6672_v8, %v5738_v50 }
 0x3d3   :  { %4704 = vtanh.f32 %v6075_v15  ;;  %v6079_v46 = vadd.f32 %v2022_v29, %v2018_v39 }
 0x3d4   :  { %4706 = vrcp.f32 %v1986_v11  ;;  %v4697_v41 = vpop.eup %4696 }
 0x3d5   :  { %4708 = vtanh.f32 %v6079_v46 }
 0x3d6   :  { %v4699_v17 = vpop.eup %4698 }
 0x3dc   :  { %v4701_v58 = vpop.eup %4700 }
 0x3dd   :  { %v2035_v37 = vmul.f32 %v4701_v58, %v4695_v7  ;;  %v6673_v7 = vld [vmem:[#allocation44_spill] sm:$0xff] }
 0x3de   :  { %v4703_v3 = vpop.eup %4702 }
 0x3df   :  { %v2033_v13 = vmul.f32 %v4703_v3, %v4697_v41  ;;  %v1060_v41 = vadd.f32 %v6673_v7, %v5760_v54 }
 0x3e0   :  { %v4705_v38 = vpop.eup %4704 }
 0x3e1   :  { %v4707_v12 = vpop.eup %4706  ;;  %v2036_v30 = vmul.f32 %v4705_v38, %v4699_v17  ;;  %v6674_v38 = vld [vmem:[#allocation47_spill] sm:$0xff] }
 0x3e2   :  { %v4709_v21 = vpop.eup %4708 }
 0x3e3   :  { %v2038_v2 = vpack.c.bf16 %v2036_v30, %v2035_v37  ;;  %v2034_v9 = vmul.f32 %v4709_v21, %v4707_v12  ;;  %v1074_v12 = vadd.f32 %v6674_v38, %v5748_v42 }
 0x3e5   :  { %4250 = vmatprep.subr.bf16.mxu1 %v2038_v2  ;;  %v2037_v16 = vpack.c.bf16 %v2034_v9, %v2033_v13 }
 0x3e6   :  { %4251 = vmatpush3.bf16.msra.mxu1 %v2038_v2  ;;  %v6675_v2 = vld [vmem:[#allocation45_spill] sm:$0xff] }
 0x3e7   :  { %4252 = vmatprep.subr.bf16.mxu1 %v2037_v16  ;;  %v1064_v13 = vadd.f32 %v6675_v2, %v5768_v57 }
 0x3ea   :  { %4253 = vmatpush3.bf16.msra.mxu1 %v2037_v16 }
 0x3ed   :  { %4255 = vmatmul.mubr.msk.bf16.vlgmr.msra.gmra.mxu1 %vm673_vm0, %v6085_v43 }
 0x3ee   :  { %4258 = vmatprep.mubr.msk.bf16.mxu1 %vm673_vm0, %v6092_v28 }
 0x3f5   :  { %4259 = vmatmul.mubr.msk.bf16.gmra.mxu1 %vm673_vm0, %v6099_v53 }
 0x3f6   :  { %4262 = vmatprep.mubr.msk.bf16.mxu1 %vm673_vm0, %v6106_v32 }
 0x3fd   :  { %4263 = vmatmul.mubr.msk.bf16.gmra.mxu1 %vm673_vm0, %v6113_v55 }
 0x3fe   :  { %4266 = vmatprep.mubr.msk.bf16.mxu1 %vm673_vm0, %v6120_v60 }
 0x405   :  { %4267 = vmatmul.mubr.msk.bf16.gmra.mxu1 %vm673_vm0, %v6127_v40 }
 0x406   :  { %4294 = vmatprep.mubr.msk.bf16.mxu1 %vm673_vm0, %v6134_v61 }
 0x4ad   :  { %v4256_v62 = vpop.f32.mrf.mxu1 }
 0x4ae   :  { %v2138_v48 = vadd.f32 %v4256_v62, %v1050_v31  ;;  %v6676_v31 = vld [vmem:[#allocation50_spill] sm:$0xff] }
 0x4af   :  { %v2073_v63 = vpop.f32.mrf.mxu1  ;;  %v1090_v62 = vadd.f32 %v6676_v31, %v5770_v56 }
 0x4b0   :  { %v3766_v19 = vmul.f32 -1.442695, %v2138_v48  ;;  %v2136_v26 = vadd.f32 %v2073_v63, %v1040_v49  ;;  %v6677_v63 = vld [vmem:[#allocation48_spill] sm:$0xff] }
 0x4b1   :  { %v4257_v1 = vpop.f32.mrf.mxu1  ;;  %v1080_v27 = vadd.f32 %v6677_v63, %v5790_v10  ;;  %v6682_v63 = vld [vmem:[#allocation58_spill] sm:$0xff] }
 0x4b2   :  { %4710 = vpow2.f32 %v3766_v19  ;;  %v3764_v18 = vmul.f32 -1.442695, %v2136_v26  ;;  %v2139_v22 = vadd.f32 %v4257_v1, %v1054_v0  ;;  %v6678_v1 = vld [vmem:[#allocation51_spill] sm:$0xff] }
 0x4b3   :  { %v2076_v34 = vpop.f32.mrf.mxu1  ;;  %v1094_v47 = vadd.f32 %v6678_v1, %v5776_v6 }
 0x4b4   :  { %4712 = vpow2.f32 %v3764_v18  ;;  %v3767_v11 = vmul.f32 -1.442695, %v2139_v22  ;;  %v2137_v39 = vadd.f32 %v2076_v34, %v1044_v51 }
 0x4b5   :  { %v4260_v29 = vpop.f32.mrf.mxu1 }
 0x4b6   :  { %4714 = vpow2.f32 %v3767_v11  ;;  %v3765_v17 = vmul.f32 -1.442695, %v2137_v39  ;;  %v2142_v58 = vadd.f32 %v4260_v29, %v1070_v33  ;;  %v6679_v33 = vld [vmem:[#allocation49_spill] sm:$0xff] }
 0x4b7   :  { %v2089_v3 = vpop.f32.mrf.mxu1  ;;  %v1084_v11 = vadd.f32 %v6679_v33, %v5798_v4 }
 0x4b8   :  { %4716 = vpow2.f32 %v3765_v17  ;;  %v3770_v37 = vmul.f32 -1.442695, %v2142_v58  ;;  %v2140_v30 = vadd.f32 %v2089_v3, %v1060_v41 }
 0x4b9   :  { %v4261_v21 = vpop.f32.mrf.mxu1 }
 0x4ba   :  { %4718 = vpow2.f32 %v3770_v37  ;;  %v3768_v9 = vmul.f32 -1.442695, %v2140_v30  ;;  %v2143_v16 = vadd.f32 %v4261_v21, %v1074_v12  ;;  %v6680_v30 = vld [vmem:[#allocation56_spill] sm:$0xff] }
 0x4bb   :  { %v2092_v20 = vpop.f32.mrf.mxu1  ;;  %v1110_v21 = vadd.f32 %v6680_v30, %v5780_v35 }
 0x4bc   :  { %4720 = vpow2.f32 %v3768_v9  ;;  %v3771_v23 = vmul.f32 -1.442695, %v2143_v16  ;;  %v2141_v49 = vadd.f32 %v2092_v20, %v1064_v13  ;;  %v6681_v20 = vld [vmem:[#allocation53_spill] sm:$0xff] }
 0x4bd   :  { %v4264_v48 = vpop.f32.mrf.mxu1  ;;  %v1100_v31 = vadd.f32 %v6681_v20, %v5806_v24 }
 0x4be   :  { %4722 = vpow2.f32 %v3771_v23  ;;  %v3769_v0 = vmul.f32 -1.442695, %v2141_v49  ;;  %v2146_v19 = vadd.f32 %v4264_v48, %v1090_v62 }
 0x4bf   :  { %v4711_v26 = vpop.eup %4710  ;;  %v2105_v51 = vpop.f32.mrf.mxu1 }
 0x4c0   :  { %v2190_v18 = vadd.f32 1.0, %v4711_v26  ;;  %4724 = vpow2.f32 %v3769_v0  ;;  %v3774_v22 = vmul.f32 -1.442695, %v2146_v19  ;;  %v2144_v34 = vadd.f32 %v2105_v51, %v1080_v27 }
 0x4c1   :  { %v4713_v8 = vpop.eup %4712  ;;  %v4265_v39 = vpop.f32.mrf.mxu1  ;;  %v1114_v27 = vadd.f32 %v6682_v63, %v5786_v45 }
 0x4c2   :  { %4726 = vrcp.f32 %v2190_v18  ;;  %v2188_v29 = vadd.f32 1.0, %v4713_v8  ;;  %v3772_v7 = vmul.f32 -1.442695, %v2144_v34  ;;  %v2147_v41 = vadd.f32 %v4265_v39, %v1094_v47  ;;  %v6683_v47 = vld [vmem:[#allocation55_spill] sm:$0xff] }
 0x4c3   :  { %v4715_v17 = vpop.eup %4714  ;;  %4728 = vpow2.f32 %v3774_v22  ;;  %v2108_v58 = vpop.f32.mrf.mxu1  ;;  %v1104_v51 = vadd.f32 %v6683_v47, %v6659_v5 }
 0x4c4   :  { %4730 = vrcp.f32 %v2188_v29  ;;  %v2191_v3 = vadd.f32 1.0, %v4715_v17  ;;  %v3775_v38 = vmul.f32 -1.442695, %v2147_v41  ;;  %v2145_v12 = vadd.f32 %v2108_v58, %v1084_v11 }
 0x4c5   :  { %v4717_v37 = vpop.eup %4716  ;;  %4732 = vpow2.f32 %v3772_v7  ;;  %v4268_v2 = vpop.f32.mrf.mxu1 }
 0x4c6   :  { %4734 = vrcp.f32 %v2191_v3  ;;  %v2189_v13 = vadd.f32 1.0, %v4717_v37  ;;  %v3773_v9 = vmul.f32 -1.442695, %v2145_v12  ;;  %v2150_v62 = vadd.f32 %v4268_v2, %v1110_v21 }
 0x4c7   :  { %v4719_v16 = vpop.eup %4718  ;;  %4736 = vpow2.f32 %v3775_v38  ;;  %v2121_v23 = vpop.f32.mrf.mxu1 }
 0x4c8   :  { %4738 = vrcp.f32 %v2189_v13  ;;  %v2194_v49 = vadd.f32 1.0, %v4719_v16  ;;  %v2148_v0 = vadd.f32 %v2121_v23, %v1100_v31 }
 0x4c9   :  { %v4721_v48 = vpop.eup %4720  ;;  %4740 = vpow2.f32 %v3773_v9  ;;  %v4269_v19 = vpop.f32.mrf.mxu1 }
 0x4ca   :  { %4742 = vrcp.f32 %v2194_v49  ;;  %v2192_v26 = vadd.f32 1.0, %v4721_v48  ;;  %v2151_v18 = vadd.f32 %v4269_v19, %v1114_v27 }
 0x4cb   :  { %v4723_v1 = vpop.eup %4722  ;;  %4744 = vtanh.f32 %v2150_v62  ;;  %v2124_v22 = vpop.f32.mrf.mxu1 }
 0x4cc   :  { %4746 = vrcp.f32 %v2192_v26  ;;  %v2195_v34 = vadd.f32 1.0, %v4723_v1  ;;  %v2149_v33 = vadd.f32 %v2124_v22, %v1104_v51 }
 0x4cd   :  { %v4725_v8 = vpop.eup %4724  ;;  %4748 = vtanh.f32 %v2148_v0 }
 0x4ce   :  { %4750 = vrcp.f32 %v2195_v34  ;;  %v2193_v11 = vadd.f32 1.0, %v4725_v8 }
 0x4cf   :  { %v4727_v39 = vpop.eup %4726  ;;  %4752 = vtanh.f32 %v2151_v18 }
 0x4d0   :  { %v4729_v29 = vpop.eup %4728  ;;  %4754 = vrcp.f32 %v2193_v11 }
 0x4d1   :  { %v4731_v7 = vpop.eup %4730  ;;  %4756 = vtanh.f32 %v2149_v33  ;;  %v2198_v30 = vadd.f32 1.0, %v4729_v29 }
 0x4d2   :  { %v4733_v41 = vpop.eup %4732 }
 0x4d3   :  { %v4735_v17 = vpop.eup %4734  ;;  %v2196_v13 = vadd.f32 1.0, %v4733_v41  ;;  %4758 = vrcp.f32 %v2198_v30 }
 0x4d4   :  { %v4737_v58 = vpop.eup %4736 }
 0x4d5   :  { %v4739_v3 = vpop.eup %4738  ;;  %v2199_v20 = vadd.f32 1.0, %v4737_v58  ;;  %4760 = vrcp.f32 %v2196_v13  ;;  %v6686_v13 = vld [vmem:[#allocation9_spill] sm:$0xff] }
 0x4d6   :  { %v4741_v38 = vpop.eup %4740 }
 0x4d7   :  { %v4743_v12 = vpop.eup %4742  ;;  %4762 = vrcp.f32 %v2199_v20  ;;  %v2197_v26 = vadd.f32 1.0, %v4741_v38 }
 0x4d8   :  { %v4745_v37 = vpop.eup %4744  ;;  %v2230_v21 = vmul.f32 %v4743_v12, %v6068_v14 }
 0x4d9   :  { %v4747_v2 = vpop.eup %4746  ;;  %v2234_v9 = vmul.f32 %v4745_v37, %v4727_v39  ;;  %v6685_v37 = vld [vmem:[#allocation3_spill] sm:$0xff] }
 0x4da   :  { %v4749_v16 = vpop.eup %4748  ;;  %v2228_v31 = vmul.f32 %v4747_v2, %v6071_v25  ;;  %v1151_v30 = vadd.f32 %v6685_v37, %v5752_v36 }
 0x4db   :  { %v4751_v62 = vpop.eup %4750  ;;  %v6172_v23 = vadd.f32 %v2234_v9, %v2230_v21  ;;  %v2232_v49 = vmul.f32 %v4749_v16, %v4731_v7  ;;  %v1165_v9 = vadd.f32 %v6686_v13, %v5742_v52 }
 0x4dc   :  { %v4753_v48 = vpop.eup %4752  ;;  %v2231_v63 = vmul.f32 %v4751_v62, %v6075_v15  ;;  %v6687_v62 = vld [vmem:[#allocation5_spill] sm:$0xff] }
 0x4dd   :  { %v4755_v27 = vpop.eup %4754  ;;  %v6175_v0 = vadd.f32 %v2232_v49, %v2228_v31  ;;  %v2235_v14 = vmul.f32 %v4753_v48, %v4735_v17  ;;  %4764 = vtanh.f32 %v6172_v23  ;;  %v1155_v49 = vadd.f32 %v6687_v62, %v5758_v44 }
 0x4de   :  { %v4757_v19 = vpop.eup %4756  ;;  %v2229_v1 = vmul.f32 %v4755_v27, %v6079_v46 }
 0x4df   :  { %v6179_v25 = vadd.f32 %v2235_v14, %v2231_v63  ;;  %v2233_v47 = vmul.f32 %v4757_v19, %v4739_v3  ;;  %4766 = vtanh.f32 %v6175_v0  ;;  %v6684_v3 = vld [vmem:[#allocation7_spill] sm:$0xff] }
 0x4e0   :  { %v4759_v51 = vpop.eup %4758  ;;  %v1161_v38 = vadd.f32 %v6684_v3, %v5732_v59  ;;  %v6688_v14 = vld [vmem:[#allocation15_spill] sm:$0xff] }
 0x4e1   :  { %4768 = vtanh.f32 %v6179_v25  ;;  %v6183_v15 = vadd.f32 %v2233_v47, %v2229_v1  ;;  %v1181_v19 = vadd.f32 %v6688_v14, %v5738_v50 }
 0x4e2   :  { %4770 = vrcp.f32 %v2197_v26  ;;  %v4761_v18 = vpop.eup %4760 }
 0x4e3   :  { %4772 = vtanh.f32 %v6183_v15 }
 0x4e4   :  { %v4763_v22 = vpop.eup %4762 }
 0x4ea   :  { %v4765_v34 = vpop.eup %4764 }
 0x4eb   :  { %v2246_v11 = vmul.f32 %v4765_v34, %v4759_v51  ;;  %v6689_v51 = vld [vmem:[#allocation11_spill] sm:$0xff] }
 0x4ec   :  { %v4767_v8 = vpop.eup %4766 }
 0x4ed   :  { %v2244_v41 = vmul.f32 %v4767_v8, %v4761_v18  ;;  %v1171_v18 = vadd.f32 %v6689_v51, %v5760_v54 }
 0x4ee   :  { %v4769_v46 = vpop.eup %4768 }
 0x4ef   :  { %v4771_v33 = vpop.eup %4770  ;;  %v2247_v39 = vmul.f32 %v4769_v46, %v4763_v22  ;;  %v6690_v46 = vld [vmem:[#allocation17_spill] sm:$0xff] }
 0x4f0   :  { %v4773_v29 = vpop.eup %4772 }
 0x4f1   :  { %v2249_v7 = vpack.c.bf16 %v2247_v39, %v2246_v11  ;;  %v2245_v17 = vmul.f32 %v4773_v29, %v4771_v33  ;;  %v1185_v33 = vadd.f32 %v6690_v46, %v5748_v42 }
 0x4f3   :  { %4270 = vmatprep.subr.bf16.mxu0 %v2249_v7  ;;  %v2248_v58 = vpack.c.bf16 %v2245_v17, %v2244_v41 }
 0x4f4   :  { %4271 = vmatpush3.bf16.msra.mxu0 %v2249_v7  ;;  %v6691_v7 = vld [vmem:[#allocation13_spill] sm:$0xff] }
 0x4f5   :  { %4272 = vmatprep.subr.bf16.mxu0 %v2248_v58  ;;  %v1175_v41 = vadd.f32 %v6691_v7, %v5768_v57 }
 0x4f8   :  { %4273 = vmatpush3.bf16.msra.mxu0 %v2248_v58 }
 0x4fb   :  { %4275 = vmatmul.mubr.msk.bf16.vlgmr.msra.gmra.mxu0 %vm673_vm0, %v6085_v43 }
 0x4fc   :  { %4278 = vmatprep.mubr.msk.bf16.mxu0 %vm673_vm0, %v6092_v28 }
 0x503   :  { %4279 = vmatmul.mubr.msk.bf16.gmra.mxu0 %vm673_vm0, %v6099_v53 }
 0x504   :  { %4282 = vmatprep.mubr.msk.bf16.mxu0 %vm673_vm0, %v6106_v32 }
 0x50b   :  { %4283 = vmatmul.mubr.msk.bf16.gmra.mxu0 %vm673_vm0, %v6113_v55 }
 0x50c   :  { %4286 = vmatprep.mubr.msk.bf16.mxu0 %vm673_vm0, %v6120_v60 }
 0x513   :  { %4287 = vmatmul.mubr.msk.bf16.gmra.mxu0 %vm673_vm0, %v6127_v40 }
 0x514   :  { %4314 = vmatprep.mubr.msk.bf16.mxu0 %vm673_vm0, %v6134_v61 }
 0x5bb   :  { %v4276_v12 = vpop.f32.mrf.mxu0 }
 0x5bc   :  { %v2349_v21 = vadd.f32 %v4276_v12, %v1161_v38  ;;  %v6692_v38 = vld [vmem:[#allocation23_spill] sm:$0xff] }
 0x5bd   :  { %v2284_v2 = vpop.f32.mrf.mxu0  ;;  %v1201_v12 = vadd.f32 %v6692_v38, %v5770_v56 }
 0x5be   :  { %v3786_v16 = vmul.f32 -1.442695, %v2349_v21  ;;  %v2347_v20 = vadd.f32 %v2284_v2, %v1151_v30  ;;  %v6693_v2 = vld [vmem:[#allocation19_spill] sm:$0xff] }
 0x5bf   :  { %v4277_v31 = vpop.f32.mrf.mxu0  ;;  %v1191_v13 = vadd.f32 %v6693_v2, %v5790_v10  ;;  %v6698_v2 = vld [vmem:[#allocation33_spill] sm:$0xff] }
 0x5c0   :  { %4774 = vpow2.f32 %v3786_v16  ;;  %v3784_v48 = vmul.f32 -1.442695, %v2347_v20  ;;  %v2350_v63 = vadd.f32 %v4277_v31, %v1165_v9  ;;  %v6694_v31 = vld [vmem:[#allocation25_spill] sm:$0xff] }
 0x5c1   :  { %v2287_v27 = vpop.f32.mrf.mxu0  ;;  %v1205_v62 = vadd.f32 %v6694_v31, %v5776_v6 }
 0x5c2   :  { %4776 = vpow2.f32 %v3784_v48  ;;  %v3787_v26 = vmul.f32 -1.442695, %v2350_v63  ;;  %v2348_v1 = vadd.f32 %v2287_v27, %v1155_v49 }
 0x5c3   :  { %v4280_v47 = vpop.f32.mrf.mxu0 }
 0x5c4   :  { %4778 = vpow2.f32 %v3787_v26  ;;  %v3785_v22 = vmul.f32 -1.442695, %v2348_v1  ;;  %v2353_v34 = vadd.f32 %v4280_v47, %v1181_v19  ;;  %v6695_v19 = vld [vmem:[#allocation21_spill] sm:$0xff] }
 0x5c5   :  { %v2300_v8 = vpop.f32.mrf.mxu0  ;;  %v1195_v26 = vadd.f32 %v6695_v19, %v5798_v4 }
 0x5c6   :  { %4780 = vpow2.f32 %v3785_v22  ;;  %v3790_v11 = vmul.f32 -1.442695, %v2353_v34  ;;  %v2351_v39 = vadd.f32 %v2300_v8, %v1171_v18 }
 0x5c7   :  { %v4281_v29 = vpop.f32.mrf.mxu0 }
 0x5c8   :  { %4782 = vpow2.f32 %v3790_v11  ;;  %v3788_v17 = vmul.f32 -1.442695, %v2351_v39  ;;  %v2354_v58 = vadd.f32 %v4281_v29, %v1185_v33  ;;  %v6696_v39 = vld [vmem:[#allocation31_spill] sm:$0xff] }
 0x5c9   :  { %v2303_v3 = vpop.f32.mrf.mxu0  ;;  %v1221_v29 = vadd.f32 %v6696_v39, %v5780_v35 }
 0x5ca   :  { %4784 = vpow2.f32 %v3788_v17  ;;  %v3791_v37 = vmul.f32 -1.442695, %v2354_v58  ;;  %v2352_v30 = vadd.f32 %v2303_v3, %v1175_v41  ;;  %v6697_v3 = vld [vmem:[#allocation27_spill] sm:$0xff] }
 0x5cb   :  { %v4284_v21 = vpop.f32.mrf.mxu0  ;;  %v1211_v38 = vadd.f32 %v6697_v3, %v5806_v24 }
 0x5cc   :  { %4786 = vpow2.f32 %v3791_v37  ;;  %v3789_v9 = vmul.f32 -1.442695, %v2352_v30  ;;  %v2357_v16 = vadd.f32 %v4284_v21, %v1201_v12 }
 0x5cd   :  { %v4775_v20 = vpop.eup %4774  ;;  %v2316_v49 = vpop.f32.mrf.mxu0 }
 0x5ce   :  { %v2401_v48 = vadd.f32 1.0, %v4775_v20  ;;  %4788 = vpow2.f32 %v3789_v9  ;;  %v3794_v63 = vmul.f32 -1.442695, %v2357_v16  ;;  %v2355_v27 = vadd.f32 %v2316_v49, %v1191_v13 }
 0x5cf   :  { %v4777_v14 = vpop.eup %4776  ;;  %v4285_v1 = vpop.f32.mrf.mxu0  ;;  %v1225_v13 = vadd.f32 %v6698_v2, %v5786_v45 }
 0x5d0   :  { %4790 = vrcp.f32 %v2401_v48  ;;  %v2399_v47 = vadd.f32 1.0, %v4777_v14  ;;  %v3792_v51 = vmul.f32 -1.442695, %v2355_v27  ;;  %v2358_v18 = vadd.f32 %v4285_v1, %v1205_v62  ;;  %v6699_v62 = vld [vmem:[#allocation29_spill] sm:$0xff] }
 0x5d1   :  { %v4779_v22 = vpop.eup %4778  ;;  %4792 = vpow2.f32 %v3794_v63  ;;  %v2319_v34 = vpop.f32.mrf.mxu0  ;;  %v1215_v49 = vadd.f32 %v6699_v62, %v6659_v5 }
 0x5d2   :  { %4794 = vrcp.f32 %v2399_v47  ;;  %v2402_v8 = vadd.f32 1.0, %v4779_v22  ;;  %v3795_v46 = vmul.f32 -1.442695, %v2358_v18  ;;  %v2356_v33 = vadd.f32 %v2319_v34, %v1195_v26 }
 0x5d3   :  { %v4781_v11 = vpop.eup %4780  ;;  %4796 = vpow2.f32 %v3792_v51  ;;  %v4288_v7 = vpop.f32.mrf.mxu0 }
 0x5d4   :  { %4798 = vrcp.f32 %v2402_v8  ;;  %v2400_v41 = vadd.f32 1.0, %v4781_v11  ;;  %v3793_v17 = vmul.f32 -1.442695, %v2356_v33  ;;  %v2361_v12 = vadd.f32 %v4288_v7, %v1221_v29 }
 0x5d5   :  { %v4783_v58 = vpop.eup %4782  ;;  %4800 = vpow2.f32 %v3795_v46  ;;  %v2332_v37 = vpop.f32.mrf.mxu0 }
 0x5d6   :  { %4802 = vrcp.f32 %v2400_v41  ;;  %v2405_v30 = vadd.f32 1.0, %v4783_v58  ;;  %v2359_v9 = vadd.f32 %v2332_v37, %v1211_v38 }
 0x5d7   :  { %v4785_v21 = vpop.eup %4784  ;;  %4804 = vpow2.f32 %v3793_v17  ;;  %v4289_v16 = vpop.f32.mrf.mxu0 }
 0x5d8   :  { %4806 = vrcp.f32 %v2405_v30  ;;  %v2403_v20 = vadd.f32 1.0, %v4785_v21  ;;  %v2362_v48 = vadd.f32 %v4289_v16, %v1225_v13 }
 0x5d9   :  { %v4787_v31 = vpop.eup %4786  ;;  %4808 = vtanh.f32 %v2361_v12  ;;  %v2335_v63 = vpop.f32.mrf.mxu0 }
 0x5da   :  { %4810 = vrcp.f32 %v2403_v20  ;;  %v2406_v27 = vadd.f32 1.0, %v4787_v31  ;;  %v2360_v19 = vadd.f32 %v2335_v63, %v1215_v49 }
 0x5db   :  { %v4789_v14 = vpop.eup %4788  ;;  %4812 = vtanh.f32 %v2359_v9 }
 0x5dc   :  { %4814 = vrcp.f32 %v2406_v27  ;;  %v2404_v26 = vadd.f32 1.0, %v4789_v14 }
 0x5dd   :  { %v4791_v1 = vpop.eup %4790  ;;  %4816 = vtanh.f32 %v2362_v48 }
 0x5de   :  { %v4793_v47 = vpop.eup %4792  ;;  %4818 = vrcp.f32 %v2404_v26 }
 0x5df   :  { %v4795_v51 = vpop.eup %4794  ;;  %4820 = vtanh.f32 %v2360_v19  ;;  %v2409_v39 = vadd.f32 1.0, %v4793_v47 }
 0x5e0   :  { %v4797_v18 = vpop.eup %4796 }
 0x5e1   :  { %v4799_v22 = vpop.eup %4798  ;;  %v2407_v41 = vadd.f32 1.0, %v4797_v18  ;;  %4822 = vrcp.f32 %v2409_v39 }
 0x5e2   :  { %v4801_v34 = vpop.eup %4800 }
 0x5e3   :  { %v4803_v8 = vpop.eup %4802  ;;  %v2410_v3 = vadd.f32 1.0, %v4801_v34  ;;  %4824 = vrcp.f32 %v2407_v41  ;;  %v6702_v41 = vld [vmem:[#allocation10_spill] sm:$0xff] }
 0x5e4   :  { %v4805_v46 = vpop.eup %4804 }
 0x5e5   :  { %v4807_v33 = vpop.eup %4806  ;;  %4826 = vrcp.f32 %v2410_v3  ;;  %v2408_v20 = vadd.f32 1.0, %v4805_v46 }
 0x5e6   :  { %v4809_v11 = vpop.eup %4808  ;;  %v2441_v29 = vmul.f32 %v4807_v33, %v6172_v23 }
 0x5e7   :  { %v4811_v7 = vpop.eup %4810  ;;  %v2445_v17 = vmul.f32 %v4809_v11, %v4791_v1  ;;  %v6701_v11 = vld [vmem:[#allocation4_spill] sm:$0xff] }
 0x5e8   :  { %v4813_v58 = vpop.eup %4812  ;;  %v2439_v38 = vmul.f32 %v4811_v7, %v6175_v0  ;;  %v1153_v39 = vadd.f32 %v6701_v11, %v5752_v36 }
 0x5e9   :  { %v4815_v12 = vpop.eup %4814  ;;  %v6236_v37 = vadd.f32 %v2445_v17, %v2441_v29  ;;  %v2443_v30 = vmul.f32 %v4813_v58, %v4795_v51  ;;  %v1167_v17 = vadd.f32 %v6702_v41, %v5742_v52 }
 0x5ea   :  { %v4817_v21 = vpop.eup %4816  ;;  %v2442_v2 = vmul.f32 %v4815_v12, %v6179_v25  ;;  %v6703_v12 = vld [vmem:[#allocation6_spill] sm:$0xff] }
 0x5eb   :  { %v4819_v13 = vpop.eup %4818  ;;  %v6239_v9 = vadd.f32 %v2443_v30, %v2439_v38  ;;  %v2446_v23 = vmul.f32 %v4817_v21, %v4799_v22  ;;  %4828 = vtanh.f32 %v6236_v37  ;;  %v1157_v30 = vadd.f32 %v6703_v12, %v5758_v44 }
 0x5ec   :  { %v4821_v16 = vpop.eup %4820  ;;  %v2440_v31 = vmul.f32 %v4819_v13, %v6183_v15  ;;  %v6704_v13 = vld [vmem:[#allocation16_spill] sm:$0xff] }
 0x5ed   :  { %v6243_v0 = vadd.f32 %v2446_v23, %v2442_v2  ;;  %v2444_v62 = vmul.f32 %v4821_v16, %v4803_v8  ;;  %4830 = vtanh.f32 %v6239_v9  ;;  %v6700_v8 = vld [vmem:[#allocation8_spill] sm:$0xff]  ;;  %v1183_v23 = vadd.f32 %v6704_v13, %v5738_v50  ;;  %v6711_v13 = vld [vmem:[#allocation22_spill] sm:$0xff] }
 0x5ee   :  { %v4823_v49 = vpop.eup %4822  ;;  %v1163_v46 = vadd.f32 %v6700_v8, %v5732_v59  ;;  %v6708_v8 = vld [vmem:[#allocation24_spill] sm:$0xff] }
 0x5ef   :  { %4832 = vtanh.f32 %v6243_v0  ;;  %v6247_v25 = vadd.f32 %v2444_v62, %v2440_v31  ;;  %v6705_v62 = vld [vmem:[#allocation12_spill] sm:$0xff] }
 0x5f0   :  { %4834 = vrcp.f32 %v2408_v20  ;;  %v4825_v48 = vpop.eup %4824 }
 0x5f1   :  { %4836 = vtanh.f32 %v6247_v25 }
 0x5f2   :  { %v4827_v63 = vpop.eup %4826 }
 0x5f8   :  { %v4829_v27 = vpop.eup %4828 }
 0x5f9   :  { %v2457_v26 = vmul.f32 %v4829_v27, %v4823_v49  ;;  %v1173_v49 = vadd.f32 %v6705_v62, %v5760_v54 }
 0x5fa   :  { %v4831_v14 = vpop.eup %4830 }
 0x5fb   :  { %v2455_v18 = vmul.f32 %v4831_v14, %v4825_v48  ;;  %v6706_v14 = vld [vmem:[#allocation18_spill] sm:$0xff] }
 0x5fc   :  { %v4833_v15 = vpop.eup %4832 }
 0x5fd   :  { %v4835_v19 = vpop.eup %4834  ;;  %v2458_v1 = vmul.f32 %v4833_v15, %v4827_v63  ;;  %v1187_v15 = vadd.f32 %v6706_v14, %v5748_v42 }
 0x5fe   :  { %v4837_v47 = vpop.eup %4836 }
 0x5ff   :  { %v2460_v51 = vpack.c.bf16 %v2458_v1, %v2457_v26  ;;  %v2456_v22 = vmul.f32 %v4837_v47, %v4835_v19  ;;  %v6707_v47 = vld [vmem:[#allocation14_spill] sm:$0xff] }
 0x601   :  { %4290 = vmatprep.subr.bf16.mxu1 %v2460_v51  ;;  %v2459_v34 = vpack.c.bf16 %v2456_v22, %v2455_v18 }
 0x602   :  { %4291 = vmatpush3.bf16.msra.mxu1 %v2460_v51  ;;  %v1177_v51 = vadd.f32 %v6707_v47, %v5768_v57 }
 0x603   :  { %4292 = vmatprep.subr.bf16.mxu1 %v2459_v34 }
 0x606   :  { %4293 = vmatpush3.bf16.msra.mxu1 %v2459_v34 }
 0x609   :  { %4295 = vmatmul.mubr.msk.bf16.vlgmr.msra.gmra.mxu1 %vm673_vm0, %v6085_v43 }
 0x60a   :  { %4298 = vmatprep.mubr.msk.bf16.mxu1 %vm673_vm0, %v6092_v28 }
 0x611   :  { %4299 = vmatmul.mubr.msk.bf16.gmra.mxu1 %vm673_vm0, %v6099_v53 }
 0x612   :  { %4302 = vmatprep.mubr.msk.bf16.mxu1 %vm673_vm0, %v6106_v32 }
 0x619   :  { %4303 = vmatmul.mubr.msk.bf16.gmra.mxu1 %vm673_vm0, %v6113_v55 }
 0x61a   :  { %4306 = vmatprep.mubr.msk.bf16.mxu1 %vm673_vm0, %v6120_v60 }
 0x621   :  { %4307 = vmatmul.mubr.msk.bf16.gmra.mxu1 %vm673_vm0, %v6127_v40 }
 0x622   :  { %4334 = vmatprep.mubr.msk.bf16.mxu1 %vm673_vm0, %v6134_v61 }
 0x6c9   :  { %v4296_v33 = vpop.f32.mrf.mxu1 }
 0x6ca   :  { %v2560_v29 = vadd.f32 %v4296_v33, %v1163_v46  ;;  %v1203_v46 = vadd.f32 %v6708_v8, %v5770_v56 }
 0x6cb   :  { %v2495_v7 = vpop.f32.mrf.mxu1 }
 0x6cc   :  { %v3806_v58 = vmul.f32 -1.442695, %v2560_v29  ;;  %v2558_v3 = vadd.f32 %v2495_v7, %v1153_v39  ;;  %v6709_v29 = vld [vmem:[#allocation20_spill] sm:$0xff] }
 0x6cd   :  { %v4297_v38 = vpop.f32.mrf.mxu1  ;;  %v1193_v7 = vadd.f32 %v6709_v29, %v5790_v10 }
 0x6ce   :  { %4838 = vpow2.f32 %v3806_v58  ;;  %v3804_v61 = vmul.f32 -1.442695, %v2558_v3  ;;  %v2561_v21 = vadd.f32 %v4297_v38, %v1167_v17  ;;  %v6710_v3 = vld [vmem:[#allocation26_spill] sm:$0xff] }
 0x6cf   :  { %v2498_v2 = vpop.f32.mrf.mxu1  ;;  %v1207_v38 = vadd.f32 %v6710_v3, %v5776_v6  ;;  %v6715_v3 = vld [vmem:[#allocation30_spill] sm:$0xff] }
 0x6d0   :  { %4840 = vpow2.f32 %v3804_v61  ;;  %v3807_v16 = vmul.f32 -1.442695, %v2561_v21  ;;  %v2559_v20 = vadd.f32 %v2498_v2, %v1157_v30 }
 0x6d1   :  { %v4300_v31 = vpop.f32.mrf.mxu1 }
 0x6d2   :  { %4842 = vpow2.f32 %v3807_v16  ;;  %v3805_v48 = vmul.f32 -1.442695, %v2559_v20  ;;  %v2564_v63 = vadd.f32 %v4300_v31, %v1183_v23  ;;  %v1197_v23 = vadd.f32 %v6711_v13, %v5798_v4 }
 0x6d3   :  { %v2511_v27 = vpop.f32.mrf.mxu1 }
 0x6d4   :  { %4844 = vpow2.f32 %v3805_v48  ;;  %v3810_v19 = vmul.f32 -1.442695, %v2564_v63  ;;  %v2562_v26 = vadd.f32 %v2511_v27, %v1173_v49 }
 0x6d5   :  { %v4301_v1 = vpop.f32.mrf.mxu1 }
 0x6d6   :  { %4846 = vpow2.f32 %v3810_v19  ;;  %v3808_v18 = vmul.f32 -1.442695, %v2562_v26  ;;  %v2565_v22 = vadd.f32 %v4301_v1, %v1187_v15  ;;  %v6712_v19 = vld [vmem:[#allocation32_spill] sm:$0xff] }
 0x6d7   :  { %v2514_v34 = vpop.f32.mrf.mxu1  ;;  %v1223_v26 = vadd.f32 %v6712_v19, %v5780_v35 }
 0x6d8   :  { %4848 = vpow2.f32 %v3808_v18  ;;  %v3811_v33 = vmul.f32 -1.442695, %v2565_v22  ;;  %v2563_v11 = vadd.f32 %v2514_v34, %v1177_v51  ;;  %v6713_v22 = vld [vmem:[#allocation28_spill] sm:$0xff] }
 0x6d9   :  { %v4304_v39 = vpop.f32.mrf.mxu1  ;;  %v1213_v34 = vadd.f32 %v6713_v22, %v5806_v24 }
 0x6da   :  { %4850 = vpow2.f32 %v3811_v33  ;;  %v3809_v41 = vmul.f32 -1.442695, %v2563_v11  ;;  %v2568_v17 = vadd.f32 %v4304_v39, %v1203_v46  ;;  %v6714_v39 = vld [vmem:[#allocation34_spill] sm:$0xff] }
 0x6db   :  { %v4839_v58 = vpop.eup %4838  ;;  %v2527_v12 = vpop.f32.mrf.mxu1  ;;  %v1227_v29 = vadd.f32 %v6714_v39, %v5786_v45 }
 0x6dc   :  { %v2612_v30 = vadd.f32 1.0, %v4839_v58  ;;  %4852 = vpow2.f32 %v3809_v41  ;;  %v3814_v61 = vmul.f32 -1.442695, %v2568_v17  ;;  %v2566_v21 = vadd.f32 %v2527_v12, %v1193_v7 }
 0x6dd   :  { %v4841_v2 = vpop.eup %4840  ;;  %v4305_v16 = vpop.f32.mrf.mxu1 }
 0x6de   :  { %4854 = vrcp.f32 %v2612_v30  ;;  %v2610_v20 = vadd.f32 1.0, %v4841_v2  ;;  %v3812_v31 = vmul.f32 -1.442695, %v2566_v21  ;;  %v2569_v62 = vadd.f32 %v4305_v16, %v1207_v38 }
 0x6df   :  { %v4843_v49 = vpop.eup %4842  ;;  %4856 = vpow2.f32 %v3814_v61  ;;  %v2530_v48 = vpop.f32.mrf.mxu1  ;;  %v1217_v38 = vadd.f32 %v6715_v3, %v6659_v5 }
 0x6e0   :  { %4858 = vrcp.f32 %v2610_v20  ;;  %v2613_v63 = vadd.f32 1.0, %v4843_v49  ;;  %v3815_v27 = vmul.f32 -1.442695, %v2569_v62  ;;  %v2567_v14 = vadd.f32 %v2530_v48, %v1197_v23 }
 0x6e1   :  { %v4845_v15 = vpop.eup %4844  ;;  %4860 = vpow2.f32 %v3812_v31  ;;  %v4308_v1 = vpop.f32.mrf.mxu1 }
 0x6e2   :  { %4862 = vrcp.f32 %v2613_v63  ;;  %v2611_v47 = vadd.f32 1.0, %v4845_v15  ;;  %v3813_v51 = vmul.f32 -1.442695, %v2567_v14  ;;  %v2572_v8 = vadd.f32 %v4308_v1, %v1223_v26 }
 0x6e3   :  { %v4847_v18 = vpop.eup %4846  ;;  %4864 = vpow2.f32 %v3815_v27  ;;  %v2543_v46 = vpop.f32.mrf.mxu1 }
 0x6e4   :  { %4866 = vrcp.f32 %v2611_v47  ;;  %v2616_v33 = vadd.f32 1.0, %v4847_v18  ;;  %v2570_v7 = vadd.f32 %v2543_v46, %v1213_v34 }
 0x6e5   :  { %v4849_v11 = vpop.eup %4848  ;;  %4868 = vpow2.f32 %v3813_v51  ;;  %v4309_v41 = vpop.f32.mrf.mxu1 }
 0x6e6   :  { %4870 = vrcp.f32 %v2616_v33  ;;  %v2614_v17 = vadd.f32 1.0, %v4849_v11  ;;  %v2573_v12 = vadd.f32 %v4309_v41, %v1227_v29 }
 0x6e7   :  { %v4851_v58 = vpop.eup %4850  ;;  %4872 = vtanh.f32 %v2572_v8  ;;  %v2546_v30 = vpop.f32.mrf.mxu1 }
 0x6e8   :  { %4874 = vrcp.f32 %v2614_v17  ;;  %v2617_v61 = vadd.f32 1.0, %v4851_v58  ;;  %v2571_v2 = vadd.f32 %v2546_v30, %v1217_v38 }
 0x6e9   :  { %v4853_v21 = vpop.eup %4852  ;;  %4876 = vtanh.f32 %v2570_v7 }
 0x6ea   :  { %4878 = vrcp.f32 %v2617_v61  ;;  %v2615_v13 = vadd.f32 1.0, %v4853_v21 }
 0x6eb   :  { %v4855_v23 = vpop.eup %4854  ;;  %4880 = vtanh.f32 %v2573_v12 }
 0x6ec   :  { %v4857_v16 = vpop.eup %4856  ;;  %4882 = vrcp.f32 %v2615_v13 }
 0x6ed   :  { %v4859_v20 = vpop.eup %4858  ;;  %4884 = vtanh.f32 %v2571_v2  ;;  %v2620_v15 = vadd.f32 1.0, %v4857_v16 }
 0x6ee   :  { %v4861_v31 = vpop.eup %4860 }
 0x6ef   :  { %v4863_v62 = vpop.eup %4862  ;;  %v2618_v1 = vadd.f32 1.0, %v4861_v31  ;;  %4886 = vrcp.f32 %v2620_v15 }
 0x6f0   :  { %v4865_v49 = vpop.eup %4864 }
 0x6f1   :  { %v4867_v48 = vpop.eup %4866  ;;  %v2621_v18 = vadd.f32 1.0, %v4865_v49  ;;  %4888 = vrcp.f32 %v2618_v1 }
 0x6f2   :  { %v4869_v63 = vpop.eup %4868 }
 0x6f3   :  { %v4871_v27 = vpop.eup %4870  ;;  %4890 = vrcp.f32 %v2621_v18  ;;  %v2619_v41 = vadd.f32 1.0, %v4869_v63 }
 0x6f4   :  { %v4873_v14 = vpop.eup %4872  ;;  %v2652_v19 = vmul.f32 %v4871_v27, %v6236_v37 }
 0x6f5   :  { %v4875_v26 = vpop.eup %4874  ;;  %v2656_v47 = vmul.f32 %v4873_v14, %v4855_v23 }
 0x6f6   :  { %v4877_v51 = vpop.eup %4876  ;;  %v2650_v22 = vmul.f32 %v4875_v26, %v6239_v9 }
 0x6f7   :  { %v4879_v34 = vpop.eup %4878  ;;  %v6300_v8 = vadd.f32 %v2656_v47, %v2652_v19  ;;  %v2654_v46 = vmul.f32 %v4877_v51, %v4859_v20  ;;  %v6720_v51 = vld [vmem:[#allocation71_spill] sm:$0xff] }
 0x6f8   :  { %v4881_v33 = vpop.eup %4880  ;;  %v2653_v11 = vmul.f32 %v4879_v34, %v6243_v0  ;;  %v1294_v18 = vadd.f32 %v6720_v51, %v5738_v50 }
 0x6f9   :  { %v4883_v39 = vpop.eup %4882  ;;  %v6303_v29 = vadd.f32 %v2654_v46, %v2650_v22  ;;  %v2657_v37 = vmul.f32 %v4881_v33, %v4863_v62  ;;  %4892 = vtanh.f32 %v6300_v8  ;;  %v6721_v33 = vld [vmem:[#allocation67_spill] sm:$0xff] }
 0x6fa   :  { %v4885_v7 = vpop.eup %4884  ;;  %v2651_v17 = vmul.f32 %v4883_v39, %v6247_v25 }
 0x6fb   :  { %v6307_v9 = vadd.f32 %v2657_v37, %v2653_v11  ;;  %v2655_v58 = vmul.f32 %v4885_v7, %v4867_v48  ;;  %4894 = vtanh.f32 %v6303_v29  ;;  %v1284_v11 = vadd.f32 %v6721_v33, %v5760_v54  ;;  %v6728_v33 = vld [vmem:[#allocation87_spill] sm:$0xff] }
 0x6fc   :  { %v4887_v3 = vpop.eup %4886 }
 0x6fd   :  { %4896 = vtanh.f32 %v6307_v9  ;;  %v6311_v0 = vadd.f32 %v2655_v58, %v2651_v17 }
 0x6fe   :  { %4898 = vrcp.f32 %v2619_v41  ;;  %v4889_v38 = vpop.eup %4888  ;;  %v6722_v41 = vld [vmem:[#allocation73_spill] sm:$0xff] }
 0x6ff   :  { %4900 = vtanh.f32 %v6311_v0  ;;  %v1298_v17 = vadd.f32 %v6722_v41, %v5748_v42 }
 0x700   :  { %v4891_v12 = vpop.eup %4890 }
 0x706   :  { %v4893_v30 = vpop.eup %4892 }
 0x707   :  { %v2668_v2 = vmul.f32 %v4893_v30, %v4887_v3 }
 0x708   :  { %v4895_v61 = vpop.eup %4894 }
 0x709   :  { %v2666_v20 = vmul.f32 %v4895_v61, %v4889_v38 }
 0x70a   :  { %v4897_v25 = vpop.eup %4896 }
 0x70b   :  { %v4899_v21 = vpop.eup %4898  ;;  %v2669_v13 = vmul.f32 %v4897_v25, %v4891_v12  ;;  %v6723_v12 = vld [vmem:[#allocation69_spill] sm:$0xff] }
 0x70c   :  { %v4901_v23 = vpop.eup %4900  ;;  %v1288_v30 = vadd.f32 %v6723_v12, %v5768_v57 }
 0x70d   :  { %v2671_v16 = vpack.c.bf16 %v2669_v13, %v2668_v2  ;;  %v2667_v31 = vmul.f32 %v4901_v23, %v4899_v21  ;;  %v6724_v2 = vld [vmem:[#allocation79_spill] sm:$0xff] }
 0x70e   :  { %v1314_v13 = vadd.f32 %v6724_v2, %v5770_v56 }
 0x70f   :  { %4310 = vmatprep.subr.bf16.mxu0 %v2671_v16  ;;  %v2670_v62 = vpack.c.bf16 %v2667_v31, %v2666_v20  ;;  %v6725_v31 = vld [vmem:[#allocation75_spill] sm:$0xff] }
 0x710   :  { %4311 = vmatpush3.bf16.msra.mxu0 %v2671_v16 }
 0x711   :  { %4312 = vmatprep.subr.bf16.mxu0 %v2670_v62 }
 0x714   :  { %4313 = vmatpush3.bf16.msra.mxu0 %v2670_v62  ;;  %v1304_v62 = vadd.f32 %v6725_v31, %v5790_v10 }
 0x717   :  { %4315 = vmatmul.mubr.msk.bf16.vlgmr.msra.gmra.mxu0 %vm673_vm0, %v6085_v43  ;;  %v6716_v43 = vld [vmem:[#allocation63_spill] sm:$0xff] }
 0x718   :  { %4318 = vmatprep.mubr.msk.bf16.mxu0 %vm673_vm0, %v6092_v28  ;;  %v1274_v49 = vadd.f32 %v6716_v43, %v5732_v59  ;;  %v6717_v28 = vld [vmem:[#allocation59_spill] sm:$0xff] }
 0x719   :  { %v1264_v63 = vadd.f32 %v6717_v28, %v5752_v36  ;;  %v6726_v28 = vld [vmem:[#allocation81_spill] sm:$0xff] }
 0x71f   :  { %4319 = vmatmul.mubr.msk.bf16.gmra.mxu0 %vm673_vm0, %v6099_v53 }
 0x720   :  { %4322 = vmatprep.mubr.msk.bf16.mxu0 %vm673_vm0, %v6106_v32  ;;  %v6718_v32 = vld [vmem:[#allocation65_spill] sm:$0xff] }
 0x721   :  { %v1278_v14 = vadd.f32 %v6718_v32, %v5742_v52 }
 0x727   :  { %4323 = vmatmul.mubr.msk.bf16.gmra.mxu0 %vm673_vm0, %v6113_v55 }
 0x728   :  { %4326 = vmatprep.mubr.msk.bf16.mxu0 %vm673_vm0, %v6120_v60  ;;  %v6719_v60 = vld [vmem:[#allocation61_spill] sm:$0xff] }
 0x729   :  { %v1268_v26 = vadd.f32 %v6719_v60, %v5758_v44 }
 0x72f   :  { %4327 = vmatmul.mubr.msk.bf16.gmra.mxu0 %vm673_vm0, %v6127_v40 }
 0x7d7   :  { %v4316_v48 = vpop.f32.mrf.mxu0 }
 0x7d8   :  { %v2771_v53 = vadd.f32 %v4316_v48, %v1274_v49 }
 0x7d9   :  { %v2706_v27 = vpop.f32.mrf.mxu0 }
 0x7da   :  { %v3826_v15 = vmul.f32 -1.442695, %v2771_v53  ;;  %v2769_v55 = vadd.f32 %v2706_v27, %v1264_v63  ;;  %v1318_v63 = vadd.f32 %v6726_v28, %v5776_v6 }
 0x7db   :  { %v4317_v19 = vpop.f32.mrf.mxu0 }
 0x7dc   :  { %4902 = vpow2.f32 %v3826_v15  ;;  %v3824_v40 = vmul.f32 -1.442695, %v2769_v55  ;;  %v2772_v1 = vadd.f32 %v4317_v19, %v1278_v14  ;;  %v6727_v55 = vld [vmem:[#allocation77_spill] sm:$0xff] }
 0x7dd   :  { %v2709_v47 = vpop.f32.mrf.mxu0  ;;  %v1308_v19 = vadd.f32 %v6727_v55, %v5798_v4 }
 0x7de   :  { %4904 = vpow2.f32 %v3824_v40  ;;  %v3827_v22 = vmul.f32 -1.442695, %v2772_v1  ;;  %v2770_v34 = vadd.f32 %v2709_v47, %v1268_v26 }
 0x7df   :  { %v4320_v46 = vpop.f32.mrf.mxu0 }
 0x7e0   :  { %4906 = vpow2.f32 %v3827_v22  ;;  %v3825_v39 = vmul.f32 -1.442695, %v2770_v34  ;;  %v2775_v37 = vadd.f32 %v4320_v46, %v1294_v18 }
 0x7e1   :  { %v2722_v7 = vpop.f32.mrf.mxu0 }
 0x7e2   :  { %4908 = vpow2.f32 %v3825_v39  ;;  %v3830_v58 = vmul.f32 -1.442695, %v2775_v37  ;;  %v2773_v3 = vadd.f32 %v2722_v7, %v1284_v11  ;;  %v1334_v11 = vadd.f32 %v6728_v33, %v5780_v35 }
 0x7e3   :  { %v4321_v38 = vpop.f32.mrf.mxu0 }
 0x7e4   :  { %4910 = vpow2.f32 %v3830_v58  ;;  %v3828_v61 = vmul.f32 -1.442695, %v2773_v3  ;;  %v2776_v25 = vadd.f32 %v4321_v38, %v1298_v17  ;;  %v6729_v17 = vld [vmem:[#allocation83_spill] sm:$0xff] }
 0x7e5   :  { %v2725_v21 = vpop.f32.mrf.mxu0  ;;  %v1324_v58 = vadd.f32 %v6729_v17, %v5806_v24 }
 0x7e6   :  { %4912 = vpow2.f32 %v3828_v61  ;;  %v3831_v23 = vmul.f32 -1.442695, %v2776_v25  ;;  %v2774_v16 = vadd.f32 %v2725_v21, %v1288_v30  ;;  %v6730_v61 = vld [vmem:[#allocation89_spill] sm:$0xff] }
 0x7e7   :  { %v4324_v20 = vpop.f32.mrf.mxu0  ;;  %v1338_v25 = vadd.f32 %v6730_v61, %v5786_v45 }
 0x7e8   :  { %4914 = vpow2.f32 %v3831_v23  ;;  %v3829_v43 = vmul.f32 -1.442695, %v2774_v16  ;;  %v2779_v49 = vadd.f32 %v4324_v20, %v1314_v13  ;;  %v6731_v16 = vld [vmem:[#allocation85_spill] sm:$0xff] }
 0x7e9   :  { %v4903_v48 = vpop.eup %4902  ;;  %v2738_v53 = vpop.f32.mrf.mxu0  ;;  %v1328_v20 = vadd.f32 %v6731_v16, %v6659_v5 }
 0x7ea   :  { %v2823_v27 = vadd.f32 1.0, %v4903_v48  ;;  %4916 = vpow2.f32 %v3829_v43  ;;  %v3834_v32 = vmul.f32 -1.442695, %v2779_v49  ;;  %v2777_v14 = vadd.f32 %v2738_v53, %v1304_v62 }
 0x7eb   :  { %v4905_v15 = vpop.eup %4904  ;;  %v4325_v60 = vpop.f32.mrf.mxu0 }
 0x7ec   :  { %4918 = vrcp.f32 %v2823_v27  ;;  %v2821_v26 = vadd.f32 1.0, %v4905_v15  ;;  %v3832_v40 = vmul.f32 -1.442695, %v2777_v14  ;;  %v2780_v1 = vadd.f32 %v4325_v60, %v1318_v63 }
 0x7ed   :  { %v4907_v47 = vpop.eup %4906  ;;  %4920 = vpow2.f32 %v3834_v32  ;;  %v2741_v51 = vpop.f32.mrf.mxu0 }
 0x7ee   :  { %4922 = vrcp.f32 %v2821_v26  ;;  %v2824_v18 = vadd.f32 1.0, %v4907_v47  ;;  %v3835_v22 = vmul.f32 -1.442695, %v2780_v1  ;;  %v2778_v34 = vadd.f32 %v2741_v51, %v1308_v19 }
 0x7ef   :  { %v4909_v46 = vpop.eup %4908  ;;  %4924 = vpow2.f32 %v3832_v40  ;;  %v4328_v39 = vpop.f32.mrf.mxu0 }
 0x7f0   :  { %4926 = vrcp.f32 %v2824_v18  ;;  %v2822_v37 = vadd.f32 1.0, %v4909_v46  ;;  %v3833_v7 = vmul.f32 -1.442695, %v2778_v34  ;;  %v2783_v3 = vadd.f32 %v4328_v39, %v1334_v11 }
 0x7f1   :  { %v4911_v41 = vpop.eup %4910  ;;  %4928 = vpow2.f32 %v3835_v22  ;;  %v2754_v38 = vpop.f32.mrf.mxu0 }
 0x7f2   :  { %4930 = vrcp.f32 %v2822_v37  ;;  %v2827_v12 = vadd.f32 1.0, %v4911_v41  ;;  %v2781_v21 = vadd.f32 %v2754_v38, %v1324_v58 }
 0x7f3   :  { %v4913_v30 = vpop.eup %4912  ;;  %4932 = vpow2.f32 %v3833_v7  ;;  %v4329_v2 = vpop.f32.mrf.mxu0 }
 0x7f4   :  { %4934 = vrcp.f32 %v2827_v12  ;;  %v2825_v13 = vadd.f32 1.0, %v4913_v30  ;;  %v2784_v31 = vadd.f32 %v4329_v2, %v1338_v25 }
 0x7f5   :  { %v4915_v23 = vpop.eup %4914  ;;  %4936 = vtanh.f32 %v2783_v3  ;;  %v2757_v62 = vpop.f32.mrf.mxu0 }
 0x7f6   :  { %4938 = vrcp.f32 %v2825_v13  ;;  %v2828_v43 = vadd.f32 1.0, %v4915_v23  ;;  %v2782_v48 = vadd.f32 %v2757_v62, %v1328_v20 }
 0x7f7   :  { %v4917_v49 = vpop.eup %4916  ;;  %4940 = vtanh.f32 %v2781_v21 }
 0x7f8   :  { %4942 = vrcp.f32 %v2828_v43  ;;  %v2826_v28 = vadd.f32 1.0, %v4917_v49 }
 0x7f9   :  { %v4919_v63 = vpop.eup %4918  ;;  %4944 = vtanh.f32 %v2784_v31 }
 0x7fa   :  { %v4921_v53 = vpop.eup %4920  ;;  %4946 = vrcp.f32 %v2826_v28  ;;  %v5039_v28 = vld [vmem:[%s6561_s3 + $0x10] sm:$0xff]  }
 0x7fb   :  { %v4923_v27 = vpop.eup %4922  ;;  %4948 = vtanh.f32 %v2782_v48  ;;  %v2831_v40 = vadd.f32 1.0, %v4921_v53  ;;  %v5038_v48 = vld [vmem:[%s6561_s3 + $0x8] sm:$0xff]   ;;  %v5041_v53 = vld [vmem:[%s6561_s3 + $0x20] sm:$0xff]  }
 0x7fc   :  { %v4925_v32 = vpop.eup %4924 }
 0x7fd   :  { %v4927_v14 = vpop.eup %4926  ;;  %v2829_v51 = vadd.f32 1.0, %v4925_v32  ;;  %4950 = vrcp.f32 %v2831_v40  ;;  %v5043_v32 = vld [vmem:[%s6561_s3 + $0x30] sm:$0xff]  }
 0x7fe   :  { %v4929_v15 = vpop.eup %4928 }
 0x7ff   :  { %v4931_v55 = vpop.eup %4930  ;;  %v2832_v34 = vadd.f32 1.0, %v4929_v15  ;;  %4952 = vrcp.f32 %v2829_v51  ;;  %v6732_v15 = vld [vmem:[#allocation64_spill] sm:$0xff] }
 0x800   :  { %v4933_v19 = vpop.eup %4932 }
 0x801   :  { %v4935_v60 = vpop.eup %4934  ;;  %4954 = vrcp.f32 %v2832_v34  ;;  %v2830_v3 = vadd.f32 1.0, %v4933_v19 }
 0x802   :  { %v4937_v26 = vpop.eup %4936  ;;  %v2863_v1 = vmul.f32 %v4935_v60, %v6300_v8  ;;  %v6733_v60 = vld [vmem:[#allocation60_spill] sm:$0xff] }
 0x803   :  { %v4939_v47 = vpop.eup %4938  ;;  %v2867_v18 = vmul.f32 %v4937_v26, %v4919_v63  ;;  %v5040_v63 = vld [vmem:[%s6561_s3 + $0x18] sm:$0xff]   ;;  %v1266_v26 = vadd.f32 %v6733_v60, %v5752_v36 }
 0x804   :  { %v4941_v22 = vpop.eup %4940  ;;  %v2861_v46 = vmul.f32 %v4939_v47, %v6303_v29  ;;  %v6734_v47 = vld [vmem:[#allocation66_spill] sm:$0xff] }
 0x805   :  { %v4943_v33 = vpop.eup %4942  ;;  %v6362_v11 = vadd.f32 %v2867_v18, %v2863_v1  ;;  %v2865_v39 = vmul.f32 %v4941_v22, %v4923_v27  ;;  %v5042_v27 = vld [vmem:[%s6561_s3 + $0x28] sm:$0xff]   ;;  %v1280_v51 = vadd.f32 %v6734_v47, %v5742_v52 }
 0x806   :  { %v4945_v37 = vpop.eup %4944  ;;  %v2864_v7 = vmul.f32 %v4943_v33, %v6307_v9 }
 0x807   :  { %v4947_v41 = vpop.eup %4946  ;;  %v6365_v17 = vadd.f32 %v2865_v39, %v2861_v46  ;;  %v2868_v8 = vmul.f32 %v4945_v37, %v4927_v14  ;;  %4956 = vtanh.f32 %v6362_v11  ;;  %v5044_v14 = vld [vmem:[%s6561_s3 + $0x38] sm:$0xff]   ;;  %v6735_v46 = vld [vmem:[#allocation62_spill] sm:$0xff] }
 0x808   :  { %v4949_v58 = vpop.eup %4948  ;;  %v2862_v38 = vmul.f32 %v4947_v41, %v6311_v0  ;;  %v1270_v33 = vadd.f32 %v6735_v46, %v5758_v44  ;;  %v6738_v44 = vld [vmem:[#allocation74_spill] sm:$0xff] }
 0x809   :  { %v6369_v29 = vadd.f32 %v2868_v8, %v2864_v7  ;;  %v2866_v12 = vmul.f32 %v4949_v58, %v4931_v55  ;;  %4958 = vtanh.f32 %v6365_v17  ;;  %v1276_v55 = vadd.f32 %v6732_v15, %v5732_v59  ;;  %v6736_v59 = vld [vmem:[#allocation72_spill] sm:$0xff] }
 0x80a   :  { %v4951_v30 = vpop.eup %4950  ;;  %v1296_v41 = vadd.f32 %v6736_v59, %v5738_v50  ;;  %v6739_v50 = vld [vmem:[#allocation70_spill] sm:$0xff] }
 0x80b   :  { %4960 = vtanh.f32 %v6369_v29  ;;  %v6373_v9 = vadd.f32 %v2866_v12, %v2862_v38 }
 0x80c   :  { %4962 = vrcp.f32 %v2830_v3  ;;  %v4953_v61 = vpop.eup %4952  ;;  %v6737_v3 = vld [vmem:[#allocation68_spill] sm:$0xff] }
 0x80d   :  { %4964 = vtanh.f32 %v6373_v9  ;;  %v1286_v52 = vadd.f32 %v6737_v3, %v5760_v54  ;;  %v6740_v54 = vld [vmem:[#allocation80_spill] sm:$0xff]  ;;  %v6746_v3 = vld [vmem:[#allocation90_spill] sm:$0xff] }
 0x80e   :  { %v4955_v25 = vpop.eup %4954 }
 0x814   :  { %v4957_v21 = vpop.eup %4956 }
 0x815   :  { %v2879_v23 = vmul.f32 %v4957_v21, %v4951_v30 }
 0x816   :  { %v4959_v2 = vpop.eup %4958 }
 0x817   :  { %v2877_v62 = vmul.f32 %v4959_v2, %v4953_v61  ;;  %v1300_v61 = vadd.f32 %v6738_v44, %v5748_v42  ;;  %v6741_v42 = vld [vmem:[#allocation76_spill] sm:$0xff]  ;;  %v6747_v44 = vld [vmem:[#allocation86_spill] sm:$0xff] }
 0x818   :  { %v4961_v0 = vpop.eup %4960 }
 0x819   :  { %v4963_v13 = vpop.eup %4962  ;;  %v2880_v16 = vmul.f32 %v4961_v0, %v4955_v25  ;;  %v1290_v0 = vadd.f32 %v6739_v50, %v5768_v57  ;;  %v6742_v57 = vld [vmem:[#allocation82_spill] sm:$0xff] }
 0x81a   :  { %v4965_v20 = vpop.eup %4964 }
 0x81b   :  { %v2882_v31 = vpack.c.bf16 %v2880_v16, %v2879_v23  ;;  %v2878_v43 = vmul.f32 %v4965_v20, %v4963_v13  ;;  %v1316_v20 = vadd.f32 %v6740_v54, %v5770_v56 }
 0x81d   :  { %4330 = vmatprep.subr.bf16.mxu1 %v2882_v31  ;;  %v2881_v49 = vpack.c.bf16 %v2878_v43, %v2877_v62 }
 0x81e   :  { %4331 = vmatpush3.bf16.msra.mxu1 %v2882_v31 }
 0x81f   :  { %4332 = vmatprep.subr.bf16.mxu1 %v2881_v49 }
 0x822   :  { %4333 = vmatpush3.bf16.msra.mxu1 %v2881_v49  ;;  %v1306_v49 = vadd.f32 %v6741_v42, %v5790_v10 }
 0x825   :  { %4335 = vmatmul.mubr.msk.bf16.vlgmr.msra.gmra.mxu1 %vm673_vm0, %v5038_v48 }
 0x826   :  { %4338 = vmatprep.mubr.msk.bf16.mxu1 %vm673_vm0, %v5039_v28 }
 0x82d   :  { %4339 = vmatmul.mubr.msk.bf16.gmra.mxu1 %vm673_vm0, %v5040_v63 }
 0x82e   :  { %4342 = vmatprep.mubr.msk.bf16.mxu1 %vm673_vm0, %v5041_v53  ;;  %v1320_v53 = vadd.f32 %v6742_v57, %v5776_v6 }
 0x835   :  { %4343 = vmatmul.mubr.msk.bf16.gmra.mxu1 %vm673_vm0, %v5042_v27 }
 0x836   :  { %4346 = vmatprep.mubr.msk.bf16.mxu1 %vm673_vm0, %v5043_v32 }
 0x83d   :  { %4347 = vmatmul.mubr.msk.bf16.gmra.mxu1 %vm673_vm0, %v5044_v14 }
 0x8e5   :  { %v4336_v19 = vpop.f32.mrf.mxu1 }
 0x8e6   :  { %v2982_v40 = vadd.f32 %v4336_v19, %v1276_v55  ;;  %v6743_v55 = vld [vmem:[#allocation78_spill] sm:$0xff] }
 0x8e7   :  { %v2917_v1 = vpop.f32.mrf.mxu1  ;;  %v1310_v19 = vadd.f32 %v6743_v55, %v5798_v4 }
 0x8e8   :  { %v3846_v18 = vmul.f32 -1.442695, %v2982_v40  ;;  %v2980_v22 = vadd.f32 %v2917_v1, %v1266_v26 }
 0x8e9   :  { %v4337_v34 = vpop.f32.mrf.mxu1 }
 0x8ea   :  { %4966 = vpow2.f32 %v3846_v18  ;;  %v3844_v39 = vmul.f32 -1.442695, %v2980_v22  ;;  %v2983_v37 = vadd.f32 %v4337_v34, %v1280_v51  ;;  %v6744_v34 = vld [vmem:[#allocation88_spill] sm:$0xff] }
 0x8eb   :  { %v2920_v7 = vpop.f32.mrf.mxu1  ;;  %v1336_v46 = vadd.f32 %v6744_v34, %v5780_v35 }
 0x8ec   :  { %4968 = vpow2.f32 %v3844_v39  ;;  %v3847_v36 = vmul.f32 -1.442695, %v2983_v37  ;;  %v2981_v8 = vadd.f32 %v2920_v7, %v1270_v33  ;;  %v6745_v7 = vld [vmem:[#allocation84_spill] sm:$0xff] }
 0x8ed   :  { %v4340_v58 = vpop.f32.mrf.mxu1  ;;  %v1326_v59 = vadd.f32 %v6745_v7, %v5806_v24  ;;  %v4506_v7 = vld [vmem:[%s6562_s6 + $0x8] sm:$0xff]  }
 0x8ee   :  { %4970 = vpow2.f32 %v3847_v36  ;;  %v3845_v38 = vmul.f32 -1.442695, %v2981_v8  ;;  %v2986_v12 = vadd.f32 %v4340_v58, %v1296_v41  ;;  %4350 = vmatprep.subr.bf16.mxu0 %v4506_v7 }
 0x8ef   :  { %v2933_v30 = vpop.f32.mrf.mxu1  ;;  %4351 = vmatpush3.bf16.msra.mxu0 %v4506_v7 }
 0x8f0   :  { %4972 = vpow2.f32 %v3845_v38  ;;  %v3850_v25 = vmul.f32 -1.442695, %v2986_v12  ;;  %v2984_v21 = vadd.f32 %v2933_v30, %v1286_v52  ;;  %v1340_v52 = vadd.f32 %v6746_v3, %v5786_v45  ;;  %v4512_v3 = vld [vmem:[%s6564_s0 + $0x10] sm:$0xff]  }
 0x8f1   :  { %v4341_v2 = vpop.f32.mrf.mxu1 }
 0x8f2   :  { %4974 = vpow2.f32 %v3850_v25  ;;  %v3848_v13 = vmul.f32 -1.442695, %v2984_v21  ;;  %v2987_v23 = vadd.f32 %v4341_v2, %v1300_v61  ;;  %v1330_v61 = vadd.f32 %v6747_v44, %v6659_v5 }
 0x8f3   :  { %v2936_v16 = vpop.f32.mrf.mxu1 }
 0x8f4   :  { %4976 = vpow2.f32 %v3848_v13  ;;  %v3851_v31 = vmul.f32 -1.442695, %v2987_v23  ;;  %v2985_v62 = vadd.f32 %v2936_v16, %v1290_v0 }
 0x8f5   :  { %v4344_v43 = vpop.f32.mrf.mxu1 }
 0x8f6   :  { %4978 = vpow2.f32 %v3851_v31  ;;  %v3849_v48 = vmul.f32 -1.442695, %v2985_v62  ;;  %v2990_v28 = vadd.f32 %v4344_v43, %v1316_v20 }
 0x8f7   :  { %v4967_v63 = vpop.eup %4966  ;;  %v2949_v27 = vpop.f32.mrf.mxu1 }
 0x8f8   :  { %v3034_v32 = vadd.f32 1.0, %v4967_v63  ;;  %4980 = vpow2.f32 %v3849_v48  ;;  %v3854_v14 = vmul.f32 -1.442695, %v2990_v28  ;;  %v2988_v15 = vadd.f32 %v2949_v27, %v1306_v49 }
 0x8f9   :  { %v4969_v56 = vpop.eup %4968  ;;  %v4345_v60 = vpop.f32.mrf.mxu1 }
 0x8fa   :  { %4982 = vrcp.f32 %v3034_v32  ;;  %v3032_v26 = vadd.f32 1.0, %v4969_v56  ;;  %v3852_v10 = vmul.f32 -1.442695, %v2988_v15  ;;  %v2991_v40 = vadd.f32 %v4345_v60, %v1320_v53 }
 0x8fb   :  { %v4971_v1 = vpop.eup %4970  ;;  %4984 = vpow2.f32 %v3854_v14  ;;  %v2952_v47 = vpop.f32.mrf.mxu1 }
 0x8fc   :  { %4986 = vrcp.f32 %v3032_v26  ;;  %v3035_v51 = vadd.f32 1.0, %v4971_v1  ;;  %v3855_v6 = vmul.f32 -1.442695, %v2991_v40  ;;  %v2989_v18 = vadd.f32 %v2952_v47, %v1310_v19 }
 0x8fd   :  { %v4973_v22 = vpop.eup %4972  ;;  %4988 = vpow2.f32 %v3852_v10  ;;  %v4348_v33 = vpop.f32.mrf.mxu1 }
 0x8fe   :  { %4990 = vrcp.f32 %v3035_v51  ;;  %v3033_v4 = vadd.f32 1.0, %v4973_v22  ;;  %v3853_v39 = vmul.f32 -1.442695, %v2989_v18  ;;  %v2994_v41 = vadd.f32 %v4348_v33, %v1336_v46 }
 0x8ff   :  { %v4975_v37 = vpop.eup %4974  ;;  %4992 = vpow2.f32 %v3855_v6  ;;  %v2965_v36 = vpop.f32.mrf.mxu1 }
 0x900   :  { %4994 = vrcp.f32 %v3033_v4  ;;  %v3038_v8 = vadd.f32 1.0, %v4975_v37  ;;  %v2992_v35 = vadd.f32 %v2965_v36, %v1326_v59  ;;  %v4507_v59 = vld [vmem:[%s6563_s5 + $0x8] sm:$0xff]   ;;  %v4509_v36 = vld [vmem:[%s6563_s5] sm:$0xff]  }
 0x901   :  { %v4977_v58 = vpop.eup %4976  ;;  %4996 = vpow2.f32 %v3853_v39  ;;  %v4349_v38 = vpop.f32.mrf.mxu1  ;;  %4370 = vmatprep.subr.bf16.mxu1 %v4507_v59 }
 0x902   :  { %4998 = vrcp.f32 %v3038_v8  ;;  %v3036_v12 = vadd.f32 1.0, %v4977_v58  ;;  %v2995_v24 = vadd.f32 %v4349_v38, %v1340_v52  ;;  %4371 = vmatpush3.bf16.msra.mxu1 %v4507_v59  ;;  %v4510_v8 = vld [vmem:[%s6564_s0] sm:$0xff]   ;;  %v4511_v58 = vld [vmem:[%s6564_s0 + $0x8] sm:$0xff]   ;;  %v4513_v52 = vld [vmem:[%s6564_s0 + $0x18] sm:$0xff]  }
 0x903   :  { %v4979_v30 = vpop.eup %4978  ;;  %5000 = vtanh.f32 %v2994_v41  ;;  %v2968_v25 = vpop.f32.mrf.mxu1  ;;  %v4508_v41 = vld [vmem:[%s6562_s6] sm:$0xff]   ;;  %4372 = vmatprep.subr.bf16.mxu1 %v4509_v36  ;;  %4374 = vmatprep.mubr.msk.bf16.mxu1 %vm673_vm0, %v4510_v8  ;;  %v4515_v38 = vld [vmem:[%s6564_s0 + $0x28] sm:$0xff]  }
 0x904   :  { %5002 = vrcp.f32 %v3036_v12  ;;  %v3039_v21 = vadd.f32 1.0, %v4979_v30  ;;  %v2993_v50 = vadd.f32 %v2968_v25, %v1330_v61  ;;  %4352 = vmatprep.subr.bf16.mxu0 %v4508_v41  ;;  %v4516_v12 = vld [vmem:[%s6564_s0 + $0x30] sm:$0xff]   ;;  %v4517_v30 = vld [vmem:[%s6564_s0 + $0x38] sm:$0xff]  }
 0x905   :  { %v4981_v2 = vpop.eup %4980  ;;  %5004 = vtanh.f32 %v2992_v35  ;;  %4353 = vmatpush3.bf16.msra.mxu0 %v4508_v41  ;;  %v4514_v35 = vld [vmem:[%s6564_s0 + $0x20] sm:$0xff]  }
 0x906   :  { %5006 = vrcp.f32 %v3039_v21  ;;  %v3037_v0 = vadd.f32 1.0, %v4981_v2  ;;  %4373 = vmatpush3.bf16.msra.mxu1 %v4509_v36 }
 0x907   :  { %v4983_v45 = vpop.eup %4982  ;;  %5008 = vtanh.f32 %v2995_v24 }
 0x908   :  { %v4985_v13 = vpop.eup %4984  ;;  %5010 = vrcp.f32 %v3037_v0 }
 0x909   :  { %v4987_v23 = vpop.eup %4986  ;;  %5012 = vtanh.f32 %v2993_v50  ;;  %v3042_v42 = vadd.f32 1.0, %v4985_v13  ;;  %4375 = vmatmul.mubr.msk.bf16.vlgmr.msra.gmra.mxu1 %vm673_vm0, %v4511_v58 }
 0x90a   :  { %v4989_v16 = vpop.eup %4988  ;;  %4378 = vmatprep.mubr.msk.bf16.mxu1 %vm673_vm0, %v4512_v3 }
 0x90b   :  { %v4991_v54 = vpop.eup %4990  ;;  %v3040_v57 = vadd.f32 1.0, %v4989_v16  ;;  %5014 = vrcp.f32 %v3042_v42 }
 0x90c   :  { %v4993_v20 = vpop.eup %4992 }
 0x90d   :  { %v4995_v5 = vpop.eup %4994  ;;  %v3043_v56 = vadd.f32 1.0, %v4993_v20 }
 0x90e   :  { %v4997_v31 = vpop.eup %4996 }
 0x90f   :  { %v4999_v62 = vpop.eup %4998 }
 0x910   :  { %v5001_v43 = vpop.eup %5000  ;;  %v3074_v49 = vmul.f32 %v4999_v62, %v6362_v11  ;;  %v3041_v11 = vadd.f32 1.0, %v4997_v31 }
 0x911   :  { %v5003_v48 = vpop.eup %5002  ;;  %v3078_v28 = vmul.f32 %v5001_v43, %v4983_v45  ;;  %4379 = vmatmul.mubr.msk.bf16.gmra.mxu1 %vm673_vm0, %v4513_v52 }
 0x912   :  { %v5005_v63 = vpop.eup %5004  ;;  %v3072_v53 = vmul.f32 %v5003_v48, %v6365_v17  ;;  %4382 = vmatprep.mubr.msk.bf16.mxu1 %vm673_vm0, %v4514_v35 }
 0x913   :  { %v5007_v27 = vpop.eup %5006  ;;  %v3082_v32 = vadd.f32 %v3078_v28, %v3074_v49  ;;  %v3076_v14 = vmul.f32 %v5005_v63, %v4987_v23 }
 0x914   :  { %v5009_v15 = vpop.eup %5008  ;;  %v3075_v55 = vmul.f32 %v5007_v27, %v6369_v29 }
 0x915   :  { %v5011_v19 = vpop.eup %5010  ;;  %5016 = vtanh.f32 %v3082_v32  ;;  %v3080_v60 = vadd.f32 %v3076_v14, %v3072_v53  ;;  %v3079_v26 = vmul.f32 %v5009_v15, %v4991_v54  ;;  %v6495_v14 = vld [vmem:[%s6565_s7] ss:$0 sm:$0xff] }
 0x916   :  { %v5013_v10 = vpop.eup %5012  ;;  %5018 = vrcp.f32 %v3040_v57  ;;  %v3073_v40 = vmul.f32 %v5011_v19, %v6373_v9 }
 0x917   :  { %5020 = vtanh.f32 %v3080_v60  ;;  %v3083_v1 = vadd.f32 %v3079_v26, %v3075_v55  ;;  %v3077_v17 = vmul.f32 %v5013_v10, %v4995_v5  ;;  %v6501_v26 = vld [vmem:[%s6566_s8] ss:$0 sm:$0xff] }
 0x918   :  { %5022 = vrcp.f32 %v3043_v56  ;;  %v5015_v51 = vpop.eup %5014 }
 0x919   :  { %5024 = vtanh.f32 %v3083_v1  ;;  %v3081_v47 = vadd.f32 %v3077_v17, %v3073_v40  ;;  %4383 = vmatmul.mubr.msk.bf16.gmra.mxu1 %vm673_vm0, %v4515_v38 }
 0x91a   :  { %5026 = vrcp.f32 %v3041_v11  ;;  %4386 = vmatprep.mubr.msk.bf16.mxu1 %vm673_vm0, %v4516_v12 }
 0x91b   :  { %5028 = vtanh.f32 %v3081_v47 }
 0x921   :  { %4387 = vmatmul.mubr.msk.bf16.gmra.mxu1 %vm673_vm0, %v4517_v30 }
 0x922   :  { %v5017_v6 = vpop.eup %5016 }
 0x923   :  { %v5019_v29 = vpop.eup %5018  ;;  %v3090_v18 = vmul.f32 %v5017_v6, %v5015_v51 }
 0x924   :  { %v5021_v22 = vpop.eup %5020 }
 0x925   :  { %v5023_v34 = vpop.eup %5022  ;;  %v3088_v46 = vmul.f32 %v5021_v22, %v5019_v29 }
 0x926   :  { %v5025_v33 = vpop.eup %5024 }
 0x927   :  { %v5027_v4 = vpop.eup %5026  ;;  %3092 = vxpose.xlu0.b32.start [1/4] (short) %v3088_v46, 128  ;;  %v3091_v39 = vmul.f32 %v5025_v33, %v5023_v34 }
 0x928   :  { %v5029_v9 = vpop.eup %5028 }
 0x929   :  { %v3089_v37 = vmul.f32 %v5029_v9, %v5027_v4 }
 0x92b   :  { %3093 = vxpose.xlu0.b32.cont [2/4] (short) %v3089_v37, 128 }
 0x92f   :  { %3094 = vxpose.xlu0.b32.cont [3/4] (short) %v3090_v18, 128 }
 0x933   :  { %3095 = vxpose.xlu0.b32.end [4/4] (short) %v3091_v39, 128 }
 0x9a3   :  { %v3108_v44 = vpop.trf.xlu0 }
 0x9a7   :  { %v3109_v61 = vpop.trf.xlu0 }
 0x9a8   :  { %v3124_v24 = vpack.c.bf16 %v3109_v61, %v3108_v44 }
 0x9aa   :  { %4354 = vmatprep.mubr.msk.bf16.mxu0 %vm673_vm0, %v3124_v24 }
 0x9ab   :  { %v3110_v25 = vpop.trf.xlu0 }
 0x9af   :  { %v3111_v21 = vpop.trf.xlu0 }
 0x9b0   :  { %v3125_v2 = vpack.c.bf16 %v3111_v21, %v3110_v25 }
 0x9b2   :  { %4355 = vmatmul.mubr.msk.bf16.vlgmr.msra.gmra.mxu0 %vm673_vm0, %v3125_v2 }
 0x9b3   :  { %v3112_v50 = vpop.trf.xlu0 }
 0x9b7   :  { %v3113_v0 = vpop.trf.xlu0 }
 0x9b8   :  { %v3126_v45 = vpack.c.bf16 %v3113_v0, %v3112_v50 }
 0x9ba   :  { %4358 = vmatprep.mubr.msk.bf16.mxu0 %vm673_vm0, %v3126_v45 }
 0x9bb   :  { %v3114_v13 = vpop.trf.xlu0 }
 0x9bf   :  { %v3115_v23 = vpop.trf.xlu0 }
 0x9c0   :  { %v3127_v16 = vpack.c.bf16 %v3115_v23, %v3114_v13 }
 0x9c2   :  { %4359 = vmatmul.mubr.msk.bf16.gmra.mxu0 %vm673_vm0, %v3127_v16 }
 0x9c3   :  { %v3116_v54 = vpop.trf.xlu0 }
 0x9c7   :  { %v3117_v20 = vpop.trf.xlu0 }
 0x9c8   :  { %v3128_v5 = vpack.c.bf16 %v3117_v20, %v3116_v54 }
 0x9c9   :  { %v4376_v53 = vpop.f32.mrf.mxu1 }
 0x9ca   :  { %4362 = vmatprep.mubr.msk.bf16.mxu0 %vm673_vm0, %v3128_v5 }
 0x9cb   :  { %v3118_v31 = vpop.trf.xlu0  ;;  %v3375_v27 = vpop.f32.mrf.mxu1 }
 0x9cd   :  { %v4377_v15 = vpop.f32.mrf.mxu1 }
 0x9cf   :  { %v3119_v62 = vpop.trf.xlu0  ;;  %v3378_v11 = vpop.f32.mrf.mxu1 }
 0x9d0   :  { %v3129_v43 = vpack.c.bf16 %v3119_v62, %v3118_v31 }
 0x9d1   :  { %v4380_v29 = vpop.f32.mrf.mxu1 }
 0x9d2   :  { %4363 = vmatmul.mubr.msk.bf16.gmra.mxu0 %vm673_vm0, %v3129_v43 }
 0x9d3   :  { %v3120_v42 = vpop.trf.xlu0  ;;  %v3391_v39 = vpop.f32.mrf.mxu1 }
 0x9d5   :  { %v4381_v36 = vpop.f32.mrf.mxu1 }
 0x9d7   :  { %v3121_v49 = vpop.trf.xlu0  ;;  %v3394_v38 = vpop.f32.mrf.mxu1 }
 0x9d8   :  { %v3130_v48 = vpack.c.bf16 %v3121_v49, %v3120_v42 }
 0x9d9   :  { %v4384_v21 = vpop.f32.mrf.mxu1 }
 0x9da   :  { %4366 = vmatprep.mubr.msk.bf16.mxu0 %vm673_vm0, %v3130_v48 }
 0x9db   :  { %v3122_v28 = vpop.trf.xlu0  ;;  %v3407_v16 = vpop.f32.mrf.mxu1 }
 0x9dd   :  { %v4385_v43 = vpop.f32.mrf.mxu1 }
 0x9df   :  { %v3123_v63 = vpop.trf.xlu0 }
 0x9e0   :  { %v3131_v57 = vpack.c.bf16 %v3123_v63, %v3122_v28 }
 0x9e2   :  { %4367 = vmatmul.mubr.msk.bf16.gmra.mxu0 %vm673_vm0, %v3131_v57  ;;  %v3410_v57 = vpop.f32.mrf.mxu1 }
 0xa72   :  { %v4356_v32 = vpop.f32.mrf.mxu0 }
 0xa73   :  { %v3384_v56 = vadd.f32 %v4376_v53, %v4356_v32 }
 0xa74   :  { %v3202_v55 = vpop.f32.mrf.mxu0 }
 0xa75   :  { %v3447_v19 = vmul.f32 %v6495_v14, %v3384_v56  ;;  %v3376_v60 = vadd.f32 %v3375_v27, %v3202_v55 }
 0xa76   :  { %v4357_v10 = vpop.f32.mrf.mxu0 }
 0xa77   :  { %v3445_v40 = vmul.f32 %v6495_v14, %v3376_v60  ;;  %v3387_v1 = vadd.f32 %v4377_v15, %v4357_v10  ;;  %v3470_v47 = vadd.f32 %v6501_v26, %v3447_v19 }
 0xa78   :  { %v3205_v17 = vpop.f32.mrf.mxu0 }
 0xa79   :  { %v3448_v51 = vmul.f32 %v6495_v14, %v3387_v1  ;;  %v3379_v6 = vadd.f32 %v3378_v11, %v3205_v17  ;;  %v3468_v18 = vadd.f32 %v6501_v26, %v3445_v40  ;;  %v3486_v46 = vmax.f32 %v3470_v47, 0.0  ;;  %v4388_v11 = vpop.f32.mrf.mxu1 }
 0xa7b   :  { %v3471_v22 = vadd.f32 %v6501_v26, %v3448_v51  ;;  %v3446_v34 = vmul.f32 %v6495_v14, %v3379_v6  ;;  %v3484_v9 = vmax.f32 %v3468_v18, 0.0 }
 0xa7d   :  { %v3487_v33 = vmax.f32 %v3471_v22, 0.0  ;;  %v3469_v4 = vadd.f32 %v6501_v26, %v3446_v34 }
 0xa7f   :  { %v3926_v37 = vpack.c.bf16 %v3487_v33, %v3486_v46  ;;  %v3485_v7 = vmax.f32 %v3469_v4, 0.0 }
 0xa81   :  { %3958 = vst [vmem:[%s6567_s9 + $0x8] sm:$0xff] %v3926_v37   ;;  %v3921_v59 = vpack.c.bf16 %v3485_v7, %v3484_v9 }
 0xa82   :  { %v4360_v41 = vpop.f32.mrf.mxu0 }
 0xa83   :  { %3922 = vst [vmem:[%s6567_s9] sm:$0xff] %v3921_v59   ;;  %v3400_v8 = vadd.f32 %v4380_v29, %v4360_v41  ;;  %v3423_v29 = vpop.f32.mrf.mxu1 }
 0xa84   :  { %v3218_v58 = vpop.f32.mrf.mxu0 }
 0xa85   :  { %v3451_v3 = vmul.f32 %v6495_v14, %v3400_v8  ;;  %v3392_v52 = vadd.f32 %v3391_v39, %v3218_v58  ;;  %v4389_v33 = vpop.f32.mrf.mxu1 }
 0xa86   :  { %v4361_v35 = vpop.f32.mrf.mxu0 }
 0xa87   :  { %v3449_v12 = vmul.f32 %v6495_v14, %v3392_v52  ;;  %v3403_v30 = vadd.f32 %v4381_v36, %v4361_v35  ;;  %v3474_v61 = vadd.f32 %v6501_v26, %v3451_v3  ;;  %v3426_v41 = vpop.f32.mrf.mxu1 }
 0xa88   :  { %v3221_v44 = vpop.f32.mrf.mxu0 }
 0xa89   :  { %v3452_v24 = vmul.f32 %v6495_v14, %v3403_v30  ;;  %v3395_v25 = vadd.f32 %v3394_v38, %v3221_v44  ;;  %v3472_v2 = vadd.f32 %v6501_v26, %v3449_v12  ;;  %v3490_v45 = vmax.f32 %v3474_v61, 0.0 }
 0xa8b   :  { %v3475_v50 = vadd.f32 %v6501_v26, %v3452_v24  ;;  %v3450_v0 = vmul.f32 %v6495_v14, %v3395_v25  ;;  %v3488_v54 = vmax.f32 %v3472_v2, 0.0 }
 0xa8d   :  { %v3491_v13 = vmax.f32 %v3475_v50, 0.0  ;;  %v3473_v23 = vadd.f32 %v6501_v26, %v3450_v0 }
 0xa8f   :  { %v3936_v20 = vpack.c.bf16 %v3491_v13, %v3490_v45  ;;  %v3489_v5 = vmax.f32 %v3473_v23, 0.0 }
 0xa91   :  { %3960 = vst [vmem:[%s6567_s9 + $0x18] sm:$0xff] %v3936_v20   ;;  %v3931_v31 = vpack.c.bf16 %v3489_v5, %v3488_v54 }
 0xa92   :  { %v4364_v62 = vpop.f32.mrf.mxu0 }
 0xa93   :  { %3959 = vst [vmem:[%s6567_s9 + $0x10] sm:$0xff] %v3931_v31   ;;  %v3416_v42 = vadd.f32 %v4384_v21, %v4364_v62 }
 0xa94   :  { %v3234_v49 = vpop.f32.mrf.mxu0 }
 0xa95   :  { %v3455_v48 = vmul.f32 %v6495_v14, %v3416_v42  ;;  %v3408_v28 = vadd.f32 %v3407_v16, %v3234_v49 }
 0xa96   :  { %v4365_v63 = vpop.f32.mrf.mxu0 }
 0xa97   :  { %v3453_v53 = vmul.f32 %v6495_v14, %v3408_v28  ;;  %v3419_v27 = vadd.f32 %v4385_v43, %v4365_v63  ;;  %v3478_v15 = vadd.f32 %v6501_v26, %v3455_v48 }
 0xa98   :  { %v3237_v32 = vpop.f32.mrf.mxu0 }
 0xa99   :  { %v3456_v56 = vmul.f32 %v6495_v14, %v3419_v27  ;;  %v3411_v55 = vadd.f32 %v3410_v57, %v3237_v32  ;;  %v3476_v19 = vadd.f32 %v6501_v26, %v3453_v53  ;;  %v3494_v40 = vmax.f32 %v3478_v15, 0.0 }
 0xa9b   :  { %v3479_v60 = vadd.f32 %v6501_v26, %v3456_v56  ;;  %v3454_v10 = vmul.f32 %v6495_v14, %v3411_v55  ;;  %v3492_v47 = vmax.f32 %v3476_v19, 0.0 }
 0xa9d   :  { %v3495_v1 = vmax.f32 %v3479_v60, 0.0  ;;  %v3477_v17 = vadd.f32 %v6501_v26, %v3454_v10 }
 0xa9f   :  { %v3946_v51 = vpack.c.bf16 %v3495_v1, %v3494_v40  ;;  %v3493_v6 = vmax.f32 %v3477_v17, 0.0 }
 0xaa1   :  { %3962 = vst [vmem:[%s6567_s9 + $0x28] sm:$0xff] %v3946_v51   ;;  %v3941_v18 = vpack.c.bf16 %v3493_v6, %v3492_v47 }
 0xaa2   :  { %v4368_v22 = vpop.f32.mrf.mxu0 }
 0xaa3   :  { %3961 = vst [vmem:[%s6567_s9 + $0x20] sm:$0xff] %v3941_v18   ;;  %v3432_v34 = vadd.f32 %v4388_v11, %v4368_v22 }
 0xaa4   :  { %v3250_v46 = vpop.f32.mrf.mxu0 }
 0xaa5   :  { %v3459_v4 = vmul.f32 %v6495_v14, %v3432_v34  ;;  %v3424_v39 = vadd.f32 %v3423_v29, %v3250_v46 }
 0xaa6   :  { %v4369_v9 = vpop.f32.mrf.mxu0 }
 0xaa7   :  { %v3457_v37 = vmul.f32 %v6495_v14, %v3424_v39  ;;  %v3435_v7 = vadd.f32 %v4389_v33, %v4369_v9  ;;  %v3482_v36 = vadd.f32 %v6501_v26, %v3459_v4 }
 0xaa8   :  { %v3253_v59 = vpop.f32.mrf.mxu0 }
 0xaa9   :  { %v3460_v8 = vmul.f32 %v6495_v14, %v3435_v7  ;;  %v3427_v58 = vadd.f32 %v3426_v41, %v3253_v59  ;;  %v3480_v3 = vadd.f32 %v6501_v26, %v3457_v37  ;;  %v3498_v38 = vmax.f32 %v3482_v36, 0.0 }
 0xaab   :  { %v3483_v52 = vadd.f32 %v6501_v26, %v3460_v8  ;;  %v3458_v35 = vmul.f32 %v6495_v14, %v3427_v58  ;;  %v3496_v44 = vmax.f32 %v3480_v3, 0.0 }
 0xaad   :  { %v3499_v12 = vmax.f32 %v3483_v52, 0.0  ;;  %v3481_v30 = vadd.f32 %v6501_v26, %v3458_v35 }
 0xaaf   :  { %v3956_v61 = vpack.c.bf16 %v3499_v12, %v3498_v38  ;;  %v3497_v24 = vmax.f32 %v3481_v30, 0.0 }
 0xab1   :  { %3964 = vst [vmem:[%s6567_s9 + $0x38] sm:$0xff] %v3956_v61   ;;  %v3951_v25 = vpack.c.bf16 %v3497_v24, %v3496_v44 }
 0xab3   :  { %3963 = vst [vmem:[%s6567_s9 + $0x30] sm:$0xff] %v3951_v25  }

</bundles_post_ra>
